<compile_context>
chip_gen: v6e
topology: v6e:2x2x1
jax: 0.10.0
libtpu: 0.0.40
codegen_flags: <defaults>
</compile_context>

<pallas_src>
import functools

import numpy as np
import jax
import jax.numpy as jnp
from jax.experimental import pallas as pl
from jax.experimental.pallas import tpu as pltpu


# Scoped-VMEM budget for the fused kernels.  Tiny for the demo config; sized
# for production block sizes while staying <= v7x's 64 MiB physical VMEM
# (v5e/v6e have 128 MiB, so this is safe on every generation).
_VMEM_LIMIT_BYTES = 64 * 1024 * 1024


def _silu(v):
    return v * jax.nn.sigmoid(v)


# ----------------------------------------------------------------------------
# Pallas kernels
# ----------------------------------------------------------------------------
def _conv_bn_act_kernel(x_ref, w_ref, s_ref, b_ref, o_ref, *, act):
    """Fused Conv1d ('same', cross-correlation) + folded BN + optional SiLU.

    x_ref: (Bt, L, Cin)     batch tile ('same' padding handled in-kernel)
    w_ref: (K, Cin, Cout)   conv weight, tap-major
    s_ref, b_ref: (1, Cout) folded BatchNorm scale / bias (or ones / conv bias)
    o_ref: (Bt, L, Cout)
    """
    f32, bf16 = jnp.float32, jnp.bfloat16
    Bt, L, Cin = x_ref.shape
    K = w_ref.shape[0]
    Cout = o_ref.shape[2]
    pad = (K - 1) // 2

    x = x_ref[...].astype(f32)
    if pad:
        z = jnp.zeros((Bt, pad, Cin), f32)
        xp = jnp.concatenate([z, x, z], axis=1)
    else:
        xp = x

    acc = jnp.zeros((Bt * L, Cout), f32)
    for k in range(K):                                     # static, K in {1, 5}
        xk = xp[:, k:k + L, :].reshape(Bt * L, Cin).astype(bf16)
        acc = acc + jnp.dot(xk, w_ref[k].astype(bf16),
                            preferred_element_type=f32)
    y = acc * s_ref[...] + b_ref[...]
    if act:
        y = _silu(y)
    o_ref[...] = y.reshape(Bt, L, Cout).astype(o_ref.dtype)


def _stage_kernel(x_ref,
                  w1_ref, s1_ref, b1_ref,
                  wdw_ref, sdw_ref, bdw_ref,
                  wse1_ref, bse1_ref, wse2_ref, bse2_ref,
                  wbl_ref, rbl_ref, sbl_ref, bbl_ref,
                  w3a_ref, w3b_ref, b3_ref,
                  w2c_ref, s2c_ref, b2c_ref,
                  wrx_ref, wrh_ref, sr_ref, br_ref,
                  o_ref):
    """One fully fused inverted-residual stage + channel-concat + resize conv.

    The "mid" (expanded) channels live in a permuted split layout:
        part r, slot g  <->  original channel g*fpg + r
    (r = index within a grouped-conv group).  All weights touching the mid
    channels were permuted to this layout at packing time.

    x_ref:    (Bt, L, prev)
    w1_ref:   (fpg, prev, G)          1x1 expand weight       (G = mid / fpg)
    s1/b1:    (fpg, 1, G)
    wdw_ref:  (K, fpg_in, fpg_out, G) true grouped-conv weight (no zeros)
    sdw/bdw:  (fpg, 1, G)
    wse1_ref: (fpg, G, h), bse1 (1, h)      SE Linear(mid -> h)
    wse2/bse2: (h, h), (1, h)               SE Linear(h -> h)
    wbl/rbl/sbl/bbl: (h, h*h2), (h, h*h2), (h*h2, h2), (1, h2)
              dense-equivalent TRL contraction + 0/1 helper matrices
    w3a/w3b/b3: (fpg, h, G), (fpg, h2, G), (fpg, 1, G)   SE Linear(h+h2 -> mid)
    w2c_ref:  (fpg, G, prev)          1x1 project weight, split by input part
    s2c/b2c:  (1, prev)
    wrx/wrh:  (K, prev, sz)           resize conv weight split for concat([x,h])
    sr/br:    (1, sz)
    o_ref:    (Bt, L, sz)
    """
    f32, bf16 = jnp.float32, jnp.bfloat16
    Bt, L, prev = x_ref.shape
    K, fpg = wdw_ref.shape[0], wdw_ref.shape[1]
    G = w1_ref.shape[2]
    sz = o_ref.shape[2]
    pad = (K - 1) // 2

    x = x_ref[...].astype(f32)                             # (Bt, L, prev)
    xf = x.reshape(Bt * L, prev).astype(bf16)

    # ---- 1x1 expand conv + BN + SiLU (per split part, MXU in bf16) ---------
    parts = []
    for r in range(fpg):
        a = jnp.dot(xf, w1_ref[r].astype(bf16), preferred_element_type=f32)
        a = a * s1_ref[r] + b1_ref[r]
        parts.append(_silu(a).reshape(Bt, L, G))

    # ---- grouped ks conv + BN + SiLU: true per-group math on the VPU -------
    zmid = jnp.zeros((Bt, pad, G), f32)
    padded = [jnp.concatenate([zmid, p, zmid], axis=1) for p in parts]
    accs = [jnp.zeros((Bt, L, G), f32) for _ in range(fpg)]
    for k in range(K):
        wk = wdw_ref[k]                                    # (fpg_in, fpg_out, G)
        shifted = [padded[ri][:, k:k + L, :] for ri in range(fpg)]
        for ro in range(fpg):
            for ri in range(fpg):
                accs[ro] = accs[ro] + shifted[ri] * wk[ri, ro:ro + 1, :]
    dw_out = []
    for ro in range(fpg):
        y = accs[ro] * sdw_ref[ro] + bdw_ref[ro]
        dw_out.append(_silu(y))                            # (Bt, L, G)

    # ---- SELayer (squeeze -> MLP -> Bilinear/TRL -> sigmoid), batched ------
    means = [jnp.sum(p, axis=1) * (1.0 / L) for p in dw_out]    # (Bt, G)
    h1 = jnp.dot(means[0], wse1_ref[0], preferred_element_type=f32)
    for r in range(1, fpg):
        h1 = h1 + jnp.dot(means[r], wse1_ref[r], preferred_element_type=f32)
    h1 = _silu(h1 + bse1_ref[...])
    h2 = jnp.dot(h1, wse2_ref[...], preferred_element_type=f32) + bse2_ref[...]
    # Bilinear: bl[b,o] = bb[o] + sum_{i,j} h2[b,i] h2[b,j] W[i,j,o]
    # computed as 3 dense matmuls (no per-i M=1 matmul loop):
    t = jnp.dot(h2, wbl_ref[...], preferred_element_type=f32)   # sum_j h2_j W[i,j,o]
    e = jnp.dot(h2, rbl_ref[...], preferred_element_type=f32)   # h2_i replicated
    bl = jnp.dot(t * e, sbl_ref[...], preferred_element_type=f32) + bbl_ref[...]
    h2s = _silu(h2)
    bls = _silu(bl)

    # ---- SE channel rescale + 1x1 project conv + BN + SiLU -----------------
    hacc = jnp.zeros((Bt * L, prev), f32)
    for r in range(fpg):
        zr = jax.nn.sigmoid(
            jnp.dot(h2s, w3a_ref[r], preferred_element_type=f32)
            + jnp.dot(bls, w3b_ref[r], preferred_element_type=f32)
            + b3_ref[r])                                   # (Bt, G)
        scaled = dw_out[r] * zr[:, None, :]                # (Bt, L, G)
        hacc = hacc + jnp.dot(scaled.reshape(Bt * L, G).astype(bf16),
                              w2c_ref[r].astype(bf16),
                              preferred_element_type=f32)
    hy = _silu(hacc * s2c_ref[...] + b2c_ref[...])         # (Bt*L, prev)
    h_res = hy.reshape(Bt, L, prev)

    # ---- concat([x, h]) fused into the resize ks conv + BN + SiLU ----------
    zprev = jnp.zeros((Bt, pad, prev), f32)
    xpad = jnp.concatenate([zprev, x, zprev], axis=1)
    hpad = jnp.concatenate([zprev, h_res, zprev], axis=1)
    acc = jnp.zeros((Bt * L, sz), f32)
    for k in range(K):
        xk = xpad[:, k:k + L, :].reshape(Bt * L, prev).astype(bf16)
        hk = hpad[:, k:k + L, :].reshape(Bt * L, prev).astype(bf16)
        acc = acc + jnp.dot(xk, wrx_ref[k].astype(bf16), preferred_element_type=f32)
        acc = acc + jnp.dot(hk, wrh_ref[k].astype(bf16), preferred_element_type=f32)
    y = _silu(acc * sr_ref[...] + br_ref[...])
    o_ref[...] = y.reshape(Bt, L, sz).astype(o_ref.dtype)


# ----------------------------------------------------------------------------
# Pallas wrappers (grid over batch tiles, weights fully resident in VMEM)
# ----------------------------------------------------------------------------
def _full_spec(shape):
    return pl.BlockSpec(shape, lambda b, _n=len(shape): (0,) * _n)


def _pick_bt(batch, cap=8):
    """Largest divisor of `batch` <= cap that keeps the grid >= 2 steps
    (so both TensorCores get work on megacore / v7x chips)."""
    best = 1
    for d in range(1, min(batch, cap) + 1):
        if batch % d == 0 and batch // d >= 2:
            best = d
    return best


def _compiler_params():
    return pltpu.CompilerParams(dimension_semantics=("parallel",),
                                vmem_limit_bytes=_VMEM_LIMIT_BYTES)


def conv_block(x, p, *, act, bt):
    """x: (B, L, Cin) -> (B, L, Cout); fused conv + BN (+ SiLU)."""
    B, L, Cin = x.shape
    K, _, Cout = p['w'].shape
    kernel = functools.partial(_conv_bn_act_kernel, act=act)
    return pl.pallas_call(
        kernel,
        out_shape=jax.ShapeDtypeStruct((B, L, Cout), x.dtype),
        grid=(B // bt,),
        in_specs=[
            pl.BlockSpec((bt, L, Cin), lambda b: (b, 0, 0)),
            _full_spec(p['w'].shape),
            _full_spec(p['scale'].shape),
            _full_spec(p['bias'].shape),
        ],
        out_specs=pl.BlockSpec((bt, L, Cout), lambda b: (b, 0, 0)),
        compiler_params=_compiler_params(),
    )(x, p['w'], p['scale'], p['bias'])


_STAGE_KEYS = ('w1', 's1', 'b1', 'wdw', 'sdw', 'bdw',
               'wse1', 'bse1', 'wse2', 'bse2',
               'wbl', 'rbl', 'sbl', 'bbl',
               'w3a', 'w3b', 'b3',
               'w2c', 's2c', 'b2c',
               'wrx', 'wrh', 'sr', 'br')


def stage_block(x, sp, *, bt):
    """Fused inverted-residual stage: (B, L, prev) -> (B, L, sz)."""
    B, L, prev = x.shape
    sz = sp['sr'].shape[1]
    wargs = [sp[k] for k in _STAGE_KEYS]
    in_specs = [pl.BlockSpec((bt, L, prev), lambda b: (b, 0, 0))]
    in_specs += [_full_spec(a.shape) for a in wargs]
    return pl.pallas_call(
        _stage_kernel,
        out_shape=jax.ShapeDtypeStruct((B, L, sz), x.dtype),
        grid=(B // bt,),
        in_specs=in_specs,
        out_specs=pl.BlockSpec((bt, L, sz), lambda b: (b, 0, 0)),
        compiler_params=_compiler_params(),
    )(x, *wargs)


# ----------------------------------------------------------------------------
# Forward pass (Pallas)
# ----------------------------------------------------------------------------
def legnet_forward_pallas(x_ncl, kparams, cfg):
    """x_ncl: (B, 6, L) PyTorch layout -> (B, final_ch, L)."""
    block_sizes = cfg['block_sizes']
    final_ch = cfg['final_ch']
    B = x_ncl.shape[0]
    bt = _pick_bt(B)
    x = jnp.transpose(x_ncl, (0, 2, 1)).astype(jnp.float32)       # (B, L, 6)
    x = conv_block(x, kparams['blc0'], act=True, bt=bt)
    for i in range(len(block_sizes) - 1):
        x = stage_block(x, kparams[f'stage{i}'], bt=bt)
    y = conv_block(x, kparams['mapper'], act=False, bt=bt)        # lane-dense (B, L, 128)
    y = y[:, :, :final_ch]
    return jnp.transpose(y, (0, 2, 1))


# ----------------------------------------------------------------------------
# Parameter init (synthetic, PyTorch-equivalent layouts) and kernel packing
# ----------------------------------------------------------------------------
def init_params(key, cfg):
    keys = iter(jax.random.split(key, 4096))
    nk = lambda: next(keys)

    def normal(shape, scale=1.0):
        return scale * jax.random.normal(nk(), shape, jnp.float32)

    def bn_fold(c):
        eps = 1e-5
        gamma = 1.0 + 0.1 * normal((c,))
        beta = 0.05 * normal((c,))
        rmean = 0.05 * normal((c,))
        rvar = 1.0 + 0.1 * jax.random.uniform(nk(), (c,), jnp.float32)
        scale = gamma / jnp.sqrt(rvar + eps)
        return scale, beta - rmean * scale

    bs, ks = cfg['block_sizes'], cfg['ks']
    fpg, rf, red = cfg['filter_per_group'], cfg['resize_factor'], cfg['se_reduction']

    raw = {}
    s0, b0 = bn_fold(bs[0])
    raw['blc0'] = {'w': normal((ks, cfg['in_ch'], bs[0])) / np.sqrt(cfg['in_ch'] * ks),
                   's': s0, 'b': b0}
    for i, (prev, sz) in enumerate(zip(bs[:-1], bs[1:])):
        mid = sz * rf
        h = prev // red
        h2 = h // 2
        s1, b1 = bn_fold(mid)
        sdw, bdw = bn_fold(mid)
        s2c, b2c = bn_fold(prev)
        sr, br = bn_fold(sz)
        raw[f'stage{i}'] = {
            'w1': normal((1, prev, mid)) / np.sqrt(prev),
            's1': s1, 'b1': b1,
            # grouped conv weight in the TRUE PyTorch Conv1d layout:
            # (out_channels, in_channels // groups, K)
            'wdw_t': normal((mid, fpg, ks)) / np.sqrt(fpg * ks),
            'sdw': sdw, 'bdw': bdw,
            'se': {
                'w1': normal((mid, h)) / np.sqrt(mid),
                'b1': 0.05 * normal((h,)),
                'w2': normal((h, h)) / np.sqrt(h),
                'b2': 0.05 * normal((h,)),
                'wb': 0.00075 * normal((h, h, h2)),   # TRL dense-equivalent, std=0.00075
                'bb': 0.05 * normal((h2,)),
                'w3': normal((h + h2, mid)) / np.sqrt(h + h2),
                'b3': 0.05 * normal((mid,)),
            },
            'w2c': normal((1, mid, prev)) / np.sqrt(mid),
            's2c': s2c, 'b2c': b2c,
            'wr': normal((ks, 2 * prev, sz)) / np.sqrt(2 * prev * ks),
            'sr': sr, 'br': br,
        }
    raw['mapper'] = {'w': normal((1, bs[-1], cfg['final_ch'])) / np.sqrt(bs[-1]),
                     'b': 0.05 * normal((cfg['final_ch'],))}
    return raw


def pack_kernel_params(raw, cfg):
    """Convert raw (PyTorch-layout) weights into the fused-kernel layouts."""
    bs, ks = cfg['block_sizes'], cfg['ks']
    fpg, rf, red = cfg['filter_per_group'], cfg['resize_factor'], cfg['se_reduction']
    final_ch = cfg['final_ch']

    kp = {'blc0': {'w': raw['blc0']['w'],
                   'scale': raw['blc0']['s'][None, :],
                   'bias': raw['blc0']['b'][None, :]}}

    for i, (prev, sz) in enumerate(zip(bs[:-1], bs[1:])):
        mid = sz * rf
        G = mid // fpg
        h = prev // red
        h2 = h // 2
        # split-layout permutation: new index r*G + g  <->  original g*fpg + r
        perm = np.arange(mid).reshape(G, fpg).T.reshape(-1)
        rp = raw[f'stage{i}']
        se = rp['se']
        st = {}
        w1p = rp['w1'][0][:, perm]
        st['w1'] = jnp.transpose(w1p.reshape(prev, fpg, G), (1, 0, 2))
        st['s1'] = rp['s1'][perm].reshape(fpg, G)[:, None, :]
        st['b1'] = rp['b1'][perm].reshape(fpg, G)[:, None, :]
        st['wdw'] = jnp.transpose(rp['wdw_t'], (2, 1, 0))[:, :, perm].reshape(ks, fpg, fpg, G)
        st['sdw'] = rp['sdw'][perm].reshape(fpg, G)[:, None, :]
        st['bdw'] = rp['bdw'][perm].reshape(fpg, G)[:, None, :]
        st['wse1'] = se['w1'][perm, :].reshape(fpg, G, h)
        st['bse1'] = se['b1'][None, :]
        st['wse2'] = se['w2']
        st['bse2'] = se['b2'][None, :]
        # Bilinear helpers: wbl[j, i*h2+o] = wb[i, j, o]; rbl/sbl are 0/1 masks.
        st['wbl'] = jnp.transpose(se['wb'], (1, 0, 2)).reshape(h, h * h2)
        st['rbl'] = jnp.asarray(np.repeat(np.eye(h, dtype=np.float32), h2, axis=1))
        st['sbl'] = jnp.asarray(np.tile(np.eye(h2, dtype=np.float32), (h, 1)))
        st['bbl'] = se['bb'][None, :]
        w3a = se['w3'][:h, :][:, perm]
        w3b = se['w3'][h:, :][:, perm]
        st['w3a'] = jnp.transpose(w3a.reshape(h, fpg, G), (1, 0, 2))
        st['w3b'] = jnp.transpose(w3b.reshape(h2, fpg, G), (1, 0, 2))
        st['b3'] = se['b3'][perm].reshape(fpg, G)[:, None, :]
        st['w2c'] = rp['w2c'][0][perm, :].reshape(fpg, G, prev)
        st['s2c'] = rp['s2c'][None, :]
        st['b2c'] = rp['b2c'][None, :]
        st['wrx'] = rp['wr'][:, :prev, :]
        st['wrh'] = rp['wr'][:, prev:, :]
        st['sr'] = rp['sr'][None, :]
        st['br'] = rp['br'][None, :]
        kp[f'stage{i}'] = st

    # mapper: pad output channels to a multiple of 128 for lane-dense stores
    clast = bs[-1]
    cpad = ((final_ch + 127) // 128) * 128
    wm = jnp.zeros((1, clast, cpad), jnp.float32).at[:, :, :final_ch].set(raw['mapper']['w'])
    bm = jnp.zeros((cpad,), jnp.float32).at[:final_ch].set(raw['mapper']['b'])
    kp['mapper'] = {'w': wm,
                    'scale': jnp.ones((1, cpad), jnp.float32),
                    'bias': bm[None, :]}
    return kp


# ----------------------------------------------------------------------------
# Pure-JAX reference (independent derivation from the raw PyTorch-layout
# weights; same bf16-at-MXU precision policy as the kernels).
# ----------------------------------------------------------------------------
def _conv_ref(x, w, scale, bias, act):
    K = w.shape[0]
    pad = (K - 1) // 2
    B, L, _ = x.shape
    xp = jnp.pad(x, ((0, 0), (pad, pad), (0, 0)))
    acc = jnp.zeros((B, L, w.shape[2]), jnp.float32)
    for k in range(K):
        acc = acc + jnp.einsum('blc,cd->bld',
                               xp[:, k:k + L, :].astype(jnp.bfloat16),
                               w[k].astype(jnp.bfloat16),
                               preferred_element_type=jnp.float32)
    y = acc * scale[None, None, :] + bias[None, None, :]
    return _silu(y) if act else y


def _grouped_conv_ref(x, wt, scale, bias):
    """True grouped Conv1d from the PyTorch (Cout, Cin/groups, K) weight."""
    C, fpg, K = wt.shape
    B, L, _ = x.shape
    G = C // fpg
    pad = (K - 1) // 2
    xp = jnp.pad(x, ((0, 0), (pad, pad), (0, 0))).reshape(B, L + 2 * pad, G, fpg)
    wg = wt.reshape(G, fpg, fpg, K)          # (group, r_out, r_in, k)
    acc = jnp.zeros((B, L, G, fpg), jnp.float32)
    for k in range(K):
        acc = acc + jnp.einsum('blgr,gpr->blgp', xp[:, k:k + L], wg[..., k])
    y = acc.reshape(B, L, C) * scale[None, None, :] + bias[None, None, :]
    return _silu(y)


def _se_ref(x, se):
    y = x.mean(axis=1)                                     # (B, C)
    h1 = _silu(y @ se['w1'] + se['b1'])
    h2 = h1 @ se['w2'] + se['b2']
    bl = se['bb'] + jnp.einsum('bi,bj,ijo->bo', h2, h2, se['wb'])
    z = jax.nn.sigmoid(jnp.concatenate([_silu(h2), _silu(bl)], axis=-1) @ se['w3']
                       + se['b3'])
    return x * z[:, None, :]


def legnet_forward_ref(x_ncl, raw, cfg):
    bs = cfg['block_sizes']
    x = jnp.transpose(x_ncl, (0, 2, 1)).astype(jnp.float32)
    b0 = raw['blc0']
    x = _conv_ref(x, b0['w'], b0['s'], b0['b'], True)
    for i in range(len(bs) - 1):
        rp = raw[f'stage{i}']
        h = _conv_ref(x, rp['w1'], rp['s1'], rp['b1'], True)
        h = _grouped_conv_ref(h, rp['wdw_t'], rp['sdw'], rp['bdw'])
        h = _se_ref(h, rp['se'])
        h = _conv_ref(h, rp['w2c'], rp['s2c'], rp['b2c'], True)
        x = _conv_ref(jnp.concatenate([x, h], axis=-1), rp['wr'], rp['sr'], rp['br'], True)
    m = raw['mapper']
    y = _conv_ref(x, m['w'], jnp.ones((m['w'].shape[2],), jnp.float32), m['b'], False)
    return jnp.transpose(y, (0, 2, 1))


# ----------------------------------------------------------------------------
if __name__ == "__main__":
    key = jax.random.PRNGKey(0)
    kx, kw = jax.random.split(key)

    cfg = dict(block_sizes=[16, 16, 8],   # small synthetic config (default [256, ...])
               ks=5, resize_factor=4, se_reduction=4,
               filter_per_group=2, final_ch=18, in_ch=6)
    seqsize = 16
    batch = 4

    raw_params = init_params(kw, cfg)
    kparams = pack_kernel_params(raw_params, cfg)

    # Input in PyTorch Conv1d layout: (batch, channels=6, seqsize)
    x = jax.random.normal(kx, (batch, cfg['in_ch'], seqsize), jnp.float32)

    fwd = jax.jit(lambda inp: legnet_forward_pallas(inp, kparams, cfg))
    out = fwd(x)
    jax.block_until_ready(out)

    assert out.shape == (batch, cfg['final_ch'], seqsize), out.shape
    ref = legnet_forward_ref(x, raw_params, cfg)
    np.testing.assert_allclose(np.asarray(out), np.asarray(ref), rtol=2e-3, atol=2e-3)

    print("KERNEL_OK")
</pallas_src>

<mosaic_0001>
module attributes {stable_mosaic.version = 11 : i64} {
  func.func @_conv_bn_act_kernel(%arg0: i32, %arg1: memref<2x16x6xf32, #tpu.memory_space<vmem>>, %arg2: memref<5x6x16xf32, #tpu.memory_space<vmem>>, %arg3: memref<1x16xf32, #tpu.memory_space<vmem>>, %arg4: memref<1x16xf32, #tpu.memory_space<vmem>>, %arg5: memref<2x16x16xf32, #tpu.memory_space<vmem>>) attributes {dimension_semantics = [#tpu.dimension_semantics<parallel>], iteration_bounds = array<i64: 2>, scalar_prefetch = 0 : i64, scratch_operands = 0 : i64, tpu.core_type = #tpu.core_type<tc>, window_params = [{transform_indices = @transform_0, window_bounds = array<i64: 2, 16, 6>}, {pipeline_mode = #tpu.pipeline_mode<synchronous>, transform_indices = @transform_1, window_bounds = array<i64: 5, 6, 16>}, {pipeline_mode = #tpu.pipeline_mode<synchronous>, transform_indices = @transform_2, window_bounds = array<i64: 1, 16>}, {pipeline_mode = #tpu.pipeline_mode<synchronous>, transform_indices = @transform_3, window_bounds = array<i64: 1, 16>}, {transform_indices = @transform_4, window_bounds = array<i64: 2, 16, 16>}]} {
    %c0 = arith.constant 0 : index
    %c0_0 = arith.constant 0 : index
    %c0_1 = arith.constant 0 : index
    %0 = vector.load %arg1[%c0, %c0_0, %c0_1] : memref<2x16x6xf32, #tpu.memory_space<vmem>>, vector<2x16x6xf32>
    %cst = arith.constant 0.000000e+00 : f32
    %1 = vector.broadcast %cst : f32 to vector<2x2x6xf32>
    %2 = tpu.concatenate %1, %0, %1 in 1 : vector<2x2x6xf32>, vector<2x16x6xf32>, vector<2x2x6xf32> -> vector<2x20x6xf32>
    %cst_2 = arith.constant 0.000000e+00 : f32
    %3 = vector.broadcast %cst_2 : f32 to vector<32x16xf32>
    %4 = vector.extract_strided_slice %2 {offsets = [0, 0, 0], sizes = [2, 16, 6], strides = [1, 1, 1]} : vector<2x20x6xf32> to vector<2x16x6xf32>
    %5 = vector.shape_cast %4 : vector<2x16x6xf32> to vector<32x6xf32>
    %6 = arith.truncf %5 : vector<32x6xf32> to vector<32x6xbf16>
    %c0_3 = arith.constant 0 : index
    %c0_4 = arith.constant 0 : index
    %c0_5 = arith.constant 0 : index
    %7 = vector.load %arg2[%c0_3, %c0_4, %c0_5] : memref<5x6x16xf32, #tpu.memory_space<vmem>>, vector<1x6x16xf32>
    %8 = vector.shape_cast %7 : vector<1x6x16xf32> to vector<6x16xf32>
    %9 = arith.truncf %8 : vector<6x16xf32> to vector<6x16xbf16>
    %cst_6 = arith.constant dense<0.000000e+00> : vector<32x16xf32>
    %10 = tpu.matmul %6, %9, %cst_6 {dimension_numbers = #tpu.dot_dimension_numbers<[1], [0], [0], [1], [0, 0, 1, 1], [], []>} : vector<32x6xbf16>, vector<6x16xbf16>, vector<32x16xf32> -> vector<32x16xf32>
    %11 = arith.addf %3, %10 : vector<32x16xf32>
    %12 = vector.extract_strided_slice %2 {offsets = [0, 1, 0], sizes = [2, 16, 6], strides = [1, 1, 1]} : vector<2x20x6xf32> to vector<2x16x6xf32>
    %13 = vector.shape_cast %12 : vector<2x16x6xf32> to vector<32x6xf32>
    %14 = arith.truncf %13 : vector<32x6xf32> to vector<32x6xbf16>
    %c1 = arith.constant 1 : index
    %c0_7 = arith.constant 0 : index
    %c0_8 = arith.constant 0 : index
    %15 = vector.load %arg2[%c1, %c0_7, %c0_8] : memref<5x6x16xf32, #tpu.memory_space<vmem>>, vector<1x6x16xf32>
    %16 = vector.shape_cast %15 : vector<1x6x16xf32> to vector<6x16xf32>
    %17 = arith.truncf %16 : vector<6x16xf32> to vector<6x16xbf16>
    %cst_9 = arith.constant dense<0.000000e+00> : vector<32x16xf32>
    %18 = tpu.matmul %14, %17, %cst_9 {dimension_numbers = #tpu.dot_dimension_numbers<[1], [0], [0], [1], [0, 0, 1, 1], [], []>} : vector<32x6xbf16>, vector<6x16xbf16>, vector<32x16xf32> -> vector<32x16xf32>
    %19 = arith.addf %11, %18 : vector<32x16xf32>
    %20 = vector.extract_strided_slice %2 {offsets = [0, 2, 0], sizes = [2, 16, 6], strides = [1, 1, 1]} : vector<2x20x6xf32> to vector<2x16x6xf32>
    %21 = vector.shape_cast %20 : vector<2x16x6xf32> to vector<32x6xf32>
    %22 = arith.truncf %21 : vector<32x6xf32> to vector<32x6xbf16>
    %c2 = arith.constant 2 : index
    %c0_10 = arith.constant 0 : index
    %c0_11 = arith.constant 0 : index
    %23 = vector.load %arg2[%c2, %c0_10, %c0_11] : memref<5x6x16xf32, #tpu.memory_space<vmem>>, vector<1x6x16xf32>
    %24 = vector.shape_cast %23 : vector<1x6x16xf32> to vector<6x16xf32>
    %25 = arith.truncf %24 : vector<6x16xf32> to vector<6x16xbf16>
    %cst_12 = arith.constant dense<0.000000e+00> : vector<32x16xf32>
    %26 = tpu.matmul %22, %25, %cst_12 {dimension_numbers = #tpu.dot_dimension_numbers<[1], [0], [0], [1], [0, 0, 1, 1], [], []>} : vector<32x6xbf16>, vector<6x16xbf16>, vector<32x16xf32> -> vector<32x16xf32>
    %27 = arith.addf %19, %26 : vector<32x16xf32>
    %28 = vector.extract_strided_slice %2 {offsets = [0, 3, 0], sizes = [2, 16, 6], strides = [1, 1, 1]} : vector<2x20x6xf32> to vector<2x16x6xf32>
    %29 = vector.shape_cast %28 : vector<2x16x6xf32> to vector<32x6xf32>
    %30 = arith.truncf %29 : vector<32x6xf32> to vector<32x6xbf16>
    %c3 = arith.constant 3 : index
    %c0_13 = arith.constant 0 : index
    %c0_14 = arith.constant 0 : index
    %31 = vector.load %arg2[%c3, %c0_13, %c0_14] : memref<5x6x16xf32, #tpu.memory_space<vmem>>, vector<1x6x16xf32>
    %32 = vector.shape_cast %31 : vector<1x6x16xf32> to vector<6x16xf32>
    %33 = arith.truncf %32 : vector<6x16xf32> to vector<6x16xbf16>
    %cst_15 = arith.constant dense<0.000000e+00> : vector<32x16xf32>
    %34 = tpu.matmul %30, %33, %cst_15 {dimension_numbers = #tpu.dot_dimension_numbers<[1], [0], [0], [1], [0, 0, 1, 1], [], []>} : vector<32x6xbf16>, vector<6x16xbf16>, vector<32x16xf32> -> vector<32x16xf32>
    %35 = arith.addf %27, %34 : vector<32x16xf32>
    %36 = vector.extract_strided_slice %2 {offsets = [0, 4, 0], sizes = [2, 16, 6], strides = [1, 1, 1]} : vector<2x20x6xf32> to vector<2x16x6xf32>
    %37 = vector.shape_cast %36 : vector<2x16x6xf32> to vector<32x6xf32>
    %38 = arith.truncf %37 : vector<32x6xf32> to vector<32x6xbf16>
    %c4 = arith.constant 4 : index
    %c0_16 = arith.constant 0 : index
    %c0_17 = arith.constant 0 : index
    %39 = vector.load %arg2[%c4, %c0_16, %c0_17] : memref<5x6x16xf32, #tpu.memory_space<vmem>>, vector<1x6x16xf32>
    %40 = vector.shape_cast %39 : vector<1x6x16xf32> to vector<6x16xf32>
    %41 = arith.truncf %40 : vector<6x16xf32> to vector<6x16xbf16>
    %cst_18 = arith.constant dense<0.000000e+00> : vector<32x16xf32>
    %42 = tpu.matmul %38, %41, %cst_18 {dimension_numbers = #tpu.dot_dimension_numbers<[1], [0], [0], [1], [0, 0, 1, 1], [], []>} : vector<32x6xbf16>, vector<6x16xbf16>, vector<32x16xf32> -> vector<32x16xf32>
    %43 = arith.addf %35, %42 : vector<32x16xf32>
    %c0_19 = arith.constant 0 : index
    %c0_20 = arith.constant 0 : index
    %44 = vector.load %arg3[%c0_19, %c0_20] : memref<1x16xf32, #tpu.memory_space<vmem>>, vector<1x16xf32>
    %45 = vector.broadcast %44 : vector<1x16xf32> to vector<32x16xf32>
    %46 = arith.mulf %43, %45 : vector<32x16xf32>
    %c0_21 = arith.constant 0 : index
    %c0_22 = arith.constant 0 : index
    %47 = vector.load %arg4[%c0_21, %c0_22] : memref<1x16xf32, #tpu.memory_space<vmem>>, vector<1x16xf32>
    %48 = vector.broadcast %47 : vector<1x16xf32> to vector<32x16xf32>
    %49 = arith.addf %46, %48 : vector<32x16xf32>
    %50 = arith.negf %49 : vector<32x16xf32>
    %51 = math.exp %50 : vector<32x16xf32>
    %cst_23 = arith.constant 1.000000e+00 : f32
    %52 = vector.broadcast %cst_23 : f32 to vector<32x16xf32>
    %53 = arith.addf %52, %51 : vector<32x16xf32>
    %54 = arith.divf %52, %53 : vector<32x16xf32>
    %55 = arith.mulf %49, %54 : vector<32x16xf32>
    %56 = vector.shape_cast %55 : vector<32x16xf32> to vector<2x16x16xf32>
    %c0_24 = arith.constant 0 : index
    %c0_25 = arith.constant 0 : index
    %c0_26 = arith.constant 0 : index
    %57 = vector.load %arg5[%c0_24, %c0_25, %c0_26] : memref<2x16x16xf32, #tpu.memory_space<vmem>>, vector<2x16x16xf32>
    tpu.vector_store %arg5[%c0_24, %c0_25, %c0_26], %56 {strides = array<i32>} : memref<2x16x16xf32, #tpu.memory_space<vmem>>, vector<2x16x16xf32>,
    return
  }
  func.func @transform_0(%arg0: i32) -> (i32, i32, i32) {
    %c0_i32 = arith.constant 0 : i32
    %c0_i32_0 = arith.constant 0 : i32
    %c0_i32_1 = arith.constant 0 : i32
    return %arg0, %c0_i32, %c0_i32_0 : i32, i32, i32
  }
  func.func @transform_1(%arg0: i32) -> (i32, i32, i32) {
    %c0_i32 = arith.constant 0 : i32
    %c0_i32_0 = arith.constant 0 : i32
    %c0_i32_1 = arith.constant 0 : i32
    %c0_i32_2 = arith.constant 0 : i32
    return %c0_i32, %c0_i32_0, %c0_i32_1 : i32, i32, i32
  }
  func.func @transform_2(%arg0: i32) -> (i32, i32) {
    %c0_i32 = arith.constant 0 : i32
    %c0_i32_0 = arith.constant 0 : i32
    %c0_i32_1 = arith.constant 0 : i32
    return %c0_i32, %c0_i32_0 : i32, i32
  }
  func.func @transform_3(%arg0: i32) -> (i32, i32) {
    %c0_i32 = arith.constant 0 : i32
    %c0_i32_0 = arith.constant 0 : i32
    %c0_i32_1 = arith.constant 0 : i32
    return %c0_i32, %c0_i32_0 : i32, i32
  }
  func.func @transform_4(%arg0: i32) -> (i32, i32, i32) {
    %c0_i32 = arith.constant 0 : i32
    %c0_i32_0 = arith.constant 0 : i32
    %c0_i32_1 = arith.constant 0 : i32
    return %arg0, %c0_i32, %c0_i32_0 : i32, i32, i32
  }
}

module attributes {stable_mosaic.version = 11 : i64} {
  func.func @_stage_kernel(%arg0: i32, %arg1: memref<2x16x16xf32, #tpu.memory_space<vmem>>, %arg2: memref<2x16x32xf32, #tpu.memory_space<vmem>>, %arg3: memref<2x1x32xf32, #tpu.memory_space<vmem>>, %arg4: memref<2x1x32xf32, #tpu.memory_space<vmem>>, %arg5: memref<5x2x2x32xf32, #tpu.memory_space<vmem>>, %arg6: memref<2x1x32xf32, #tpu.memory_space<vmem>>, %arg7: memref<2x1x32xf32, #tpu.memory_space<vmem>>, %arg8: memref<2x32x4xf32, #tpu.memory_space<vmem>>, %arg9: memref<1x4xf32, #tpu.memory_space<vmem>>, %arg10: memref<4x4xf32, #tpu.memory_space<vmem>>, %arg11: memref<1x4xf32, #tpu.memory_space<vmem>>, %arg12: memref<4x8xf32, #tpu.memory_space<vmem>>, %arg13: memref<4x8xf32, #tpu.memory_space<vmem>>, %arg14: memref<8x2xf32, #tpu.memory_space<vmem>>, %arg15: memref<1x2xf32, #tpu.memory_space<vmem>>, %arg16: memref<2x4x32xf32, #tpu.memory_space<vmem>>, %arg17: memref<2x2x32xf32, #tpu.memory_space<vmem>>, %arg18: memref<2x1x32xf32, #tpu.memory_space<vmem>>, %arg19: memref<2x32x16xf32, #tpu.memory_space<vmem>>, %arg20: memref<1x16xf32, #tpu.memory_space<vmem>>, %arg21: memref<1x16xf32, #tpu.memory_space<vmem>>, %arg22: memref<5x16x16xf32, #tpu.memory_space<vmem>>, %arg23: memref<5x16x16xf32, #tpu.memory_space<vmem>>, %arg24: memref<1x16xf32, #tpu.memory_space<vmem>>, %arg25: memref<1x16xf32, #tpu.memory_space<vmem>>, %arg26: memref<2x16x16xf32, #tpu.memory_space<vmem>>) attributes {dimension_semantics = [#tpu.dimension_semantics<parallel>], iteration_bounds = array<i64: 2>, scalar_prefetch = 0 : i64, scratch_operands = 0 : i64, tpu.core_type = #tpu.core_type<tc>, window_params = [{transform_indices = @transform_0, window_bounds = array<i64: 2, 16, 16>}, {pipeline_mode = #tpu.pipeline_mode<synchronous>, transform_indices = @transform_1, window_bounds = array<i64: 2, 16, 32>}, {pipeline_mode = #tpu.pipeline_mode<synchronous>, transform_indices = @transform_2, window_bounds = array<i64: 2, 1, 32>}, {pipeline_mode = #tpu.pipeline_mode<synchronous>, transform_indices = @transform_3, window_bounds = array<i64: 2, 1, 32>}, {pipeline_mode = #tpu.pipeline_mode<synchronous>, transform_indices = @transform_4, window_bounds = array<i64: 5, 2, 2, 32>}, {pipeline_mode = #tpu.pipeline_mode<synchronous>, transform_indices = @transform_5, window_bounds = array<i64: 2, 1, 32>}, {pipeline_mode = #tpu.pipeline_mode<synchronous>, transform_indices = @transform_6, window_bounds = array<i64: 2, 1, 32>}, {pipeline_mode = #tpu.pipeline_mode<synchronous>, transform_indices = @transform_7, window_bounds = array<i64: 2, 32, 4>}, {pipeline_mode = #tpu.pipeline_mode<synchronous>, transform_indices = @transform_8, window_bounds = array<i64: 1, 4>}, {pipeline_mode = #tpu.pipeline_mode<synchronous>, transform_indices = @transform_9, window_bounds = array<i64: 4, 4>}, {pipeline_mode = #tpu.pipeline_mode<synchronous>, transform_indices = @transform_10, window_bounds = array<i64: 1, 4>}, {pipeline_mode = #tpu.pipeline_mode<synchronous>, transform_indices = @transform_11, window_bounds = array<i64: 4, 8>}, {pipeline_mode = #tpu.pipeline_mode<synchronous>, transform_indices = @transform_12, window_bounds = array<i64: 4, 8>}, {pipeline_mode = #tpu.pipeline_mode<synchronous>, transform_indices = @transform_13, window_bounds = array<i64: 8, 2>}, {pipeline_mode = #tpu.pipeline_mode<synchronous>, transform_indices = @transform_14, window_bounds = array<i64: 1, 2>}, {pipeline_mode = #tpu.pipeline_mode<synchronous>, transform_indices = @transform_15, window_bounds = array<i64: 2, 4, 32>}, {pipeline_mode = #tpu.pipeline_mode<synchronous>, transform_indices = @transform_16, window_bounds = array<i64: 2, 2, 32>}, {pipeline_mode = #tpu.pipeline_mode<synchronous>, transform_indices = @transform_17, window_bounds = array<i64: 2, 1, 32>}, {pipeline_mode = #tpu.pipeline_mode<synchronous>, transform_indices = @transform_18, window_bounds = array<i64: 2, 32, 16>}, {pipeline_mode = #tpu.pipeline_mode<synchronous>, transform_indices = @transform_19, window_bounds = array<i64: 1, 16>}, {pipeline_mode = #tpu.pipeline_mode<synchronous>, transform_indices = @transform_20, window_bounds = array<i64: 1, 16>}, {pipeline_mode = #tpu.pipeline_mode<synchronous>, transform_indices = @transform_21, window_bounds = array<i64: 5, 16, 16>}, {pipeline_mode = #tpu.pipeline_mode<synchronous>, transform_indices = @transform_22, window_bounds = array<i64: 5, 16, 16>}, {pipeline_mode = #tpu.pipeline_mode<synchronous>, transform_indices = @transform_23, window_bounds = array<i64: 1, 16>}, {pipeline_mode = #tpu.pipeline_mode<synchronous>, transform_indices = @transform_24, window_bounds = array<i64: 1, 16>}, {transform_indices = @transform_25, window_bounds = array<i64: 2, 16, 16>}]} {
    %c0 = arith.constant 0 : index
    %c0_0 = arith.constant 0 : index
    %c0_1 = arith.constant 0 : index
    %0 = vector.load %arg1[%c0, %c0_0, %c0_1] : memref<2x16x16xf32, #tpu.memory_space<vmem>>, vector<2x16x16xf32>
    %1 = vector.shape_cast %0 : vector<2x16x16xf32> to vector<32x16xf32>
    %2 = arith.truncf %1 : vector<32x16xf32> to vector<32x16xbf16>
    %c0_2 = arith.constant 0 : index
    %c0_3 = arith.constant 0 : index
    %c0_4 = arith.constant 0 : index
    %3 = vector.load %arg2[%c0_2, %c0_3, %c0_4] : memref<2x16x32xf32, #tpu.memory_space<vmem>>, vector<1x16x32xf32>
    %4 = vector.shape_cast %3 : vector<1x16x32xf32> to vector<16x32xf32>
    %5 = arith.truncf %4 : vector<16x32xf32> to vector<16x32xbf16>
    %cst = arith.constant dense<0.000000e+00> : vector<32x32xf32>
    %6 = tpu.matmul %2, %5, %cst {dimension_numbers = #tpu.dot_dimension_numbers<[1], [0], [0], [1], [0, 0, 1, 1], [], []>} : vector<32x16xbf16>, vector<16x32xbf16>, vector<32x32xf32> -> vector<32x32xf32>
    %c0_5 = arith.constant 0 : index
    %c0_6 = arith.constant 0 : index
    %c0_7 = arith.constant 0 : index
    %7 = vector.load %arg3[%c0_5, %c0_6, %c0_7] : memref<2x1x32xf32, #tpu.memory_space<vmem>>, vector<1x1x32xf32>
    %8 = vector.shape_cast %7 : vector<1x1x32xf32> to vector<1x32xf32>
    %9 = vector.broadcast %8 : vector<1x32xf32> to vector<32x32xf32>
    %10 = arith.mulf %6, %9 : vector<32x32xf32>
    %c0_8 = arith.constant 0 : index
    %c0_9 = arith.constant 0 : index
    %c0_10 = arith.constant 0 : index
    %11 = vector.load %arg4[%c0_8, %c0_9, %c0_10] : memref<2x1x32xf32, #tpu.memory_space<vmem>>, vector<1x1x32xf32>
    %12 = vector.shape_cast %11 : vector<1x1x32xf32> to vector<1x32xf32>
    %13 = vector.broadcast %12 : vector<1x32xf32> to vector<32x32xf32>
    %14 = arith.addf %10, %13 : vector<32x32xf32>
    %15 = arith.negf %14 : vector<32x32xf32>
    %16 = math.exp %15 : vector<32x32xf32>
    %cst_11 = arith.constant 1.000000e+00 : f32
    %17 = vector.broadcast %cst_11 : f32 to vector<32x32xf32>
    %18 = arith.addf %17, %16 : vector<32x32xf32>
    %19 = arith.divf %17, %18 : vector<32x32xf32>
    %20 = arith.mulf %14, %19 : vector<32x32xf32>
    %21 = vector.shape_cast %20 : vector<32x32xf32> to vector<2x16x32xf32>
    %c1 = arith.constant 1 : index
    %c0_12 = arith.constant 0 : index
    %c0_13 = arith.constant 0 : index
    %22 = vector.load %arg2[%c1, %c0_12, %c0_13] : memref<2x16x32xf32, #tpu.memory_space<vmem>>, vector<1x16x32xf32>
    %23 = vector.shape_cast %22 : vector<1x16x32xf32> to vector<16x32xf32>
    %24 = arith.truncf %23 : vector<16x32xf32> to vector<16x32xbf16>
    %cst_14 = arith.constant dense<0.000000e+00> : vector<32x32xf32>
    %25 = tpu.matmul %2, %24, %cst_14 {dimension_numbers = #tpu.dot_dimension_numbers<[1], [0], [0], [1], [0, 0, 1, 1], [], []>} : vector<32x16xbf16>, vector<16x32xbf16>, vector<32x32xf32> -> vector<32x32xf32>
    %c1_15 = arith.constant 1 : index
    %c0_16 = arith.constant 0 : index
    %c0_17 = arith.constant 0 : index
    %26 = vector.load %arg3[%c1_15, %c0_16, %c0_17] : memref<2x1x32xf32, #tpu.memory_space<vmem>>, vector<1x1x32xf32>
    %27 = vector.shape_cast %26 : vector<1x1x32xf32> to vector<1x32xf32>
    %28 = vector.broadcast %27 : vector<1x32xf32> to vector<32x32xf32>
    %29 = arith.mulf %25, %28 : vector<32x32xf32>
    %c1_18 = arith.constant 1 : index
    %c0_19 = arith.constant 0 : index
    %c0_20 = arith.constant 0 : index
    %30 = vector.load %arg4[%c1_18, %c0_19, %c0_20] : memref<2x1x32xf32, #tpu.memory_space<vmem>>, vector<1x1x32xf32>
    %31 = vector.shape_cast %30 : vector<1x1x32xf32> to vector<1x32xf32>
    %32 = vector.broadcast %31 : vector<1x32xf32> to vector<32x32xf32>
    %33 = arith.addf %29, %32 : vector<32x32xf32>
    %34 = arith.negf %33 : vector<32x32xf32>
    %35 = math.exp %34 : vector<32x32xf32>
    %cst_21 = arith.constant 1.000000e+00 : f32
    %36 = vector.broadcast %cst_21 : f32 to vector<32x32xf32>
    %37 = arith.addf %36, %35 : vector<32x32xf32>
    %38 = arith.divf %36, %37 : vector<32x32xf32>
    %39 = arith.mulf %33, %38 : vector<32x32xf32>
    %40 = vector.shape_cast %39 : vector<32x32xf32> to vector<2x16x32xf32>
    %cst_22 = arith.constant 0.000000e+00 : f32
    %41 = vector.broadcast %cst_22 : f32 to vector<2x2x32xf32>
    %42 = tpu.concatenate %41, %21, %41 in 1 : vector<2x2x32xf32>, vector<2x16x32xf32>, vector<2x2x32xf32> -> vector<2x20x32xf32>
    %43 = tpu.concatenate %41, %40, %41 in 1 : vector<2x2x32xf32>, vector<2x16x32xf32>, vector<2x2x32xf32> -> vector<2x20x32xf32>
    %cst_23 = arith.constant 0.000000e+00 : f32
    %44 = vector.broadcast %cst_23 : f32 to vector<2x16x32xf32>
    %cst_24 = arith.constant 0.000000e+00 : f32
    %45 = vector.broadcast %cst_24 : f32 to vector<2x16x32xf32>
    %c0_25 = arith.constant 0 : index
    %c0_26 = arith.constant 0 : index
    %c0_27 = arith.constant 0 : index
    %c0_28 = arith.constant 0 : index
    %46 = vector.load %arg5[%c0_25, %c0_26, %c0_27, %c0_28] : memref<5x2x2x32xf32, #tpu.memory_space<vmem>>, vector<1x2x2x32xf32>
    %47 = vector.shape_cast %46 : vector<1x2x2x32xf32> to vector<2x2x32xf32>
    %48 = vector.extract_strided_slice %42 {offsets = [0, 0, 0], sizes = [2, 16, 32], strides = [1, 1, 1]} : vector<2x20x32xf32> to vector<2x16x32xf32>
    %49 = vector.extract_strided_slice %43 {offsets = [0, 0, 0], sizes = [2, 16, 32], strides = [1, 1, 1]} : vector<2x20x32xf32> to vector<2x16x32xf32>
    %50 = vector.extract_strided_slice %47 {offsets = [0, 0, 0], sizes = [1, 1, 32], strides = [1, 1, 1]} : vector<2x2x32xf32> to vector<1x1x32xf32>
    %51 = vector.shape_cast %50 : vector<1x1x32xf32> to vector<1x32xf32>
    %52 = vector.shape_cast %51 : vector<1x32xf32> to vector<1x1x32xf32>
    %53 = vector.broadcast %52 : vector<1x1x32xf32> to vector<2x16x32xf32>
    %54 = arith.mulf %48, %53 : vector<2x16x32xf32>
    %55 = arith.addf %44, %54 : vector<2x16x32xf32>
    %56 = vector.extract_strided_slice %47 {offsets = [1, 0, 0], sizes = [1, 1, 32], strides = [1, 1, 1]} : vector<2x2x32xf32> to vector<1x1x32xf32>
    %57 = vector.shape_cast %56 : vector<1x1x32xf32> to vector<1x32xf32>
    %58 = vector.shape_cast %57 : vector<1x32xf32> to vector<1x1x32xf32>
    %59 = vector.broadcast %58 : vector<1x1x32xf32> to vector<2x16x32xf32>
    %60 = arith.mulf %49, %59 : vector<2x16x32xf32>
    %61 = arith.addf %55, %60 : vector<2x16x32xf32>
    %62 = vector.extract_strided_slice %47 {offsets = [0, 1, 0], sizes = [1, 1, 32], strides = [1, 1, 1]} : vector<2x2x32xf32> to vector<1x1x32xf32>
    %63 = vector.shape_cast %62 : vector<1x1x32xf32> to vector<1x32xf32>
    %64 = vector.shape_cast %63 : vector<1x32xf32> to vector<1x1x32xf32>
    %65 = vector.broadcast %64 : vector<1x1x32xf32> to vector<2x16x32xf32>
    %66 = arith.mulf %48, %65 : vector<2x16x32xf32>
    %67 = arith.addf %45, %66 : vector<2x16x32xf32>
    %68 = vector.extract_strided_slice %47 {offsets = [1, 1, 0], sizes = [1, 1, 32], strides = [1, 1, 1]} : vector<2x2x32xf32> to vector<1x1x32xf32>
    %69 = vector.shape_cast %68 : vector<1x1x32xf32> to vector<1x32xf32>
    %70 = vector.shape_cast %69 : vector<1x32xf32> to vector<1x1x32xf32>
    %71 = vector.broadcast %70 : vector<1x1x32xf32> to vector<2x16x32xf32>
    %72 = arith.mulf %49, %71 : vector<2x16x32xf32>
    %73 = arith.addf %67, %72 : vector<2x16x32xf32>
    %c1_29 = arith.constant 1 : index
    %c0_30 = arith.constant 0 : index
    %c0_31 = arith.constant 0 : index
    %c0_32 = arith.constant 0 : index
    %74 = vector.load %arg5[%c1_29, %c0_30, %c0_31, %c0_32] : memref<5x2x2x32xf32, #tpu.memory_space<vmem>>, vector<1x2x2x32xf32>
    %75 = vector.shape_cast %74 : vector<1x2x2x32xf32> to vector<2x2x32xf32>
    %76 = vector.extract_strided_slice %42 {offsets = [0, 1, 0], sizes = [2, 16, 32], strides = [1, 1, 1]} : vector<2x20x32xf32> to vector<2x16x32xf32>
    %77 = vector.extract_strided_slice %43 {offsets = [0, 1, 0], sizes = [2, 16, 32], strides = [1, 1, 1]} : vector<2x20x32xf32> to vector<2x16x32xf32>
    %78 = vector.extract_strided_slice %75 {offsets = [0, 0, 0], sizes = [1, 1, 32], strides = [1, 1, 1]} : vector<2x2x32xf32> to vector<1x1x32xf32>
    %79 = vector.shape_cast %78 : vector<1x1x32xf32> to vector<1x32xf32>
    %80 = vector.shape_cast %79 : vector<1x32xf32> to vector<1x1x32xf32>
    %81 = vector.broadcast %80 : vector<1x1x32xf32> to vector<2x16x32xf32>
    %82 = arith.mulf %76, %81 : vector<2x16x32xf32>
    %83 = arith.addf %61, %82 : vector<2x16x32xf32>
    %84 = vector.extract_strided_slice %75 {offsets = [1, 0, 0], sizes = [1, 1, 32], strides = [1, 1, 1]} : vector<2x2x32xf32> to vector<1x1x32xf32>
    %85 = vector.shape_cast %84 : vector<1x1x32xf32> to vector<1x32xf32>
    %86 = vector.shape_cast %85 : vector<1x32xf32> to vector<1x1x32xf32>
    %87 = vector.broadcast %86 : vector<1x1x32xf32> to vector<2x16x32xf32>
    %88 = arith.mulf %77, %87 : vector<2x16x32xf32>
    %89 = arith.addf %83, %88 : vector<2x16x32xf32>
    %90 = vector.extract_strided_slice %75 {offsets = [0, 1, 0], sizes = [1, 1, 32], strides = [1, 1, 1]} : vector<2x2x32xf32> to vector<1x1x32xf32>
    %91 = vector.shape_cast %90 : vector<1x1x32xf32> to vector<1x32xf32>
    %92 = vector.shape_cast %91 : vector<1x32xf32> to vector<1x1x32xf32>
    %93 = vector.broadcast %92 : vector<1x1x32xf32> to vector<2x16x32xf32>
    %94 = arith.mulf %76, %93 : vector<2x16x32xf32>
    %95 = arith.addf %73, %94 : vector<2x16x32xf32>
    %96 = vector.extract_strided_slice %75 {offsets = [1, 1, 0], sizes = [1, 1, 32], strides = [1, 1, 1]} : vector<2x2x32xf32> to vector<1x1x32xf32>
    %97 = vector.shape_cast %96 : vector<1x1x32xf32> to vector<1x32xf32>
    %98 = vector.shape_cast %97 : vector<1x32xf32> to vector<1x1x32xf32>
    %99 = vector.broadcast %98 : vector<1x1x32xf32> to vector<2x16x32xf32>
    %100 = arith.mulf %77, %99 : vector<2x16x32xf32>
    %101 = arith.addf %95, %100 : vector<2x16x32xf32>
    %c2 = arith.constant 2 : index
    %c0_33 = arith.constant 0 : index
    %c0_34 = arith.constant 0 : index
    %c0_35 = arith.constant 0 : index
    %102 = vector.load %arg5[%c2, %c0_33, %c0_34, %c0_35] : memref<5x2x2x32xf32, #tpu.memory_space<vmem>>, vector<1x2x2x32xf32>
    %103 = vector.shape_cast %102 : vector<1x2x2x32xf32> to vector<2x2x32xf32>
    %104 = vector.extract_strided_slice %42 {offsets = [0, 2, 0], sizes = [2, 16, 32], strides = [1, 1, 1]} : vector<2x20x32xf32> to vector<2x16x32xf32>
    %105 = vector.extract_strided_slice %43 {offsets = [0, 2, 0], sizes = [2, 16, 32], strides = [1, 1, 1]} : vector<2x20x32xf32> to vector<2x16x32xf32>
    %106 = vector.extract_strided_slice %103 {offsets = [0, 0, 0], sizes = [1, 1, 32], strides = [1, 1, 1]} : vector<2x2x32xf32> to vector<1x1x32xf32>
    %107 = vector.shape_cast %106 : vector<1x1x32xf32> to vector<1x32xf32>
    %108 = vector.shape_cast %107 : vector<1x32xf32> to vector<1x1x32xf32>
    %109 = vector.broadcast %108 : vector<1x1x32xf32> to vector<2x16x32xf32>
    %110 = arith.mulf %104, %109 : vector<2x16x32xf32>
    %111 = arith.addf %89, %110 : vector<2x16x32xf32>
    %112 = vector.extract_strided_slice %103 {offsets = [1, 0, 0], sizes = [1, 1, 32], strides = [1, 1, 1]} : vector<2x2x32xf32> to vector<1x1x32xf32>
    %113 = vector.shape_cast %112 : vector<1x1x32xf32> to vector<1x32xf32>
    %114 = vector.shape_cast %113 : vector<1x32xf32> to vector<1x1x32xf32>
    %115 = vector.broadcast %114 : vector<1x1x32xf32> to vector<2x16x32xf32>
    %116 = arith.mulf %105, %115 : vector<2x16x32xf32>
    %117 = arith.addf %111, %116 : vector<2x16x32xf32>
    %118 = vector.extract_strided_slice %103 {offsets = [0, 1, 0], sizes = [1, 1, 32], strides = [1, 1, 1]} : vector<2x2x32xf32> to vector<1x1x32xf32>
    %119 = vector.shape_cast %118 : vector<1x1x32xf32> to vector<1x32xf32>
    %120 = vector.shape_cast %119 : vector<1x32xf32> to vector<1x1x32xf32>
    %121 = vector.broadcast %120 : vector<1x1x32xf32> to vector<2x16x32xf32>
    %122 = arith.mulf %104, %121 : vector<2x16x32xf32>
    %123 = arith.addf %101, %122 : vector<2x16x32xf32>
    %124 = vector.extract_strided_slice %103 {offsets = [1, 1, 0], sizes = [1, 1, 32], strides = [1, 1, 1]} : vector<2x2x32xf32> to vector<1x1x32xf32>
    %125 = vector.shape_cast %124 : vector<1x1x32xf32> to vector<1x32xf32>
    %126 = vector.shape_cast %125 : vector<1x32xf32> to vector<1x1x32xf32>
    %127 = vector.broadcast %126 : vector<1x1x32xf32> to vector<2x16x32xf32>
    %128 = arith.mulf %105, %127 : vector<2x16x32xf32>
    %129 = arith.addf %123, %128 : vector<2x16x32xf32>
    %c3 = arith.constant 3 : index
    %c0_36 = arith.constant 0 : index
    %c0_37 = arith.constant 0 : index
    %c0_38 = arith.constant 0 : index
    %130 = vector.load %arg5[%c3, %c0_36, %c0_37, %c0_38] : memref<5x2x2x32xf32, #tpu.memory_space<vmem>>, vector<1x2x2x32xf32>
    %131 = vector.shape_cast %130 : vector<1x2x2x32xf32> to vector<2x2x32xf32>
    %132 = vector.extract_strided_slice %42 {offsets = [0, 3, 0], sizes = [2, 16, 32], strides = [1, 1, 1]} : vector<2x20x32xf32> to vector<2x16x32xf32>
    %133 = vector.extract_strided_slice %43 {offsets = [0, 3, 0], sizes = [2, 16, 32], strides = [1, 1, 1]} : vector<2x20x32xf32> to vector<2x16x32xf32>
    %134 = vector.extract_strided_slice %131 {offsets = [0, 0, 0], sizes = [1, 1, 32], strides = [1, 1, 1]} : vector<2x2x32xf32> to vector<1x1x32xf32>
    %135 = vector.shape_cast %134 : vector<1x1x32xf32> to vector<1x32xf32>
    %136 = vector.shape_cast %135 : vector<1x32xf32> to vector<1x1x32xf32>
    %137 = vector.broadcast %136 : vector<1x1x32xf32> to vector<2x16x32xf32>
    %138 = arith.mulf %132, %137 : vector<2x16x32xf32>
    %139 = arith.addf %117, %138 : vector<2x16x32xf32>
    %140 = vector.extract_strided_slice %131 {offsets = [1, 0, 0], sizes = [1, 1, 32], strides = [1, 1, 1]} : vector<2x2x32xf32> to vector<1x1x32xf32>
    %141 = vector.shape_cast %140 : vector<1x1x32xf32> to vector<1x32xf32>
    %142 = vector.shape_cast %141 : vector<1x32xf32> to vector<1x1x32xf32>
    %143 = vector.broadcast %142 : vector<1x1x32xf32> to vector<2x16x32xf32>
    %144 = arith.mulf %133, %143 : vector<2x16x32xf32>
    %145 = arith.addf %139, %144 : vector<2x16x32xf32>
    %146 = vector.extract_strided_slice %131 {offsets = [0, 1, 0], sizes = [1, 1, 32], strides = [1, 1, 1]} : vector<2x2x32xf32> to vector<1x1x32xf32>
    %147 = vector.shape_cast %146 : vector<1x1x32xf32> to vector<1x32xf32>
    %148 = vector.shape_cast %147 : vector<1x32xf32> to vector<1x1x32xf32>
    %149 = vector.broadcast %148 : vector<1x1x32xf32> to vector<2x16x32xf32>
    %150 = arith.mulf %132, %149 : vector<2x16x32xf32>
    %151 = arith.addf %129, %150 : vector<2x16x32xf32>
    %152 = vector.extract_strided_slice %131 {offsets = [1, 1, 0], sizes = [1, 1, 32], strides = [1, 1, 1]} : vector<2x2x32xf32> to vector<1x1x32xf32>
    %153 = vector.shape_cast %152 : vector<1x1x32xf32> to vector<1x32xf32>
    %154 = vector.shape_cast %153 : vector<1x32xf32> to vector<1x1x32xf32>
    %155 = vector.broadcast %154 : vector<1x1x32xf32> to vector<2x16x32xf32>
    %156 = arith.mulf %133, %155 : vector<2x16x32xf32>
    %157 = arith.addf %151, %156 : vector<2x16x32xf32>
    %c4 = arith.constant 4 : index
    %c0_39 = arith.constant 0 : index
    %c0_40 = arith.constant 0 : index
    %c0_41 = arith.constant 0 : index
    %158 = vector.load %arg5[%c4, %c0_39, %c0_40, %c0_41] : memref<5x2x2x32xf32, #tpu.memory_space<vmem>>, vector<1x2x2x32xf32>
    %159 = vector.shape_cast %158 : vector<1x2x2x32xf32> to vector<2x2x32xf32>
    %160 = vector.extract_strided_slice %42 {offsets = [0, 4, 0], sizes = [2, 16, 32], strides = [1, 1, 1]} : vector<2x20x32xf32> to vector<2x16x32xf32>
    %161 = vector.extract_strided_slice %43 {offsets = [0, 4, 0], sizes = [2, 16, 32], strides = [1, 1, 1]} : vector<2x20x32xf32> to vector<2x16x32xf32>
    %162 = vector.extract_strided_slice %159 {offsets = [0, 0, 0], sizes = [1, 1, 32], strides = [1, 1, 1]} : vector<2x2x32xf32> to vector<1x1x32xf32>
    %163 = vector.shape_cast %162 : vector<1x1x32xf32> to vector<1x32xf32>
    %164 = vector.shape_cast %163 : vector<1x32xf32> to vector<1x1x32xf32>
    %165 = vector.broadcast %164 : vector<1x1x32xf32> to vector<2x16x32xf32>
    %166 = arith.mulf %160, %165 : vector<2x16x32xf32>
    %167 = arith.addf %145, %166 : vector<2x16x32xf32>
    %168 = vector.extract_strided_slice %159 {offsets = [1, 0, 0], sizes = [1, 1, 32], strides = [1, 1, 1]} : vector<2x2x32xf32> to vector<1x1x32xf32>
    %169 = vector.shape_cast %168 : vector<1x1x32xf32> to vector<1x32xf32>
    %170 = vector.shape_cast %169 : vector<1x32xf32> to vector<1x1x32xf32>
    %171 = vector.broadcast %170 : vector<1x1x32xf32> to vector<2x16x32xf32>
    %172 = arith.mulf %161, %171 : vector<2x16x32xf32>
    %173 = arith.addf %167, %172 : vector<2x16x32xf32>
    %174 = vector.extract_strided_slice %159 {offsets = [0, 1, 0], sizes = [1, 1, 32], strides = [1, 1, 1]} : vector<2x2x32xf32> to vector<1x1x32xf32>
    %175 = vector.shape_cast %174 : vector<1x1x32xf32> to vector<1x32xf32>
    %176 = vector.shape_cast %175 : vector<1x32xf32> to vector<1x1x32xf32>
    %177 = vector.broadcast %176 : vector<1x1x32xf32> to vector<2x16x32xf32>
    %178 = arith.mulf %160, %177 : vector<2x16x32xf32>
    %179 = arith.addf %157, %178 : vector<2x16x32xf32>
    %180 = vector.extract_strided_slice %159 {offsets = [1, 1, 0], sizes = [1, 1, 32], strides = [1, 1, 1]} : vector<2x2x32xf32> to vector<1x1x32xf32>
    %181 = vector.shape_cast %180 : vector<1x1x32xf32> to vector<1x32xf32>
    %182 = vector.shape_cast %181 : vector<1x32xf32> to vector<1x1x32xf32>
    %183 = vector.broadcast %182 : vector<1x1x32xf32> to vector<2x16x32xf32>
    %184 = arith.mulf %161, %183 : vector<2x16x32xf32>
    %185 = arith.addf %179, %184 : vector<2x16x32xf32>
    %c0_42 = arith.constant 0 : index
    %c0_43 = arith.constant 0 : index
    %c0_44 = arith.constant 0 : index
    %186 = vector.load %arg6[%c0_42, %c0_43, %c0_44] : memref<2x1x32xf32, #tpu.memory_space<vmem>>, vector<1x1x32xf32>
    %187 = vector.shape_cast %186 : vector<1x1x32xf32> to vector<1x32xf32>
    %188 = vector.shape_cast %187 : vector<1x32xf32> to vector<1x1x32xf32>
    %189 = vector.broadcast %188 : vector<1x1x32xf32> to vector<2x16x32xf32>
    %190 = arith.mulf %173, %189 : vector<2x16x32xf32>
    %c0_45 = arith.constant 0 : index
    %c0_46 = arith.constant 0 : index
    %c0_47 = arith.constant 0 : index
    %191 = vector.load %arg7[%c0_45, %c0_46, %c0_47] : memref<2x1x32xf32, #tpu.memory_space<vmem>>, vector<1x1x32xf32>
    %192 = vector.shape_cast %191 : vector<1x1x32xf32> to vector<1x32xf32>
    %193 = vector.shape_cast %192 : vector<1x32xf32> to vector<1x1x32xf32>
    %194 = vector.broadcast %193 : vector<1x1x32xf32> to vector<2x16x32xf32>
    %195 = arith.addf %190, %194 : vector<2x16x32xf32>
    %196 = arith.negf %195 : vector<2x16x32xf32>
    %197 = math.exp %196 : vector<2x16x32xf32>
    %cst_48 = arith.constant 1.000000e+00 : f32
    %198 = vector.broadcast %cst_48 : f32 to vector<2x16x32xf32>
    %199 = arith.addf %198, %197 : vector<2x16x32xf32>
    %200 = arith.divf %198, %199 : vector<2x16x32xf32>
    %201 = arith.mulf %195, %200 : vector<2x16x32xf32>
    %c1_49 = arith.constant 1 : index
    %c0_50 = arith.constant 0 : index
    %c0_51 = arith.constant 0 : index
    %202 = vector.load %arg6[%c1_49, %c0_50, %c0_51] : memref<2x1x32xf32, #tpu.memory_space<vmem>>, vector<1x1x32xf32>
    %203 = vector.shape_cast %202 : vector<1x1x32xf32> to vector<1x32xf32>
    %204 = vector.shape_cast %203 : vector<1x32xf32> to vector<1x1x32xf32>
    %205 = vector.broadcast %204 : vector<1x1x32xf32> to vector<2x16x32xf32>
    %206 = arith.mulf %185, %205 : vector<2x16x32xf32>
    %c1_52 = arith.constant 1 : index
    %c0_53 = arith.constant 0 : index
    %c0_54 = arith.constant 0 : index
    %207 = vector.load %arg7[%c1_52, %c0_53, %c0_54] : memref<2x1x32xf32, #tpu.memory_space<vmem>>, vector<1x1x32xf32>
    %208 = vector.shape_cast %207 : vector<1x1x32xf32> to vector<1x32xf32>
    %209 = vector.shape_cast %208 : vector<1x32xf32> to vector<1x1x32xf32>
    %210 = vector.broadcast %209 : vector<1x1x32xf32> to vector<2x16x32xf32>
    %211 = arith.addf %206, %210 : vector<2x16x32xf32>
    %212 = arith.negf %211 : vector<2x16x32xf32>
    %213 = math.exp %212 : vector<2x16x32xf32>
    %cst_55 = arith.constant 1.000000e+00 : f32
    %214 = vector.broadcast %cst_55 : f32 to vector<2x16x32xf32>
    %215 = arith.addf %214, %213 : vector<2x16x32xf32>
    %216 = arith.divf %214, %215 : vector<2x16x32xf32>
    %217 = arith.mulf %211, %216 : vector<2x16x32xf32>
    %cst_56 = arith.constant dense<0.000000e+00> : vector<2x32xf32>
    %218 = vector.multi_reduction <add>, %201, %cst_56 [1] : vector<2x16x32xf32> to vector<2x32xf32>
    %cst_57 = arith.constant 6.250000e-02 : f32
    %219 = vector.broadcast %cst_57 : f32 to vector<2x32xf32>
    %220 = arith.mulf %218, %219 : vector<2x32xf32>
    %cst_58 = arith.constant dense<0.000000e+00> : vector<2x32xf32>
    %221 = vector.multi_reduction <add>, %217, %cst_58 [1] : vector<2x16x32xf32> to vector<2x32xf32>
    %cst_59 = arith.constant 6.250000e-02 : f32
    %222 = vector.broadcast %cst_59 : f32 to vector<2x32xf32>
    %223 = arith.mulf %221, %222 : vector<2x32xf32>
    %c0_60 = arith.constant 0 : index
    %c0_61 = arith.constant 0 : index
    %c0_62 = arith.constant 0 : index
    %224 = vector.load %arg8[%c0_60, %c0_61, %c0_62] : memref<2x32x4xf32, #tpu.memory_space<vmem>>, vector<1x32x4xf32>
    %225 = vector.shape_cast %224 : vector<1x32x4xf32> to vector<32x4xf32>
    %cst_63 = arith.constant dense<0.000000e+00> : vector<2x4xf32>
    %226 = tpu.matmul %220, %225, %cst_63 {dimension_numbers = #tpu.dot_dimension_numbers<[1], [0], [0], [1], [0, 0, 1, 1], [], []>} : vector<2x32xf32>, vector<32x4xf32>, vector<2x4xf32> -> vector<2x4xf32>
    %c1_64 = arith.constant 1 : index
    %c0_65 = arith.constant 0 : index
    %c0_66 = arith.constant 0 : index
    %227 = vector.load %arg8[%c1_64, %c0_65, %c0_66] : memref<2x32x4xf32, #tpu.memory_space<vmem>>, vector<1x32x4xf32>
    %228 = vector.shape_cast %227 : vector<1x32x4xf32> to vector<32x4xf32>
    %cst_67 = arith.constant dense<0.000000e+00> : vector<2x4xf32>
    %229 = tpu.matmul %223, %228, %cst_67 {dimension_numbers = #tpu.dot_dimension_numbers<[1], [0], [0], [1], [0, 0, 1, 1], [], []>} : vector<2x32xf32>, vector<32x4xf32>, vector<2x4xf32> -> vector<2x4xf32>
    %230 = arith.addf %226, %229 : vector<2x4xf32>
    %c0_68 = arith.constant 0 : index
    %c0_69 = arith.constant 0 : index
    %231 = vector.load %arg9[%c0_68, %c0_69] : memref<1x4xf32, #tpu.memory_space<vmem>>, vector<1x4xf32>
    %232 = vector.broadcast %231 : vector<1x4xf32> to vector<2x4xf32>
    %233 = arith.addf %230, %232 : vector<2x4xf32>
    %234 = arith.negf %233 : vector<2x4xf32>
    %235 = math.exp %234 : vector<2x4xf32>
    %cst_70 = arith.constant 1.000000e+00 : f32
    %236 = vector.broadcast %cst_70 : f32 to vector<2x4xf32>
    %237 = arith.addf %236, %235 : vector<2x4xf32>
    %238 = arith.divf %236, %237 : vector<2x4xf32>
    %239 = arith.mulf %233, %238 : vector<2x4xf32>
    %c0_71 = arith.constant 0 : index
    %c0_72 = arith.constant 0 : index
    %240 = vector.load %arg10[%c0_71, %c0_72] : memref<4x4xf32, #tpu.memory_space<vmem>>, vector<4x4xf32>
    %cst_73 = arith.constant dense<0.000000e+00> : vector<2x4xf32>
    %241 = tpu.matmul %239, %240, %cst_73 {dimension_numbers = #tpu.dot_dimension_numbers<[1], [0], [0], [1], [0, 0, 1, 1], [], []>} : vector<2x4xf32>, vector<4x4xf32>, vector<2x4xf32> -> vector<2x4xf32>
    %c0_74 = arith.constant 0 : index
    %c0_75 = arith.constant 0 : index
    %242 = vector.load %arg11[%c0_74, %c0_75] : memref<1x4xf32, #tpu.memory_space<vmem>>, vector<1x4xf32>
    %243 = vector.broadcast %242 : vector<1x4xf32> to vector<2x4xf32>
    %244 = arith.addf %241, %243 : vector<2x4xf32>
    %c0_76 = arith.constant 0 : index
    %c0_77 = arith.constant 0 : index
    %245 = vector.load %arg12[%c0_76, %c0_77] : memref<4x8xf32, #tpu.memory_space<vmem>>, vector<4x8xf32>
    %cst_78 = arith.constant dense<0.000000e+00> : vector<2x8xf32>
    %246 = tpu.matmul %244, %245, %cst_78 {dimension_numbers = #tpu.dot_dimension_numbers<[1], [0], [0], [1], [0, 0, 1, 1], [], []>} : vector<2x4xf32>, vector<4x8xf32>, vector<2x8xf32> -> vector<2x8xf32>
    %c0_79 = arith.constant 0 : index
    %c0_80 = arith.constant 0 : index
    %247 = vector.load %arg13[%c0_79, %c0_80] : memref<4x8xf32, #tpu.memory_space<vmem>>, vector<4x8xf32>
    %cst_81 = arith.constant dense<0.000000e+00> : vector<2x8xf32>
    %248 = tpu.matmul %244, %247, %cst_81 {dimension_numbers = #tpu.dot_dimension_numbers<[1], [0], [0], [1], [0, 0, 1, 1], [], []>} : vector<2x4xf32>, vector<4x8xf32>, vector<2x8xf32> -> vector<2x8xf32>
    %249 = arith.mulf %246, %248 : vector<2x8xf32>
    %c0_82 = arith.constant 0 : index
    %c0_83 = arith.constant 0 : index
    %250 = vector.load %arg14[%c0_82, %c0_83] : memref<8x2xf32, #tpu.memory_space<vmem>>, vector<8x2xf32>
    %cst_84 = arith.constant dense<0.000000e+00> : vector<2x2xf32>
    %251 = tpu.matmul %249, %250, %cst_84 {dimension_numbers = #tpu.dot_dimension_numbers<[1], [0], [0], [1], [0, 0, 1, 1], [], []>} : vector<2x8xf32>, vector<8x2xf32>, vector<2x2xf32> -> vector<2x2xf32>
    %c0_85 = arith.constant 0 : index
    %c0_86 = arith.constant 0 : index
    %252 = vector.load %arg15[%c0_85, %c0_86] : memref<1x2xf32, #tpu.memory_space<vmem>>, vector<1x2xf32>
    %253 = vector.broadcast %252 : vector<1x2xf32> to vector<2x2xf32>
    %254 = arith.addf %251, %253 : vector<2x2xf32>
    %255 = arith.negf %244 : vector<2x4xf32>
    %256 = math.exp %255 : vector<2x4xf32>
    %cst_87 = arith.constant 1.000000e+00 : f32
    %257 = vector.broadcast %cst_87 : f32 to vector<2x4xf32>
    %258 = arith.addf %257, %256 : vector<2x4xf32>
    %259 = arith.divf %257, %258 : vector<2x4xf32>
    %260 = arith.mulf %244, %259 : vector<2x4xf32>
    %261 = arith.negf %254 : vector<2x2xf32>
    %262 = math.exp %261 : vector<2x2xf32>
    %cst_88 = arith.constant 1.000000e+00 : f32
    %263 = vector.broadcast %cst_88 : f32 to vector<2x2xf32>
    %264 = arith.addf %263, %262 : vector<2x2xf32>
    %265 = arith.divf %263, %264 : vector<2x2xf32>
    %266 = arith.mulf %254, %265 : vector<2x2xf32>
    %cst_89 = arith.constant 0.000000e+00 : f32
    %267 = vector.broadcast %cst_89 : f32 to vector<32x16xf32>
    %c0_90 = arith.constant 0 : index
    %c0_91 = arith.constant 0 : index
    %c0_92 = arith.constant 0 : index
    %268 = vector.load %arg16[%c0_90, %c0_91, %c0_92] : memref<2x4x32xf32, #tpu.memory_space<vmem>>, vector<1x4x32xf32>
    %269 = vector.shape_cast %268 : vector<1x4x32xf32> to vector<4x32xf32>
    %cst_93 = arith.constant dense<0.000000e+00> : vector<2x32xf32>
    %270 = tpu.matmul %260, %269, %cst_93 {dimension_numbers = #tpu.dot_dimension_numbers<[1], [0], [0], [1], [0, 0, 1, 1], [], []>} : vector<2x4xf32>, vector<4x32xf32>, vector<2x32xf32> -> vector<2x32xf32>
    %c0_94 = arith.constant 0 : index
    %c0_95 = arith.constant 0 : index
    %c0_96 = arith.constant 0 : index
    %271 = vector.load %arg17[%c0_94, %c0_95, %c0_96] : memref<2x2x32xf32, #tpu.memory_space<vmem>>, vector<1x2x32xf32>
    %272 = vector.shape_cast %271 : vector<1x2x32xf32> to vector<2x32xf32>
    %cst_97 = arith.constant dense<0.000000e+00> : vector<2x32xf32>
    %273 = tpu.matmul %266, %272, %cst_97 {dimension_numbers = #tpu.dot_dimension_numbers<[1], [0], [0], [1], [0, 0, 1, 1], [], []>} : vector<2x2xf32>, vector<2x32xf32>, vector<2x32xf32> -> vector<2x32xf32>
    %274 = arith.addf %270, %273 : vector<2x32xf32>
    %c0_98 = arith.constant 0 : index
    %c0_99 = arith.constant 0 : index
    %c0_100 = arith.constant 0 : index
    %275 = vector.load %arg18[%c0_98, %c0_99, %c0_100] : memref<2x1x32xf32, #tpu.memory_space<vmem>>, vector<1x1x32xf32>
    %276 = vector.shape_cast %275 : vector<1x1x32xf32> to vector<1x32xf32>
    %277 = vector.broadcast %276 : vector<1x32xf32> to vector<2x32xf32>
    %278 = arith.addf %274, %277 : vector<2x32xf32>
    %279 = arith.negf %278 : vector<2x32xf32>
    %280 = math.exp %279 : vector<2x32xf32>
    %cst_101 = arith.constant 1.000000e+00 : f32
    %281 = vector.broadcast %cst_101 : f32 to vector<2x32xf32>
    %282 = arith.addf %281, %280 : vector<2x32xf32>
    %283 = arith.divf %281, %282 : vector<2x32xf32>
    %284 = vector.shape_cast %283 : vector<2x32xf32> to vector<2x1x32xf32>
    %285 = vector.broadcast %284 : vector<2x1x32xf32> to vector<2x16x32xf32>
    %286 = arith.mulf %201, %285 : vector<2x16x32xf32>
    %287 = vector.shape_cast %286 : vector<2x16x32xf32> to vector<32x32xf32>
    %288 = arith.truncf %287 : vector<32x32xf32> to vector<32x32xbf16>
    %c0_102 = arith.constant 0 : index
    %c0_103 = arith.constant 0 : index
    %c0_104 = arith.constant 0 : index
    %289 = vector.load %arg19[%c0_102, %c0_103, %c0_104] : memref<2x32x16xf32, #tpu.memory_space<vmem>>, vector<1x32x16xf32>
    %290 = vector.shape_cast %289 : vector<1x32x16xf32> to vector<32x16xf32>
    %291 = arith.truncf %290 : vector<32x16xf32> to vector<32x16xbf16>
    %cst_105 = arith.constant dense<0.000000e+00> : vector<32x16xf32>
    %292 = tpu.matmul %288, %291, %cst_105 {dimension_numbers = #tpu.dot_dimension_numbers<[1], [0], [0], [1], [0, 0, 1, 1], [], []>} : vector<32x32xbf16>, vector<32x16xbf16>, vector<32x16xf32> -> vector<32x16xf32>
    %293 = arith.addf %267, %292 : vector<32x16xf32>
    %c1_106 = arith.constant 1 : index
    %c0_107 = arith.constant 0 : index
    %c0_108 = arith.constant 0 : index
    %294 = vector.load %arg16[%c1_106, %c0_107, %c0_108] : memref<2x4x32xf32, #tpu.memory_space<vmem>>, vector<1x4x32xf32>
    %295 = vector.shape_cast %294 : vector<1x4x32xf32> to vector<4x32xf32>
    %cst_109 = arith.constant dense<0.000000e+00> : vector<2x32xf32>
    %296 = tpu.matmul %260, %295, %cst_109 {dimension_numbers = #tpu.dot_dimension_numbers<[1], [0], [0], [1], [0, 0, 1, 1], [], []>} : vector<2x4xf32>, vector<4x32xf32>, vector<2x32xf32> -> vector<2x32xf32>
    %c1_110 = arith.constant 1 : index
    %c0_111 = arith.constant 0 : index
    %c0_112 = arith.constant 0 : index
    %297 = vector.load %arg17[%c1_110, %c0_111, %c0_112] : memref<2x2x32xf32, #tpu.memory_space<vmem>>, vector<1x2x32xf32>
    %298 = vector.shape_cast %297 : vector<1x2x32xf32> to vector<2x32xf32>
    %cst_113 = arith.constant dense<0.000000e+00> : vector<2x32xf32>
    %299 = tpu.matmul %266, %298, %cst_113 {dimension_numbers = #tpu.dot_dimension_numbers<[1], [0], [0], [1], [0, 0, 1, 1], [], []>} : vector<2x2xf32>, vector<2x32xf32>, vector<2x32xf32> -> vector<2x32xf32>
    %300 = arith.addf %296, %299 : vector<2x32xf32>
    %c1_114 = arith.constant 1 : index
    %c0_115 = arith.constant 0 : index
    %c0_116 = arith.constant 0 : index
    %301 = vector.load %arg18[%c1_114, %c0_115, %c0_116] : memref<2x1x32xf32, #tpu.memory_space<vmem>>, vector<1x1x32xf32>
    %302 = vector.shape_cast %301 : vector<1x1x32xf32> to vector<1x32xf32>
    %303 = vector.broadcast %302 : vector<1x32xf32> to vector<2x32xf32>
    %304 = arith.addf %300, %303 : vector<2x32xf32>
    %305 = arith.negf %304 : vector<2x32xf32>
    %306 = math.exp %305 : vector<2x32xf32>
    %cst_117 = arith.constant 1.000000e+00 : f32
    %307 = vector.broadcast %cst_117 : f32 to vector<2x32xf32>
    %308 = arith.addf %307, %306 : vector<2x32xf32>
    %309 = arith.divf %307, %308 : vector<2x32xf32>
    %310 = vector.shape_cast %309 : vector<2x32xf32> to vector<2x1x32xf32>
    %311 = vector.broadcast %310 : vector<2x1x32xf32> to vector<2x16x32xf32>
    %312 = arith.mulf %217, %311 : vector<2x16x32xf32>
    %313 = vector.shape_cast %312 : vector<2x16x32xf32> to vector<32x32xf32>
    %314 = arith.truncf %313 : vector<32x32xf32> to vector<32x32xbf16>
    %c1_118 = arith.constant 1 : index
    %c0_119 = arith.constant 0 : index
    %c0_120 = arith.constant 0 : index
    %315 = vector.load %arg19[%c1_118, %c0_119, %c0_120] : memref<2x32x16xf32, #tpu.memory_space<vmem>>, vector<1x32x16xf32>
    %316 = vector.shape_cast %315 : vector<1x32x16xf32> to vector<32x16xf32>
    %317 = arith.truncf %316 : vector<32x16xf32> to vector<32x16xbf16>
    %cst_121 = arith.constant dense<0.000000e+00> : vector<32x16xf32>
    %318 = tpu.matmul %314, %317, %cst_121 {dimension_numbers = #tpu.dot_dimension_numbers<[1], [0], [0], [1], [0, 0, 1, 1], [], []>} : vector<32x32xbf16>, vector<32x16xbf16>, vector<32x16xf32> -> vector<32x16xf32>
    %319 = arith.addf %293, %318 : vector<32x16xf32>
    %c0_122 = arith.constant 0 : index
    %c0_123 = arith.constant 0 : index
    %320 = vector.load %arg20[%c0_122, %c0_123] : memref<1x16xf32, #tpu.memory_space<vmem>>, vector<1x16xf32>
    %321 = vector.broadcast %320 : vector<1x16xf32> to vector<32x16xf32>
    %322 = arith.mulf %319, %321 : vector<32x16xf32>
    %c0_124 = arith.constant 0 : index
    %c0_125 = arith.constant 0 : index
    %323 = vector.load %arg21[%c0_124, %c0_125] : memref<1x16xf32, #tpu.memory_space<vmem>>, vector<1x16xf32>
    %324 = vector.broadcast %323 : vector<1x16xf32> to vector<32x16xf32>
    %325 = arith.addf %322, %324 : vector<32x16xf32>
    %326 = arith.negf %325 : vector<32x16xf32>
    %327 = math.exp %326 : vector<32x16xf32>
    %cst_126 = arith.constant 1.000000e+00 : f32
    %328 = vector.broadcast %cst_126 : f32 to vector<32x16xf32>
    %329 = arith.addf %328, %327 : vector<32x16xf32>
    %330 = arith.divf %328, %329 : vector<32x16xf32>
    %331 = arith.mulf %325, %330 : vector<32x16xf32>
    %332 = vector.shape_cast %331 : vector<32x16xf32> to vector<2x16x16xf32>
    %cst_127 = arith.constant 0.000000e+00 : f32
    %333 = vector.broadcast %cst_127 : f32 to vector<2x2x16xf32>
    %334 = tpu.concatenate %333, %0, %333 in 1 : vector<2x2x16xf32>, vector<2x16x16xf32>, vector<2x2x16xf32> -> vector<2x20x16xf32>
    %335 = tpu.concatenate %333, %332, %333 in 1 : vector<2x2x16xf32>, vector<2x16x16xf32>, vector<2x2x16xf32> -> vector<2x20x16xf32>
    %cst_128 = arith.constant 0.000000e+00 : f32
    %336 = vector.broadcast %cst_128 : f32 to vector<32x16xf32>
    %337 = vector.extract_strided_slice %334 {offsets = [0, 0, 0], sizes = [2, 16, 16], strides = [1, 1, 1]} : vector<2x20x16xf32> to vector<2x16x16xf32>
    %338 = vector.shape_cast %337 : vector<2x16x16xf32> to vector<32x16xf32>
    %339 = arith.truncf %338 : vector<32x16xf32> to vector<32x16xbf16>
    %340 = vector.extract_strided_slice %335 {offsets = [0, 0, 0], sizes = [2, 16, 16], strides = [1, 1, 1]} : vector<2x20x16xf32> to vector<2x16x16xf32>
    %341 = vector.shape_cast %340 : vector<2x16x16xf32> to vector<32x16xf32>
    %342 = arith.truncf %341 : vector<32x16xf32> to vector<32x16xbf16>
    %c0_129 = arith.constant 0 : index
    %c0_130 = arith.constant 0 : index
    %c0_131 = arith.constant 0 : index
    %343 = vector.load %arg22[%c0_129, %c0_130, %c0_131] : memref<5x16x16xf32, #tpu.memory_space<vmem>>, vector<1x16x16xf32>
    %344 = vector.shape_cast %343 : vector<1x16x16xf32> to vector<16x16xf32>
    %345 = arith.truncf %344 : vector<16x16xf32> to vector<16x16xbf16>
    %cst_132 = arith.constant dense<0.000000e+00> : vector<32x16xf32>
    %346 = tpu.matmul %339, %345, %cst_132 {dimension_numbers = #tpu.dot_dimension_numbers<[1], [0], [0], [1], [0, 0, 1, 1], [], []>} : vector<32x16xbf16>, vector<16x16xbf16>, vector<32x16xf32> -> vector<32x16xf32>
    %347 = arith.addf %336, %346 : vector<32x16xf32>
    %c0_133 = arith.constant 0 : index
    %c0_134 = arith.constant 0 : index
    %c0_135 = arith.constant 0 : index
    %348 = vector.load %arg23[%c0_133, %c0_134, %c0_135] : memref<5x16x16xf32, #tpu.memory_space<vmem>>, vector<1x16x16xf32>
    %349 = vector.shape_cast %348 : vector<1x16x16xf32> to vector<16x16xf32>
    %350 = arith.truncf %349 : vector<16x16xf32> to vector<16x16xbf16>
    %cst_136 = arith.constant dense<0.000000e+00> : vector<32x16xf32>
    %351 = tpu.matmul %342, %350, %cst_136 {dimension_numbers = #tpu.dot_dimension_numbers<[1], [0], [0], [1], [0, 0, 1, 1], [], []>} : vector<32x16xbf16>, vector<16x16xbf16>, vector<32x16xf32> -> vector<32x16xf32>
    %352 = arith.addf %347, %351 : vector<32x16xf32>
    %353 = vector.extract_strided_slice %334 {offsets = [0, 1, 0], sizes = [2, 16, 16], strides = [1, 1, 1]} : vector<2x20x16xf32> to vector<2x16x16xf32>
    %354 = vector.shape_cast %353 : vector<2x16x16xf32> to vector<32x16xf32>
    %355 = arith.truncf %354 : vector<32x16xf32> to vector<32x16xbf16>
    %356 = vector.extract_strided_slice %335 {offsets = [0, 1, 0], sizes = [2, 16, 16], strides = [1, 1, 1]} : vector<2x20x16xf32> to vector<2x16x16xf32>
    %357 = vector.shape_cast %356 : vector<2x16x16xf32> to vector<32x16xf32>
    %358 = arith.truncf %357 : vector<32x16xf32> to vector<32x16xbf16>
    %c1_137 = arith.constant 1 : index
    %c0_138 = arith.constant 0 : index
    %c0_139 = arith.constant 0 : index
    %359 = vector.load %arg22[%c1_137, %c0_138, %c0_139] : memref<5x16x16xf32, #tpu.memory_space<vmem>>, vector<1x16x16xf32>
    %360 = vector.shape_cast %359 : vector<1x16x16xf32> to vector<16x16xf32>
    %361 = arith.truncf %360 : vector<16x16xf32> to vector<16x16xbf16>
    %cst_140 = arith.constant dense<0.000000e+00> : vector<32x16xf32>
    %362 = tpu.matmul %355, %361, %cst_140 {dimension_numbers = #tpu.dot_dimension_numbers<[1], [0], [0], [1], [0, 0, 1, 1], [], []>} : vector<32x16xbf16>, vector<16x16xbf16>, vector<32x16xf32> -> vector<32x16xf32>
    %363 = arith.addf %352, %362 : vector<32x16xf32>
    %c1_141 = arith.constant 1 : index
    %c0_142 = arith.constant 0 : index
    %c0_143 = arith.constant 0 : index
    %364 = vector.load %arg23[%c1_141, %c0_142, %c0_143] : memref<5x16x16xf32, #tpu.memory_space<vmem>>, vector<1x16x16xf32>
    %365 = vector.shape_cast %364 : vector<1x16x16xf32> to vector<16x16xf32>
    %366 = arith.truncf %365 : vector<16x16xf32> to vector<16x16xbf16>
    %cst_144 = arith.constant dense<0.000000e+00> : vector<32x16xf32>
    %367 = tpu.matmul %358, %366, %cst_144 {dimension_numbers = #tpu.dot_dimension_numbers<[1], [0], [0], [1], [0, 0, 1, 1], [], []>} : vector<32x16xbf16>, vector<16x16xbf16>, vector<32x16xf32> -> vector<32x16xf32>
    %368 = arith.addf %363, %367 : vector<32x16xf32>
    %369 = vector.extract_strided_slice %334 {offsets = [0, 2, 0], sizes = [2, 16, 16], strides = [1, 1, 1]} : vector<2x20x16xf32> to vector<2x16x16xf32>
    %370 = vector.shape_cast %369 : vector<2x16x16xf32> to vector<32x16xf32>
    %371 = arith.truncf %370 : vector<32x16xf32> to vector<32x16xbf16>
    %372 = vector.extract_strided_slice %335 {offsets = [0, 2, 0], sizes = [2, 16, 16], strides = [1, 1, 1]} : vector<2x20x16xf32> to vector<2x16x16xf32>
    %373 = vector.shape_cast %372 : vector<2x16x16xf32> to vector<32x16xf32>
    %374 = arith.truncf %373 : vector<32x16xf32> to vector<32x16xbf16>
    %c2_145 = arith.constant 2 : index
    %c0_146 = arith.constant 0 : index
    %c0_147 = arith.constant 0 : index
    %375 = vector.load %arg22[%c2_145, %c0_146, %c0_147] : memref<5x16x16xf32, #tpu.memory_space<vmem>>, vector<1x16x16xf32>
    %376 = vector.shape_cast %375 : vector<1x16x16xf32> to vector<16x16xf32>
    %377 = arith.truncf %376 : vector<16x16xf32> to vector<16x16xbf16>
    %cst_148 = arith.constant dense<0.000000e+00> : vector<32x16xf32>
    %378 = tpu.matmul %371, %377, %cst_148 {dimension_numbers = #tpu.dot_dimension_numbers<[1], [0], [0], [1], [0, 0, 1, 1], [], []>} : vector<32x16xbf16>, vector<16x16xbf16>, vector<32x16xf32> -> vector<32x16xf32>
    %379 = arith.addf %368, %378 : vector<32x16xf32>
    %c2_149 = arith.constant 2 : index
    %c0_150 = arith.constant 0 : index
    %c0_151 = arith.constant 0 : index
    %380 = vector.load %arg23[%c2_149, %c0_150, %c0_151] : memref<5x16x16xf32, #tpu.memory_space<vmem>>, vector<1x16x16xf32>
    %381 = vector.shape_cast %380 : vector<1x16x16xf32> to vector<16x16xf32>
    %382 = arith.truncf %381 : vector<16x16xf32> to vector<16x16xbf16>
    %cst_152 = arith.constant dense<0.000000e+00> : vector<32x16xf32>
    %383 = tpu.matmul %374, %382, %cst_152 {dimension_numbers = #tpu.dot_dimension_numbers<[1], [0], [0], [1], [0, 0, 1, 1], [], []>} : vector<32x16xbf16>, vector<16x16xbf16>, vector<32x16xf32> -> vector<32x16xf32>
    %384 = arith.addf %379, %383 : vector<32x16xf32>
    %385 = vector.extract_strided_slice %334 {offsets = [0, 3, 0], sizes = [2, 16, 16], strides = [1, 1, 1]} : vector<2x20x16xf32> to vector<2x16x16xf32>
    %386 = vector.shape_cast %385 : vector<2x16x16xf32> to vector<32x16xf32>
    %387 = arith.truncf %386 : vector<32x16xf32> to vector<32x16xbf16>
    %388 = vector.extract_strided_slice %335 {offsets = [0, 3, 0], sizes = [2, 16, 16], strides = [1, 1, 1]} : vector<2x20x16xf32> to vector<2x16x16xf32>
    %389 = vector.shape_cast %388 : vector<2x16x16xf32> to vector<32x16xf32>
    %390 = arith.truncf %389 : vector<32x16xf32> to vector<32x16xbf16>
    %c3_153 = arith.constant 3 : index
    %c0_154 = arith.constant 0 : index
    %c0_155 = arith.constant 0 : index
    %391 = vector.load %arg22[%c3_153, %c0_154, %c0_155] : memref<5x16x16xf32, #tpu.memory_space<vmem>>, vector<1x16x16xf32>
    %392 = vector.shape_cast %391 : vector<1x16x16xf32> to vector<16x16xf32>
    %393 = arith.truncf %392 : vector<16x16xf32> to vector<16x16xbf16>
    %cst_156 = arith.constant dense<0.000000e+00> : vector<32x16xf32>
    %394 = tpu.matmul %387, %393, %cst_156 {dimension_numbers = #tpu.dot_dimension_numbers<[1], [0], [0], [1], [0, 0, 1, 1], [], []>} : vector<32x16xbf16>, vector<16x16xbf16>, vector<32x16xf32> -> vector<32x16xf32>
    %395 = arith.addf %384, %394 : vector<32x16xf32>
    %c3_157 = arith.constant 3 : index
    %c0_158 = arith.constant 0 : index
    %c0_159 = arith.constant 0 : index
    %396 = vector.load %arg23[%c3_157, %c0_158, %c0_159] : memref<5x16x16xf32, #tpu.memory_space<vmem>>, vector<1x16x16xf32>
    %397 = vector.shape_cast %396 : vector<1x16x16xf32> to vector<16x16xf32>
    %398 = arith.truncf %397 : vector<16x16xf32> to vector<16x16xbf16>
    %cst_160 = arith.constant dense<0.000000e+00> : vector<32x16xf32>
    %399 = tpu.matmul %390, %398, %cst_160 {dimension_numbers = #tpu.dot_dimension_numbers<[1], [0], [0], [1], [0, 0, 1, 1], [], []>} : vector<32x16xbf16>, vector<16x16xbf16>, vector<32x16xf32> -> vector<32x16xf32>
    %400 = arith.addf %395, %399 : vector<32x16xf32>
    %401 = vector.extract_strided_slice %334 {offsets = [0, 4, 0], sizes = [2, 16, 16], strides = [1, 1, 1]} : vector<2x20x16xf32> to vector<2x16x16xf32>
    %402 = vector.shape_cast %401 : vector<2x16x16xf32> to vector<32x16xf32>
    %403 = arith.truncf %402 : vector<32x16xf32> to vector<32x16xbf16>
    %404 = vector.extract_strided_slice %335 {offsets = [0, 4, 0], sizes = [2, 16, 16], strides = [1, 1, 1]} : vector<2x20x16xf32> to vector<2x16x16xf32>
    %405 = vector.shape_cast %404 : vector<2x16x16xf32> to vector<32x16xf32>
    %406 = arith.truncf %405 : vector<32x16xf32> to vector<32x16xbf16>
    %c4_161 = arith.constant 4 : index
    %c0_162 = arith.constant 0 : index
    %c0_163 = arith.constant 0 : index
    %407 = vector.load %arg22[%c4_161, %c0_162, %c0_163] : memref<5x16x16xf32, #tpu.memory_space<vmem>>, vector<1x16x16xf32>
    %408 = vector.shape_cast %407 : vector<1x16x16xf32> to vector<16x16xf32>
    %409 = arith.truncf %408 : vector<16x16xf32> to vector<16x16xbf16>
    %cst_164 = arith.constant dense<0.000000e+00> : vector<32x16xf32>
    %410 = tpu.matmul %403, %409, %cst_164 {dimension_numbers = #tpu.dot_dimension_numbers<[1], [0], [0], [1], [0, 0, 1, 1], [], []>} : vector<32x16xbf16>, vector<16x16xbf16>, vector<32x16xf32> -> vector<32x16xf32>
    %411 = arith.addf %400, %410 : vector<32x16xf32>
    %c4_165 = arith.constant 4 : index
    %c0_166 = arith.constant 0 : index
    %c0_167 = arith.constant 0 : index
    %412 = vector.load %arg23[%c4_165, %c0_166, %c0_167] : memref<5x16x16xf32, #tpu.memory_space<vmem>>, vector<1x16x16xf32>
    %413 = vector.shape_cast %412 : vector<1x16x16xf32> to vector<16x16xf32>
    %414 = arith.truncf %413 : vector<16x16xf32> to vector<16x16xbf16>
    %cst_168 = arith.constant dense<0.000000e+00> : vector<32x16xf32>
    %415 = tpu.matmul %406, %414, %cst_168 {dimension_numbers = #tpu.dot_dimension_numbers<[1], [0], [0], [1], [0, 0, 1, 1], [], []>} : vector<32x16xbf16>, vector<16x16xbf16>, vector<32x16xf32> -> vector<32x16xf32>
    %416 = arith.addf %411, %415 : vector<32x16xf32>
    %c0_169 = arith.constant 0 : index
    %c0_170 = arith.constant 0 : index
    %417 = vector.load %arg24[%c0_169, %c0_170] : memref<1x16xf32, #tpu.memory_space<vmem>>, vector<1x16xf32>
    %418 = vector.broadcast %417 : vector<1x16xf32> to vector<32x16xf32>
    %419 = arith.mulf %416, %418 : vector<32x16xf32>
    %c0_171 = arith.constant 0 : index
    %c0_172 = arith.constant 0 : index
    %420 = vector.load %arg25[%c0_171, %c0_172] : memref<1x16xf32, #tpu.memory_space<vmem>>, vector<1x16xf32>
    %421 = vector.broadcast %420 : vector<1x16xf32> to vector<32x16xf32>
    %422 = arith.addf %419, %421 : vector<32x16xf32>
    %423 = arith.negf %422 : vector<32x16xf32>
    %424 = math.exp %423 : vector<32x16xf32>
    %cst_173 = arith.constant 1.000000e+00 : f32
    %425 = vector.broadcast %cst_173 : f32 to vector<32x16xf32>
    %426 = arith.addf %425, %424 : vector<32x16xf32>
    %427 = arith.divf %425, %426 : vector<32x16xf32>
    %428 = arith.mulf %422, %427 : vector<32x16xf32>
    %429 = vector.shape_cast %428 : vector<32x16xf32> to vector<2x16x16xf32>
    %c0_174 = arith.constant 0 : index
    %c0_175 = arith.constant 0 : index
    %c0_176 = arith.constant 0 : index
    %430 = vector.load %arg26[%c0_174, %c0_175, %c0_176] : memref<2x16x16xf32, #tpu.memory_space<vmem>>, vector<2x16x16xf32>
    tpu.vector_store %arg26[%c0_174, %c0_175, %c0_176], %429 {strides = array<i32>} : memref<2x16x16xf32, #tpu.memory_space<vmem>>, vector<2x16x16xf32>,
    return
  }
  func.func @transform_0(%arg0: i32) -> (i32, i32, i32) {
    %c0_i32 = arith.constant 0 : i32
    %c0_i32_0 = arith.constant 0 : i32
    %c0_i32_1 = arith.constant 0 : i32
    return %arg0, %c0_i32, %c0_i32_0 : i32, i32, i32
  }
  func.func @transform_1(%arg0: i32) -> (i32, i32, i32) {
    %c0_i32 = arith.constant 0 : i32
    %c0_i32_0 = arith.constant 0 : i32
    %c0_i32_1 = arith.constant 0 : i32
    %c0_i32_2 = arith.constant 0 : i32
    return %c0_i32, %c0_i32_0, %c0_i32_1 : i32, i32, i32
  }
  func.func @transform_2(%arg0: i32) -> (i32, i32, i32) {
    %c0_i32 = arith.constant 0 : i32
    %c0_i32_0 = arith.constant 0 : i32
    %c0_i32_1 = arith.constant 0 : i32
    %c0_i32_2 = arith.constant 0 : i32
    return %c0_i32, %c0_i32_0, %c0_i32_1 : i32, i32, i32
  }
  func.func @transform_3(%arg0: i32) -> (i32, i32, i32) {
    %c0_i32 = arith.constant 0 : i32
    %c0_i32_0 = arith.constant 0 : i32
    %c0_i32_1 = arith.constant 0 : i32
    %c0_i32_2 = arith.constant 0 : i32
    return %c0_i32, %c0_i32_0, %c0_i32_1 : i32, i32, i32
  }
  func.func @transform_4(%arg0: i32) -> (i32, i32, i32, i32) {
    %c0_i32 = arith.constant 0 : i32
    %c0_i32_0 = arith.constant 0 : i32
    %c0_i32_1 = arith.constant 0 : i32
    %c0_i32_2 = arith.constant 0 : i32
    %c0_i32_3 = arith.constant 0 : i32
    return %c0_i32, %c0_i32_0, %c0_i32_1, %c0_i32_2 : i32, i32, i32, i32
  }
  func.func @transform_5(%arg0: i32) -> (i32, i32, i32) {
    %c0_i32 = arith.constant 0 : i32
    %c0_i32_0 = arith.constant 0 : i32
    %c0_i32_1 = arith.constant 0 : i32
    %c0_i32_2 = arith.constant 0 : i32
    return %c0_i32, %c0_i32_0, %c0_i32_1 : i32, i32, i32
  }
  func.func @transform_6(%arg0: i32) -> (i32, i32, i32) {
    %c0_i32 = arith.constant 0 : i32
    %c0_i32_0 = arith.constant 0 : i32
    %c0_i32_1 = arith.constant 0 : i32
    %c0_i32_2 = arith.constant 0 : i32
    return %c0_i32, %c0_i32_0, %c0_i32_1 : i32, i32, i32
  }
  func.func @transform_7(%arg0: i32) -> (i32, i32, i32) {
    %c0_i32 = arith.constant 0 : i32
    %c0_i32_0 = arith.constant 0 : i32
    %c0_i32_1 = arith.constant 0 : i32
    %c0_i32_2 = arith.constant 0 : i32
    return %c0_i32, %c0_i32_0, %c0_i32_1 : i32, i32, i32
  }
  func.func @transform_8(%arg0: i32) -> (i32, i32) {
    %c0_i32 = arith.constant 0 : i32
    %c0_i32_0 = arith.constant 0 : i32
    %c0_i32_1 = arith.constant 0 : i32
    return %c0_i32, %c0_i32_0 : i32, i32
  }
  func.func @transform_9(%arg0: i32) -> (i32, i32) {
    %c0_i32 = arith.constant 0 : i32
    %c0_i32_0 = arith.constant 0 : i32
    %c0_i32_1 = arith.constant 0 : i32
    return %c0_i32, %c0_i32_0 : i32, i32
  }
  func.func @transform_10(%arg0: i32) -> (i32, i32) {
    %c0_i32 = arith.constant 0 : i32
    %c0_i32_0 = arith.constant 0 : i32
    %c0_i32_1 = arith.constant 0 : i32
    return %c0_i32, %c0_i32_0 : i32, i32
  }
  func.func @transform_11(%arg0: i32) -> (i32, i32) {
    %c0_i32 = arith.constant 0 : i32
    %c0_i32_0 = arith.constant 0 : i32
    %c0_i32_1 = arith.constant 0 : i32
    return %c0_i32, %c0_i32_0 : i32, i32
  }
  func.func @transform_12(%arg0: i32) -> (i32, i32) {
    %c0_i32 = arith.constant 0 : i32
    %c0_i32_0 = arith.constant 0 : i32
    %c0_i32_1 = arith.constant 0 : i32
    return %c0_i32, %c0_i32_0 : i32, i32
  }
  func.func @transform_13(%arg0: i32) -> (i32, i32) {
    %c0_i32 = arith.constant 0 : i32
    %c0_i32_0 = arith.constant 0 : i32
    %c0_i32_1 = arith.constant 0 : i32
    return %c0_i32, %c0_i32_0 : i32, i32
  }
  func.func @transform_14(%arg0: i32) -> (i32, i32) {
    %c0_i32 = arith.constant 0 : i32
    %c0_i32_0 = arith.constant 0 : i32
    %c0_i32_1 = arith.constant 0 : i32
    return %c0_i32, %c0_i32_0 : i32, i32
  }
  func.func @transform_15(%arg0: i32) -> (i32, i32, i32) {
    %c0_i32 = arith.constant 0 : i32
    %c0_i32_0 = arith.constant 0 : i32
    %c0_i32_1 = arith.constant 0 : i32
    %c0_i32_2 = arith.constant 0 : i32
    return %c0_i32, %c0_i32_0, %c0_i32_1 : i32, i32, i32
  }
  func.func @transform_16(%arg0: i32) -> (i32, i32, i32) {
    %c0_i32 = arith.constant 0 : i32
    %c0_i32_0 = arith.constant 0 : i32
    %c0_i32_1 = arith.constant 0 : i32
    %c0_i32_2 = arith.constant 0 : i32
    return %c0_i32, %c0_i32_0, %c0_i32_1 : i32, i32, i32
  }
  func.func @transform_17(%arg0: i32) -> (i32, i32, i32) {
    %c0_i32 = arith.constant 0 : i32
    %c0_i32_0 = arith.constant 0 : i32
    %c0_i32_1 = arith.constant 0 : i32
    %c0_i32_2 = arith.constant 0 : i32
    return %c0_i32, %c0_i32_0, %c0_i32_1 : i32, i32, i32
  }
  func.func @transform_18(%arg0: i32) -> (i32, i32, i32) {
    %c0_i32 = arith.constant 0 : i32
    %c0_i32_0 = arith.constant 0 : i32
    %c0_i32_1 = arith.constant 0 : i32
    %c0_i32_2 = arith.constant 0 : i32
    return %c0_i32, %c0_i32_0, %c0_i32_1 : i32, i32, i32
  }
  func.func @transform_19(%arg0: i32) -> (i32, i32) {
    %c0_i32 = arith.constant 0 : i32
    %c0_i32_0 = arith.constant 0 : i32
    %c0_i32_1 = arith.constant 0 : i32
    return %c0_i32, %c0_i32_0 : i32, i32
  }
  func.func @transform_20(%arg0: i32) -> (i32, i32) {
    %c0_i32 = arith.constant 0 : i32
    %c0_i32_0 = arith.constant 0 : i32
    %c0_i32_1 = arith.constant 0 : i32
    return %c0_i32, %c0_i32_0 : i32, i32
  }
  func.func @transform_21(%arg0: i32) -> (i32, i32, i32) {
    %c0_i32 = arith.constant 0 : i32
    %c0_i32_0 = arith.constant 0 : i32
    %c0_i32_1 = arith.constant 0 : i32
    %c0_i32_2 = arith.constant 0 : i32
    return %c0_i32, %c0_i32_0, %c0_i32_1 : i32, i32, i32
  }
  func.func @transform_22(%arg0: i32) -> (i32, i32, i32) {
    %c0_i32 = arith.constant 0 : i32
    %c0_i32_0 = arith.constant 0 : i32
    %c0_i32_1 = arith.constant 0 : i32
    %c0_i32_2 = arith.constant 0 : i32
    return %c0_i32, %c0_i32_0, %c0_i32_1 : i32, i32, i32
  }
  func.func @transform_23(%arg0: i32) -> (i32, i32) {
    %c0_i32 = arith.constant 0 : i32
    %c0_i32_0 = arith.constant 0 : i32
    %c0_i32_1 = arith.constant 0 : i32
    return %c0_i32, %c0_i32_0 : i32, i32
  }
  func.func @transform_24(%arg0: i32) -> (i32, i32) {
    %c0_i32 = arith.constant 0 : i32
    %c0_i32_0 = arith.constant 0 : i32
    %c0_i32_1 = arith.constant 0 : i32
    return %c0_i32, %c0_i32_0 : i32, i32
  }
  func.func @transform_25(%arg0: i32) -> (i32, i32, i32) {
    %c0_i32 = arith.constant 0 : i32
    %c0_i32_0 = arith.constant 0 : i32
    %c0_i32_1 = arith.constant 0 : i32
    return %arg0, %c0_i32, %c0_i32_0 : i32, i32, i32
  }
}

module attributes {stable_mosaic.version = 11 : i64} {
  func.func @_stage_kernel(%arg0: i32, %arg1: memref<2x16x16xf32, #tpu.memory_space<vmem>>, %arg2: memref<2x16x16xf32, #tpu.memory_space<vmem>>, %arg3: memref<2x1x16xf32, #tpu.memory_space<vmem>>, %arg4: memref<2x1x16xf32, #tpu.memory_space<vmem>>, %arg5: memref<5x2x2x16xf32, #tpu.memory_space<vmem>>, %arg6: memref<2x1x16xf32, #tpu.memory_space<vmem>>, %arg7: memref<2x1x16xf32, #tpu.memory_space<vmem>>, %arg8: memref<2x16x4xf32, #tpu.memory_space<vmem>>, %arg9: memref<1x4xf32, #tpu.memory_space<vmem>>, %arg10: memref<4x4xf32, #tpu.memory_space<vmem>>, %arg11: memref<1x4xf32, #tpu.memory_space<vmem>>, %arg12: memref<4x8xf32, #tpu.memory_space<vmem>>, %arg13: memref<4x8xf32, #tpu.memory_space<vmem>>, %arg14: memref<8x2xf32, #tpu.memory_space<vmem>>, %arg15: memref<1x2xf32, #tpu.memory_space<vmem>>, %arg16: memref<2x4x16xf32, #tpu.memory_space<vmem>>, %arg17: memref<2x2x16xf32, #tpu.memory_space<vmem>>, %arg18: memref<2x1x16xf32, #tpu.memory_space<vmem>>, %arg19: memref<2x16x16xf32, #tpu.memory_space<vmem>>, %arg20: memref<1x16xf32, #tpu.memory_space<vmem>>, %arg21: memref<1x16xf32, #tpu.memory_space<vmem>>, %arg22: memref<5x16x8xf32, #tpu.memory_space<vmem>>, %arg23: memref<5x16x8xf32, #tpu.memory_space<vmem>>, %arg24: memref<1x8xf32, #tpu.memory_space<vmem>>, %arg25: memref<1x8xf32, #tpu.memory_space<vmem>>, %arg26: memref<2x16x8xf32, #tpu.memory_space<vmem>>) attributes {dimension_semantics = [#tpu.dimension_semantics<parallel>], iteration_bounds = array<i64: 2>, scalar_prefetch = 0 : i64, scratch_operands = 0 : i64, tpu.core_type = #tpu.core_type<tc>, window_params = [{transform_indices = @transform_0, window_bounds = array<i64: 2, 16, 16>}, {pipeline_mode = #tpu.pipeline_mode<synchronous>, transform_indices = @transform_1, window_bounds = array<i64: 2, 16, 16>}, {pipeline_mode = #tpu.pipeline_mode<synchronous>, transform_indices = @transform_2, window_bounds = array<i64: 2, 1, 16>}, {pipeline_mode = #tpu.pipeline_mode<synchronous>, transform_indices = @transform_3, window_bounds = array<i64: 2, 1, 16>}, {pipeline_mode = #tpu.pipeline_mode<synchronous>, transform_indices = @transform_4, window_bounds = array<i64: 5, 2, 2, 16>}, {pipeline_mode = #tpu.pipeline_mode<synchronous>, transform_indices = @transform_5, window_bounds = array<i64: 2, 1, 16>}, {pipeline_mode = #tpu.pipeline_mode<synchronous>, transform_indices = @transform_6, window_bounds = array<i64: 2, 1, 16>}, {pipeline_mode = #tpu.pipeline_mode<synchronous>, transform_indices = @transform_7, window_bounds = array<i64: 2, 16, 4>}, {pipeline_mode = #tpu.pipeline_mode<synchronous>, transform_indices = @transform_8, window_bounds = array<i64: 1, 4>}, {pipeline_mode = #tpu.pipeline_mode<synchronous>, transform_indices = @transform_9, window_bounds = array<i64: 4, 4>}, {pipeline_mode = #tpu.pipeline_mode<synchronous>, transform_indices = @transform_10, window_bounds = array<i64: 1, 4>}, {pipeline_mode = #tpu.pipeline_mode<synchronous>, transform_indices = @transform_11, window_bounds = array<i64: 4, 8>}, {pipeline_mode = #tpu.pipeline_mode<synchronous>, transform_indices = @transform_12, window_bounds = array<i64: 4, 8>}, {pipeline_mode = #tpu.pipeline_mode<synchronous>, transform_indices = @transform_13, window_bounds = array<i64: 8, 2>}, {pipeline_mode = #tpu.pipeline_mode<synchronous>, transform_indices = @transform_14, window_bounds = array<i64: 1, 2>}, {pipeline_mode = #tpu.pipeline_mode<synchronous>, transform_indices = @transform_15, window_bounds = array<i64: 2, 4, 16>}, {pipeline_mode = #tpu.pipeline_mode<synchronous>, transform_indices = @transform_16, window_bounds = array<i64: 2, 2, 16>}, {pipeline_mode = #tpu.pipeline_mode<synchronous>, transform_indices = @transform_17, window_bounds = array<i64: 2, 1, 16>}, {pipeline_mode = #tpu.pipeline_mode<synchronous>, transform_indices = @transform_18, window_bounds = array<i64: 2, 16, 16>}, {pipeline_mode = #tpu.pipeline_mode<synchronous>, transform_indices = @transform_19, window_bounds = array<i64: 1, 16>}, {pipeline_mode = #tpu.pipeline_mode<synchronous>, transform_indices = @transform_20, window_bounds = array<i64: 1, 16>}, {pipeline_mode = #tpu.pipeline_mode<synchronous>, transform_indices = @transform_21, window_bounds = array<i64: 5, 16, 8>}, {pipeline_mode = #tpu.pipeline_mode<synchronous>, transform_indices = @transform_22, window_bounds = array<i64: 5, 16, 8>}, {pipeline_mode = #tpu.pipeline_mode<synchronous>, transform_indices = @transform_23, window_bounds = array<i64: 1, 8>}, {pipeline_mode = #tpu.pipeline_mode<synchronous>, transform_indices = @transform_24, window_bounds = array<i64: 1, 8>}, {transform_indices = @transform_25, window_bounds = array<i64: 2, 16, 8>}]} {
    %c0 = arith.constant 0 : index
    %c0_0 = arith.constant 0 : index
    %c0_1 = arith.constant 0 : index
    %0 = vector.load %arg1[%c0, %c0_0, %c0_1] : memref<2x16x16xf32, #tpu.memory_space<vmem>>, vector<2x16x16xf32>
    %1 = vector.shape_cast %0 : vector<2x16x16xf32> to vector<32x16xf32>
    %2 = arith.truncf %1 : vector<32x16xf32> to vector<32x16xbf16>
    %c0_2 = arith.constant 0 : index
    %c0_3 = arith.constant 0 : index
    %c0_4 = arith.constant 0 : index
    %3 = vector.load %arg2[%c0_2, %c0_3, %c0_4] : memref<2x16x16xf32, #tpu.memory_space<vmem>>, vector<1x16x16xf32>
    %4 = vector.shape_cast %3 : vector<1x16x16xf32> to vector<16x16xf32>
    %5 = arith.truncf %4 : vector<16x16xf32> to vector<16x16xbf16>
    %cst = arith.constant dense<0.000000e+00> : vector<32x16xf32>
    %6 = tpu.matmul %2, %5, %cst {dimension_numbers = #tpu.dot_dimension_numbers<[1], [0], [0], [1], [0, 0, 1, 1], [], []>} : vector<32x16xbf16>, vector<16x16xbf16>, vector<32x16xf32> -> vector<32x16xf32>
    %c0_5 = arith.constant 0 : index
    %c0_6 = arith.constant 0 : index
    %c0_7 = arith.constant 0 : index
    %7 = vector.load %arg3[%c0_5, %c0_6, %c0_7] : memref<2x1x16xf32, #tpu.memory_space<vmem>>, vector<1x1x16xf32>
    %8 = vector.shape_cast %7 : vector<1x1x16xf32> to vector<1x16xf32>
    %9 = vector.broadcast %8 : vector<1x16xf32> to vector<32x16xf32>
    %10 = arith.mulf %6, %9 : vector<32x16xf32>
    %c0_8 = arith.constant 0 : index
    %c0_9 = arith.constant 0 : index
    %c0_10 = arith.constant 0 : index
    %11 = vector.load %arg4[%c0_8, %c0_9, %c0_10] : memref<2x1x16xf32, #tpu.memory_space<vmem>>, vector<1x1x16xf32>
    %12 = vector.shape_cast %11 : vector<1x1x16xf32> to vector<1x16xf32>
    %13 = vector.broadcast %12 : vector<1x16xf32> to vector<32x16xf32>
    %14 = arith.addf %10, %13 : vector<32x16xf32>
    %15 = arith.negf %14 : vector<32x16xf32>
    %16 = math.exp %15 : vector<32x16xf32>
    %cst_11 = arith.constant 1.000000e+00 : f32
    %17 = vector.broadcast %cst_11 : f32 to vector<32x16xf32>
    %18 = arith.addf %17, %16 : vector<32x16xf32>
    %19 = arith.divf %17, %18 : vector<32x16xf32>
    %20 = arith.mulf %14, %19 : vector<32x16xf32>
    %21 = vector.shape_cast %20 : vector<32x16xf32> to vector<2x16x16xf32>
    %c1 = arith.constant 1 : index
    %c0_12 = arith.constant 0 : index
    %c0_13 = arith.constant 0 : index
    %22 = vector.load %arg2[%c1, %c0_12, %c0_13] : memref<2x16x16xf32, #tpu.memory_space<vmem>>, vector<1x16x16xf32>
    %23 = vector.shape_cast %22 : vector<1x16x16xf32> to vector<16x16xf32>
    %24 = arith.truncf %23 : vector<16x16xf32> to vector<16x16xbf16>
    %cst_14 = arith.constant dense<0.000000e+00> : vector<32x16xf32>
    %25 = tpu.matmul %2, %24, %cst_14 {dimension_numbers = #tpu.dot_dimension_numbers<[1], [0], [0], [1], [0, 0, 1, 1], [], []>} : vector<32x16xbf16>, vector<16x16xbf16>, vector<32x16xf32> -> vector<32x16xf32>
    %c1_15 = arith.constant 1 : index
    %c0_16 = arith.constant 0 : index
    %c0_17 = arith.constant 0 : index
    %26 = vector.load %arg3[%c1_15, %c0_16, %c0_17] : memref<2x1x16xf32, #tpu.memory_space<vmem>>, vector<1x1x16xf32>
    %27 = vector.shape_cast %26 : vector<1x1x16xf32> to vector<1x16xf32>
    %28 = vector.broadcast %27 : vector<1x16xf32> to vector<32x16xf32>
    %29 = arith.mulf %25, %28 : vector<32x16xf32>
    %c1_18 = arith.constant 1 : index
    %c0_19 = arith.constant 0 : index
    %c0_20 = arith.constant 0 : index
    %30 = vector.load %arg4[%c1_18, %c0_19, %c0_20] : memref<2x1x16xf32, #tpu.memory_space<vmem>>, vector<1x1x16xf32>
    %31 = vector.shape_cast %30 : vector<1x1x16xf32> to vector<1x16xf32>
    %32 = vector.broadcast %31 : vector<1x16xf32> to vector<32x16xf32>
    %33 = arith.addf %29, %32 : vector<32x16xf32>
    %34 = arith.negf %33 : vector<32x16xf32>
    %35 = math.exp %34 : vector<32x16xf32>
    %cst_21 = arith.constant 1.000000e+00 : f32
    %36 = vector.broadcast %cst_21 : f32 to vector<32x16xf32>
    %37 = arith.addf %36, %35 : vector<32x16xf32>
    %38 = arith.divf %36, %37 : vector<32x16xf32>
    %39 = arith.mulf %33, %38 : vector<32x16xf32>
    %40 = vector.shape_cast %39 : vector<32x16xf32> to vector<2x16x16xf32>
    %cst_22 = arith.constant 0.000000e+00 : f32
    %41 = vector.broadcast %cst_22 : f32 to vector<2x2x16xf32>
    %42 = tpu.concatenate %41, %21, %41 in 1 : vector<2x2x16xf32>, vector<2x16x16xf32>, vector<2x2x16xf32> -> vector<2x20x16xf32>
    %43 = tpu.concatenate %41, %40, %41 in 1 : vector<2x2x16xf32>, vector<2x16x16xf32>, vector<2x2x16xf32> -> vector<2x20x16xf32>
    %cst_23 = arith.constant 0.000000e+00 : f32
    %44 = vector.broadcast %cst_23 : f32 to vector<2x16x16xf32>
    %cst_24 = arith.constant 0.000000e+00 : f32
    %45 = vector.broadcast %cst_24 : f32 to vector<2x16x16xf32>
    %c0_25 = arith.constant 0 : index
    %c0_26 = arith.constant 0 : index
    %c0_27 = arith.constant 0 : index
    %c0_28 = arith.constant 0 : index
    %46 = vector.load %arg5[%c0_25, %c0_26, %c0_27, %c0_28] : memref<5x2x2x16xf32, #tpu.memory_space<vmem>>, vector<1x2x2x16xf32>
    %47 = vector.shape_cast %46 : vector<1x2x2x16xf32> to vector<2x2x16xf32>
    %48 = vector.extract_strided_slice %42 {offsets = [0, 0, 0], sizes = [2, 16, 16], strides = [1, 1, 1]} : vector<2x20x16xf32> to vector<2x16x16xf32>
    %49 = vector.extract_strided_slice %43 {offsets = [0, 0, 0], sizes = [2, 16, 16], strides = [1, 1, 1]} : vector<2x20x16xf32> to vector<2x16x16xf32>
    %50 = vector.extract_strided_slice %47 {offsets = [0, 0, 0], sizes = [1, 1, 16], strides = [1, 1, 1]} : vector<2x2x16xf32> to vector<1x1x16xf32>
    %51 = vector.shape_cast %50 : vector<1x1x16xf32> to vector<1x16xf32>
    %52 = vector.shape_cast %51 : vector<1x16xf32> to vector<1x1x16xf32>
    %53 = vector.broadcast %52 : vector<1x1x16xf32> to vector<2x16x16xf32>
    %54 = arith.mulf %48, %53 : vector<2x16x16xf32>
    %55 = arith.addf %44, %54 : vector<2x16x16xf32>
    %56 = vector.extract_strided_slice %47 {offsets = [1, 0, 0], sizes = [1, 1, 16], strides = [1, 1, 1]} : vector<2x2x16xf32> to vector<1x1x16xf32>
    %57 = vector.shape_cast %56 : vector<1x1x16xf32> to vector<1x16xf32>
    %58 = vector.shape_cast %57 : vector<1x16xf32> to vector<1x1x16xf32>
    %59 = vector.broadcast %58 : vector<1x1x16xf32> to vector<2x16x16xf32>
    %60 = arith.mulf %49, %59 : vector<2x16x16xf32>
    %61 = arith.addf %55, %60 : vector<2x16x16xf32>
    %62 = vector.extract_strided_slice %47 {offsets = [0, 1, 0], sizes = [1, 1, 16], strides = [1, 1, 1]} : vector<2x2x16xf32> to vector<1x1x16xf32>
    %63 = vector.shape_cast %62 : vector<1x1x16xf32> to vector<1x16xf32>
    %64 = vector.shape_cast %63 : vector<1x16xf32> to vector<1x1x16xf32>
    %65 = vector.broadcast %64 : vector<1x1x16xf32> to vector<2x16x16xf32>
    %66 = arith.mulf %48, %65 : vector<2x16x16xf32>
    %67 = arith.addf %45, %66 : vector<2x16x16xf32>
    %68 = vector.extract_strided_slice %47 {offsets = [1, 1, 0], sizes = [1, 1, 16], strides = [1, 1, 1]} : vector<2x2x16xf32> to vector<1x1x16xf32>
    %69 = vector.shape_cast %68 : vector<1x1x16xf32> to vector<1x16xf32>
    %70 = vector.shape_cast %69 : vector<1x16xf32> to vector<1x1x16xf32>
    %71 = vector.broadcast %70 : vector<1x1x16xf32> to vector<2x16x16xf32>
    %72 = arith.mulf %49, %71 : vector<2x16x16xf32>
    %73 = arith.addf %67, %72 : vector<2x16x16xf32>
    %c1_29 = arith.constant 1 : index
    %c0_30 = arith.constant 0 : index
    %c0_31 = arith.constant 0 : index
    %c0_32 = arith.constant 0 : index
    %74 = vector.load %arg5[%c1_29, %c0_30, %c0_31, %c0_32] : memref<5x2x2x16xf32, #tpu.memory_space<vmem>>, vector<1x2x2x16xf32>
    %75 = vector.shape_cast %74 : vector<1x2x2x16xf32> to vector<2x2x16xf32>
    %76 = vector.extract_strided_slice %42 {offsets = [0, 1, 0], sizes = [2, 16, 16], strides = [1, 1, 1]} : vector<2x20x16xf32> to vector<2x16x16xf32>
    %77 = vector.extract_strided_slice %43 {offsets = [0, 1, 0], sizes = [2, 16, 16], strides = [1, 1, 1]} : vector<2x20x16xf32> to vector<2x16x16xf32>
    %78 = vector.extract_strided_slice %75 {offsets = [0, 0, 0], sizes = [1, 1, 16], strides = [1, 1, 1]} : vector<2x2x16xf32> to vector<1x1x16xf32>
    %79 = vector.shape_cast %78 : vector<1x1x16xf32> to vector<1x16xf32>
    %80 = vector.shape_cast %79 : vector<1x16xf32> to vector<1x1x16xf32>
    %81 = vector.broadcast %80 : vector<1x1x16xf32> to vector<2x16x16xf32>
    %82 = arith.mulf %76, %81 : vector<2x16x16xf32>
    %83 = arith.addf %61, %82 : vector<2x16x16xf32>
    %84 = vector.extract_strided_slice %75 {offsets = [1, 0, 0], sizes = [1, 1, 16], strides = [1, 1, 1]} : vector<2x2x16xf32> to vector<1x1x16xf32>
    %85 = vector.shape_cast %84 : vector<1x1x16xf32> to vector<1x16xf32>
    %86 = vector.shape_cast %85 : vector<1x16xf32> to vector<1x1x16xf32>
    %87 = vector.broadcast %86 : vector<1x1x16xf32> to vector<2x16x16xf32>
    %88 = arith.mulf %77, %87 : vector<2x16x16xf32>
    %89 = arith.addf %83, %88 : vector<2x16x16xf32>
    %90 = vector.extract_strided_slice %75 {offsets = [0, 1, 0], sizes = [1, 1, 16], strides = [1, 1, 1]} : vector<2x2x16xf32> to vector<1x1x16xf32>
    %91 = vector.shape_cast %90 : vector<1x1x16xf32> to vector<1x16xf32>
    %92 = vector.shape_cast %91 : vector<1x16xf32> to vector<1x1x16xf32>
    %93 = vector.broadcast %92 : vector<1x1x16xf32> to vector<2x16x16xf32>
    %94 = arith.mulf %76, %93 : vector<2x16x16xf32>
    %95 = arith.addf %73, %94 : vector<2x16x16xf32>
    %96 = vector.extract_strided_slice %75 {offsets = [1, 1, 0], sizes = [1, 1, 16], strides = [1, 1, 1]} : vector<2x2x16xf32> to vector<1x1x16xf32>
    %97 = vector.shape_cast %96 : vector<1x1x16xf32> to vector<1x16xf32>
    %98 = vector.shape_cast %97 : vector<1x16xf32> to vector<1x1x16xf32>
    %99 = vector.broadcast %98 : vector<1x1x16xf32> to vector<2x16x16xf32>
    %100 = arith.mulf %77, %99 : vector<2x16x16xf32>
    %101 = arith.addf %95, %100 : vector<2x16x16xf32>
    %c2 = arith.constant 2 : index
    %c0_33 = arith.constant 0 : index
    %c0_34 = arith.constant 0 : index
    %c0_35 = arith.constant 0 : index
    %102 = vector.load %arg5[%c2, %c0_33, %c0_34, %c0_35] : memref<5x2x2x16xf32, #tpu.memory_space<vmem>>, vector<1x2x2x16xf32>
    %103 = vector.shape_cast %102 : vector<1x2x2x16xf32> to vector<2x2x16xf32>
    %104 = vector.extract_strided_slice %42 {offsets = [0, 2, 0], sizes = [2, 16, 16], strides = [1, 1, 1]} : vector<2x20x16xf32> to vector<2x16x16xf32>
    %105 = vector.extract_strided_slice %43 {offsets = [0, 2, 0], sizes = [2, 16, 16], strides = [1, 1, 1]} : vector<2x20x16xf32> to vector<2x16x16xf32>
    %106 = vector.extract_strided_slice %103 {offsets = [0, 0, 0], sizes = [1, 1, 16], strides = [1, 1, 1]} : vector<2x2x16xf32> to vector<1x1x16xf32>
    %107 = vector.shape_cast %106 : vector<1x1x16xf32> to vector<1x16xf32>
    %108 = vector.shape_cast %107 : vector<1x16xf32> to vector<1x1x16xf32>
    %109 = vector.broadcast %108 : vector<1x1x16xf32> to vector<2x16x16xf32>
    %110 = arith.mulf %104, %109 : vector<2x16x16xf32>
    %111 = arith.addf %89, %110 : vector<2x16x16xf32>
    %112 = vector.extract_strided_slice %103 {offsets = [1, 0, 0], sizes = [1, 1, 16], strides = [1, 1, 1]} : vector<2x2x16xf32> to vector<1x1x16xf32>
    %113 = vector.shape_cast %112 : vector<1x1x16xf32> to vector<1x16xf32>
    %114 = vector.shape_cast %113 : vector<1x16xf32> to vector<1x1x16xf32>
    %115 = vector.broadcast %114 : vector<1x1x16xf32> to vector<2x16x16xf32>
    %116 = arith.mulf %105, %115 : vector<2x16x16xf32>
    %117 = arith.addf %111, %116 : vector<2x16x16xf32>
    %118 = vector.extract_strided_slice %103 {offsets = [0, 1, 0], sizes = [1, 1, 16], strides = [1, 1, 1]} : vector<2x2x16xf32> to vector<1x1x16xf32>
    %119 = vector.shape_cast %118 : vector<1x1x16xf32> to vector<1x16xf32>
    %120 = vector.shape_cast %119 : vector<1x16xf32> to vector<1x1x16xf32>
    %121 = vector.broadcast %120 : vector<1x1x16xf32> to vector<2x16x16xf32>
    %122 = arith.mulf %104, %121 : vector<2x16x16xf32>
    %123 = arith.addf %101, %122 : vector<2x16x16xf32>
    %124 = vector.extract_strided_slice %103 {offsets = [1, 1, 0], sizes = [1, 1, 16], strides = [1, 1, 1]} : vector<2x2x16xf32> to vector<1x1x16xf32>
    %125 = vector.shape_cast %124 : vector<1x1x16xf32> to vector<1x16xf32>
    %126 = vector.shape_cast %125 : vector<1x16xf32> to vector<1x1x16xf32>
    %127 = vector.broadcast %126 : vector<1x1x16xf32> to vector<2x16x16xf32>
    %128 = arith.mulf %105, %127 : vector<2x16x16xf32>
    %129 = arith.addf %123, %128 : vector<2x16x16xf32>
    %c3 = arith.constant 3 : index
    %c0_36 = arith.constant 0 : index
    %c0_37 = arith.constant 0 : index
    %c0_38 = arith.constant 0 : index
    %130 = vector.load %arg5[%c3, %c0_36, %c0_37, %c0_38] : memref<5x2x2x16xf32, #tpu.memory_space<vmem>>, vector<1x2x2x16xf32>
    %131 = vector.shape_cast %130 : vector<1x2x2x16xf32> to vector<2x2x16xf32>
    %132 = vector.extract_strided_slice %42 {offsets = [0, 3, 0], sizes = [2, 16, 16], strides = [1, 1, 1]} : vector<2x20x16xf32> to vector<2x16x16xf32>
    %133 = vector.extract_strided_slice %43 {offsets = [0, 3, 0], sizes = [2, 16, 16], strides = [1, 1, 1]} : vector<2x20x16xf32> to vector<2x16x16xf32>
    %134 = vector.extract_strided_slice %131 {offsets = [0, 0, 0], sizes = [1, 1, 16], strides = [1, 1, 1]} : vector<2x2x16xf32> to vector<1x1x16xf32>
    %135 = vector.shape_cast %134 : vector<1x1x16xf32> to vector<1x16xf32>
    %136 = vector.shape_cast %135 : vector<1x16xf32> to vector<1x1x16xf32>
    %137 = vector.broadcast %136 : vector<1x1x16xf32> to vector<2x16x16xf32>
    %138 = arith.mulf %132, %137 : vector<2x16x16xf32>
    %139 = arith.addf %117, %138 : vector<2x16x16xf32>
    %140 = vector.extract_strided_slice %131 {offsets = [1, 0, 0], sizes = [1, 1, 16], strides = [1, 1, 1]} : vector<2x2x16xf32> to vector<1x1x16xf32>
    %141 = vector.shape_cast %140 : vector<1x1x16xf32> to vector<1x16xf32>
    %142 = vector.shape_cast %141 : vector<1x16xf32> to vector<1x1x16xf32>
    %143 = vector.broadcast %142 : vector<1x1x16xf32> to vector<2x16x16xf32>
    %144 = arith.mulf %133, %143 : vector<2x16x16xf32>
    %145 = arith.addf %139, %144 : vector<2x16x16xf32>
    %146 = vector.extract_strided_slice %131 {offsets = [0, 1, 0], sizes = [1, 1, 16], strides = [1, 1, 1]} : vector<2x2x16xf32> to vector<1x1x16xf32>
    %147 = vector.shape_cast %146 : vector<1x1x16xf32> to vector<1x16xf32>
    %148 = vector.shape_cast %147 : vector<1x16xf32> to vector<1x1x16xf32>
    %149 = vector.broadcast %148 : vector<1x1x16xf32> to vector<2x16x16xf32>
    %150 = arith.mulf %132, %149 : vector<2x16x16xf32>
    %151 = arith.addf %129, %150 : vector<2x16x16xf32>
    %152 = vector.extract_strided_slice %131 {offsets = [1, 1, 0], sizes = [1, 1, 16], strides = [1, 1, 1]} : vector<2x2x16xf32> to vector<1x1x16xf32>
    %153 = vector.shape_cast %152 : vector<1x1x16xf32> to vector<1x16xf32>
    %154 = vector.shape_cast %153 : vector<1x16xf32> to vector<1x1x16xf32>
    %155 = vector.broadcast %154 : vector<1x1x16xf32> to vector<2x16x16xf32>
    %156 = arith.mulf %133, %155 : vector<2x16x16xf32>
    %157 = arith.addf %151, %156 : vector<2x16x16xf32>
    %c4 = arith.constant 4 : index
    %c0_39 = arith.constant 0 : index
    %c0_40 = arith.constant 0 : index
    %c0_41 = arith.constant 0 : index
    %158 = vector.load %arg5[%c4, %c0_39, %c0_40, %c0_41] : memref<5x2x2x16xf32, #tpu.memory_space<vmem>>, vector<1x2x2x16xf32>
    %159 = vector.shape_cast %158 : vector<1x2x2x16xf32> to vector<2x2x16xf32>
    %160 = vector.extract_strided_slice %42 {offsets = [0, 4, 0], sizes = [2, 16, 16], strides = [1, 1, 1]} : vector<2x20x16xf32> to vector<2x16x16xf32>
    %161 = vector.extract_strided_slice %43 {offsets = [0, 4, 0], sizes = [2, 16, 16], strides = [1, 1, 1]} : vector<2x20x16xf32> to vector<2x16x16xf32>
    %162 = vector.extract_strided_slice %159 {offsets = [0, 0, 0], sizes = [1, 1, 16], strides = [1, 1, 1]} : vector<2x2x16xf32> to vector<1x1x16xf32>
    %163 = vector.shape_cast %162 : vector<1x1x16xf32> to vector<1x16xf32>
    %164 = vector.shape_cast %163 : vector<1x16xf32> to vector<1x1x16xf32>
    %165 = vector.broadcast %164 : vector<1x1x16xf32> to vector<2x16x16xf32>
    %166 = arith.mulf %160, %165 : vector<2x16x16xf32>
    %167 = arith.addf %145, %166 : vector<2x16x16xf32>
    %168 = vector.extract_strided_slice %159 {offsets = [1, 0, 0], sizes = [1, 1, 16], strides = [1, 1, 1]} : vector<2x2x16xf32> to vector<1x1x16xf32>
    %169 = vector.shape_cast %168 : vector<1x1x16xf32> to vector<1x16xf32>
    %170 = vector.shape_cast %169 : vector<1x16xf32> to vector<1x1x16xf32>
    %171 = vector.broadcast %170 : vector<1x1x16xf32> to vector<2x16x16xf32>
    %172 = arith.mulf %161, %171 : vector<2x16x16xf32>
    %173 = arith.addf %167, %172 : vector<2x16x16xf32>
    %174 = vector.extract_strided_slice %159 {offsets = [0, 1, 0], sizes = [1, 1, 16], strides = [1, 1, 1]} : vector<2x2x16xf32> to vector<1x1x16xf32>
    %175 = vector.shape_cast %174 : vector<1x1x16xf32> to vector<1x16xf32>
    %176 = vector.shape_cast %175 : vector<1x16xf32> to vector<1x1x16xf32>
    %177 = vector.broadcast %176 : vector<1x1x16xf32> to vector<2x16x16xf32>
    %178 = arith.mulf %160, %177 : vector<2x16x16xf32>
    %179 = arith.addf %157, %178 : vector<2x16x16xf32>
    %180 = vector.extract_strided_slice %159 {offsets = [1, 1, 0], sizes = [1, 1, 16], strides = [1, 1, 1]} : vector<2x2x16xf32> to vector<1x1x16xf32>
    %181 = vector.shape_cast %180 : vector<1x1x16xf32> to vector<1x16xf32>
    %182 = vector.shape_cast %181 : vector<1x16xf32> to vector<1x1x16xf32>
    %183 = vector.broadcast %182 : vector<1x1x16xf32> to vector<2x16x16xf32>
    %184 = arith.mulf %161, %183 : vector<2x16x16xf32>
    %185 = arith.addf %179, %184 : vector<2x16x16xf32>
    %c0_42 = arith.constant 0 : index
    %c0_43 = arith.constant 0 : index
    %c0_44 = arith.constant 0 : index
    %186 = vector.load %arg6[%c0_42, %c0_43, %c0_44] : memref<2x1x16xf32, #tpu.memory_space<vmem>>, vector<1x1x16xf32>
    %187 = vector.shape_cast %186 : vector<1x1x16xf32> to vector<1x16xf32>
    %188 = vector.shape_cast %187 : vector<1x16xf32> to vector<1x1x16xf32>
    %189 = vector.broadcast %188 : vector<1x1x16xf32> to vector<2x16x16xf32>
    %190 = arith.mulf %173, %189 : vector<2x16x16xf32>
    %c0_45 = arith.constant 0 : index
    %c0_46 = arith.constant 0 : index
    %c0_47 = arith.constant 0 : index
    %191 = vector.load %arg7[%c0_45, %c0_46, %c0_47] : memref<2x1x16xf32, #tpu.memory_space<vmem>>, vector<1x1x16xf32>
    %192 = vector.shape_cast %191 : vector<1x1x16xf32> to vector<1x16xf32>
    %193 = vector.shape_cast %192 : vector<1x16xf32> to vector<1x1x16xf32>
    %194 = vector.broadcast %193 : vector<1x1x16xf32> to vector<2x16x16xf32>
    %195 = arith.addf %190, %194 : vector<2x16x16xf32>
    %196 = arith.negf %195 : vector<2x16x16xf32>
    %197 = math.exp %196 : vector<2x16x16xf32>
    %cst_48 = arith.constant 1.000000e+00 : f32
    %198 = vector.broadcast %cst_48 : f32 to vector<2x16x16xf32>
    %199 = arith.addf %198, %197 : vector<2x16x16xf32>
    %200 = arith.divf %198, %199 : vector<2x16x16xf32>
    %201 = arith.mulf %195, %200 : vector<2x16x16xf32>
    %c1_49 = arith.constant 1 : index
    %c0_50 = arith.constant 0 : index
    %c0_51 = arith.constant 0 : index
    %202 = vector.load %arg6[%c1_49, %c0_50, %c0_51] : memref<2x1x16xf32, #tpu.memory_space<vmem>>, vector<1x1x16xf32>
    %203 = vector.shape_cast %202 : vector<1x1x16xf32> to vector<1x16xf32>
    %204 = vector.shape_cast %203 : vector<1x16xf32> to vector<1x1x16xf32>
    %205 = vector.broadcast %204 : vector<1x1x16xf32> to vector<2x16x16xf32>
    %206 = arith.mulf %185, %205 : vector<2x16x16xf32>
    %c1_52 = arith.constant 1 : index
    %c0_53 = arith.constant 0 : index
    %c0_54 = arith.constant 0 : index
    %207 = vector.load %arg7[%c1_52, %c0_53, %c0_54] : memref<2x1x16xf32, #tpu.memory_space<vmem>>, vector<1x1x16xf32>
    %208 = vector.shape_cast %207 : vector<1x1x16xf32> to vector<1x16xf32>
    %209 = vector.shape_cast %208 : vector<1x16xf32> to vector<1x1x16xf32>
    %210 = vector.broadcast %209 : vector<1x1x16xf32> to vector<2x16x16xf32>
    %211 = arith.addf %206, %210 : vector<2x16x16xf32>
    %212 = arith.negf %211 : vector<2x16x16xf32>
    %213 = math.exp %212 : vector<2x16x16xf32>
    %cst_55 = arith.constant 1.000000e+00 : f32
    %214 = vector.broadcast %cst_55 : f32 to vector<2x16x16xf32>
    %215 = arith.addf %214, %213 : vector<2x16x16xf32>
    %216 = arith.divf %214, %215 : vector<2x16x16xf32>
    %217 = arith.mulf %211, %216 : vector<2x16x16xf32>
    %cst_56 = arith.constant dense<0.000000e+00> : vector<2x16xf32>
    %218 = vector.multi_reduction <add>, %201, %cst_56 [1] : vector<2x16x16xf32> to vector<2x16xf32>
    %cst_57 = arith.constant 6.250000e-02 : f32
    %219 = vector.broadcast %cst_57 : f32 to vector<2x16xf32>
    %220 = arith.mulf %218, %219 : vector<2x16xf32>
    %cst_58 = arith.constant dense<0.000000e+00> : vector<2x16xf32>
    %221 = vector.multi_reduction <add>, %217, %cst_58 [1] : vector<2x16x16xf32> to vector<2x16xf32>
    %cst_59 = arith.constant 6.250000e-02 : f32
    %222 = vector.broadcast %cst_59 : f32 to vector<2x16xf32>
    %223 = arith.mulf %221, %222 : vector<2x16xf32>
    %c0_60 = arith.constant 0 : index
    %c0_61 = arith.constant 0 : index
    %c0_62 = arith.constant 0 : index
    %224 = vector.load %arg8[%c0_60, %c0_61, %c0_62] : memref<2x16x4xf32, #tpu.memory_space<vmem>>, vector<1x16x4xf32>
    %225 = vector.shape_cast %224 : vector<1x16x4xf32> to vector<16x4xf32>
    %cst_63 = arith.constant dense<0.000000e+00> : vector<2x4xf32>
    %226 = tpu.matmul %220, %225, %cst_63 {dimension_numbers = #tpu.dot_dimension_numbers<[1], [0], [0], [1], [0, 0, 1, 1], [], []>} : vector<2x16xf32>, vector<16x4xf32>, vector<2x4xf32> -> vector<2x4xf32>
    %c1_64 = arith.constant 1 : index
    %c0_65 = arith.constant 0 : index
    %c0_66 = arith.constant 0 : index
    %227 = vector.load %arg8[%c1_64, %c0_65, %c0_66] : memref<2x16x4xf32, #tpu.memory_space<vmem>>, vector<1x16x4xf32>
    %228 = vector.shape_cast %227 : vector<1x16x4xf32> to vector<16x4xf32>
    %cst_67 = arith.constant dense<0.000000e+00> : vector<2x4xf32>
    %229 = tpu.matmul %223, %228, %cst_67 {dimension_numbers = #tpu.dot_dimension_numbers<[1], [0], [0], [1], [0, 0, 1, 1], [], []>} : vector<2x16xf32>, vector<16x4xf32>, vector<2x4xf32> -> vector<2x4xf32>
    %230 = arith.addf %226, %229 : vector<2x4xf32>
    %c0_68 = arith.constant 0 : index
    %c0_69 = arith.constant 0 : index
    %231 = vector.load %arg9[%c0_68, %c0_69] : memref<1x4xf32, #tpu.memory_space<vmem>>, vector<1x4xf32>
    %232 = vector.broadcast %231 : vector<1x4xf32> to vector<2x4xf32>
    %233 = arith.addf %230, %232 : vector<2x4xf32>
    %234 = arith.negf %233 : vector<2x4xf32>
    %235 = math.exp %234 : vector<2x4xf32>
    %cst_70 = arith.constant 1.000000e+00 : f32
    %236 = vector.broadcast %cst_70 : f32 to vector<2x4xf32>
    %237 = arith.addf %236, %235 : vector<2x4xf32>
    %238 = arith.divf %236, %237 : vector<2x4xf32>
    %239 = arith.mulf %233, %238 : vector<2x4xf32>
    %c0_71 = arith.constant 0 : index
    %c0_72 = arith.constant 0 : index
    %240 = vector.load %arg10[%c0_71, %c0_72] : memref<4x4xf32, #tpu.memory_space<vmem>>, vector<4x4xf32>
    %cst_73 = arith.constant dense<0.000000e+00> : vector<2x4xf32>
    %241 = tpu.matmul %239, %240, %cst_73 {dimension_numbers = #tpu.dot_dimension_numbers<[1], [0], [0], [1], [0, 0, 1, 1], [], []>} : vector<2x4xf32>, vector<4x4xf32>, vector<2x4xf32> -> vector<2x4xf32>
    %c0_74 = arith.constant 0 : index
    %c0_75 = arith.constant 0 : index
    %242 = vector.load %arg11[%c0_74, %c0_75] : memref<1x4xf32, #tpu.memory_space<vmem>>, vector<1x4xf32>
    %243 = vector.broadcast %242 : vector<1x4xf32> to vector<2x4xf32>
    %244 = arith.addf %241, %243 : vector<2x4xf32>
    %c0_76 = arith.constant 0 : index
    %c0_77 = arith.constant 0 : index
    %245 = vector.load %arg12[%c0_76, %c0_77] : memref<4x8xf32, #tpu.memory_space<vmem>>, vector<4x8xf32>
    %cst_78 = arith.constant dense<0.000000e+00> : vector<2x8xf32>
    %246 = tpu.matmul %244, %245, %cst_78 {dimension_numbers = #tpu.dot_dimension_numbers<[1], [0], [0], [1], [0, 0, 1, 1], [], []>} : vector<2x4xf32>, vector<4x8xf32>, vector<2x8xf32> -> vector<2x8xf32>
    %c0_79 = arith.constant 0 : index
    %c0_80 = arith.constant 0 : index
    %247 = vector.load %arg13[%c0_79, %c0_80] : memref<4x8xf32, #tpu.memory_space<vmem>>, vector<4x8xf32>
    %cst_81 = arith.constant dense<0.000000e+00> : vector<2x8xf32>
    %248 = tpu.matmul %244, %247, %cst_81 {dimension_numbers = #tpu.dot_dimension_numbers<[1], [0], [0], [1], [0, 0, 1, 1], [], []>} : vector<2x4xf32>, vector<4x8xf32>, vector<2x8xf32> -> vector<2x8xf32>
    %249 = arith.mulf %246, %248 : vector<2x8xf32>
    %c0_82 = arith.constant 0 : index
    %c0_83 = arith.constant 0 : index
    %250 = vector.load %arg14[%c0_82, %c0_83] : memref<8x2xf32, #tpu.memory_space<vmem>>, vector<8x2xf32>
    %cst_84 = arith.constant dense<0.000000e+00> : vector<2x2xf32>
    %251 = tpu.matmul %249, %250, %cst_84 {dimension_numbers = #tpu.dot_dimension_numbers<[1], [0], [0], [1], [0, 0, 1, 1], [], []>} : vector<2x8xf32>, vector<8x2xf32>, vector<2x2xf32> -> vector<2x2xf32>
    %c0_85 = arith.constant 0 : index
    %c0_86 = arith.constant 0 : index
    %252 = vector.load %arg15[%c0_85, %c0_86] : memref<1x2xf32, #tpu.memory_space<vmem>>, vector<1x2xf32>
    %253 = vector.broadcast %252 : vector<1x2xf32> to vector<2x2xf32>
    %254 = arith.addf %251, %253 : vector<2x2xf32>
    %255 = arith.negf %244 : vector<2x4xf32>
    %256 = math.exp %255 : vector<2x4xf32>
    %cst_87 = arith.constant 1.000000e+00 : f32
    %257 = vector.broadcast %cst_87 : f32 to vector<2x4xf32>
    %258 = arith.addf %257, %256 : vector<2x4xf32>
    %259 = arith.divf %257, %258 : vector<2x4xf32>
    %260 = arith.mulf %244, %259 : vector<2x4xf32>
    %261 = arith.negf %254 : vector<2x2xf32>
    %262 = math.exp %261 : vector<2x2xf32>
    %cst_88 = arith.constant 1.000000e+00 : f32
    %263 = vector.broadcast %cst_88 : f32 to vector<2x2xf32>
    %264 = arith.addf %263, %262 : vector<2x2xf32>
    %265 = arith.divf %263, %264 : vector<2x2xf32>
    %266 = arith.mulf %254, %265 : vector<2x2xf32>
    %cst_89 = arith.constant 0.000000e+00 : f32
    %267 = vector.broadcast %cst_89 : f32 to vector<32x16xf32>
    %c0_90 = arith.constant 0 : index
    %c0_91 = arith.constant 0 : index
    %c0_92 = arith.constant 0 : index
    %268 = vector.load %arg16[%c0_90, %c0_91, %c0_92] : memref<2x4x16xf32, #tpu.memory_space<vmem>>, vector<1x4x16xf32>
    %269 = vector.shape_cast %268 : vector<1x4x16xf32> to vector<4x16xf32>
    %cst_93 = arith.constant dense<0.000000e+00> : vector<2x16xf32>
    %270 = tpu.matmul %260, %269, %cst_93 {dimension_numbers = #tpu.dot_dimension_numbers<[1], [0], [0], [1], [0, 0, 1, 1], [], []>} : vector<2x4xf32>, vector<4x16xf32>, vector<2x16xf32> -> vector<2x16xf32>
    %c0_94 = arith.constant 0 : index
    %c0_95 = arith.constant 0 : index
    %c0_96 = arith.constant 0 : index
    %271 = vector.load %arg17[%c0_94, %c0_95, %c0_96] : memref<2x2x16xf32, #tpu.memory_space<vmem>>, vector<1x2x16xf32>
    %272 = vector.shape_cast %271 : vector<1x2x16xf32> to vector<2x16xf32>
    %cst_97 = arith.constant dense<0.000000e+00> : vector<2x16xf32>
    %273 = tpu.matmul %266, %272, %cst_97 {dimension_numbers = #tpu.dot_dimension_numbers<[1], [0], [0], [1], [0, 0, 1, 1], [], []>} : vector<2x2xf32>, vector<2x16xf32>, vector<2x16xf32> -> vector<2x16xf32>
    %274 = arith.addf %270, %273 : vector<2x16xf32>
    %c0_98 = arith.constant 0 : index
    %c0_99 = arith.constant 0 : index
    %c0_100 = arith.constant 0 : index
    %275 = vector.load %arg18[%c0_98, %c0_99, %c0_100] : memref<2x1x16xf32, #tpu.memory_space<vmem>>, vector<1x1x16xf32>
    %276 = vector.shape_cast %275 : vector<1x1x16xf32> to vector<1x16xf32>
    %277 = vector.broadcast %276 : vector<1x16xf32> to vector<2x16xf32>
    %278 = arith.addf %274, %277 : vector<2x16xf32>
    %279 = arith.negf %278 : vector<2x16xf32>
    %280 = math.exp %279 : vector<2x16xf32>
    %cst_101 = arith.constant 1.000000e+00 : f32
    %281 = vector.broadcast %cst_101 : f32 to vector<2x16xf32>
    %282 = arith.addf %281, %280 : vector<2x16xf32>
    %283 = arith.divf %281, %282 : vector<2x16xf32>
    %284 = vector.shape_cast %283 : vector<2x16xf32> to vector<2x1x16xf32>
    %285 = vector.broadcast %284 : vector<2x1x16xf32> to vector<2x16x16xf32>
    %286 = arith.mulf %201, %285 : vector<2x16x16xf32>
    %287 = vector.shape_cast %286 : vector<2x16x16xf32> to vector<32x16xf32>
    %288 = arith.truncf %287 : vector<32x16xf32> to vector<32x16xbf16>
    %c0_102 = arith.constant 0 : index
    %c0_103 = arith.constant 0 : index
    %c0_104 = arith.constant 0 : index
    %289 = vector.load %arg19[%c0_102, %c0_103, %c0_104] : memref<2x16x16xf32, #tpu.memory_space<vmem>>, vector<1x16x16xf32>
    %290 = vector.shape_cast %289 : vector<1x16x16xf32> to vector<16x16xf32>
    %291 = arith.truncf %290 : vector<16x16xf32> to vector<16x16xbf16>
    %cst_105 = arith.constant dense<0.000000e+00> : vector<32x16xf32>
    %292 = tpu.matmul %288, %291, %cst_105 {dimension_numbers = #tpu.dot_dimension_numbers<[1], [0], [0], [1], [0, 0, 1, 1], [], []>} : vector<32x16xbf16>, vector<16x16xbf16>, vector<32x16xf32> -> vector<32x16xf32>
    %293 = arith.addf %267, %292 : vector<32x16xf32>
    %c1_106 = arith.constant 1 : index
    %c0_107 = arith.constant 0 : index
    %c0_108 = arith.constant 0 : index
    %294 = vector.load %arg16[%c1_106, %c0_107, %c0_108] : memref<2x4x16xf32, #tpu.memory_space<vmem>>, vector<1x4x16xf32>
    %295 = vector.shape_cast %294 : vector<1x4x16xf32> to vector<4x16xf32>
    %cst_109 = arith.constant dense<0.000000e+00> : vector<2x16xf32>
    %296 = tpu.matmul %260, %295, %cst_109 {dimension_numbers = #tpu.dot_dimension_numbers<[1], [0], [0], [1], [0, 0, 1, 1], [], []>} : vector<2x4xf32>, vector<4x16xf32>, vector<2x16xf32> -> vector<2x16xf32>
    %c1_110 = arith.constant 1 : index
    %c0_111 = arith.constant 0 : index
    %c0_112 = arith.constant 0 : index
    %297 = vector.load %arg17[%c1_110, %c0_111, %c0_112] : memref<2x2x16xf32, #tpu.memory_space<vmem>>, vector<1x2x16xf32>
    %298 = vector.shape_cast %297 : vector<1x2x16xf32> to vector<2x16xf32>
    %cst_113 = arith.constant dense<0.000000e+00> : vector<2x16xf32>
    %299 = tpu.matmul %266, %298, %cst_113 {dimension_numbers = #tpu.dot_dimension_numbers<[1], [0], [0], [1], [0, 0, 1, 1], [], []>} : vector<2x2xf32>, vector<2x16xf32>, vector<2x16xf32> -> vector<2x16xf32>
    %300 = arith.addf %296, %299 : vector<2x16xf32>
    %c1_114 = arith.constant 1 : index
    %c0_115 = arith.constant 0 : index
    %c0_116 = arith.constant 0 : index
    %301 = vector.load %arg18[%c1_114, %c0_115, %c0_116] : memref<2x1x16xf32, #tpu.memory_space<vmem>>, vector<1x1x16xf32>
    %302 = vector.shape_cast %301 : vector<1x1x16xf32> to vector<1x16xf32>
    %303 = vector.broadcast %302 : vector<1x16xf32> to vector<2x16xf32>
    %304 = arith.addf %300, %303 : vector<2x16xf32>
    %305 = arith.negf %304 : vector<2x16xf32>
    %306 = math.exp %305 : vector<2x16xf32>
    %cst_117 = arith.constant 1.000000e+00 : f32
    %307 = vector.broadcast %cst_117 : f32 to vector<2x16xf32>
    %308 = arith.addf %307, %306 : vector<2x16xf32>
    %309 = arith.divf %307, %308 : vector<2x16xf32>
    %310 = vector.shape_cast %309 : vector<2x16xf32> to vector<2x1x16xf32>
    %311 = vector.broadcast %310 : vector<2x1x16xf32> to vector<2x16x16xf32>
    %312 = arith.mulf %217, %311 : vector<2x16x16xf32>
    %313 = vector.shape_cast %312 : vector<2x16x16xf32> to vector<32x16xf32>
    %314 = arith.truncf %313 : vector<32x16xf32> to vector<32x16xbf16>
    %c1_118 = arith.constant 1 : index
    %c0_119 = arith.constant 0 : index
    %c0_120 = arith.constant 0 : index
    %315 = vector.load %arg19[%c1_118, %c0_119, %c0_120] : memref<2x16x16xf32, #tpu.memory_space<vmem>>, vector<1x16x16xf32>
    %316 = vector.shape_cast %315 : vector<1x16x16xf32> to vector<16x16xf32>
    %317 = arith.truncf %316 : vector<16x16xf32> to vector<16x16xbf16>
    %cst_121 = arith.constant dense<0.000000e+00> : vector<32x16xf32>
    %318 = tpu.matmul %314, %317, %cst_121 {dimension_numbers = #tpu.dot_dimension_numbers<[1], [0], [0], [1], [0, 0, 1, 1], [], []>} : vector<32x16xbf16>, vector<16x16xbf16>, vector<32x16xf32> -> vector<32x16xf32>
    %319 = arith.addf %293, %318 : vector<32x16xf32>
    %c0_122 = arith.constant 0 : index
    %c0_123 = arith.constant 0 : index
    %320 = vector.load %arg20[%c0_122, %c0_123] : memref<1x16xf32, #tpu.memory_space<vmem>>, vector<1x16xf32>
    %321 = vector.broadcast %320 : vector<1x16xf32> to vector<32x16xf32>
    %322 = arith.mulf %319, %321 : vector<32x16xf32>
    %c0_124 = arith.constant 0 : index
    %c0_125 = arith.constant 0 : index
    %323 = vector.load %arg21[%c0_124, %c0_125] : memref<1x16xf32, #tpu.memory_space<vmem>>, vector<1x16xf32>
    %324 = vector.broadcast %323 : vector<1x16xf32> to vector<32x16xf32>
    %325 = arith.addf %322, %324 : vector<32x16xf32>
    %326 = arith.negf %325 : vector<32x16xf32>
    %327 = math.exp %326 : vector<32x16xf32>
    %cst_126 = arith.constant 1.000000e+00 : f32
    %328 = vector.broadcast %cst_126 : f32 to vector<32x16xf32>
    %329 = arith.addf %328, %327 : vector<32x16xf32>
    %330 = arith.divf %328, %329 : vector<32x16xf32>
    %331 = arith.mulf %325, %330 : vector<32x16xf32>
    %332 = vector.shape_cast %331 : vector<32x16xf32> to vector<2x16x16xf32>
    %cst_127 = arith.constant 0.000000e+00 : f32
    %333 = vector.broadcast %cst_127 : f32 to vector<2x2x16xf32>
    %334 = tpu.concatenate %333, %0, %333 in 1 : vector<2x2x16xf32>, vector<2x16x16xf32>, vector<2x2x16xf32> -> vector<2x20x16xf32>
    %335 = tpu.concatenate %333, %332, %333 in 1 : vector<2x2x16xf32>, vector<2x16x16xf32>, vector<2x2x16xf32> -> vector<2x20x16xf32>
    %cst_128 = arith.constant 0.000000e+00 : f32
    %336 = vector.broadcast %cst_128 : f32 to vector<32x8xf32>
    %337 = vector.extract_strided_slice %334 {offsets = [0, 0, 0], sizes = [2, 16, 16], strides = [1, 1, 1]} : vector<2x20x16xf32> to vector<2x16x16xf32>
    %338 = vector.shape_cast %337 : vector<2x16x16xf32> to vector<32x16xf32>
    %339 = arith.truncf %338 : vector<32x16xf32> to vector<32x16xbf16>
    %340 = vector.extract_strided_slice %335 {offsets = [0, 0, 0], sizes = [2, 16, 16], strides = [1, 1, 1]} : vector<2x20x16xf32> to vector<2x16x16xf32>
    %341 = vector.shape_cast %340 : vector<2x16x16xf32> to vector<32x16xf32>
    %342 = arith.truncf %341 : vector<32x16xf32> to vector<32x16xbf16>
    %c0_129 = arith.constant 0 : index
    %c0_130 = arith.constant 0 : index
    %c0_131 = arith.constant 0 : index
    %343 = vector.load %arg22[%c0_129, %c0_130, %c0_131] : memref<5x16x8xf32, #tpu.memory_space<vmem>>, vector<1x16x8xf32>
    %344 = vector.shape_cast %343 : vector<1x16x8xf32> to vector<16x8xf32>
    %345 = arith.truncf %344 : vector<16x8xf32> to vector<16x8xbf16>
    %cst_132 = arith.constant dense<0.000000e+00> : vector<32x8xf32>
    %346 = tpu.matmul %339, %345, %cst_132 {dimension_numbers = #tpu.dot_dimension_numbers<[1], [0], [0], [1], [0, 0, 1, 1], [], []>} : vector<32x16xbf16>, vector<16x8xbf16>, vector<32x8xf32> -> vector<32x8xf32>
    %347 = arith.addf %336, %346 : vector<32x8xf32>
    %c0_133 = arith.constant 0 : index
    %c0_134 = arith.constant 0 : index
    %c0_135 = arith.constant 0 : index
    %348 = vector.load %arg23[%c0_133, %c0_134, %c0_135] : memref<5x16x8xf32, #tpu.memory_space<vmem>>, vector<1x16x8xf32>
    %349 = vector.shape_cast %348 : vector<1x16x8xf32> to vector<16x8xf32>
    %350 = arith.truncf %349 : vector<16x8xf32> to vector<16x8xbf16>
    %cst_136 = arith.constant dense<0.000000e+00> : vector<32x8xf32>
    %351 = tpu.matmul %342, %350, %cst_136 {dimension_numbers = #tpu.dot_dimension_numbers<[1], [0], [0], [1], [0, 0, 1, 1], [], []>} : vector<32x16xbf16>, vector<16x8xbf16>, vector<32x8xf32> -> vector<32x8xf32>
    %352 = arith.addf %347, %351 : vector<32x8xf32>
    %353 = vector.extract_strided_slice %334 {offsets = [0, 1, 0], sizes = [2, 16, 16], strides = [1, 1, 1]} : vector<2x20x16xf32> to vector<2x16x16xf32>
    %354 = vector.shape_cast %353 : vector<2x16x16xf32> to vector<32x16xf32>
    %355 = arith.truncf %354 : vector<32x16xf32> to vector<32x16xbf16>
    %356 = vector.extract_strided_slice %335 {offsets = [0, 1, 0], sizes = [2, 16, 16], strides = [1, 1, 1]} : vector<2x20x16xf32> to vector<2x16x16xf32>
    %357 = vector.shape_cast %356 : vector<2x16x16xf32> to vector<32x16xf32>
    %358 = arith.truncf %357 : vector<32x16xf32> to vector<32x16xbf16>
    %c1_137 = arith.constant 1 : index
    %c0_138 = arith.constant 0 : index
    %c0_139 = arith.constant 0 : index
    %359 = vector.load %arg22[%c1_137, %c0_138, %c0_139] : memref<5x16x8xf32, #tpu.memory_space<vmem>>, vector<1x16x8xf32>
    %360 = vector.shape_cast %359 : vector<1x16x8xf32> to vector<16x8xf32>
    %361 = arith.truncf %360 : vector<16x8xf32> to vector<16x8xbf16>
    %cst_140 = arith.constant dense<0.000000e+00> : vector<32x8xf32>
    %362 = tpu.matmul %355, %361, %cst_140 {dimension_numbers = #tpu.dot_dimension_numbers<[1], [0], [0], [1], [0, 0, 1, 1], [], []>} : vector<32x16xbf16>, vector<16x8xbf16>, vector<32x8xf32> -> vector<32x8xf32>
    %363 = arith.addf %352, %362 : vector<32x8xf32>
    %c1_141 = arith.constant 1 : index
    %c0_142 = arith.constant 0 : index
    %c0_143 = arith.constant 0 : index
    %364 = vector.load %arg23[%c1_141, %c0_142, %c0_143] : memref<5x16x8xf32, #tpu.memory_space<vmem>>, vector<1x16x8xf32>
    %365 = vector.shape_cast %364 : vector<1x16x8xf32> to vector<16x8xf32>
    %366 = arith.truncf %365 : vector<16x8xf32> to vector<16x8xbf16>
    %cst_144 = arith.constant dense<0.000000e+00> : vector<32x8xf32>
    %367 = tpu.matmul %358, %366, %cst_144 {dimension_numbers = #tpu.dot_dimension_numbers<[1], [0], [0], [1], [0, 0, 1, 1], [], []>} : vector<32x16xbf16>, vector<16x8xbf16>, vector<32x8xf32> -> vector<32x8xf32>
    %368 = arith.addf %363, %367 : vector<32x8xf32>
    %369 = vector.extract_strided_slice %334 {offsets = [0, 2, 0], sizes = [2, 16, 16], strides = [1, 1, 1]} : vector<2x20x16xf32> to vector<2x16x16xf32>
    %370 = vector.shape_cast %369 : vector<2x16x16xf32> to vector<32x16xf32>
    %371 = arith.truncf %370 : vector<32x16xf32> to vector<32x16xbf16>
    %372 = vector.extract_strided_slice %335 {offsets = [0, 2, 0], sizes = [2, 16, 16], strides = [1, 1, 1]} : vector<2x20x16xf32> to vector<2x16x16xf32>
    %373 = vector.shape_cast %372 : vector<2x16x16xf32> to vector<32x16xf32>
    %374 = arith.truncf %373 : vector<32x16xf32> to vector<32x16xbf16>
    %c2_145 = arith.constant 2 : index
    %c0_146 = arith.constant 0 : index
    %c0_147 = arith.constant 0 : index
    %375 = vector.load %arg22[%c2_145, %c0_146, %c0_147] : memref<5x16x8xf32, #tpu.memory_space<vmem>>, vector<1x16x8xf32>
    %376 = vector.shape_cast %375 : vector<1x16x8xf32> to vector<16x8xf32>
    %377 = arith.truncf %376 : vector<16x8xf32> to vector<16x8xbf16>
    %cst_148 = arith.constant dense<0.000000e+00> : vector<32x8xf32>
    %378 = tpu.matmul %371, %377, %cst_148 {dimension_numbers = #tpu.dot_dimension_numbers<[1], [0], [0], [1], [0, 0, 1, 1], [], []>} : vector<32x16xbf16>, vector<16x8xbf16>, vector<32x8xf32> -> vector<32x8xf32>
    %379 = arith.addf %368, %378 : vector<32x8xf32>
    %c2_149 = arith.constant 2 : index
    %c0_150 = arith.constant 0 : index
    %c0_151 = arith.constant 0 : index
    %380 = vector.load %arg23[%c2_149, %c0_150, %c0_151] : memref<5x16x8xf32, #tpu.memory_space<vmem>>, vector<1x16x8xf32>
    %381 = vector.shape_cast %380 : vector<1x16x8xf32> to vector<16x8xf32>
    %382 = arith.truncf %381 : vector<16x8xf32> to vector<16x8xbf16>
    %cst_152 = arith.constant dense<0.000000e+00> : vector<32x8xf32>
    %383 = tpu.matmul %374, %382, %cst_152 {dimension_numbers = #tpu.dot_dimension_numbers<[1], [0], [0], [1], [0, 0, 1, 1], [], []>} : vector<32x16xbf16>, vector<16x8xbf16>, vector<32x8xf32> -> vector<32x8xf32>
    %384 = arith.addf %379, %383 : vector<32x8xf32>
    %385 = vector.extract_strided_slice %334 {offsets = [0, 3, 0], sizes = [2, 16, 16], strides = [1, 1, 1]} : vector<2x20x16xf32> to vector<2x16x16xf32>
    %386 = vector.shape_cast %385 : vector<2x16x16xf32> to vector<32x16xf32>
    %387 = arith.truncf %386 : vector<32x16xf32> to vector<32x16xbf16>
    %388 = vector.extract_strided_slice %335 {offsets = [0, 3, 0], sizes = [2, 16, 16], strides = [1, 1, 1]} : vector<2x20x16xf32> to vector<2x16x16xf32>
    %389 = vector.shape_cast %388 : vector<2x16x16xf32> to vector<32x16xf32>
    %390 = arith.truncf %389 : vector<32x16xf32> to vector<32x16xbf16>
    %c3_153 = arith.constant 3 : index
    %c0_154 = arith.constant 0 : index
    %c0_155 = arith.constant 0 : index
    %391 = vector.load %arg22[%c3_153, %c0_154, %c0_155] : memref<5x16x8xf32, #tpu.memory_space<vmem>>, vector<1x16x8xf32>
    %392 = vector.shape_cast %391 : vector<1x16x8xf32> to vector<16x8xf32>
    %393 = arith.truncf %392 : vector<16x8xf32> to vector<16x8xbf16>
    %cst_156 = arith.constant dense<0.000000e+00> : vector<32x8xf32>
    %394 = tpu.matmul %387, %393, %cst_156 {dimension_numbers = #tpu.dot_dimension_numbers<[1], [0], [0], [1], [0, 0, 1, 1], [], []>} : vector<32x16xbf16>, vector<16x8xbf16>, vector<32x8xf32> -> vector<32x8xf32>
    %395 = arith.addf %384, %394 : vector<32x8xf32>
    %c3_157 = arith.constant 3 : index
    %c0_158 = arith.constant 0 : index
    %c0_159 = arith.constant 0 : index
    %396 = vector.load %arg23[%c3_157, %c0_158, %c0_159] : memref<5x16x8xf32, #tpu.memory_space<vmem>>, vector<1x16x8xf32>
    %397 = vector.shape_cast %396 : vector<1x16x8xf32> to vector<16x8xf32>
    %398 = arith.truncf %397 : vector<16x8xf32> to vector<16x8xbf16>
    %cst_160 = arith.constant dense<0.000000e+00> : vector<32x8xf32>
    %399 = tpu.matmul %390, %398, %cst_160 {dimension_numbers = #tpu.dot_dimension_numbers<[1], [0], [0], [1], [0, 0, 1, 1], [], []>} : vector<32x16xbf16>, vector<16x8xbf16>, vector<32x8xf32> -> vector<32x8xf32>
    %400 = arith.addf %395, %399 : vector<32x8xf32>
    %401 = vector.extract_strided_slice %334 {offsets = [0, 4, 0], sizes = [2, 16, 16], strides = [1, 1, 1]} : vector<2x20x16xf32> to vector<2x16x16xf32>
    %402 = vector.shape_cast %401 : vector<2x16x16xf32> to vector<32x16xf32>
    %403 = arith.truncf %402 : vector<32x16xf32> to vector<32x16xbf16>
    %404 = vector.extract_strided_slice %335 {offsets = [0, 4, 0], sizes = [2, 16, 16], strides = [1, 1, 1]} : vector<2x20x16xf32> to vector<2x16x16xf32>
    %405 = vector.shape_cast %404 : vector<2x16x16xf32> to vector<32x16xf32>
    %406 = arith.truncf %405 : vector<32x16xf32> to vector<32x16xbf16>
    %c4_161 = arith.constant 4 : index
    %c0_162 = arith.constant 0 : index
    %c0_163 = arith.constant 0 : index
    %407 = vector.load %arg22[%c4_161, %c0_162, %c0_163] : memref<5x16x8xf32, #tpu.memory_space<vmem>>, vector<1x16x8xf32>
    %408 = vector.shape_cast %407 : vector<1x16x8xf32> to vector<16x8xf32>
    %409 = arith.truncf %408 : vector<16x8xf32> to vector<16x8xbf16>
    %cst_164 = arith.constant dense<0.000000e+00> : vector<32x8xf32>
    %410 = tpu.matmul %403, %409, %cst_164 {dimension_numbers = #tpu.dot_dimension_numbers<[1], [0], [0], [1], [0, 0, 1, 1], [], []>} : vector<32x16xbf16>, vector<16x8xbf16>, vector<32x8xf32> -> vector<32x8xf32>
    %411 = arith.addf %400, %410 : vector<32x8xf32>
    %c4_165 = arith.constant 4 : index
    %c0_166 = arith.constant 0 : index
    %c0_167 = arith.constant 0 : index
    %412 = vector.load %arg23[%c4_165, %c0_166, %c0_167] : memref<5x16x8xf32, #tpu.memory_space<vmem>>, vector<1x16x8xf32>
    %413 = vector.shape_cast %412 : vector<1x16x8xf32> to vector<16x8xf32>
    %414 = arith.truncf %413 : vector<16x8xf32> to vector<16x8xbf16>
    %cst_168 = arith.constant dense<0.000000e+00> : vector<32x8xf32>
    %415 = tpu.matmul %406, %414, %cst_168 {dimension_numbers = #tpu.dot_dimension_numbers<[1], [0], [0], [1], [0, 0, 1, 1], [], []>} : vector<32x16xbf16>, vector<16x8xbf16>, vector<32x8xf32> -> vector<32x8xf32>
    %416 = arith.addf %411, %415 : vector<32x8xf32>
    %c0_169 = arith.constant 0 : index
    %c0_170 = arith.constant 0 : index
    %417 = vector.load %arg24[%c0_169, %c0_170] : memref<1x8xf32, #tpu.memory_space<vmem>>, vector<1x8xf32>
    %418 = vector.broadcast %417 : vector<1x8xf32> to vector<32x8xf32>
    %419 = arith.mulf %416, %418 : vector<32x8xf32>
    %c0_171 = arith.constant 0 : index
    %c0_172 = arith.constant 0 : index
    %420 = vector.load %arg25[%c0_171, %c0_172] : memref<1x8xf32, #tpu.memory_space<vmem>>, vector<1x8xf32>
    %421 = vector.broadcast %420 : vector<1x8xf32> to vector<32x8xf32>
    %422 = arith.addf %419, %421 : vector<32x8xf32>
    %423 = arith.negf %422 : vector<32x8xf32>
    %424 = math.exp %423 : vector<32x8xf32>
    %cst_173 = arith.constant 1.000000e+00 : f32
    %425 = vector.broadcast %cst_173 : f32 to vector<32x8xf32>
    %426 = arith.addf %425, %424 : vector<32x8xf32>
    %427 = arith.divf %425, %426 : vector<32x8xf32>
    %428 = arith.mulf %422, %427 : vector<32x8xf32>
    %429 = vector.shape_cast %428 : vector<32x8xf32> to vector<2x16x8xf32>
    %c0_174 = arith.constant 0 : index
    %c0_175 = arith.constant 0 : index
    %c0_176 = arith.constant 0 : index
    %430 = vector.load %arg26[%c0_174, %c0_175, %c0_176] : memref<2x16x8xf32, #tpu.memory_space<vmem>>, vector<2x16x8xf32>
    tpu.vector_store %arg26[%c0_174, %c0_175, %c0_176], %429 {strides = array<i32>} : memref<2x16x8xf32, #tpu.memory_space<vmem>>, vector<2x16x8xf32>,
    return
  }
  func.func @transform_0(%arg0: i32) -> (i32, i32, i32) {
    %c0_i32 = arith.constant 0 : i32
    %c0_i32_0 = arith.constant 0 : i32
    %c0_i32_1 = arith.constant 0 : i32
    return %arg0, %c0_i32, %c0_i32_0 : i32, i32, i32
  }
  func.func @transform_1(%arg0: i32) -> (i32, i32, i32) {
    %c0_i32 = arith.constant 0 : i32
    %c0_i32_0 = arith.constant 0 : i32
    %c0_i32_1 = arith.constant 0 : i32
    %c0_i32_2 = arith.constant 0 : i32
    return %c0_i32, %c0_i32_0, %c0_i32_1 : i32, i32, i32
  }
  func.func @transform_2(%arg0: i32) -> (i32, i32, i32) {
    %c0_i32 = arith.constant 0 : i32
    %c0_i32_0 = arith.constant 0 : i32
    %c0_i32_1 = arith.constant 0 : i32
    %c0_i32_2 = arith.constant 0 : i32
    return %c0_i32, %c0_i32_0, %c0_i32_1 : i32, i32, i32
  }
  func.func @transform_3(%arg0: i32) -> (i32, i32, i32) {
    %c0_i32 = arith.constant 0 : i32
    %c0_i32_0 = arith.constant 0 : i32
    %c0_i32_1 = arith.constant 0 : i32
    %c0_i32_2 = arith.constant 0 : i32
    return %c0_i32, %c0_i32_0, %c0_i32_1 : i32, i32, i32
  }
  func.func @transform_4(%arg0: i32) -> (i32, i32, i32, i32) {
    %c0_i32 = arith.constant 0 : i32
    %c0_i32_0 = arith.constant 0 : i32
    %c0_i32_1 = arith.constant 0 : i32
    %c0_i32_2 = arith.constant 0 : i32
    %c0_i32_3 = arith.constant 0 : i32
    return %c0_i32, %c0_i32_0, %c0_i32_1, %c0_i32_2 : i32, i32, i32, i32
  }
  func.func @transform_5(%arg0: i32) -> (i32, i32, i32) {
    %c0_i32 = arith.constant 0 : i32
    %c0_i32_0 = arith.constant 0 : i32
    %c0_i32_1 = arith.constant 0 : i32
    %c0_i32_2 = arith.constant 0 : i32
    return %c0_i32, %c0_i32_0, %c0_i32_1 : i32, i32, i32
  }
  func.func @transform_6(%arg0: i32) -> (i32, i32, i32) {
    %c0_i32 = arith.constant 0 : i32
    %c0_i32_0 = arith.constant 0 : i32
    %c0_i32_1 = arith.constant 0 : i32
    %c0_i32_2 = arith.constant 0 : i32
    return %c0_i32, %c0_i32_0, %c0_i32_1 : i32, i32, i32
  }
  func.func @transform_7(%arg0: i32) -> (i32, i32, i32) {
    %c0_i32 = arith.constant 0 : i32
    %c0_i32_0 = arith.constant 0 : i32
    %c0_i32_1 = arith.constant 0 : i32
    %c0_i32_2 = arith.constant 0 : i32
    return %c0_i32, %c0_i32_0, %c0_i32_1 : i32, i32, i32
  }
  func.func @transform_8(%arg0: i32) -> (i32, i32) {
    %c0_i32 = arith.constant 0 : i32
    %c0_i32_0 = arith.constant 0 : i32
    %c0_i32_1 = arith.constant 0 : i32
    return %c0_i32, %c0_i32_0 : i32, i32
  }
  func.func @transform_9(%arg0: i32) -> (i32, i32) {
    %c0_i32 = arith.constant 0 : i32
    %c0_i32_0 = arith.constant 0 : i32
    %c0_i32_1 = arith.constant 0 : i32
    return %c0_i32, %c0_i32_0 : i32, i32
  }
  func.func @transform_10(%arg0: i32) -> (i32, i32) {
    %c0_i32 = arith.constant 0 : i32
    %c0_i32_0 = arith.constant 0 : i32
    %c0_i32_1 = arith.constant 0 : i32
    return %c0_i32, %c0_i32_0 : i32, i32
  }
  func.func @transform_11(%arg0: i32) -> (i32, i32) {
    %c0_i32 = arith.constant 0 : i32
    %c0_i32_0 = arith.constant 0 : i32
    %c0_i32_1 = arith.constant 0 : i32
    return %c0_i32, %c0_i32_0 : i32, i32
  }
  func.func @transform_12(%arg0: i32) -> (i32, i32) {
    %c0_i32 = arith.constant 0 : i32
    %c0_i32_0 = arith.constant 0 : i32
    %c0_i32_1 = arith.constant 0 : i32
    return %c0_i32, %c0_i32_0 : i32, i32
  }
  func.func @transform_13(%arg0: i32) -> (i32, i32) {
    %c0_i32 = arith.constant 0 : i32
    %c0_i32_0 = arith.constant 0 : i32
    %c0_i32_1 = arith.constant 0 : i32
    return %c0_i32, %c0_i32_0 : i32, i32
  }
  func.func @transform_14(%arg0: i32) -> (i32, i32) {
    %c0_i32 = arith.constant 0 : i32
    %c0_i32_0 = arith.constant 0 : i32
    %c0_i32_1 = arith.constant 0 : i32
    return %c0_i32, %c0_i32_0 : i32, i32
  }
  func.func @transform_15(%arg0: i32) -> (i32, i32, i32) {
    %c0_i32 = arith.constant 0 : i32
    %c0_i32_0 = arith.constant 0 : i32
    %c0_i32_1 = arith.constant 0 : i32
    %c0_i32_2 = arith.constant 0 : i32
    return %c0_i32, %c0_i32_0, %c0_i32_1 : i32, i32, i32
  }
  func.func @transform_16(%arg0: i32) -> (i32, i32, i32) {
    %c0_i32 = arith.constant 0 : i32
    %c0_i32_0 = arith.constant 0 : i32
    %c0_i32_1 = arith.constant 0 : i32
    %c0_i32_2 = arith.constant 0 : i32
    return %c0_i32, %c0_i32_0, %c0_i32_1 : i32, i32, i32
  }
  func.func @transform_17(%arg0: i32) -> (i32, i32, i32) {
    %c0_i32 = arith.constant 0 : i32
    %c0_i32_0 = arith.constant 0 : i32
    %c0_i32_1 = arith.constant 0 : i32
    %c0_i32_2 = arith.constant 0 : i32
    return %c0_i32, %c0_i32_0, %c0_i32_1 : i32, i32, i32
  }
  func.func @transform_18(%arg0: i32) -> (i32, i32, i32) {
    %c0_i32 = arith.constant 0 : i32
    %c0_i32_0 = arith.constant 0 : i32
    %c0_i32_1 = arith.constant 0 : i32
    %c0_i32_2 = arith.constant 0 : i32
    return %c0_i32, %c0_i32_0, %c0_i32_1 : i32, i32, i32
  }
  func.func @transform_19(%arg0: i32) -> (i32, i32) {
    %c0_i32 = arith.constant 0 : i32
    %c0_i32_0 = arith.constant 0 : i32
    %c0_i32_1 = arith.constant 0 : i32
    return %c0_i32, %c0_i32_0 : i32, i32
  }
  func.func @transform_20(%arg0: i32) -> (i32, i32) {
    %c0_i32 = arith.constant 0 : i32
    %c0_i32_0 = arith.constant 0 : i32
    %c0_i32_1 = arith.constant 0 : i32
    return %c0_i32, %c0_i32_0 : i32, i32
  }
  func.func @transform_21(%arg0: i32) -> (i32, i32, i32) {
    %c0_i32 = arith.constant 0 : i32
    %c0_i32_0 = arith.constant 0 : i32
    %c0_i32_1 = arith.constant 0 : i32
    %c0_i32_2 = arith.constant 0 : i32
    return %c0_i32, %c0_i32_0, %c0_i32_1 : i32, i32, i32
  }
  func.func @transform_22(%arg0: i32) -> (i32, i32, i32) {
    %c0_i32 = arith.constant 0 : i32
    %c0_i32_0 = arith.constant 0 : i32
    %c0_i32_1 = arith.constant 0 : i32
    %c0_i32_2 = arith.constant 0 : i32
    return %c0_i32, %c0_i32_0, %c0_i32_1 : i32, i32, i32
  }
  func.func @transform_23(%arg0: i32) -> (i32, i32) {
    %c0_i32 = arith.constant 0 : i32
    %c0_i32_0 = arith.constant 0 : i32
    %c0_i32_1 = arith.constant 0 : i32
    return %c0_i32, %c0_i32_0 : i32, i32
  }
  func.func @transform_24(%arg0: i32) -> (i32, i32) {
    %c0_i32 = arith.constant 0 : i32
    %c0_i32_0 = arith.constant 0 : i32
    %c0_i32_1 = arith.constant 0 : i32
    return %c0_i32, %c0_i32_0 : i32, i32
  }
  func.func @transform_25(%arg0: i32) -> (i32, i32, i32) {
    %c0_i32 = arith.constant 0 : i32
    %c0_i32_0 = arith.constant 0 : i32
    %c0_i32_1 = arith.constant 0 : i32
    return %arg0, %c0_i32, %c0_i32_0 : i32, i32, i32
  }
}

module attributes {stable_mosaic.version = 11 : i64} {
  func.func @_conv_bn_act_kernel(%arg0: i32, %arg1: memref<2x16x8xf32, #tpu.memory_space<vmem>>, %arg2: memref<1x8x128xf32, #tpu.memory_space<vmem>>, %arg3: memref<1x128xf32, #tpu.memory_space<vmem>>, %arg4: memref<1x128xf32, #tpu.memory_space<vmem>>, %arg5: memref<2x16x128xf32, #tpu.memory_space<vmem>>) attributes {dimension_semantics = [#tpu.dimension_semantics<parallel>], iteration_bounds = array<i64: 2>, scalar_prefetch = 0 : i64, scratch_operands = 0 : i64, tpu.core_type = #tpu.core_type<tc>, window_params = [{transform_indices = @transform_0, window_bounds = array<i64: 2, 16, 8>}, {pipeline_mode = #tpu.pipeline_mode<synchronous>, transform_indices = @transform_1, window_bounds = array<i64: 1, 8, 128>}, {pipeline_mode = #tpu.pipeline_mode<synchronous>, transform_indices = @transform_2, window_bounds = array<i64: 1, 128>}, {pipeline_mode = #tpu.pipeline_mode<synchronous>, transform_indices = @transform_3, window_bounds = array<i64: 1, 128>}, {transform_indices = @transform_4, window_bounds = array<i64: 2, 16, 128>}]} {
    %c0 = arith.constant 0 : index
    %c0_0 = arith.constant 0 : index
    %c0_1 = arith.constant 0 : index
    %0 = vector.load %arg1[%c0, %c0_0, %c0_1] : memref<2x16x8xf32, #tpu.memory_space<vmem>>, vector<2x16x8xf32>
    %cst = arith.constant 0.000000e+00 : f32
    %1 = vector.broadcast %cst : f32 to vector<32x128xf32>
    %2 = vector.shape_cast %0 : vector<2x16x8xf32> to vector<32x8xf32>
    %3 = arith.truncf %2 : vector<32x8xf32> to vector<32x8xbf16>
    %c0_2 = arith.constant 0 : index
    %c0_3 = arith.constant 0 : index
    %c0_4 = arith.constant 0 : index
    %4 = vector.load %arg2[%c0_2, %c0_3, %c0_4] : memref<1x8x128xf32, #tpu.memory_space<vmem>>, vector<1x8x128xf32>
    %5 = vector.shape_cast %4 : vector<1x8x128xf32> to vector<8x128xf32>
    %6 = arith.truncf %5 : vector<8x128xf32> to vector<8x128xbf16>
    %cst_5 = arith.constant dense<0.000000e+00> : vector<32x128xf32>
    %7 = tpu.matmul %3, %6, %cst_5 {dimension_numbers = #tpu.dot_dimension_numbers<[1], [0], [0], [1], [0, 0, 1, 1], [], []>} : vector<32x8xbf16>, vector<8x128xbf16>, vector<32x128xf32> -> vector<32x128xf32>
    %8 = arith.addf %1, %7 : vector<32x128xf32>
    %c0_6 = arith.constant 0 : index
    %c0_7 = arith.constant 0 : index
    %9 = vector.load %arg3[%c0_6, %c0_7] : memref<1x128xf32, #tpu.memory_space<vmem>>, vector<1x128xf32>
    %10 = vector.broadcast %9 : vector<1x128xf32> to vector<32x128xf32>
    %11 = arith.mulf %8, %10 : vector<32x128xf32>
    %c0_8 = arith.constant 0 : index
    %c0_9 = arith.constant 0 : index
    %12 = vector.load %arg4[%c0_8, %c0_9] : memref<1x128xf32, #tpu.memory_space<vmem>>, vector<1x128xf32>
    %13 = vector.broadcast %12 : vector<1x128xf32> to vector<32x128xf32>
    %14 = arith.addf %11, %13 : vector<32x128xf32>
    %15 = vector.shape_cast %14 : vector<32x128xf32> to vector<2x16x128xf32>
    %c0_10 = arith.constant 0 : index
    %c0_11 = arith.constant 0 : index
    %c0_12 = arith.constant 0 : index
    %16 = vector.load %arg5[%c0_10, %c0_11, %c0_12] : memref<2x16x128xf32, #tpu.memory_space<vmem>>, vector<2x16x128xf32>
    tpu.vector_store %arg5[%c0_10, %c0_11, %c0_12], %15 {strides = array<i32>} : memref<2x16x128xf32, #tpu.memory_space<vmem>>, vector<2x16x128xf32>,
    return
  }
  func.func @transform_0(%arg0: i32) -> (i32, i32, i32) {
    %c0_i32 = arith.constant 0 : i32
    %c0_i32_0 = arith.constant 0 : i32
    %c0_i32_1 = arith.constant 0 : i32
    return %arg0, %c0_i32, %c0_i32_0 : i32, i32, i32
  }
  func.func @transform_1(%arg0: i32) -> (i32, i32, i32) {
    %c0_i32 = arith.constant 0 : i32
    %c0_i32_0 = arith.constant 0 : i32
    %c0_i32_1 = arith.constant 0 : i32
    %c0_i32_2 = arith.constant 0 : i32
    return %c0_i32, %c0_i32_0, %c0_i32_1 : i32, i32, i32
  }
  func.func @transform_2(%arg0: i32) -> (i32, i32) {
    %c0_i32 = arith.constant 0 : i32
    %c0_i32_0 = arith.constant 0 : i32
    %c0_i32_1 = arith.constant 0 : i32
    return %c0_i32, %c0_i32_0 : i32, i32
  }
  func.func @transform_3(%arg0: i32) -> (i32, i32) {
    %c0_i32 = arith.constant 0 : i32
    %c0_i32_0 = arith.constant 0 : i32
    %c0_i32_1 = arith.constant 0 : i32
    return %c0_i32, %c0_i32_0 : i32, i32
  }
  func.func @transform_4(%arg0: i32) -> (i32, i32, i32) {
    %c0_i32 = arith.constant 0 : i32
    %c0_i32_0 = arith.constant 0 : i32
    %c0_i32_1 = arith.constant 0 : i32
    return %arg0, %c0_i32, %c0_i32_0 : i32, i32, i32
  }
}

</mosaic_0001>

<bundles_post_ra>
// kernel: _lambda_.7
= control target key start
LH: loop header
LB: loop body
LE: loop exit
PB: predicated region body
PF: predicated region fallthrough
CT: control target
= control target key end

     0   :  { %s429_s15 = smov 0   ;;  %s455_s0 = inlined_call_operand.vmem [shape: f32[4,16,8], index: 0, kind: input, shape index: {}]   ;;  %s456_s1 = inlined_call_operand.vmem [shape: f32[1,8,128], index: 1, kind: input, shape index: {}]   ;;  %s457_s2 = inlined_call_operand.vmem [shape: f32[1,128], index: 2, kind: input, shape index: {}]   ;;  %s458_s3 = inlined_call_operand.vmem [shape: f32[1,128], index: 3, kind: input, shape index: {}]   ;;  %s459_s4 = inlined_call_operand.vmem [shape: f32[4,16,128], index: 4, kind: output, shape index: {}]  }
   0x1 LB: > { %s359_s16 = sadd.s32 4294967295, %s402_s15   ;;  %p363_p0 = scmp.ge.s32.totalorder %s402_s15, 1  ;;  %s402_s15 = sphi %s429_s15, %s14_s15  }
   0x2   : > { %p164_p1 = scmp.lt.s32.totalorder %s402_s15, 3 }
   0x4   : > { %p165_p2 = pnand %p363_p0, %p164_p1 }
   0x5   : > { %s364_s19 = sshll.u32 (!%p165_p2), %s359_s16, 1 }
   0x6   : > { %168 = sbr.rel (%p165_p2) target bundleno = 222 (0xde), region = 36  ;;  %p193_p3 = scmp.lt.s32.totalorder (!%p165_p2), %s364_s19, 3 }
   0xb   : > { %v213_v0 = vld [vmem:[%s456_s1] sm:$0xff]  ;;  %vm222_vm0 = vcmask 1043456   ;;  %s461_s19 = smov (!%p193_p3, %s364_s19), 3  ;;  %vm215_vm1 = vcmask 64512  }
   0xc   : > { %v214_v1 = vpack.c.bf16 %v213_v0, %v213_v0  ;;  %s376_s20 = sshll.u32 %s461_s19, 4  ;;  %v372_v9 = vld [vmem:[%s457_s2] ss:$0 sm:$0xff] }
   0xd   : > { %s197_s23 = scalar_lea.vmem %s455_s0, %s376_s20  ;;  %v373_v13 = vld [vmem:[%s458_s3] ss:$0 sm:$0xff]  ;;  %s204_s30 = scalar_lea.vmem %s459_s4, %s376_s20 }
   0xe   : > { %387 = vmatprep.subr.msk.bf16.mxu0 %vm222_vm0, %v214_v1  ;;  %v224_v2 = vsel %vm222_vm0, %v214_v1, 0  ;;  %v207_v3 = vld [vmem:[%s197_s23] sm:$0xff]  ;;  %v208_v4 = vld [vmem:[%s197_s23 + $0x8] sm:$0xff]  ;;  %v209_v5 = vld [vmem:[%s197_s23 + $0x10] sm:$0xff] }
   0xf   : > { %382 = vmatpush3.bf16.msra.mxu0 %v224_v2  ;;  %v211_v6 = vpack.c.bf16 %v208_v4, %v207_v3  ;;  %v210_v7 = vld [vmem:[%s197_s23 + $0x18] sm:$0xff] }
  0x10   : > { %v212_v8 = vpack.c.bf16 %v210_v7, %v209_v5 }
  0x11   : > { %383 = vmatprep.mubr.msk.bf16.mxu0 %vm215_vm1, %v211_v6 }
  0x12   : > { %384 = vmatmul.mubr.msk.bf16.vlgmr.msra.gmra.mxu0 %vm215_vm1, %v212_v8 }
  0xd2   : > { %v385_v10 = vpop.f32.mrf.mxu0 }
  0xd3   : > { %v284_v11 = vmul.f32 %v385_v10, %v372_v9 }
  0xd4   : > { %v260_v12 = vpop.f32.mrf.mxu0 }
  0xd5   : > { %v282_v14 = vmul.f32 %v372_v9, %v260_v12  ;;  %v295_v17 = vadd.f32 %v373_v13, %v284_v11 }
  0xd6   : > { %v386_v15 = vpop.f32.mrf.mxu0 }
  0xd7   : > { %v293_v16 = vadd.f32 %v373_v13, %v282_v14  ;;  %v285_v18 = vmul.f32 %v386_v15, %v372_v9  ;;  %299 = vst [vmem:[%s204_s30 + $0x10] sm:$0xff] %v295_v17 }
  0xd8   : > { %v263_v19 = vpop.f32.mrf.mxu0 }
  0xd9   : > { %297 = vst [vmem:[%s204_s30] sm:$0xff] %v293_v16  ;;  %v283_v20 = vmul.f32 %v372_v9, %v263_v19  ;;  %v296_v22 = vadd.f32 %v373_v13, %v285_v18 }
  0xdb   : > { %v294_v21 = vadd.f32 %v373_v13, %v283_v20  ;;  %300 = vst [vmem:[%s204_s30 + $0x18] sm:$0xff] %v296_v22 }
  0xdd   : > { %298 = vst [vmem:[%s204_s30 + $0x8] sm:$0xff] %v294_v21 }
  0xde PF: > { %s14_s15 = sadd.s32 1, %s402_s15  }
  0xdf   : > { %p11_p4 = scmp.ge.s32.totalorder %s14_s15, 4  }
  0xe1   :  { %13 = sbr.rel (!%p11_p4) target bundleno = 1 (0x1), region = 66 }

// kernel: _lambda_.4
= control target key start
LH: loop header
LB: loop body
LE: loop exit
PB: predicated region body
PF: predicated region fallthrough
CT: control target
= control target key end

     0   :  { %s879_s15 = smov 0   ;;  %s977_s0 = inlined_call_operand.vmem [shape: f32[4,16,6], index: 0, kind: input, shape index: {}]   ;;  %s978_s1 = inlined_call_operand.vmem [shape: f32[5,6,16], index: 1, kind: input, shape index: {}]   ;;  %s979_s2 = inlined_call_operand.vmem [shape: f32[1,16], index: 2, kind: input, shape index: {}]   ;;  %s980_s3 = inlined_call_operand.vmem [shape: f32[1,16], index: 3, kind: input, shape index: {}]   ;;  %s981_s4 = inlined_call_operand.vmem [shape: f32[4,16,16], index: 4, kind: output, shape index: {}]  }
   0x1 LB: > { %s737_s16 = sadd.s32 4294967295, %s852_s15   ;;  %p741_p0 = scmp.ge.s32.totalorder %s852_s15, 1  ;;  %s852_s15 = sphi %s879_s15, %s14_s15  }
   0x2   : > { %p164_p1 = scmp.lt.s32.totalorder %s852_s15, 3 }
   0x4   : > { %p165_p2 = pnand %p741_p0, %p164_p1 }
   0x5   : > { %s742_s21 = sshll.u32 (!%p165_p2), %s737_s16, 1 }
   0x6   : > { %168 = sbr.rel (%p165_p2) target bundleno = 281 (0x119), region = 36  ;;  %p193_p3 = scmp.lt.s32.totalorder (!%p165_p2), %s742_s21, 3 }
   0xb   : > { %v748_v0 = vld [vmem:[%s978_s1 + $0x8] sm:$0x3f]  ;;  %vm267_vm0 = vcmask 1042432   ;;  %v234_v1 = vld [vmem:[%s978_s1] sm:$0x3f]  ;;  %s983_s21 = smov (!%p193_p3, %s742_s21), 3 }
   0xc   : > { %v259_v2 = vpack.c.bf16 %v748_v0, %v748_v0  ;;  %v235_v3 = vpack.c.bf16 %v234_v1, %v234_v1  ;;  %v753_v4 = vld [vmem:[%s978_s1 + $0x10] sm:$0x3f]  ;;  %v756_v6 = vld [vmem:[%s978_s1 + $0x18] sm:$0x3f]  ;;  %s770_s26 = sshll.u32 %s983_s21, 4  ;;  %vm215_vm1 = vcmask 1041408  }
   0xd   : > { %v397_v5 = vpack.c.bf16 %v753_v4, %v753_v4  ;;  %v479_v9 = vpack.c.bf16 %v756_v6, %v756_v6  ;;  %s197_s29 = scalar_lea.vmem %s977_s0, %s770_s26  ;;  %v759_v10 = vld [vmem:[%s978_s1 + $0x20] sm:$0x3f]  ;;  %vm240_vm2 = vcmask 1046528   ;;  %vm260_vm3 = vcmask 48128   ;;  %s204_s12 = scalar_lea.vmem %s981_s4, %s770_s26 }
   0xe   : > { %817 = vmatprep.subr.msk.bf16.mxu0 %vm267_vm0, %v259_v2  ;;  %v269_v7 = vsel %vm267_vm0, %v259_v2, 0  ;;  %818 = vmatprep.subr.msk.bf16.mxu1 %vm267_vm0, %v235_v3  ;;  %v327_v8 = vsel %vm267_vm0, %v235_v3, 0  ;;  %v207_v11 = vld [vmem:[%s197_s29] sm:$0xff]  ;;  %v208_v12 = vld [vmem:[%s197_s29 + $0x8] sm:$0xff]  ;;  %v209_v13 = vld [vmem:[%s197_s29 + $0x10] sm:$0xff]  ;;  %vm378_vm4 = vcmask 1045504   ;;  %v918_v21 = vpack.c.bf16 %v759_v10, %v759_v10 }
   0xf   : > { %788 = vmatpush3.bf16.msra.mxu0 %v269_v7  ;;  %794 = vmatpush3.bf16.msra.mxu1 %v327_v8  ;;  %v216_v14 = vrot.slane %v207_v11, 6  ;;  %v217_v15 = vrot.slane %v208_v12, 6  ;;  %v210_v16 = vld [vmem:[%s197_s29 + $0x18] sm:$0xff]  ;;  %v219_v17 = vrot.slane %v209_v13, 6  ;;  %vm460_vm5 = vcmask 1044480  }
  0x10   : > { %819 = vmatprep.subr.msk.bf16.mxu0 %vm267_vm0, %v397_v5  ;;  %820 = vmatprep.subr.msk.bf16.mxu1 %vm267_vm0, %v479_v9  ;;  %v220_v18 = vrot.slane %v210_v16, 6  ;;  %v405_v19 = vsel %vm267_vm0, %v397_v5, 0  ;;  %v487_v20 = vsel %vm267_vm0, %v479_v9, 0  ;;  %vm542_vm6 = vcmask 1043456  }
  0x11   : > { %v218_v22 = vsel %vm215_vm1, %v216_v14, %v217_v15  ;;  %v228_v23 = vsel %vm215_vm1, 0.0, %v216_v14  ;;  %v230_v24 = vsel %vm215_vm1, %v217_v15, 0.0  ;;  %v924_v25 = vsel %vm215_vm1, 0.0, %v219_v17 }
  0x12   : > { %v241_v26 = vrot.slane %v228_v23, 1  ;;  %v242_v27 = vrot.slane %v218_v22, 1  ;;  %v244_v28 = vrot.slane %v230_v24, 1  ;;  %v232_v29 = vpack.c.bf16 %v218_v22, %v228_v23 }
  0x13   : > { %v221_v30 = vsel %vm215_vm1, %v219_v17, %v220_v18  ;;  %v231_v31 = vsel %vm215_vm1, %v220_v18, 0.0  ;;  %v246_v32 = vrot.slane %v924_v25, 1  ;;  %v379_v33 = vrot.slane %v228_v23, 2 }
  0x14   : > { %v243_v34 = vsel %vm240_vm2, %v241_v26, %v242_v27  ;;  %v245_v35 = vsel %vm240_vm2, %v242_v27, %v244_v28  ;;  %795 = vmatprep.mubr.msk.bf16.mxu1 %vm260_vm3, %v232_v29  ;;  %v247_v36 = vrot.slane %v221_v30, 1  ;;  %v249_v37 = vrot.slane %v231_v31, 1 }
  0x15   : > { %v255_v38 = vpack.c.bf16 %v245_v35, %v243_v34  ;;  %v233_v39 = vpack.c.bf16 %v221_v30, %v924_v25  ;;  %v380_v40 = vrot.slane %v218_v22, 2  ;;  %v382_v41 = vrot.slane %v230_v24, 2 }
  0x16   : > { %v248_v42 = vsel %vm240_vm2, %v246_v32, %v247_v36  ;;  %v250_v43 = vsel %vm240_vm2, %v247_v36, %v249_v37  ;;  %v461_v44 = vrot.slane %v228_v23, 3  ;;  %v462_v45 = vrot.slane %v218_v22, 3 }
  0x17   : > { %789 = vmatprep.mubr.msk.bf16.mxu0 %vm260_vm3, %v255_v38  ;;  %v256_v46 = vpack.c.bf16 %v250_v43, %v248_v42  ;;  %796 = vmatmul.mubr.msk.bf16.vlgmr.msra.gmra.mxu1 %vm260_vm3, %v233_v39  ;;  %v381_v47 = vsel %vm378_vm4, %v379_v33, %v380_v40  ;;  %v383_v48 = vsel %vm378_vm4, %v380_v40, %v382_v41  ;;  %v464_v49 = vrot.slane %v230_v24, 3  ;;  %v762_v39 = vld [vmem:[%s979_s2] ss:$0 sm:$0xff] }
  0x18   : > { %806 = vmatpush3.bf16.msra.mxu1 %v487_v20  ;;  %v393_v50 = vpack.c.bf16 %v383_v48, %v381_v47  ;;  %v463_v51 = vsel %vm460_vm5, %v461_v44, %v462_v45  ;;  %v384_v52 = vrot.slane %v924_v25, 2  ;;  %v385_v53 = vrot.slane %v221_v30, 2  ;;  %v763_v43 = vld [vmem:[%s980_s3] ss:$0 sm:$0xff] }
  0x19   : > { %790 = vmatmul.mubr.msk.bf16.vlgmr.msra.gmra.mxu0 %vm260_vm3, %v256_v46  ;;  %v465_v54 = vsel %vm460_vm5, %v462_v45, %v464_v49  ;;  %v387_v55 = vrot.slane %v231_v31, 2  ;;  %v466_v56 = vrot.slane %v924_v25, 3  ;;  %v467_v57 = vrot.slane %v221_v30, 3 }
  0x1a   : > { %800 = vmatpush3.bf16.msra.mxu0 %v405_v19  ;;  %801 = vmatprep.mubr.msk.bf16.mxu0 %vm260_vm3, %v393_v50  ;;  %v475_v58 = vpack.c.bf16 %v465_v54, %v463_v51  ;;  %v386_v59 = vsel %vm378_vm4, %v384_v52, %v385_v53  ;;  %v469_v60 = vrot.slane %v231_v31, 3  ;;  %v543_v61 = vrot.slane %v228_v23, 4 }
  0x1b   : > { %821 = vmatprep.subr.msk.bf16.mxu0 %vm267_vm0, %v918_v21  ;;  %v388_v62 = vsel %vm378_vm4, %v385_v53, %v387_v55  ;;  %v468_v63 = vsel %vm460_vm5, %v466_v56, %v467_v57  ;;  %v544_v0 = vrot.slane %v218_v22, 4  ;;  %v546_v1 = vrot.slane %v230_v24, 4 }
  0x1c   : > { %807 = vmatprep.mubr.msk.bf16.mxu1 %vm260_vm3, %v475_v58  ;;  %v470_v2 = vsel %vm460_vm5, %v467_v57, %v469_v60  ;;  %v394_v3 = vpack.c.bf16 %v388_v62, %v386_v59  ;;  %v548_v8 = vrot.slane %v924_v25, 4  ;;  %v549_v9 = vrot.slane %v221_v30, 4 }
  0x1d   : > { %v476_v4 = vpack.c.bf16 %v470_v2, %v468_v63  ;;  %v545_v5 = vsel %vm542_vm6, %v543_v61, %v544_v0  ;;  %v547_v6 = vsel %vm542_vm6, %v544_v0, %v546_v1  ;;  %v551_v10 = vrot.slane %v231_v31, 4 }
  0x1e   : > { %v557_v7 = vpack.c.bf16 %v547_v6, %v545_v5  ;;  %v569_v11 = vsel %vm267_vm0, %v918_v21, 0  ;;  %v550_v12 = vsel %vm542_vm6, %v548_v8, %v549_v9  ;;  %vm674_vm7 = vcmask 130048  }
  0x1f   : > { %808 = vmatmul.mubr.msk.bf16.vlgmr.msra.gmra.mxu1 %vm260_vm3, %v476_v4  ;;  %v552_v13 = vsel %vm542_vm6, %v549_v9, %v551_v10 }
  0x20   : > { %v558_v14 = vpack.c.bf16 %v552_v13, %v550_v12 }
  0x21   : > { %802 = vmatmul.mubr.msk.bf16.vlgmr.msra.gmra.mxu0 %vm260_vm3, %v394_v3 }
  0x22   : > { %812 = vmatpush3.bf16.msra.mxu0 %v569_v11  ;;  %813 = vmatprep.mubr.msk.bf16.mxu0 %vm260_vm3, %v557_v7 }
  0x29   : > { %814 = vmatmul.mubr.msk.bf16.vlgmr.msra.gmra.mxu0 %vm260_vm3, %v558_v14 }
  0xd7   : > { %v797_v15 = vpop.f32.mrf.mxu1 }
  0xd9   : > { %v791_v16 = vpop.f32.mrf.mxu0  ;;  %v363_v17 = vpop.f32.mrf.mxu1 }
  0xda   : > { %v372_v25 = vadd.f32 %v797_v15, %v791_v16 }
  0xdb   : > { %v305_v18 = vpop.f32.mrf.mxu0  ;;  %v798_v19 = vpop.f32.mrf.mxu1 }
  0xdc   : > { %v364_v27 = vadd.f32 %v363_v17, %v305_v18 }
  0xdd   : > { %v792_v20 = vpop.f32.mrf.mxu0  ;;  %v366_v22 = vpop.f32.mrf.mxu1 }
  0xde   : > { %v375_v31 = vadd.f32 %v798_v19, %v792_v20 }
  0xdf   : > { %v308_v21 = vpop.f32.mrf.mxu0  ;;  %v809_v24 = vpop.f32.mrf.mxu1 }
  0xe0   : > { %v367_v34 = vadd.f32 %v366_v22, %v308_v21 }
  0xe1   : > { %v803_v23 = vpop.f32.mrf.mxu0  ;;  %v523_v29 = vpop.f32.mrf.mxu1 }
  0xe2   : > { %v458_v28 = vadd.f32 %v803_v23, %v372_v25 }
  0xe3   : > { %v441_v26 = vpop.f32.mrf.mxu0  ;;  %v810_v37 = vpop.f32.mrf.mxu1 }
  0xe4   : > { %v456_v32 = vadd.f32 %v441_v26, %v364_v27  ;;  %v540_v35 = vadd.f32 %v809_v24, %v458_v28 }
  0xe5   : > { %v804_v30 = vpop.f32.mrf.mxu0  ;;  %v526_v48 = vpop.f32.mrf.mxu1 }
  0xe6   : > { %v459_v36 = vadd.f32 %v804_v30, %v375_v31  ;;  %v538_v40 = vadd.f32 %v523_v29, %v456_v32 }
  0xe7   : > { %v444_v33 = vpop.f32.mrf.mxu0 }
  0xe8   : > { %v457_v41 = vadd.f32 %v444_v33, %v367_v34  ;;  %v541_v45 = vadd.f32 %v810_v37, %v459_v36 }
  0xe9   : > { %v815_v38 = vpop.f32.mrf.mxu0 }
  0xea   : > { %v622_v42 = vadd.f32 %v815_v38, %v540_v35  ;;  %v539_v50 = vadd.f32 %v526_v48, %v457_v41 }
  0xeb   : > { %v605_v44 = vpop.f32.mrf.mxu0 }
  0xec   : > { %v633_v46 = vmul.f32 %v762_v39, %v622_v42  ;;  %v620_v47 = vadd.f32 %v605_v44, %v538_v40 }
  0xed   : > { %v816_v49 = vpop.f32.mrf.mxu0 }
  0xee   : > { %v644_v51 = vadd.f32 %v763_v43, %v633_v46  ;;  %v631_v52 = vmul.f32 %v762_v39, %v620_v47  ;;  %v623_v53 = vadd.f32 %v816_v49, %v541_v45 }
  0xef   : > { %v608_v54 = vpop.f32.mrf.mxu0 }
  0xf0   : > { %v766_v55 = vmul.f32 -1.442695, %v644_v51  ;;  %v642_v56 = vadd.f32 %v763_v43, %v631_v52  ;;  %v634_v57 = vmul.f32 %v762_v39, %v623_v53  ;;  %v621_v58 = vadd.f32 %v608_v54, %v539_v50 }
  0xf2   : > { %830 = vpow2.f32 %v766_v55  ;;  %v764_v59 = vmul.f32 -1.442695, %v642_v56  ;;  %v645_v60 = vadd.f32 %v763_v43, %v634_v57  ;;  %v632_v61 = vmul.f32 %v762_v39, %v621_v58 }
  0xf4   : > { %832 = vpow2.f32 %v764_v59  ;;  %v767_v62 = vmul.f32 -1.442695, %v645_v60  ;;  %v643_v63 = vadd.f32 %v763_v43, %v632_v61 }
  0xf6   : > { %834 = vpow2.f32 %v767_v62  ;;  %v765_v0 = vmul.f32 -1.442695, %v643_v63 }
  0xf8   : > { %836 = vpow2.f32 %v765_v0 }
  0xff   : > { %v831_v1 = vpop.eup %830 }
 0x100   : > { %v660_v2 = vadd.f32 1.0, %v831_v1 }
 0x101   : > { %v833_v3 = vpop.eup %832 }
 0x102   : > { %v658_v4 = vadd.f32 1.0, %v833_v3  ;;  %838 = vrcp.f32 %v660_v2 }
 0x103   : > { %v835_v5 = vpop.eup %834 }
 0x104   : > { %840 = vrcp.f32 %v658_v4  ;;  %v661_v6 = vadd.f32 1.0, %v835_v5 }
 0x105   : > { %v837_v7 = vpop.eup %836 }
 0x106   : > { %v659_v8 = vadd.f32 1.0, %v837_v7  ;;  %842 = vrcp.f32 %v661_v6 }
 0x108   : > { %844 = vrcp.f32 %v659_v8 }
 0x10f   : > { %v839_v9 = vpop.eup %838 }
 0x110   : > { %v672_v12 = vmul.f32 %v839_v9, %v644_v51 }
 0x111   : > { %v841_v10 = vpop.eup %840 }
 0x112   : > { %v670_v11 = vmul.f32 %v841_v10, %v642_v56  ;;  %677 = vst.msk [vmem:[%s204_s12 + $0x10] sm:$0xff] %vm674_vm7, %v672_v12 }
 0x113   : > { %v843_v13 = vpop.eup %842 }
 0x114   : > { %675 = vst.msk [vmem:[%s204_s12] sm:$0xff] %vm674_vm7, %v670_v11  ;;  %v673_v16 = vmul.f32 %v843_v13, %v645_v60 }
 0x115   : > { %v845_v14 = vpop.eup %844 }
 0x116   : > { %v671_v15 = vmul.f32 %v845_v14, %v643_v63  ;;  %678 = vst.msk [vmem:[%s204_s12 + $0x18] sm:$0xff] %vm674_vm7, %v673_v16 }
 0x118   : > { %676 = vst.msk [vmem:[%s204_s12 + $0x8] sm:$0xff] %vm674_vm7, %v671_v15 }
 0x119 PF: > { %s14_s15 = sadd.s32 1, %s852_s15  }
 0x11a   : > { %p11_p4 = scmp.ge.s32.totalorder %s14_s15, 4  }
 0x11c   :  { %13 = sbr.rel (!%p11_p4) target bundleno = 1 (0x1), region = 70 }

// kernel: _lambda_.5
= control target key start
LH: loop header
LB: loop body
LE: loop exit
PB: predicated region body
PF: predicated region fallthrough
CT: control target
= control target key end

     0   :  { %s6890_s0 = inlined_call_operand.vmem [shape: f32[4,16,16], index: 0, kind: input, shape index: {}]   ;;  %s6891_s1 = inlined_call_operand.hbm [shape: f32[2,16,32], index: 1, kind: input, shape index: {}]   ;;  %s6892_s2 = inlined_call_operand.hbm [shape: f32[2,1,32], index: 2, kind: input, shape index: {}]   ;;  %s6893_s3 = inlined_call_operand.hbm [shape: f32[2,1,32], index: 3, kind: input, shape index: {}]   ;;  %s6894_s4 = inlined_call_operand.hbm [shape: f32[5,2,2,32], index: 4, kind: input, shape index: {}]   ;;  %s6895_s5 = inlined_call_operand.hbm [shape: f32[2,1,32], index: 5, kind: input, shape index: {}]   ;;  %s6896_s6 = inlined_call_operand.hbm [shape: f32[2,1,32], index: 6, kind: input, shape index: {}]   ;;  %s6897_s7 = inlined_call_operand.vmem [shape: f32[2,32,4], index: 7, kind: input, shape index: {}]   ;;  %s6898_s8 = inlined_call_operand.hbm [shape: f32[1,4], index: 8, kind: input, shape index: {}]   ;;  %s6899_s9 = inlined_call_operand.hbm [shape: f32[4,4], index: 9, kind: input, shape index: {}]   ;;  %s6900_s10 = inlined_call_operand.hbm [shape: f32[1,4], index: 10, kind: input, shape index: {}]   ;;  %s6901_s11 = inlined_call_operand.hbm [shape: f32[4,8], index: 11, kind: input, shape index: {}]   ;;  %s6902_s12 = inlined_call_operand.vmem [shape: f32[4,8], index: 12, kind: input, shape index: {}]   ;;  %s6903_s13 = inlined_call_operand.vmem [shape: f32[8,2], index: 13, kind: input, shape index: {}]   ;;  %s6904_s14 = inlined_call_operand.hbm [shape: f32[1,2], index: 14, kind: input, shape index: {}]   ;;  %s6905_s15 = inlined_call_operand.hbm [shape: f32[2,4,32], index: 15, kind: input, shape index: {}]   ;;  %s6906_s16 = inlined_call_operand.hbm [shape: f32[2,2,32], index: 16, kind: input, shape index: {}]   ;;  %s6907_s17 = inlined_call_operand.hbm [shape: f32[2,1,32], index: 17, kind: input, shape index: {}]   ;;  %s6908_s18 = inlined_call_operand.vmem [shape: f32[2,32,16], index: 18, kind: input, shape index: {}]   ;;  %s6909_s19 = inlined_call_operand.hbm [shape: f32[1,16], index: 19, kind: input, shape index: {}]   ;;  %s6910_s20 = inlined_call_operand.hbm [shape: f32[1,16], index: 20, kind: input, shape index: {}]   ;;  %s6911_s21 = inlined_call_operand.vmem [shape: f32[5,16,16], index: 21, kind: input, shape index: {}]   ;;  %s6912_s22 = inlined_call_operand.vmem [shape: f32[5,16,16], index: 22, kind: input, shape index: {}]   ;;  %s6913_s23 = inlined_call_operand.vmem [shape: f32[1,16], index: 23, kind: input, shape index: {}]   ;;  %s6914_s24 = inlined_call_operand.vmem [shape: f32[1,16], index: 24, kind: input, shape index: {}]   ;;  %s6915_s25 = inlined_call_operand.vmem [shape: f32[4,16,16], index: 25, kind: output, shape index: {}]  }
   0x1   :  { %6986 = sst [smem:[#allocation77_spill]] %s6890_s0 }
   0x2   :  { %6987 = sst [smem:[#allocation78_spill]] %s6891_s1 }
   0x3   :  { %6988 = sst [smem:[#allocation79_spill]] %s6892_s2 }
   0x4   :  { %6989 = sst [smem:[#allocation80_spill]] %s6893_s3 }
   0x5   :  { %6990 = sst [smem:[#allocation81_spill]] %s6894_s4 }
   0x6   :  { %6991 = sst [smem:[#allocation82_spill]] %s6895_s5 }
   0x7   :  { %6992 = sst [smem:[#allocation83_spill]] %s6896_s6 }
   0x8   :  { %6993 = sst [smem:[#allocation84_spill]] %s6897_s7 }
   0x9   :  { %6994 = sst [smem:[#allocation85_spill]] %s6898_s8 }
   0xa   :  { %6995 = sst [smem:[#allocation86_spill]] %s6899_s9 }
   0xb   :  { %6996 = sst [smem:[#allocation87_spill]] %s6901_s11 }
   0xc   :  { %6997 = sst [smem:[#allocation88_spill]] %s6905_s15 }
   0xd   :  { %6998 = sst [smem:[#allocation89_spill]] %s6914_s24 }
   0xe   :  { %6999 = sst [smem:[#allocation90_spill]] %s6915_s25 }
   0xf   :  { %30 = vsyncpa [#allocation3], 0 }
  0x10   :  { %31 = vsyncpa [#allocation5], 0 }
  0x11   :  { %32 = vsyncpa [#allocation8], 0 }
  0x12   :  { %33 = vsyncpa [#allocation11], 0 }
  0x13   :  { %34 = vsyncpa [#allocation14], 0 }
  0x14   :  { %35 = vsyncpa [#allocation17], 0 }
  0x15   :  { %36 = vsyncpa [#allocation20], 0 }
  0x16   :  { %37 = vsyncpa [#allocation23], 0 }
  0x17   :  { %38 = vsyncpa [#allocation26], 0  ;;  %s5462_s29 = smov 0  }
  0x18 LB: > { %s5305_s2 = smov [#allocation4]   ;;  %s6917_s30 = sadd.s32 4294967295, %s5303_s29   ;;  %s5303_s29 = sphi %s5462_s29, %s44_s29  }
  0x19   : > { %s630_s6 = sshll.u32 %s5305_s2, 4  ;;  %p4169_p0 = scmp.ge.s32.totalorder %s5303_s29, 1  ;;  %s631_s6 = int_to_ptr.vmem [resolvable:$true] %s630_s6 }
  0x1a   : > { %p605_p1 = scmp.lt.s32.totalorder %s5303_s29, 3  ;;  %p5472_p2 = scmp.eq.s32.totalorder %s6917_s30, 0 }
  0x1b   : > { %s5306_s26 = smov [#allocation7]   ;;  %s5307_s27 = smov [#allocation10]  }
  0x1c   : > { %s7000_s7 = scalar_select %p5472_p2, 1, 0 }
  0x1d   : > { %p5476_p3 = pnand %p4169_p0, %p605_p1  ;;  %s656_s1 = sshll.u32 %s5306_s26, 4  ;;  %s5482_s1 = int_to_ptr.vmem [resolvable:$true] %s656_s1 }
  0x1e   : > { %s5490_s4 = sshll.u32 %s5307_s27, 4  ;;  %s4856_s9 = scalar_lea.vmem %s631_s6, 32  ;;  %s683_s4 = int_to_ptr.vmem [resolvable:$true] %s5490_s4 }
  0x1f   : > { %s7001_s3 = scalar_select %p5476_p3, 1, 0 }
  0x20   : > { %p4613_p4 = pneg %p5476_p3  ;;  %p4857_p7 = scmp.ne.s32.totalorder %s631_s6, %s4856_s9 }
  0x21   : > { %p4864_p10 = scmp.lt.s32.totalorder %s631_s6, %s631_s6  ;;  %p4865_p11 = scmp.lt.s32.totalorder %s4856_s9, %s4856_s9 }
  0x22   : > { %p5486_p5 = pnand %p5472_p2, %p4613_p4 }
  0x23   : > { %p4866_p12 = por %p4865_p11, %p4864_p10 }
  0x24   : > { %p5494_p6 = pneg %p5486_p5 }
  0x26   : > { %p4859_p8 = pnand %p4857_p7, %p5494_p6 }
  0x28   : > { %p4860_p9 = pneg %p4859_p8 }
  0x2a   : > { %p4867_p13 = pnand %p4866_p12, %p4860_p9 }
  0x2c   : > { %4870 = shalt.err (!%p4867_p13)
}
  0x2d   : > { %s6918_s5 = smov 16   ;;  %s6925_s0 = smov 1  }
  0x2e   : > { %s7004_s27 = sld [smem:[#allocation79_spill]]  ;;  %s4882_s30 = scalar_lea.vmem %s5482_s1, 320 }
  0x2f   : > { %p4883_p0 = scmp.ne.s32.totalorder %s5482_s1, %s4882_s30  ;;  %p4890_p7 = scmp.lt.s32.totalorder %s5482_s1, %s5482_s1 }
  0x30   : > { %p4891_p8 = scmp.lt.s32.totalorder %s4882_s30, %s4882_s30 }
  0x31   : > { %p4885_p1 = pnand %p4883_p0, %p5494_p6 }
  0x32   : > { %p4892_p9 = por %p4891_p8, %p4890_p7 }
  0x33   : > { %p4886_p4 = pneg %p4885_p1 }
  0x34   : > { %4619 = dma.hbm_to_vmem [thread:$0]  (!%p5486_p5), %s7004_s27, 32, %s631_s6, [#allocation5], %s6918_s5, %s6918_s5, %s6925_s0  }
  0x35   : > { %p4893_p10 = pnand %p4892_p9, %p4886_p4 }
  0x37   : > { %4896 = shalt.err (!%p4893_p10)
}
  0x38   : > { %s6920_s9 = smov 32   ;;  %s6921_s25 = smov 2  }
  0x39   : > { %s7005_s26 = sld [smem:[#allocation81_spill]]  ;;  %s5312_s27 = smov [#allocation13]  }
  0x3a   : > { %s710_s30 = sshll.u32 %s5312_s27, 4  ;;  %s4908_s5 = scalar_lea.vmem %s683_s4, 32  ;;  %s711_s30 = int_to_ptr.vmem [resolvable:$true] %s710_s30 }
  0x3b   : > { %p4909_p11 = scmp.ne.s32.totalorder %s683_s4, %s4908_s5  ;;  %p4916_p0 = scmp.lt.s32.totalorder %s683_s4, %s683_s4 }
  0x3c   : > { %p4917_p1 = scmp.lt.s32.totalorder %s4908_s5, %s4908_s5 }
  0x3d   : > { %p4911_p12 = pnand %p4909_p11, %p5494_p6 }
  0x3e   : > { %p4918_p4 = por %p4917_p1, %p4916_p0 }
  0x3f   : > { %4625 = dma.hbm_to_vmem [thread:$0]  (!%p5486_p5), %s7005_s26, 320, %s5482_s1, [#allocation8], %s6920_s9, %s6920_s9, %s6921_s25  }
  0x40   : > { %p4912_p13 = pneg %p4911_p12 }
  0x42   : > { %p4919_p7 = pnand %p4918_p4, %p4912_p13 }
  0x44   : > { %4922 = shalt.err (!%p4919_p7)
}
  0x45   : > { %s7006_s24 = smov 16   ;;  %s7007_s2 = sld [smem:[#allocation83_spill]] }
  0x46   : > { %s4934_s26 = scalar_lea.vmem %s711_s30, 64  ;;  %p4942_p11 = scmp.lt.s32.totalorder %s711_s30, %s711_s30 }
  0x47   : > { %p4935_p8 = scmp.ne.s32.totalorder %s711_s30, %s4934_s26  ;;  %p4943_p12 = scmp.lt.s32.totalorder %s4934_s26, %s4934_s26 }
  0x49   : > { %p4937_p9 = pnand %p4935_p8, %p5494_p6  ;;  %p4944_p13 = por %p4943_p12, %p4942_p11 }
  0x4b   : > { %4631 = dma.hbm_to_vmem [thread:$0]  (!%p5486_p5), %s7007_s2, 32, %s683_s4, [#allocation11], %s7006_s24, %s7006_s24, %s6925_s0  }
  0x4c   : > { %p4938_p10 = pneg %p4937_p9 }
  0x4e   : > { %p4945_p0 = pnand %p4944_p13, %p4938_p10 }
  0x50   : > { %4948 = shalt.err (!%p4945_p0)
}
  0x51   : > { %s7008_s9 = sld [smem:[#allocation86_spill]]  ;;  %s5313_s6 = smov [#allocation16]  }
  0x52   : > { %s732_s4 = sshll.u32 %s5313_s6, 4  ;;  %s5314_s1 = smov [#allocation19]   ;;  %s733_s4 = int_to_ptr.vmem [resolvable:$true] %s732_s4 }
  0x53   : > { %s759_s2 = sshll.u32 %s5314_s1, 4  ;;  %s4960_s25 = scalar_lea.vmem %s733_s4, 64  ;;  %s760_s2 = int_to_ptr.vmem [resolvable:$true] %s759_s2 }
  0x54   : > { %p4961_p1 = scmp.ne.s32.totalorder %s733_s4, %s4960_s25  ;;  %p4968_p8 = scmp.lt.s32.totalorder %s733_s4, %s733_s4 }
  0x55   : > { %p4969_p9 = scmp.lt.s32.totalorder %s4960_s25, %s4960_s25 }
  0x56   : > { %p4963_p4 = pnand %p4961_p1, %p5494_p6 }
  0x57   : > { %4637 = dma.hbm_to_vmem [thread:$0]  (!%p5486_p5), %s7008_s9, 64, %s711_s30, [#allocation14]  }
  0x58   : > { %p4964_p7 = pneg %p4963_p4  ;;  %p4970_p10 = por %p4969_p9, %p4968_p8 }
  0x5a   : > { %p4971_p11 = pnand %p4970_p10, %p4964_p7 }
  0x5c   : > { %4974 = shalt.err (!%p4971_p11)
}
  0x5d   : > { %s7009_s11 = sld [smem:[#allocation87_spill]]  ;;  %s4986_s9 = scalar_lea.vmem %s760_s2, 128 }
  0x5e   : > { %p4987_p12 = scmp.ne.s32.totalorder %s760_s2, %s4986_s9  ;;  %p4994_p1 = scmp.lt.s32.totalorder %s760_s2, %s760_s2 }
  0x5f   : > { %p4995_p4 = scmp.lt.s32.totalorder %s4986_s9, %s4986_s9 }
  0x60   : > { %p4989_p13 = pnand %p4987_p12, %p5494_p6 }
  0x61   : > { %p4996_p2 = por %p4995_p4, %p4994_p1 }
  0x62   : > { %p4990_p0 = pneg %p4989_p13 }
  0x63   : > { %4643 = dma.hbm_to_vmem [thread:$0]  (!%p5486_p5), %s7009_s11, 64, %s733_s4, [#allocation17]  }
  0x64   : > { %p4997_p3 = pnand %p4996_p2, %p4990_p0 }
  0x66   : > { %5000 = shalt.err (!%p4997_p3)
}
  0x67   : > { %s5315_s25 = smov 64   ;;  %s5316_s30 = smov 4  }
  0x68   : > { %s7010_s15 = sld [smem:[#allocation88_spill]]  ;;  %s5317_s4 = smov [#allocation22]  }
  0x69   : > { %s785_s1 = sshll.u32 %s5317_s4, 4  ;;  %s5318_s26 = smov [#allocation2]   ;;  %s786_s1 = int_to_ptr.vmem [resolvable:$true] %s785_s1 }
  0x6a   : > { %s617_s5 = sshll.u32 %s5318_s26, 4  ;;  %s5012_s0 = scalar_lea.vmem %s786_s1, 32  ;;  %s618_s5 = int_to_ptr.vmem [resolvable:$true] %s617_s5 }
  0x6b   : > { %p5013_p7 = scmp.ne.s32.totalorder %s786_s1, %s5012_s0  ;;  %p5020_p3 = scmp.lt.s32.totalorder %s786_s1, %s786_s1 }
  0x6c   : > { %p5021_p9 = scmp.lt.s32.totalorder %s5012_s0, %s5012_s0 }
  0x6d   : > { %p5015_p8 = pnand %p5013_p7, %p5494_p6 }
  0x6e   : > { %4649 = dma.hbm_to_vmem [thread:$0]  (!%p5486_p5), %s7010_s15, 128, %s760_s2, [#allocation20], %s5315_s25, %s5315_s25, %s5316_s30  }
  0x6f   : > { %p5016_p2 = pneg %p5015_p8  ;;  %p5022_p10 = por %p5021_p9, %p5020_p3 }
  0x71   : > { %p5023_p11 = pnand %p5022_p10, %p5016_p2 }
  0x73   : > { %5026 = shalt.err (!%p5023_p11)
}
  0x74   : > { %s7011_s9 = smov 1   ;;  %s5038_s30 = scalar_lea.vmem %s618_s5, 512 }
  0x75   : > { %4655 = dma.hbm_to_vmem [thread:$0]  (!%p5486_p5), %s6907_s17, 32, %s786_s1, [#allocation23], %s7006_s24, %s7006_s24, %s7011_s9  }
  0x76   : > { %p5039_p12 = scmp.ne.s32.totalorder %s618_s5, %s5038_s30  ;;  %p5046_p1 = scmp.lt.s32.totalorder %s618_s5, %s618_s5 }
  0x77   : > { %p5047_p4 = scmp.lt.s32.totalorder %s5038_s30, %s5038_s30 }
  0x78   : > { %p5041_p13 = pnand %p5039_p12, %p5494_p6 }
  0x79   : > { %p5048_p7 = por %p5047_p4, %p5046_p1 }
  0x7a   : > { %p5042_p0 = pneg %p5041_p13 }
  0x7c   : > { %p5049_p8 = pnand %p5048_p7, %p5042_p0 }
  0x7e   : > { %5052 = shalt.err (!%p5049_p8)
}
  0x7f   : > { %s5319_s0 = smov 128   ;;  %s5320_s27 = smov 8  }
  0x80   : > { %s7012_s26 = sld [smem:[#allocation78_spill]]  ;;  %s5321_s1 = smov [#allocation6]  }
  0x81   : > { %s643_s2 = sshll.u32 %s5321_s1, 4  ;;  %s5322_s25 = smov [#allocation9]   ;;  %s644_s2 = int_to_ptr.vmem [resolvable:$true] %s643_s2 }
  0x82   : > { %s669_s11 = sshll.u32 %s5322_s25, 4  ;;  %s5064_s15 = scalar_lea.vmem %s644_s2, 32  ;;  %s670_s11 = int_to_ptr.vmem [resolvable:$true] %s669_s11 }
  0x83   : > { %p5065_p2 = scmp.ne.s32.totalorder %s644_s2, %s5064_s15  ;;  %p5072_p10 = scmp.lt.s32.totalorder %s644_s2, %s644_s2 }
  0x84   : > { %p5073_p11 = scmp.lt.s32.totalorder %s5064_s15, %s5064_s15 }
  0x85   : > { %p5067_p3 = pnand %p5065_p2, %p5494_p6 }
  0x86   : > { %4616 = dma.hbm_to_vmem [thread:$0]  (!%p5486_p5), %s7012_s26, 512, %s618_s5, [#allocation3], %s5319_s0, %s5319_s0, %s5320_s27  }
  0x87   : > { %p5068_p9 = pneg %p5067_p3  ;;  %p5074_p12 = por %p5073_p11, %p5072_p10 }
  0x89   : > { %p5075_p13 = pnand %p5074_p12, %p5068_p9 }
  0x8b   : > { %5078 = shalt.err (!%p5075_p13)
}
  0x8c   : > { %s7013_s0 = sld [smem:[#allocation80_spill]]  ;;  %s5090_s27 = scalar_lea.vmem %s670_s11, 32 }
  0x8d   : > { %p5091_p0 = scmp.ne.s32.totalorder %s670_s11, %s5090_s27  ;;  %p5098_p7 = scmp.lt.s32.totalorder %s670_s11, %s670_s11 }
  0x8e   : > { %p5099_p8 = scmp.lt.s32.totalorder %s5090_s27, %s5090_s27 }
  0x8f   : > { %p5093_p1 = pnand %p5091_p0, %p5494_p6 }
  0x90   : > { %p5100_p2 = por %p5099_p8, %p5098_p7 }
  0x91   : > { %p5094_p4 = pneg %p5093_p1 }
  0x92   : > { %4622 = dma.hbm_to_vmem [thread:$0]  (!%p5486_p5), %s7013_s0, 32, %s644_s2, [#allocation5], %s7006_s24, %s7006_s24, %s7011_s9  }
  0x93   : > { %p5101_p3 = pnand %p5100_p2, %p5094_p4 }
  0x95   : > { %5104 = shalt.err (!%p5101_p3)
}
  0x96   : > { %s7014_s4 = sld [smem:[#allocation82_spill]]  ;;  %s5323_s26 = smov [#allocation12]  }
  0x97   : > { %s699_s1 = sshll.u32 %s5323_s26, 4  ;;  %s5324_s2 = smov [#allocation15]   ;;  %s700_s1 = int_to_ptr.vmem [resolvable:$true] %s699_s1 }
  0x98   : > { %s721_s25 = sshll.u32 %s5324_s2, 4  ;;  %s5116_s5 = scalar_lea.vmem %s700_s1, 16  ;;  %s722_s25 = int_to_ptr.vmem [resolvable:$true] %s721_s25 }
  0x99   : > { %p5117_p9 = scmp.ne.s32.totalorder %s700_s1, %s5116_s5  ;;  %s5123_s30 = scalar_lea.vmem %s700_s1, 32 }
  0x9a   : > { %p5124_p12 = scmp.lt.s32.totalorder %s700_s1, %s700_s1  ;;  %p5125_p13 = scmp.lt.s32.totalorder %s5123_s30, %s5116_s5 }
  0x9b   : > { %p5119_p10 = pnand %p5117_p9, %p5494_p6 }
  0x9c   : > { %4628 = dma.hbm_to_vmem [thread:$0]  (!%p5486_p5), %s7014_s4, 32, %s670_s11, [#allocation8], %s7006_s24, %s7006_s24, %s7011_s9  }
  0x9d   : > { %p5120_p11 = pneg %p5119_p10  ;;  %p5126_p0 = por %p5125_p13, %p5124_p12 }
  0x9f   : > { %p5127_p1 = pnand %p5126_p0, %p5120_p11 }
  0xa1   : > { %5130 = shalt.err (!%p5127_p1)
}
  0xa2   : > { %s7015_s24 = sld [smem:[#allocation85_spill]]  ;;  %s5142_s9 = scalar_lea.vmem %s722_s25, 16 }
  0xa3   : > { %p5143_p4 = scmp.ne.s32.totalorder %s722_s25, %s5142_s9  ;;  %s5149_s27 = scalar_lea.vmem %s722_s25, 32 }
  0xa4   : > { %p5150_p2 = scmp.lt.s32.totalorder %s722_s25, %s722_s25  ;;  %p5151_p3 = scmp.lt.s32.totalorder %s5149_s27, %s5142_s9 }
  0xa5   : > { %p5145_p7 = pnand %p5143_p4, %p5494_p6 }
  0xa6   : > { %p5152_p9 = por %p5151_p3, %p5150_p2 }
  0xa7   : > { %p5146_p8 = pneg %p5145_p7 }
  0xa8   : > { %4634 = dma.hbm_to_vmem [thread:$0]  (!%p5486_p5), %s7015_s24, 16, %s700_s1, [#allocation11]  }
  0xa9   : > { %p5153_p10 = pnand %p5152_p9, %p5146_p8 }
  0xab   : > { %5156 = shalt.err (!%p5153_p10)
}
  0xac   : > { %4640 = dma.hbm_to_vmem [thread:$0]  (!%p5486_p5), %s6900_s10, 16, %s722_s25, [#allocation14]  }
  0xad   : > { %s5325_s4 = smov [#allocation18]   ;;  %s5326_s1 = smov [#allocation21]  }
  0xae   : > { %s749_s26 = sshll.u32 %s5325_s4, 4  ;;  %s772_s2 = sshll.u32 %s5326_s1, 4  ;;  %s750_s26 = int_to_ptr.vmem [resolvable:$true] %s749_s26  ;;  %s773_s2 = int_to_ptr.vmem [resolvable:$true] %s772_s2 }
  0xaf   : > { %s5168_s5 = scalar_lea.vmem %s750_s26, 16  ;;  %s5175_s30 = scalar_lea.vmem %s750_s26, 32 }
  0xb0   : > { %p5169_p11 = scmp.ne.s32.totalorder %s750_s26, %s5168_s5  ;;  %p5176_p0 = scmp.lt.s32.totalorder %s750_s26, %s750_s26 }
  0xb1   : > { %p5177_p1 = scmp.lt.s32.totalorder %s5175_s30, %s5168_s5 }
  0xb2   : > { %p5171_p12 = pnand %p5169_p11, %p5494_p6 }
  0xb3   : > { %p5178_p4 = por %p5177_p1, %p5176_p0 }
  0xb4   : > { %p5172_p13 = pneg %p5171_p12 }
  0xb6   : > { %p5179_p7 = pnand %p5178_p4, %p5172_p13 }
  0xb8   : > { %5182 = shalt.err (!%p5179_p7)
}
  0xb9   : > { %4646 = dma.hbm_to_vmem [thread:$0]  (!%p5486_p5), %s6904_s14, 16, %s750_s26, [#allocation17]  }
  0xba   : > { %s5194_s11 = scalar_lea.vmem %s773_s2, 64  ;;  %p5202_p9 = scmp.lt.s32.totalorder %s773_s2, %s773_s2 }
  0xbb   : > { %p5195_p8 = scmp.ne.s32.totalorder %s773_s2, %s5194_s11  ;;  %p5203_p10 = scmp.lt.s32.totalorder %s5194_s11, %s5194_s11 }
  0xbd   : > { %p5197_p2 = pnand %p5195_p8, %p5494_p6  ;;  %p5204_p11 = por %p5203_p10, %p5202_p9 }
  0xbf   : > { %p5198_p3 = pneg %p5197_p2 }
  0xc1   : > { %p5205_p12 = pnand %p5204_p11, %p5198_p3 }
  0xc3   : > { %5208 = shalt.err (!%p5205_p12)
}
  0xc4   : > { %s7016_s24 = smov 2   ;;  %s7017_s9 = smov 32  }
  0xc5   : > { %4652 = dma.hbm_to_vmem [thread:$0]  (!%p5486_p5), %s6906_s16, 64, %s773_s2, [#allocation20], %s7017_s9, %s7017_s9, %s7016_s24  }
  0xc6   : > { %s5327_s6 = smov [#allocation24]   ;;  %s5328_s26 = smov [#allocation25]  }
  0xc7   : > { %s802_s4 = sshll.u32 %s5327_s6, 4  ;;  %s813_s1 = sshll.u32 %s5328_s26, 4  ;;  %s803_s4 = int_to_ptr.vmem [resolvable:$true] %s802_s4  ;;  %s814_s1 = int_to_ptr.vmem [resolvable:$true] %s813_s1 }
  0xc8   : > { %s5220_s5 = scalar_lea.vmem %s803_s4, 16  ;;  %s5227_s30 = scalar_lea.vmem %s803_s4, 32 }
  0xc9   : > { %p5221_p13 = scmp.ne.s32.totalorder %s803_s4, %s5220_s5  ;;  %p5228_p4 = scmp.lt.s32.totalorder %s803_s4, %s803_s4 }
  0xca   : > { %p5229_p7 = scmp.lt.s32.totalorder %s5227_s30, %s5220_s5 }
  0xcb   : > { %p5223_p0 = pnand %p5221_p13, %p5494_p6 }
  0xcc   : > { %p5230_p8 = por %p5229_p7, %p5228_p4 }
  0xcd   : > { %p5224_p1 = pneg %p5223_p0 }
  0xcf   : > { %p5231_p2 = pnand %p5230_p8, %p5224_p1 }
  0xd1   : > { %5234 = shalt.err (!%p5231_p2)
}
  0xd2   : > { %4658 = dma.hbm_to_vmem [thread:$0]  (!%p5486_p5), %s6909_s19, 16, %s803_s4, [#allocation23]  }
  0xd3   : > { %s5246_s25 = scalar_lea.vmem %s814_s1, 16  ;;  %s5253_s11 = scalar_lea.vmem %s814_s1, 32 }
  0xd4   : > { %p5247_p3 = scmp.ne.s32.totalorder %s814_s1, %s5246_s25  ;;  %p5254_p11 = scmp.lt.s32.totalorder %s814_s1, %s814_s1 }
  0xd5   : > { %p5255_p12 = scmp.lt.s32.totalorder %s5253_s11, %s5246_s25 }
  0xd6   : > { %p5249_p9 = pnand %p5247_p3, %p5494_p6 }
  0xd7   : > { %p5256_p13 = por %p5255_p12, %p5254_p11 }
  0xd8   : > { %p5250_p10 = pneg %p5249_p9 }
  0xda   : > { %p5257_p0 = pnand %p5256_p13, %p5250_p10 }
  0xdc   : > { %5260 = shalt.err (!%p5257_p0)
}
  0xdd   : > { %4661 = dma.hbm_to_vmem [thread:$0]  (!%p5486_p5), %s6910_s20, 16, %s814_s1, [#allocation26]  }
  0xde   : > { %p7018_p1 = scmp.ne.s32.totalorder %s7001_s3, 0 }
  0xe0   : > { %848 = sbr.rel (%p7018_p1) target bundleno = 2272 (0x8e0), region = 120 }
  0xe5   : > { %p7019_p4 = scmp.ne.s32.totalorder %s7000_s7, 0 }
  0xe7   : > { %5266 = dma.done.wait (%p7019_p4), [#allocation3], 512  }
  0xe8   : > { %5268 = vsyncadd (%p7019_p4), [#allocation3], 4294966784 }
  0xe9   : > { %5270 = dma.done.wait (%p7019_p4), [#allocation5], 64  }
  0xea   : > { %5272 = vsyncadd (%p7019_p4), [#allocation5], 4294967232 }
  0xeb   : > { %5274 = dma.done.wait (%p7019_p4), [#allocation8], 352  }
  0xec   : > { %5276 = vsyncadd (%p7019_p4), [#allocation8], 4294966944 }
  0xed   : > { %5278 = dma.done.wait (%p7019_p4), [#allocation11], 48  }
  0xee   : > { %5280 = vsyncadd (%p7019_p4), [#allocation11], 4294967248 }
  0xef   : > { %5282 = dma.done.wait (%p7019_p4), [#allocation14], 80  }
  0xf0   : > { %5284 = vsyncadd (%p7019_p4), [#allocation14], 4294967216 }
  0xf1   : > { %5286 = dma.done.wait (%p7019_p4), [#allocation17], 80  }
  0xf2   : > { %5288 = vsyncadd (%p7019_p4), [#allocation17], 4294967216 }
  0xf3   : > { %5290 = dma.done.wait (%p7019_p4), [#allocation20], 192  }
  0xf4   : > { %5292 = vsyncadd (%p7019_p4), [#allocation20], 4294967104 }
  0xf5   : > { %5294 = dma.done.wait (%p7019_p4), [#allocation23], 48  }
  0xf6   : > { %5296 = vsyncadd (%p7019_p4), [#allocation23], 4294967248 }
  0xf7   : > { %5298 = dma.done.wait (%p7019_p4), [#allocation26], 16  }
  0xf8   : > { %5300 = vsyncadd (%p7019_p4), [#allocation26], 4294967280  ;;  %s7020_s3 = sadd.s32 4294967295, %s5303_s29   ;;  %s7021_s6 = sld [smem:[#allocation77_spill]]  ;;  %v999_v0 = vld [vmem:[#allocation2] sm:$0xff]  ;;  %v1000_v1 = vld [vmem:[#allocation2 + $0x8] sm:$0xff] }
  0xf9   : > { %s4204_s8 = sshll.u32 %s7020_s3, 1  ;;  %v1109_v2 = vld [vmem:[#allocation2 + $0x10] sm:$0xff]  ;;  %v1001_v3 = vpack.c.bf16 %v1000_v1, %v999_v0  ;;  %v1110_v4 = vld [vmem:[#allocation2 + $0x18] sm:$0xff]  ;;  %vm1002_vm0 = vcmask 130048   ;;  %vm1217_vm1 = vcmask 1041408   ;;  %s7028_s1 = sld [smem:[#allocation84_spill]] }
  0xfa   : > { %p979_p5 = scmp.lt.s32.totalorder %s4204_s8, 3  ;;  %v1111_v7 = vpack.c.bf16 %v1110_v4, %v1109_v2  ;;  %v6931_v20 = vmov 0.0   ;;  %vm5330_vm2 = vmmov 0   ;;  %v4212_v27 = vld [vmem:[#allocation4] ss:$0 sm:$0xff]  ;;  %vm1323_vm3 = vcmask 1046528  }
  0xfb   : > { %4399 = vmatprep.subr.bf16.mxu0 %v1001_v3  ;;  %v4220_v28 = vld [vmem:[#allocation4 + $0x1] ss:$0 sm:$0xff]  ;;  %v4213_v30 = vld [vmem:[#allocation6] ss:$0 sm:$0xff]  ;;  %v4221_v33 = vld [vmem:[#allocation6 + $0x1] ss:$0 sm:$0xff] }
  0xfc   : > { %s7161_s8 = smov (!%p979_p5, %s4204_s8), 3  ;;  %4405 = vmatprep.subr.bf16.mxu1 %v1111_v7  ;;  %4400 = vmatpush3.bf16.msra.mxu0 %v1001_v3  ;;  %v1256_v3 = vlaneseq  ;;  %vm1463_vm4 = vcmask 1045504   ;;  %vm1603_vm5 = vcmask 1044480   ;;  %vm1743_vm6 = vcmask 1043456   ;;  %s7158_s2 = sld [smem:[#allocation89_spill]] }
  0xfd   : > { %s4327_s28 = sshll.u32 %s7161_s8, 4  ;;  %4406 = vmatpush3.bf16.msra.mxu1 %v1111_v7  ;;  %4411 = vmatprep.subr.mxu0 %v6931_v20  ;;  %vm1966_vm7 = vcmask 261120   ;;  %vm2018_vm8 = vcmask 1041409   ;;  %vm2190_vm9 = vcmask 31744   ;;  %vm2427_vm10 = vcmask 64512   ;;  %s7159_s24 = sld [smem:[#allocation90_spill]] }
  0xfe   : > { %s983_s4 = scalar_lea.vmem %s7021_s6, %s4327_s28  ;;  %4422 = vmatprep.subr.mxu1 %v6931_v20  ;;  %vm2517_vm11 = vcmask 15360  }
  0xff   : > { %v5685_v5 = vld [vmem:[%s983_s4] sm:$0xff]  ;;  %v5687_v6 = vld [vmem:[%s983_s4 + $0x8] sm:$0xff]  ;;  %v5693_v11 = vld [vmem:[%s983_s4 + $0x10] sm:$0xff] }
 0x100   : > { %7022 = vst [vmem:[#allocation36_spill] sm:$0xff] %v5685_v5  ;;  %7023 = vst [vmem:[#allocation37_spill] sm:$0xff] %v5687_v6  ;;  %v997_v8 = vpack.c.bf16 %v5687_v6, %v5685_v5  ;;  %v6930_v9 = vrot.slane %v5685_v5, 6  ;;  %v6928_v10 = vrot.slane %v5687_v6, 6  ;;  %v5695_v12 = vld [vmem:[%s983_s4 + $0x18] sm:$0xff]  ;;  %v6929_v14 = vrot.slane %v5693_v11, 6 }
 0x101   : > { %7024 = vst [vmem:[#allocation38_spill] sm:$0xff] %v5693_v11  ;;  %7025 = vst [vmem:[#allocation39_spill] sm:$0xff] %v5695_v12  ;;  %v998_v13 = vpack.c.bf16 %v5695_v12, %v5693_v11  ;;  %v6927_v15 = vrot.slane %v5695_v12, 6  ;;  %v4241_v18 = vld [vmem:[%s7028_s1 + $0x38] sm:$0xff]  ;;  %v4240_v21 = vld [vmem:[%s7028_s1 + $0x30] sm:$0xff] }
 0x102   : > { %v5706_v16 = vsel %vm1217_vm1, %v6930_v9, %v6928_v10  ;;  %4401 = vmatprep.mubr.msk.bf16.mxu0 %vm1002_vm0, %v997_v8  ;;  %4407 = vmatprep.mubr.msk.bf16.mxu1 %vm1002_vm0, %v997_v8  ;;  %v2010_v19 = vld [vmem:[%s7028_s1 + $0x18] sm:$0xff]  ;;  %v2009_v22 = vld [vmem:[%s7028_s1 + $0x10] sm:$0xff]  ;;  %v4239_v23 = vld [vmem:[%s7028_s1 + $0x28] sm:$0xff] }
 0x103   : > { %7026 = vst [vmem:[#allocation40_spill] sm:$0xff] %v5706_v16  ;;  %4402 = vmatmul.mubr.msk.bf16.vlgmr.msra.gmra.mxu0 %vm1002_vm0, %v998_v13  ;;  %v5716_v17 = vsel %vm1217_vm1, %v6929_v14, %v6927_v15  ;;  %4408 = vmatmul.mubr.msk.bf16.vlgmr.msra.gmra.mxu1 %vm1002_vm0, %v998_v13  ;;  %v2008_v24 = vld [vmem:[%s7028_s1 + $0x8] sm:$0xff]  ;;  %v4238_v25 = vld [vmem:[%s7028_s1 + $0x20] sm:$0xff]  ;;  %s990_s9 = scalar_lea.vmem %s7159_s24, %s4327_s28 }
 0x104   : > { %7027 = vst [vmem:[#allocation41_spill] sm:$0xff] %v5716_v17  ;;  %4412 = vmatpush3.msra.mxu0 %v4241_v18  ;;  %4423 = vmatpush3.msra.mxu1 %v2010_v19  ;;  %v2007_v26 = vld [vmem:[%s7028_s1] sm:$0xff] }
 0x105   : > { %4413 = vmatprep.subr.mxu0 %v6931_v20  ;;  %4424 = vmatprep.subr.mxu1 %v6931_v20 }
 0x106   : > { %4414 = vmatpush3.msra.mxu0 %v4240_v21  ;;  %4425 = vmatpush3.msra.mxu1 %v2009_v22  ;;  %v5781_v21 = vshrl.u32 %v1256_v3, 7 }
 0x107   : > { %4415 = vmatprep.subr.mxu0 %v6931_v20  ;;  %4426 = vmatprep.subr.mxu1 %v6931_v20 }
 0x108   : > { %4416 = vmatpush3.msra.mxu0 %v4239_v23  ;;  %4427 = vmatpush3.msra.mxu1 %v2008_v24  ;;  %7029 = vst [vmem:[#allocation42_spill] sm:$0xff] %v5781_v21  ;;  %v5784_v22 = vsub.s32 0, %v5781_v21  ;;  %v1282_v23 = vsub.s32 1, %v5781_v21  ;;  %v1254_v24 = vld [vmem:[#allocation7] sm:$0x3] }
 0x109   : > { %4417 = vmatprep.subr.mxu0 %v6931_v20  ;;  %4428 = vmatprep.subr.mxu1 %v6931_v20 }
 0x10a   : > { %4418 = vmatpush3.msra.mxu0 %v4238_v25  ;;  %4429 = vmatpush3.msra.mxu1 %v2007_v26  ;;  %7030 = vst [vmem:[#allocation43_spill] sm:$0xff] %v5784_v22  ;;  %v1305_v25 = vld [vmem:[#allocation7 + $0x4] sm:$0x3] }
 0x10b   : > { %4419 = vmatprep.mubr.msk.f32.mxu0 %vm5330_vm2, %v6931_v20  ;;  %4430 = vmatprep.mubr.msk.f32.mxu1 %vm5330_vm2, %v6931_v20 }
 0x10c   : > { %4433 = vmatprep.subr.mxu0 %v6931_v20  ;;  %4438 = vmatprep.subr.mxu1 %v6931_v20 }
 0x1c3   : > { %v4403_v29 = vpop.f32.mrf.mxu0  ;;  %v4409_v32 = vpop.f32.mrf.mxu1 }
 0x1c4   : > { %v1067_v31 = vmul.f32 %v4403_v29, %v4212_v27  ;;  %v1171_v34 = vmul.f32 %v4409_v32, %v4220_v28  ;;  %v5788_v32 = vrot.slane %v1254_v24, %v5784_v22 }
 0x1c5   : > { %v1043_v35 = vpop.f32.mrf.mxu0  ;;  %v1146_v38 = vpop.f32.mrf.mxu1 }
 0x1c6   : > { %v5757_v36 = vadd.f32 %v4213_v30, %v1067_v31  ;;  %v1065_v37 = vmul.f32 %v4212_v27, %v1043_v35  ;;  %v5759_v39 = vadd.f32 %v4221_v33, %v1171_v34  ;;  %v1169_v40 = vmul.f32 %v4220_v28, %v1146_v38 }
 0x1c7   : > { %v4404_v41 = vpop.f32.mrf.mxu0  ;;  %v4410_v45 = vpop.f32.mrf.mxu1  ;;  %v5793_v34 = vrot.slane %v1305_v25, %v5784_v22  ;;  %v5795_v35 = vrot.slane %v1305_v25, %v1282_v23 }
 0x1c8   : > { %v4216_v42 = vmul.f32 -1.442695, %v5757_v36  ;;  %v5762_v43 = vadd.f32 %v4213_v30, %v1065_v37  ;;  %v1068_v44 = vmul.f32 %v4404_v41, %v4212_v27  ;;  %v4224_v46 = vmul.f32 -1.442695, %v5759_v39  ;;  %v1255_v37 = vld [vmem:[#allocation7 + $0x2] sm:$0x3] }
 0x1c9   : > { %v5765_v47 = vadd.f32 %v4221_v33, %v1169_v40  ;;  %v1046_v48 = vpop.f32.mrf.mxu0  ;;  %v1172_v51 = vmul.f32 %v4410_v45, %v4220_v28  ;;  %v1149_v52 = vpop.f32.mrf.mxu1 }
 0x1ca   : > { %4729 = vpow2.f32 %v4216_v42  ;;  %v4214_v49 = vmul.f32 -1.442695, %v5762_v43  ;;  %v5768_v50 = vadd.f32 %v4213_v30, %v1068_v44  ;;  %v1066_v54 = vmul.f32 %v4212_v27, %v1046_v48  ;;  %v1445_v27 = vld [vmem:[#allocation7 + $0x8] sm:$0x3]  ;;  %v1306_v42 = vld [vmem:[#allocation7 + $0x6] sm:$0x3] }
 0x1cb   : > { %4731 = vpow2.f32 %v4224_v46  ;;  %v4222_v53 = vmul.f32 -1.442695, %v5765_v47  ;;  %v1170_v56 = vmul.f32 %v4220_v28, %v1149_v52  ;;  %v5772_v57 = vadd.f32 %v4221_v33, %v1172_v51  ;;  %v1585_v28 = vld [vmem:[#allocation7 + $0xc] sm:$0x3]  ;;  %v1446_v44 = vld [vmem:[#allocation7 + $0xa] sm:$0x3] }
 0x1cc   : > { %4733 = vpow2.f32 %v4214_v49  ;;  %v4217_v55 = vmul.f32 -1.442695, %v5768_v50  ;;  %v5774_v58 = vadd.f32 %v4213_v30, %v1066_v54  ;;  %v1725_v30 = vld [vmem:[#allocation7 + $0x10] sm:$0x3]  ;;  %v5798_v38 = vrot.slane %v1445_v27, %v5784_v22 }
 0x1cd   : > { %4735 = vpow2.f32 %v4222_v53  ;;  %v5776_v59 = vadd.f32 %v4221_v33, %v1170_v56  ;;  %v4225_v60 = vmul.f32 -1.442695, %v5772_v57  ;;  %v5790_v33 = vrot.slane %v1254_v24, %v1282_v23 }
 0x1ce   : > { %4737 = vpow2.f32 %v4217_v55  ;;  %v4215_v61 = vmul.f32 -1.442695, %v5774_v58  ;;  %v5800_v40 = vrot.slane %v1445_v27, %v1282_v23  ;;  %v5803_v41 = vrot.slane %v1585_v28, %v5784_v22 }
 0x1cf   : > { %v4223_v62 = vmul.f32 -1.442695, %v5776_v59  ;;  %4739 = vpow2.f32 %v4225_v60  ;;  %v5805_v48 = vrot.slane %v1585_v28, %v1282_v23  ;;  %v5808_v49 = vrot.slane %v1725_v30, %v5784_v22  ;;  %v1586_v60 = vld [vmem:[#allocation7 + $0xe] sm:$0x3] }
 0x1d0   : > { %4741 = vpow2.f32 %v4215_v61  ;;  %v5810_v51 = vrot.slane %v1725_v30, %v1282_v23  ;;  %v5816_v55 = vrot.slane %v1255_v37, %v5784_v22  ;;  %v5818_v56 = vrot.slane %v1255_v37, %v1282_v23  ;;  %v1726_v61 = vld [vmem:[#allocation7 + $0x12] sm:$0x3] }
 0x1d1   : > { %4743 = vpow2.f32 %v4223_v62 }
 0x1d7   : > { %v4730_v63 = vpop.eup %4729 }
 0x1d8   : > { %v4732_v0 = vpop.eup %4731  ;;  %v1094_v1 = vadd.f32 1.0, %v4730_v63 }
 0x1d9   : > { %v4734_v2 = vpop.eup %4733  ;;  %v1199_v4 = vadd.f32 1.0, %v4732_v0 }
 0x1da   : > { %v4736_v7 = vpop.eup %4735  ;;  %4745 = vrcp.f32 %v1094_v1  ;;  %v1092_v8 = vadd.f32 1.0, %v4734_v2  ;;  %v5824_v1 = vrot.slane %v1306_v42, %v5784_v22  ;;  %v5826_v2 = vrot.slane %v1306_v42, %v1282_v23 }
 0x1db   : > { %v4738_v13 = vpop.eup %4737  ;;  %4747 = vrcp.f32 %v1199_v4  ;;  %v1197_v18 = vadd.f32 1.0, %v4736_v7  ;;  %v5832_v7 = vrot.slane %v1446_v44, %v1282_v23 }
 0x1dc   : > { %4749 = vrcp.f32 %v1092_v8  ;;  %v1095_v19 = vadd.f32 1.0, %v4738_v13  ;;  %v4740_v26 = vpop.eup %4739  ;;  %7031 = vst [vmem:[#allocation44_spill] sm:$0xff] %v5826_v2  ;;  %v5840_v13 = vrot.slane %v1586_v60, %v1282_v23 }
 0x1dd   : > { %4751 = vrcp.f32 %v1197_v18  ;;  %v4742_v29 = vpop.eup %4741  ;;  %v1200_v45 = vadd.f32 1.0, %v4740_v26  ;;  %v5843_v18 = vrot.slane %v1726_v61, %v5784_v22  ;;  %v5849_v26 = vrot.slane %v1726_v61, %v1282_v23 }
 0x1de   : > { %4753 = vrcp.f32 %v1095_v19  ;;  %v4744_v31 = vpop.eup %4743  ;;  %v1093_v52 = vadd.f32 1.0, %v4742_v29 }
 0x1df   : > { %v1198_v62 = vadd.f32 1.0, %v4744_v31  ;;  %4755 = vrcp.f32 %v1200_v45 }
 0x1e0   : > { %4757 = vrcp.f32 %v1093_v52 }
 0x1e1   : > { %4759 = vrcp.f32 %v1198_v62 }
 0x1e7   : > { %v4746_v46 = vpop.eup %4745 }
 0x1e8   : > { %v4748_v53 = vpop.eup %4747  ;;  %v5813_v54 = vmul.f32 %v4746_v46, %v5757_v36  ;;  %v5829_v36 = vrot.slane %v1446_v44, %v5784_v22 }
 0x1e9   : > { %v4750_v63 = vpop.eup %4749  ;;  %v5821_v0 = vmul.f32 %v4748_v53, %v5759_v39  ;;  %v5838_v39 = vrot.slane %v1586_v60, %v5784_v22 }
 0x1ea   : > { %7032 = vst [vmem:[#allocation45_spill] sm:$0xff] %v5829_v36  ;;  %v4752_v3 = vpop.eup %4751  ;;  %v6934_v4 = vrot.slane %v5813_v54, 6  ;;  %v5835_v8 = vmul.f32 %v4750_v63, %v5762_v43 }
 0x1eb   : > { %v4754_v19 = vpop.eup %4753  ;;  %v6933_v25 = vrot.slane %v5821_v0, 6  ;;  %v5859_v29 = vmul.f32 %v4752_v3, %v5765_v47 }
 0x1ec   : > { %v1231_v24 = vsel %vm1217_vm1, 0.0, %v6934_v4  ;;  %v6935_v28 = vrot.slane %v5835_v8, 6  ;;  %v1107_v47 = vmul.f32 %v4754_v19, %v5768_v50 }
 0x1ed   : > { %v5852_v43 = vmul.f32 %v5793_v34, %v1231_v24  ;;  %v5855_v27 = vmul.f32 %v5795_v35, %v1231_v24  ;;  %v5862_v30 = vmul.f32 %v5798_v38, %v1231_v24  ;;  %v5865_v31 = vmul.f32 %v5800_v40, %v1231_v24 }
 0x1ee   : > { %v5868_v23 = vmul.f32 %v5803_v41, %v1231_v24  ;;  %v5871_v37 = vmul.f32 %v5805_v48, %v1231_v24  ;;  %v1262_v42 = vmul.f32 %v5788_v32, %v1231_v24  ;;  %v1286_v44 = vmul.f32 %v5790_v33, %v1231_v24 }
 0x1ef   : > { %7033 = vst [vmem:[#allocation46_spill] sm:$0xff] %v5862_v30  ;;  %v5880_v53 = vmul.f32 %v5808_v49, %v1231_v24  ;;  %v5883_v60 = vmul.f32 %v5810_v51, %v1231_v24  ;;  %v5891_v50 = vsel %vm1217_vm1, 0.0, %v6933_v25  ;;  %v1230_v20 = vsel %vm1217_vm1, 0.0, %v6935_v28 }
 0x1f0   : > { %7034 = vst [vmem:[#allocation47_spill] sm:$0xff] %v5868_v23  ;;  %7035 = vst [vmem:[#allocation48_spill] sm:$0xff] %v5871_v37  ;;  %v1274_v3 = vmul.f32 %v5816_v55, %v5891_v50  ;;  %v1298_v19 = vmul.f32 %v5818_v56, %v5891_v50  ;;  %v5899_v24 = vmul.f32 %v5824_v1, %v5891_v50  ;;  %v7050_v28 = vrot.slane %v5813_v54, 6 }
 0x1f1   : > { %7036 = vst [vmem:[#allocation49_spill] sm:$0xff] %v5880_v53  ;;  %7037 = vst [vmem:[#allocation50_spill] sm:$0xff] %v5883_v60  ;;  %v5903_v15 = vmul.f32 %v5826_v2, %v5891_v50  ;;  %v5907_v10 = vmul.f32 %v5829_v36, %v5891_v50  ;;  %v5911_v14 = vmul.f32 %v5832_v7, %v5891_v50  ;;  %v6949_v53 = vrot.slane %v5859_v29, 6 }
 0x1f2   : > { %7038 = vst [vmem:[#allocation51_spill] sm:$0xff] %v5891_v50  ;;  %v5915_v9 = vmul.f32 %v5838_v39, %v5891_v50  ;;  %v5922_v63 = vadd.f32 %v1274_v3, %v1262_v42  ;;  %v5926_v61 = vmul.f32 %v5840_v13, %v5891_v50  ;;  %v5928_v25 = vadd.f32 %v1298_v19, %v1286_v44  ;;  %v4756_v3 = vpop.eup %4755 }
 0x1f3   : > { %7039 = vst [vmem:[#allocation52_spill] sm:$0xff] %v5907_v10  ;;  %7040 = vst [vmem:[#allocation53_spill] sm:$0xff] %v5911_v14  ;;  %v5936_v52 = vmul.f32 %v5793_v34, %v1230_v20  ;;  %v5939_v42 = vmul.f32 %v5795_v35, %v1230_v20  ;;  %v5942_v44 = vmul.f32 %v5798_v38, %v1230_v20  ;;  %v4758_v62 = vpop.eup %4757  ;;  %v5977_v22 = vsel %vm1217_vm1, 0.0, %v6949_v53 }
 0x1f4   : > { %7041 = vst [vmem:[#allocation54_spill] sm:$0xff] %v5915_v9  ;;  %7042 = vst [vmem:[#allocation55_spill] sm:$0xff] %v5926_v61  ;;  %v5945_v19 = vmul.f32 %v5800_v40, %v1230_v20  ;;  %v5948_v45 = vmul.f32 %v5803_v41, %v1230_v20  ;;  %v5951_v4 = vmul.f32 %v5805_v48, %v1230_v20  ;;  %v4760_v17 = vpop.eup %4759  ;;  %v1222_v9 = vrot.slane %v1107_v47, 6 }
 0x1f5   : > { %7043 = vst [vmem:[#allocation56_spill] sm:$0xff] %v5942_v44  ;;  %v1260_v46 = vmul.f32 %v5788_v32, %v1230_v20  ;;  %v5956_v12 = vmul.f32 %v5808_v49, %v1230_v20  ;;  %v5959_v6 = vmul.f32 %v5810_v51, %v1230_v20  ;;  %v1284_v16 = vmul.f32 %v5790_v33, %v1230_v20 }
 0x1f6   : > { %7044 = vst [vmem:[#allocation57_spill] sm:$0xff] %v5945_v19  ;;  %7045 = vst [vmem:[#allocation58_spill] sm:$0xff] %v5948_v45  ;;  %v5972_v11 = vmul.f32 %v4756_v3, %v5772_v57  ;;  %v1223_v21 = vsel %vm1217_vm1, %v7050_v28, %v1222_v9  ;;  %v1233_v47 = vsel %vm1217_vm1, %v1222_v9, 0.0  ;;  %v5984_v23 = vmul.f32 %v4758_v62, %v5774_v58 }
 0x1f7   : > { %7046 = vst [vmem:[#allocation59_spill] sm:$0xff] %v5951_v4  ;;  %7047 = vst [vmem:[#allocation60_spill] sm:$0xff] %v5956_v12  ;;  %v1272_v10 = vmul.f32 %v5816_v55, %v5977_v22  ;;  %v1296_v57 = vmul.f32 %v5818_v56, %v5977_v22  ;;  %v5992_v3 = vmul.f32 %v5824_v1, %v5977_v22  ;;  %v7059_v61 = vrot.slane %v5852_v43, 1 }
 0x1f8   : > { %7048 = vst [vmem:[#allocation61_spill] sm:$0xff] %v5959_v6  ;;  %7049 = vst [vmem:[#allocation62_spill] sm:$0xff] %v5977_v22  ;;  %v5996_v54 = vmul.f32 %v5826_v2, %v5977_v22  ;;  %v6000_v9 = vmul.f32 %v5829_v36, %v5977_v22  ;;  %v6004_v58 = vmul.f32 %v5832_v7, %v5977_v22  ;;  %v7061_v37 = vrot.slane %v5855_v27, 1 }
 0x1f9   : > { %7051 = vst [vmem:[#allocation63_spill] sm:$0xff] %v5992_v3  ;;  %v6008_v28 = vmul.f32 %v5838_v39, %v5977_v22  ;;  %v6012_v62 = vmul.f32 %v5840_v13, %v5977_v22  ;;  %v6014_v20 = vadd.f32 %v1272_v10, %v1260_v46  ;;  %v6016_v53 = vadd.f32 %v1296_v57, %v1284_v16 }
 0x1fa   : > { %7052 = vst [vmem:[#allocation64_spill] sm:$0xff] %v5996_v54  ;;  %7053 = vst [vmem:[#allocation65_spill] sm:$0xff] %v6000_v9  ;;  %v6019_v5 = vmul.f32 %v4760_v17, %v5776_v59  ;;  %v6023_v12 = vmul.f32 %v5849_v26, %v5891_v50  ;;  %v1315_v17 = vmul.f32 %v5793_v34, %v1223_v21 }
 0x1fb   : > { %7054 = vst [vmem:[#allocation66_spill] sm:$0xff] %v6004_v58  ;;  %7055 = vst [vmem:[#allocation67_spill] sm:$0xff] %v6008_v28  ;;  %v1316_v59 = vmul.f32 %v5793_v34, %v1233_v47  ;;  %v1384_v46 = vmul.f32 %v5795_v35, %v1223_v21  ;;  %v1385_v57 = vmul.f32 %v5795_v35, %v1233_v47 }
 0x1fc   : > { %7056 = vst [vmem:[#allocation68_spill] sm:$0xff] %v6012_v62  ;;  %7057 = vst [vmem:[#allocation69_spill] sm:$0xff] %v6023_v12  ;;  %v6036_v45 = vmul.f32 %v5798_v38, %v1223_v21  ;;  %v1456_v44 = vmul.f32 %v5798_v38, %v1233_v47  ;;  %v1330_v22 = vrot.slane %v1315_v17, 1  ;;  %v6040_v10 = vmul.f32 %v5800_v40, %v1223_v21 }
 0x1fd   : > { %v1332_v30 = vrot.slane %v1316_v59, 1  ;;  %v1525_v16 = vmul.f32 %v5800_v40, %v1233_v47  ;;  %v1398_v50 = vrot.slane %v1384_v46, 1  ;;  %v1400_v28 = vrot.slane %v1385_v57, 1 }
 0x1fe   : > { %7058 = vst [vmem:[#allocation70_spill] sm:$0xff] %v6036_v45  ;;  %v1472_v12 = vrot.slane %v1456_v44, 2  ;;  %v1263_v60 = vmul.f32 %v5788_v32, %v1223_v21  ;;  %v1287_v6 = vmul.f32 %v5790_v33, %v1223_v21  ;;  %v1331_v62 = vsel %vm1323_vm3, %v7059_v61, %v1330_v22 }
 0x1ff   : > { %v1333_v17 = vsel %vm1323_vm3, %v1330_v22, %v1332_v30  ;;  %v6051_v59 = vadd.f32 %v1331_v62, %v5922_v63  ;;  %v1399_v46 = vsel %vm1323_vm3, %v7061_v37, %v1398_v50  ;;  %v1538_v57 = vrot.slane %v6040_v10, 2 }
 0x200   : > { %v1540_v44 = vrot.slane %v1525_v16, 2  ;;  %v1401_v9 = vsel %vm1323_vm3, %v1398_v50, %v1400_v28  ;;  %v7062_v4 = vrot.slane %v6036_v45, 2  ;;  %v6062_v61 = vmul.f32 %v5803_v41, %v1223_v21 }
 0x201   : > { %7060 = vst [vmem:[#allocation71_spill] sm:$0xff] %v6051_v59  ;;  %v1596_v22 = vmul.f32 %v5803_v41, %v1233_v47  ;;  %v6066_v30 = vmul.f32 %v5805_v48, %v1223_v21  ;;  %v1665_v27 = vmul.f32 %v5805_v48, %v1233_v47  ;;  %v6070_v37 = vmul.f32 %v5808_v49, %v1223_v21 }
 0x202   : > { %v1473_v43 = vsel %vm1463_vm4, %v7062_v4, %v1472_v12  ;;  %7063 = vst [vmem:[#allocation72_spill] sm:$0xff] %v6062_v61  ;;  %v1736_v63 = vmul.f32 %v5808_v49, %v1233_v47  ;;  %v6967_v50 = vrot.slane %v6062_v61, 3  ;;  %v6075_v12 = vmul.f32 %v5810_v51, %v1223_v21 }
 0x203   : > { %7064 = vst [vmem:[#allocation73_spill] sm:$0xff] %v6066_v30  ;;  %7065 = vst [vmem:[#allocation74_spill] sm:$0xff] %v6070_v37  ;;  %v1612_v28 = vrot.slane %v1596_v22, 3  ;;  %v1805_v4 = vmul.f32 %v5810_v51, %v1233_v47  ;;  %v6969_v62 = vrot.slane %v6066_v30, 3  ;;  %v1680_v10 = vrot.slane %v1665_v27, 3 }
 0x204   : > { %v6968_v16 = vrot.slane %v6070_v37, 4  ;;  %v1752_v45 = vrot.slane %v1736_v63, 4  ;;  %v6081_v59 = vadd.f32 %v1399_v46, %v5928_v25  ;;  %v1541_v14 = vsel %vm1463_vm4, %v1538_v57, %v1540_v44 }
 0x205   : > { %v1613_v22 = vsel %vm1603_vm5, %v6967_v50, %v1612_v28  ;;  %v1242_v21 = vrot.slane %v5972_v11, 6  ;;  %v1681_v47 = vsel %vm1603_vm5, %v6969_v62, %v1680_v10  ;;  %v1820_v46 = vrot.slane %v1805_v4, 4 }
 0x206   : > { %7066 = vst [vmem:[#allocation75_spill] sm:$0xff] %v6081_v59  ;;  %v6094_v27 = vsel %vm1743_vm6, %v6968_v16, %v1752_v45  ;;  %v7068_v44 = vrot.slane %v5821_v0, 6  ;;  %v1219_v11 = vrot.slane %v5984_v23, 6  ;;  %v7069_v19 = vrot.slane %v6075_v12, 4 }
 0x207   : > { %7067 = vst [vmem:[#allocation76_spill] sm:$0xff] %v6094_v27  ;;  %v1253_v28 = vsel %vm1217_vm1, %v1242_v21, 0.0 }
 0x208   : > { %v6100_v63 = vsel %vm1217_vm1, %v7068_v44, %v1242_v21  ;;  %v1351_v0 = vmul.f32 %v5824_v1, %v1253_v28  ;;  %v1419_v21 = vmul.f32 %v5826_v2, %v1253_v28  ;;  %v1491_v16 = vmul.f32 %v5829_v36, %v1253_v28 }
 0x209   : > { %v1275_v10 = vmul.f32 %v5816_v55, %v6100_v63  ;;  %v1299_v45 = vmul.f32 %v5818_v56, %v6100_v63  ;;  %v1350_v4 = vmul.f32 %v5824_v1, %v6100_v63  ;;  %v1418_v44 = vmul.f32 %v5826_v2, %v6100_v63 }
 0x20a   : > { %v6117_v23 = vmul.f32 %v5829_v36, %v6100_v63  ;;  %v1366_v27 = vrot.slane %v1351_v0, 1  ;;  %v1434_v61 = vrot.slane %v1419_v21, 1  ;;  %v1506_v58 = vrot.slane %v1491_v16, 2 }
 0x20b   : > { %v1279_v62 = vadd.f32 %v1275_v10, %v1263_v60  ;;  %v1303_v50 = vadd.f32 %v1299_v45, %v1287_v6  ;;  %v1364_v25 = vrot.slane %v1350_v4, 1  ;;  %v1432_v37 = vrot.slane %v1418_v44, 1 }
 0x20c   : > { %v6983_v30 = vrot.slane %v6117_v23, 2  ;;  %v6124_v59 = vsel %vm1743_vm6, %v7069_v19, %v1820_v46  ;;  %v7070_v2 = vrot.slane %v5865_v31, 2  ;;  %v6138_v10 = vmul.f32 %v5832_v7, %v6100_v63 }
 0x20d   : > { %v1341_v3 = vadd.f32 %v1333_v17, %v1279_v62  ;;  %v1409_v54 = vadd.f32 %v1401_v9, %v1303_v50  ;;  %v1367_v6 = vsel %vm1323_vm3, %v1364_v25, %v1366_v27  ;;  %v1435_v60 = vsel %vm1323_vm3, %v1432_v37, %v1434_v61 }
 0x20e   : > { %v6129_v36 = vsel %vm1463_vm4, %v7070_v2, %v1538_v57  ;;  %v1507_v16 = vsel %vm1463_vm4, %v6983_v30, %v1506_v58  ;;  %v1559_v9 = vmul.f32 %v5832_v7, %v1253_v28  ;;  %v6143_v2 = vmul.f32 %v5838_v39, %v6100_v63 }
 0x20f   : > { %v1375_v19 = vadd.f32 %v1367_v6, %v1341_v3  ;;  %v1443_v17 = vadd.f32 %v1435_v60, %v1409_v54  ;;  %v1572_v31 = vrot.slane %v6138_v10, 2  ;;  %v1631_v57 = vmul.f32 %v5838_v39, %v1253_v28 }
 0x210   : > { %v6149_v61 = vmul.f32 %v5840_v13, %v6100_v63  ;;  %v1699_v58 = vmul.f32 %v5840_v13, %v1253_v28  ;;  %v1574_v3 = vrot.slane %v1559_v9, 2  ;;  %v6981_v54 = vrot.slane %v6143_v2, 3 }
 0x211   : > { %v1481_v50 = vadd.f32 %v1473_v43, %v1375_v19  ;;  %v1549_v62 = vadd.f32 %v1541_v14, %v1443_v17  ;;  %v1646_v27 = vrot.slane %v1631_v57, 3  ;;  %v6155_v4 = vmul.f32 %v5843_v18, %v1253_v28 }
 0x212   : > { %v1712_v46 = vrot.slane %v6149_v61, 3  ;;  %v1714_v45 = vrot.slane %v1699_v58, 3  ;;  %v1575_v44 = vsel %vm1463_vm4, %v1572_v31, %v1574_v3  ;;  %v6161_v21 = vmul.f32 %v5849_v26, %v1253_v28 }
 0x213   : > { %v1515_v0 = vadd.f32 %v1507_v16, %v1481_v50  ;;  %v7071_v14 = vrot.slane %v5835_v8, 6  ;;  %v7072_v6 = vrot.slane %v5899_v24, 1  ;;  %v7073_v19 = vrot.slane %v5903_v15, 1  ;;  %v7080_v24 = vld [vmem:[#allocation45_spill] sm:$0xff] }
 0x214   : > { %v1583_v17 = vadd.f32 %v1575_v44, %v1549_v62  ;;  %v1647_v28 = vsel %vm1603_vm5, %v6981_v54, %v1646_v27  ;;  %v1715_v8 = vsel %vm1603_vm5, %v1712_v46, %v1714_v45 }
 0x215   : > { %v1220_v43 = vsel %vm1217_vm1, %v7071_v14, %v1219_v11  ;;  %v6169_v60 = vsel %vm1323_vm3, %v7072_v6, %v1364_v25  ;;  %v6174_v16 = vsel %vm1323_vm3, %v7073_v19, %v1432_v37  ;;  %v1621_v9 = vadd.f32 %v1613_v22, %v1515_v0 }
 0x216   : > { %v1232_v25 = vsel %vm1217_vm1, %v1219_v11, 0.0  ;;  %v1689_v57 = vadd.f32 %v1681_v47, %v1583_v17  ;;  %v1312_v37 = vmul.f32 %v5793_v34, %v1220_v43  ;;  %v1261_v50 = vmul.f32 %v5788_v32, %v1220_v43 }
 0x217   : > { %v1313_v58 = vmul.f32 %v5793_v34, %v1232_v25  ;;  %v1381_v62 = vmul.f32 %v5795_v35, %v1220_v43  ;;  %v1382_v22 = vmul.f32 %v5795_v35, %v1232_v25  ;;  %v6191_v3 = vmul.f32 %v5798_v38, %v1220_v43 }
 0x218   : > { %v1285_v27 = vmul.f32 %v5790_v33, %v1220_v43  ;;  %v1325_v45 = vrot.slane %v1312_v37, 1  ;;  %v1453_v47 = vmul.f32 %v5798_v38, %v1232_v25  ;;  %v6195_v0 = vadd.f32 %v1647_v28, %v1621_v9 }
 0x219   : > { %v1327_v11 = vrot.slane %v1313_v58, 1  ;;  %v1393_v44 = vrot.slane %v1381_v62, 1  ;;  %v1395_v14 = vrot.slane %v1382_v22, 1  ;;  %v6198_v34 = vmul.f32 %v5800_v40, %v1220_v43 }
 0x21a   : > { %v6200_v32 = vadd.f32 %v1715_v8, %v1689_v57  ;;  %v7074_v35 = vrot.slane %v5936_v52, 1  ;;  %v6985_v19 = vrot.slane %v6191_v3, 2  ;;  %v1522_v33 = vmul.f32 %v5800_v40, %v1232_v25 }
 0x21b   : > { %v1328_v17 = vsel %vm1323_vm3, %v1325_v45, %v1327_v11  ;;  %v7075_v38 = vrot.slane %v5939_v42, 1  ;;  %v1467_v9 = vrot.slane %v1453_v47, 2  ;;  %v1533_v37 = vrot.slane %v6198_v34, 2 }
 0x21c   : > { %v1326_v6 = vsel %vm1323_vm3, %v7074_v35, %v1325_v45  ;;  %v1396_v52 = vsel %vm1323_vm3, %v1393_v44, %v1395_v14  ;;  %v1535_v57 = vrot.slane %v1522_v33, 2  ;;  %v6217_v58 = vmul.f32 %v5803_v41, %v1220_v43 }
 0x21d   : > { %v1394_v28 = vsel %vm1323_vm3, %v7075_v38, %v1393_v44  ;;  %v6213_v8 = vadd.f32 %v1326_v6, %v6014_v20  ;;  %v1593_v40 = vmul.f32 %v5803_v41, %v1232_v25  ;;  %v6221_v62 = vmul.f32 %v5805_v48, %v1220_v43 }
 0x21e   : > { %v1662_v42 = vmul.f32 %v5805_v48, %v1232_v25  ;;  %v6225_v22 = vmul.f32 %v5808_v49, %v1220_v43  ;;  %v6228_v45 = vadd.f32 %v1394_v28, %v6016_v53  ;;  %v6982_v20 = vrot.slane %v6217_v58, 3 }
 0x21f   : > { %v1733_v11 = vmul.f32 %v5808_v49, %v1232_v25  ;;  %v6233_v47 = vmul.f32 %v5810_v51, %v1220_v43  ;;  %v1468_v41 = vsel %vm1463_vm4, %v6985_v19, %v1467_v9  ;;  %v1536_v48 = vsel %vm1463_vm4, %v1533_v37, %v1535_v57 }
 0x220   : > { %v1607_v44 = vrot.slane %v1593_v40, 3  ;;  %v1673_v14 = vrot.slane %v6221_v62, 3  ;;  %v1675_v53 = vrot.slane %v1662_v42, 3  ;;  %v6984_v35 = vrot.slane %v6225_v22, 4 }
 0x221   : > { %v1802_v6 = vmul.f32 %v5810_v51, %v1232_v25  ;;  %v7076_v49 = vrot.slane %v6019_v5, 6  ;;  %v7077_v43 = vrot.slane %v5859_v29, 6  ;;  %v1747_v38 = vrot.slane %v1733_v11, 4  ;;  %v7079_v5 = vld [vmem:[#allocation44_spill] sm:$0xff] }
 0x222   : > { %v1813_v28 = vrot.slane %v6233_v47, 4  ;;  %v1608_v51 = vsel %vm1603_vm5, %v6982_v20, %v1607_v44  ;;  %v1838_v47 = vmul.f32 %v5849_v26, %v6100_v63 }
 0x223   : > { %v6249_v33 = vsel %vm1217_vm1, %v7077_v43, %v7076_v49  ;;  %v7078_v9 = vmov %v7076_v49  ;;  %v1815_v25 = vrot.slane %v1802_v6, 4 }
 0x224   : > { %v1252_v57 = vsel %vm1217_vm1, %v7078_v9, 0.0  ;;  %v1273_v40 = vmul.f32 %v5816_v55, %v6249_v33  ;;  %v1297_v29 = vmul.f32 %v5818_v56, %v6249_v33  ;;  %v1347_v42 = vmul.f32 %v5824_v1, %v6249_v33 }
 0x225   : > { %v1348_v49 = vmul.f32 %v5824_v1, %v1252_v57  ;;  %v1415_v43 = vmul.f32 %v7079_v5, %v6249_v33  ;;  %v1416_v9 = vmul.f32 %v7079_v5, %v1252_v57  ;;  %v1676_v55 = vsel %vm1603_vm5, %v1673_v14, %v1675_v53 }
 0x226   : > { %v1277_v11 = vadd.f32 %v1273_v40, %v1261_v50  ;;  %v1301_v44 = vadd.f32 %v1297_v29, %v1285_v27  ;;  %v1359_v6 = vrot.slane %v1347_v42, 1  ;;  %v6273_v56 = vmul.f32 %v7080_v24, %v6249_v33 }
 0x227   : > { %v1361_v20 = vrot.slane %v1348_v49, 1  ;;  %v1427_v50 = vrot.slane %v1415_v43, 1  ;;  %v1429_v40 = vrot.slane %v1416_v9, 1  ;;  %v6278_v1 = vsel %vm1743_vm6, %v6984_v35, %v1747_v38 }
 0x228   : > { %v1339_v54 = vadd.f32 %v1328_v17, %v1277_v11  ;;  %v1407_v5 = vadd.f32 %v1396_v52, %v1301_v44  ;;  %v1488_v30 = vmul.f32 %v7080_v24, %v1252_v57  ;;  %v1499_v53 = vrot.slane %v6273_v56, 2 }
 0x229   : > { %v1816_v27 = vsel %vm1743_vm6, %v1813_v28, %v1815_v25  ;;  %v1362_v29 = vsel %vm1323_vm3, %v1359_v6, %v1361_v20  ;;  %v1430_v17 = vsel %vm1323_vm3, %v1427_v50, %v1429_v40  ;;  %v1555_v42 = vmul.f32 %v5832_v7, %v6249_v33 }
 0x22a   : > { %v1373_v11 = vadd.f32 %v1362_v29, %v1339_v54  ;;  %v1441_v49 = vadd.f32 %v1430_v17, %v1407_v5  ;;  %v1501_v38 = vrot.slane %v1488_v30, 2  ;;  %v1556_v52 = vmul.f32 %v5832_v7, %v1252_v57  ;;  %v7081_v17 = vld [vmem:[#allocation64_spill] sm:$0xff] }
 0x22b   : > { %v1567_v43 = vrot.slane %v1555_v42, 2  ;;  %v6292_v24 = vmul.f32 %v5838_v39, %v6249_v33  ;;  %v1628_v9 = vmul.f32 %v5838_v39, %v1252_v57  ;;  %v1695_v20 = vmul.f32 %v5840_v13, %v6249_v33 }
 0x22c   : > { %v1479_v25 = vadd.f32 %v1468_v41, %v1373_v11  ;;  %v1502_v44 = vsel %vm1463_vm4, %v1499_v53, %v1501_v38  ;;  %v1547_v54 = vadd.f32 %v1536_v48, %v1441_v49  ;;  %v1569_v40 = vrot.slane %v1556_v52, 2  ;;  %v7083_v11 = vld [vmem:[#allocation63_spill] sm:$0xff] }
 0x22d   : > { %v1639_v30 = vrot.slane %v6292_v24, 3  ;;  %v1641_v7 = vrot.slane %v1628_v9, 3  ;;  %v1696_v5 = vmul.f32 %v5840_v13, %v1252_v57  ;;  %v1707_v29 = vrot.slane %v1695_v20, 3  ;;  %v7085_v20 = vld [vmem:[#allocation75_spill] sm:$0xff] }
 0x22e   : > { %v7082_v42 = vrot.slane %v7081_v17, 1  ;;  %v1513_v35 = vadd.f32 %v1502_v44, %v1479_v25  ;;  %v1570_v15 = vsel %vm1463_vm4, %v1567_v43, %v1569_v40  ;;  %v1836_v41 = vmul.f32 %v5849_v26, %v1252_v57 }
 0x22f   : > { %v7084_v19 = vrot.slane %v7083_v11, 1  ;;  %v1581_v49 = vadd.f32 %v1570_v15, %v1547_v54  ;;  %v1709_v38 = vrot.slane %v1696_v5, 3  ;;  %v1642_v13 = vsel %vm1603_vm5, %v1639_v30, %v1641_v7  ;;  %v7086_v15 = vld [vmem:[#allocation57_spill] sm:$0xff] }
 0x230   : > { %v1428_v39 = vsel %vm1323_vm3, %v7082_v42, %v1427_v50  ;;  %v1619_v9 = vadd.f32 %v1608_v51, %v1513_v35  ;;  %v6315_v50 = vmul.f32 %v5843_v18, %v1252_v57  ;;  %v1442_v25 = vadd.f32 %v6174_v16, %v7085_v20  ;;  %v7088_v57 = vld [vmem:[#allocation66_spill] sm:$0xff]  ;;  %v7092_v42 = vld [vmem:[#allocation59_spill] sm:$0xff] }
 0x231   : > { %v1360_v48 = vsel %vm1323_vm3, %v7084_v19, %v1359_v6  ;;  %v1440_v52 = vadd.f32 %v1428_v39, %v6228_v45  ;;  %v1687_v44 = vadd.f32 %v1676_v55, %v1581_v49  ;;  %v1710_v40 = vsel %vm1603_vm5, %v1707_v29, %v1709_v38  ;;  %v7090_v55 = vld [vmem:[#allocation53_spill] sm:$0xff] }
 0x232   : > { %v1849_v17 = vrot.slane %v1836_v41, 4  ;;  %v7087_v19 = vrot.slane %v7086_v15, 2  ;;  %v6325_v35 = vadd.f32 %v1642_v13, %v1619_v9  ;;  %v1548_v6 = vadd.f32 %v6129_v36, %v1442_v25  ;;  %v7094_v41 = vld [vmem:[#allocation73_spill] sm:$0xff]  ;;  %v7096_v36 = vld [vmem:[#allocation48_spill] sm:$0xff]  ;;  %v7105_v15 = vld [vmem:[#allocation50_spill] sm:$0xff] }
 0x233   : > { %v7089_v54 = vrot.slane %v7088_v57, 2  ;;  %v1721_v16 = vadd.f32 %v1710_v40, %v1687_v44  ;;  %v7091_v5 = vrot.slane %v7090_v55, 2  ;;  %v7095_v11 = vrot.slane %v7094_v41, 3  ;;  %v7098_v9 = vld [vmem:[#allocation68_spill] sm:$0xff] }
 0x234   : > { %v1534_v45 = vsel %vm1463_vm4, %v7087_v19, %v1533_v37  ;;  %v7093_v37 = vrot.slane %v7092_v42, 3  ;;  %v7097_v49 = vrot.slane %v7096_v36, 3  ;;  %v7099_v10 = vrot.slane %v7098_v9, 3  ;;  %v7109_v42 = vld [vmem:[#allocation69_spill] sm:$0xff]  ;;  %v7111_v41 = vld [vmem:[#allocation56_spill] sm:$0xff]  ;;  %v7113_v36 = vld [vmem:[#allocation70_spill] sm:$0xff] }
 0x235   : > { %v1546_v51 = vadd.f32 %v1534_v45, %v1440_v52  ;;  %v1568_v7 = vsel %vm1463_vm4, %v7089_v54, %v1567_v43  ;;  %v1573_v34 = vsel %vm1463_vm4, %v7091_v5, %v1572_v31  ;;  %v7100_v31 = vld [vmem:[#allocation55_spill] sm:$0xff]  ;;  %v7104_v40 = vrot.slane %v6075_v12, 4 }
 0x236   : > { %v1674_v39 = vsel %vm1603_vm5, %v7093_v37, %v1673_v14  ;;  %v1679_v38 = vsel %vm1603_vm5, %v7097_v49, %v7095_v11  ;;  %v1582_v52 = vadd.f32 %v1573_v34, %v1548_v6  ;;  %v1708_v13 = vsel %vm1603_vm5, %v7099_v10, %v1707_v29  ;;  %v7102_v14 = vld [vmem:[#allocation61_spill] sm:$0xff]  ;;  %v7107_v29 = vld [vmem:[#allocation62_spill] sm:$0xff] }
 0x237   : > { %v1580_v43 = vadd.f32 %v1568_v7, %v1546_v51  ;;  %v7101_v62 = vrot.slane %v7100_v31, 3  ;;  %v7103_v25 = vrot.slane %v7102_v14, 4  ;;  %v7106_v19 = vrot.slane %v7105_v15, 4  ;;  %v7108_v7 = vld [vmem:[#allocation71_spill] sm:$0xff] }
 0x238   : > { %v1827_v51 = vadd.f32 %v1816_v27, %v1721_v16  ;;  %v1834_v61 = vmul.f32 %v5849_v26, %v7107_v29  ;;  %v1688_v57 = vadd.f32 %v1679_v38, %v1582_v52  ;;  %v1372_v54 = vadd.f32 %v1360_v48, %v6213_v8 }
 0x239   : > { %v1713_v20 = vsel %vm1603_vm5, %v7101_v62, %v1712_v46  ;;  %v1814_v44 = vsel %vm1743_vm6, %v7103_v25, %v1813_v28  ;;  %v1819_v45 = vsel %vm1743_vm6, %v7106_v19, %v7104_v40  ;;  %v1686_v6 = vadd.f32 %v1674_v39, %v1580_v43 }
 0x23a   : > { %v1835_v46 = vmul.f32 %v5849_v26, %v6249_v33  ;;  %v1829_v28 = vadd.f32 %v6124_v59, %v6200_v32  ;;  %v1846_v12 = vrot.slane %v1834_v61, 4  ;;  %v1374_v27 = vadd.f32 %v6169_v60, %v7108_v7  ;;  %v7115_v32 = vld [vmem:[#allocation46_spill] sm:$0xff]  ;;  %v7117_v60 = vld [vmem:[#allocation65_spill] sm:$0xff] }
 0x23b   : > { %v1720_v16 = vadd.f32 %v1708_v13, %v1686_v6  ;;  %v1722_v55 = vadd.f32 %v1713_v20, %v1688_v57  ;;  %v1852_v34 = vrot.slane %v1838_v47, 4  ;;  %v1851_v37 = vrot.slane %v7109_v42, 4  ;;  %v4232_v20 = vld [vmem:[#allocation9 + $0x1] ss:$0 sm:$0xff]  ;;  %v7124_v57 = vld [vmem:[#allocation58_spill] sm:$0xff] }
 0x23c   : > { %v1847_v5 = vrot.slane %v1835_v46, 4  ;;  %v7110_v39 = vrot.slane %v6191_v3, 2  ;;  %v7112_v11 = vrot.slane %v7111_v41, 2  ;;  %v7114_v59 = vrot.slane %v7113_v36, 2 }
 0x23d   : > { %v7116_v49 = vrot.slane %v7115_v32, 2  ;;  %v7118_v48 = vrot.slane %v7117_v60, 2  ;;  %v1826_v43 = vadd.f32 %v1814_v44, %v1720_v16  ;;  %v1828_v52 = vadd.f32 %v1819_v45, %v1722_v55  ;;  %v4233_v44 = vld [vmem:[#allocation10 + $0x1] ss:$0 sm:$0xff]  ;;  %v7121_v45 = vld [vmem:[#allocation52_spill] sm:$0xff]  ;;  %v7133_v32 = vld [vmem:[#allocation54_spill] sm:$0xff] }
 0x23e   : > { %v1466_v26 = vsel %vm1463_vm4, %v7112_v11, %v7110_v39  ;;  %v1848_v3 = vsel %vm1743_vm6, %v1846_v12, %v1847_v5  ;;  %v1850_v9 = vsel %vm1743_vm6, %v1847_v5, %v1849_v17  ;;  %v1853_v10 = vsel %vm1743_vm6, %v1851_v37, %v1852_v34 }
 0x23f   : > { %v1471_v8 = vsel %vm1463_vm4, %v7116_v49, %v7114_v59  ;;  %v1500_v38 = vsel %vm1463_vm4, %v7118_v48, %v1499_v53  ;;  %v7119_v13 = vrot.slane %v6161_v21, 4  ;;  %v1861_v62 = vadd.f32 %v1850_v9, %v1827_v51  ;;  %v7136_v48 = vld [vmem:[#allocation60_spill] sm:$0xff] }
 0x240   : > { %v1478_v14 = vadd.f32 %v1466_v26, %v1372_v54  ;;  %v1860_v56 = vadd.f32 %v1848_v3, %v1826_v43  ;;  %v1862_v25 = vadd.f32 %v1853_v10, %v1828_v52  ;;  %v1480_v15 = vadd.f32 %v1471_v8, %v1374_v27  ;;  %v7126_v27 = vld [vmem:[#allocation72_spill] sm:$0xff]  ;;  %v7138_v10 = vld [vmem:[#allocation74_spill] sm:$0xff] }
 0x241   : > { %v1855_v31 = vsel %vm1743_vm6, %v1852_v34, %v7119_v13  ;;  %v1923_v53 = vmul.f32 %v4232_v20, %v1861_v62  ;;  %v7120_v19 = vrot.slane %v6117_v23, 2  ;;  %v7122_v61 = vrot.slane %v7121_v45, 2  ;;  %v7128_v23 = vld [vmem:[#allocation47_spill] sm:$0xff] }
 0x242   : > { %v1863_v40 = vadd.f32 %v1855_v31, %v1829_v28  ;;  %v1512_v6 = vadd.f32 %v1500_v38, %v1478_v14  ;;  %v7123_v21 = vrot.slane %v6217_v58, 3  ;;  %v7125_v46 = vrot.slane %v7124_v57, 3  ;;  %v7130_v58 = vld [vmem:[#allocation67_spill] sm:$0xff]  ;;  %v7140_v31 = vld [vmem:[#allocation49_spill] sm:$0xff] }
 0x243   : > { %v1505_v17 = vsel %vm1463_vm4, %v7122_v61, %v7120_v19  ;;  %v1922_v47 = vmul.f32 %v4232_v20, %v1860_v56  ;;  %v1924_v12 = vmul.f32 %v4232_v20, %v1862_v25  ;;  %v6407_v7 = vadd.f32 %v4233_v44, %v1923_v53 }
 0x244   : > { %v1606_v51 = vsel %vm1603_vm5, %v7125_v46, %v7123_v21  ;;  %v1925_v54 = vmul.f32 %v4232_v20, %v1863_v40  ;;  %v1514_v28 = vadd.f32 %v1505_v17, %v1480_v15  ;;  %v7127_v16 = vrot.slane %v7126_v27, 3  ;;  %v7143_v15 = vld [vmem:[#allocation51_spill] sm:$0xff] }
 0x245   : > { %v7129_v55 = vrot.slane %v7128_v23, 3  ;;  %v1618_v34 = vadd.f32 %v1606_v51, %v1512_v6  ;;  %v7131_v42 = vrot.slane %v7130_v58, 3  ;;  %v6419_v39 = vadd.f32 %v4233_v44, %v1922_v47  ;;  %v4226_v46 = vld [vmem:[#allocation9] ss:$0 sm:$0xff] }
 0x246   : > { %v6421_v41 = vadd.f32 %v4233_v44, %v1924_v12  ;;  %v6423_v11 = vadd.f32 %v4233_v44, %v1925_v54  ;;  %v4235_v36 = vmul.f32 -1.442695, %v6407_v7  ;;  %v7132_v59 = vrot.slane %v6143_v2, 3 }
 0x247   : > { %v1611_v5 = vsel %vm1603_vm5, %v7129_v55, %v7127_v16  ;;  %v1640_v37 = vsel %vm1603_vm5, %v7131_v42, %v1639_v30  ;;  %v7134_v49 = vrot.slane %v7133_v32, 3  ;;  %v7135_v60 = vrot.slane %v6225_v22, 4 }
 0x248   : > { %v1620_v26 = vadd.f32 %v1611_v5, %v1514_v28  ;;  %v1652_v24 = vadd.f32 %v1640_v37, %v1618_v34  ;;  %v7137_v30 = vrot.slane %v7136_v48, 4  ;;  %v4234_v43 = vmul.f32 -1.442695, %v6419_v39  ;;  %v4227_v28 = vld [vmem:[#allocation10] ss:$0 sm:$0xff] }
 0x249   : > { %v1645_v8 = vsel %vm1603_vm5, %v7134_v49, %v7132_v59  ;;  %v4236_v52 = vmul.f32 -1.442695, %v6421_v41  ;;  %v4237_v3 = vmul.f32 -1.442695, %v6423_v11  ;;  %v1781_v2 = vrot.slane %v6315_v50, 4  ;;  %v7142_v50 = vld [vmem:[#allocation76_spill] sm:$0xff] }
 0x24a   : > { %v1746_v38 = vsel %vm1743_vm6, %v7137_v30, %v7135_v60  ;;  %v1654_v9 = vadd.f32 %v1645_v8, %v1620_v26  ;;  %4761 = vpow2.f32 %v4235_v36  ;;  %v7139_v13 = vrot.slane %v7138_v10, 4 }
 0x24b   : > { %v7141_v62 = vrot.slane %v7140_v31, 4  ;;  %v1758_v20 = vadd.f32 %v1746_v38, %v1652_v24  ;;  %4763 = vpow2.f32 %v4234_v43  ;;  %v1759_v14 = vadd.f32 %v6278_v1, %v6325_v35 }
 0x24c   : > { %v1766_v56 = vmul.f32 %v5843_v18, %v7107_v29  ;;  %v1767_v25 = vmul.f32 %v5843_v18, %v6249_v33  ;;  %4765 = vpow2.f32 %v4236_v52  ;;  %v1761_v40 = vadd.f32 %v7142_v50, %v6195_v0 }
 0x24d   : > { %v1751_v22 = vsel %vm1743_vm6, %v7141_v62, %v7139_v13  ;;  %v1769_v53 = vmul.f32 %v5843_v18, %v7143_v15  ;;  %v1770_v44 = vmul.f32 %v5843_v18, %v6100_v63  ;;  %4767 = vpow2.f32 %v4237_v3 }
 0x24e   : > { %v1760_v19 = vadd.f32 %v1751_v22, %v1654_v9  ;;  %v1778_v45 = vrot.slane %v1766_v56, 4  ;;  %v1779_v1 = vrot.slane %v1767_v25, 4  ;;  %v7144_v0 = vrot.slane %v6155_v4, 4 }
 0x24f   : > { %v1783_v35 = vrot.slane %v1769_v53, 4  ;;  %v1784_v61 = vrot.slane %v1770_v44, 4 }
 0x250   : > { %v1780_v29 = vsel %vm1743_vm6, %v1778_v45, %v1779_v1  ;;  %v1782_v33 = vsel %vm1743_vm6, %v1779_v1, %v1781_v2 }
 0x251   : > { %v1785_v17 = vsel %vm1743_vm6, %v1783_v35, %v1784_v61  ;;  %v1787_v6 = vsel %vm1743_vm6, %v1784_v61, %v7144_v0  ;;  %v1792_v21 = vadd.f32 %v1780_v29, %v1758_v20  ;;  %v1793_v57 = vadd.f32 %v1782_v33, %v1759_v14 }
 0x252   : > { %v1794_v18 = vadd.f32 %v1785_v17, %v1760_v19  ;;  %v1795_v63 = vadd.f32 %v1787_v6, %v1761_v40 }
 0x253   : > { %v1871_v51 = vmul.f32 %v4226_v46, %v1792_v21  ;;  %v1872_v47 = vmul.f32 %v4226_v46, %v1793_v57 }
 0x254   : > { %v1873_v12 = vmul.f32 %v4226_v46, %v1794_v18  ;;  %v1874_v54 = vmul.f32 %v4226_v46, %v1795_v63 }
 0x255   : > { %v1882_v27 = vadd.f32 %v4227_v28, %v1871_v51  ;;  %v1883_v16 = vadd.f32 %v4227_v28, %v1872_v47 }
 0x256   : > { %v6463_v23 = vadd.f32 %v4227_v28, %v1873_v12  ;;  %v6465_v4 = vadd.f32 %v4227_v28, %v1874_v54 }
 0x257   : > { %v4228_v55 = vmul.f32 -1.442695, %v1882_v27  ;;  %v4229_v5 = vmul.f32 -1.442695, %v1883_v16  ;;  %v4762_v34 = vpop.eup %4761 }
 0x258   : > { %v4764_v58 = vpop.eup %4763  ;;  %v1951_v42 = vadd.f32 1.0, %v4762_v34  ;;  %v4230_v32 = vmul.f32 -1.442695, %v6463_v23  ;;  %v4231_v8 = vmul.f32 -1.442695, %v6465_v4 }
 0x259   : > { %4769 = vpow2.f32 %v4228_v55  ;;  %v4766_v37 = vpop.eup %4765  ;;  %v1950_v26 = vadd.f32 1.0, %v4764_v58 }
 0x25a   : > { %4771 = vpow2.f32 %v4229_v5  ;;  %v4768_v36 = vpop.eup %4767  ;;  %v1952_v59 = vadd.f32 1.0, %v4766_v37 }
 0x25b   : > { %4773 = vrcp.f32 %v1951_v42  ;;  %v1953_v49 = vadd.f32 1.0, %v4768_v36  ;;  %v7145_v42 = vmov 0.0  }
 0x25c   : > { %4775 = vrcp.f32 %v1950_v26 }
 0x25d   : > { %4777 = vrcp.f32 %v1952_v59 }
 0x25e   : > { %4779 = vrcp.f32 %v1953_v49 }
 0x25f   : > { %4781 = vpow2.f32 %v4230_v32 }
 0x260   : > { %4783 = vpow2.f32 %v4231_v8 }
 0x266   : > { %v4770_v24 = vpop.eup %4769 }
 0x267   : > { %v4772_v60 = vpop.eup %4771  ;;  %v1898_v48 = vadd.f32 1.0, %v4770_v24 }
 0x268   : > { %v4774_v30 = vpop.eup %4773  ;;  %v1899_v38 = vadd.f32 1.0, %v4772_v60 }
 0x269   : > { %v4776_v43 = vpop.eup %4775  ;;  %v6470_v52 = vmul.f32 %v4774_v30, %v6407_v7  ;;  %4785 = vrcp.f32 %v1898_v48  ;;  %v2182_v30 = vld [vmem:[#allocation13] sm:$0xf] }
 0x26a   : > { %v4778_v3 = vpop.eup %4777  ;;  %v6473_v9 = vmul.f32 %v4776_v43, %v6419_v39  ;;  %4787 = vrcp.f32 %v1899_v38  ;;  %v2267_v38 = vld [vmem:[#allocation16] sm:$0xf] }
 0x26b   : > { %v4780_v2 = vpop.eup %4779  ;;  %v6476_v10 = vmul.f32 %v4778_v3, %v6421_v41  ;;  %v1988_v13 = vsel %vm1966_vm7, %v6470_v52, 0.0 }
 0x26c   : > { %v4782_v31 = vpop.eup %4781  ;;  %v6481_v62 = vmul.f32 %v4780_v2, %v6423_v11  ;;  %v1987_v7 = vsel %vm1966_vm7, %v6473_v9, 0.0 }
 0x26d   : > { %v4784_v22 = vpop.eup %4783  ;;  %v1989_v20 = vadd.f32 %v1988_v13, %v1987_v7  ;;  %v1996_v39 = vsel %vm1966_vm7, %v6476_v10, 0.0  ;;  %v1900_v14 = vadd.f32 1.0, %v4782_v31  ;;  %v4244_v13 = vld [vmem:[#allocation12] ss:$0 sm:$0xff] }
 0x26e   : > { %v1997_v41 = vsel %vm1966_vm7, %v6481_v62, 0.0  ;;  %v1901_v56 = vadd.f32 1.0, %v4784_v22 }
 0x26f   : > { %v1990_v25 = vrot.slane %v1989_v20, 4  ;;  %v1998_v50 = vadd.f32 %v1997_v41, %v1996_v39  ;;  %4789 = vrcp.f32 %v1900_v14 }
 0x270   : > { %4791 = vrcp.f32 %v1901_v56 }
 0x271   : > { %v1991_v40 = vadd.f32 %v1990_v25, %v1989_v20  ;;  %v1999_v11 = vrot.slane %v1998_v50, 4  ;;  %v2344_v25 = vld [vmem:[%s6902_s12] sm:$0xf] }
 0x273   : > { %v1992_v15 = vrot.slane %v1991_v40, 2  ;;  %v2000_v53 = vadd.f32 %v1999_v11, %v1998_v50  ;;  %v4246_v50 = vld [vmem:[#allocation15] ss:$0 sm:$0xff] }
 0x275   : > { %v1993_v44 = vadd.f32 %v1992_v15, %v1991_v40  ;;  %v2001_v19 = vrot.slane %v2000_v53, 2  ;;  %v2419_v15 = vld [vmem:[%s6903_s13] sm:$0xff] }
 0x276   : > { %v4786_v45 = vpop.eup %4785 }
 0x277   : > { %v4788_v1 = vpop.eup %4787  ;;  %v1994_v35 = vrot.slane %v1993_v44, 1  ;;  %v2002_v61 = vadd.f32 %v2001_v19, %v2000_v53  ;;  %v6489_v29 = vmul.f32 %v4786_v45, %v1882_v27 }
 0x278   : > { %v6491_v33 = vmul.f32 %v4788_v1, %v1883_v16 }
 0x279   : > { %v1995_v17 = vadd.f32 %v1994_v35, %v1993_v44  ;;  %v2003_v0 = vrot.slane %v2002_v61, 1  ;;  %v1967_v6 = vsel %vm1966_vm7, %v6489_v29, 0.0 }
 0x27a   : > { %v1968_v21 = vsel %vm1966_vm7, %v6491_v33, 0.0 }
 0x27b   : > { %v2004_v57 = vadd.f32 %v2003_v0, %v2002_v61  ;;  %v2005_v46 = vmul.f32 0.0625, %v1995_v17  ;;  %v1969_v18 = vadd.f32 %v1968_v21, %v1967_v6  ;;  %v2515_v17 = vld [vmem:[#allocation19] sm:$0xf] }
 0x27c   : > { %v4790_v63 = vpop.eup %4789 }
 0x27d   : > { %v4792_v51 = vpop.eup %4791  ;;  %v2006_v47 = vmul.f32 0.0625, %v2004_v57  ;;  %v6498_v12 = vmul.f32 %v4790_v63, %v6463_v23  ;;  %v1970_v54 = vrot.slane %v1969_v18, 4  ;;  %v4253_v63 = vld [vmem:[#allocation18] ss:$0 sm:$0xff] }
 0x27e   : > { %v6501_v28 = vmul.f32 %v4792_v51, %v6465_v4 }
 0x27f   : > { %v2019_v27 = vsel %vm2018_vm8, %v2006_v47, %v2005_v46  ;;  %v1971_v16 = vadd.f32 %v1970_v54, %v1969_v18  ;;  %v1976_v55 = vsel %vm1966_vm7, %v6498_v12, 0.0  ;;  %v2730_v46 = vld [vmem:[#allocation19 + $0x4] sm:$0xf]  ;;  %v2516_v18 = vld [vmem:[#allocation21] sm:$0x3] }
 0x280   : > { %4420 = vmatmul.mubr.msk.f32.vlgmr.msra.gmra.mxu0 %vm1966_vm7, %v2019_v27  ;;  %v1977_v5 = vsel %vm1966_vm7, %v6501_v28, 0.0 }
 0x281   : > { %v1972_v34 = vrot.slane %v1971_v16, 2  ;;  %v1978_v58 = vadd.f32 %v1977_v5, %v1976_v55  ;;  %4435 = vmatprep.mubr.msk.f32.mxu0 %vm5330_vm2, %v7145_v42  ;;  %4434 = vmatpush3.msk.msra.mxu0 %vm1743_vm6, %v2182_v30  ;;  %v4269_v30 = vld [vmem:[%s6908_s18 + $0x20] sm:$0xff] }
 0x282   : > { %4443 = vmatprep.subr.mxu0 %v7145_v42 }
 0x283   : > { %v1973_v23 = vadd.f32 %v1972_v34, %v1971_v16  ;;  %v1979_v37 = vrot.slane %v1978_v58, 4 }
 0x285   : > { %v1974_v4 = vrot.slane %v1973_v23, 1  ;;  %v1980_v26 = vadd.f32 %v1979_v37, %v1978_v58 }
 0x287   : > { %v1981_v36 = vrot.slane %v1980_v26, 2  ;;  %v1975_v59 = vadd.f32 %v1974_v4, %v1973_v23 }
 0x289   : > { %v1982_v32 = vadd.f32 %v1981_v36, %v1980_v26  ;;  %v1985_v24 = vmul.f32 0.0625, %v1975_v59  ;;  %v2732_v26 = vld [vmem:[#allocation21 + $0x2] sm:$0x3]  ;;  %v2725_v36 = vld [vmem:[%s6908_s18 + $0x10] sm:$0xff]  ;;  %v2726_v59 = vld [vmem:[%s6908_s18 + $0x18] sm:$0xff] }
 0x28b   : > { %v1983_v49 = vrot.slane %v1982_v32, 1 }
 0x28d   : > { %v1984_v8 = vadd.f32 %v1983_v49, %v1982_v32  ;;  %v4271_v32 = vld [vmem:[%s6908_s18 + $0x30] sm:$0xff]  ;;  %v2728_v49 = vpack.c.bf16 %v2726_v59, %v2725_v36 }
 0x28e   : > { %v7148_v36 = vld [vmem:[#allocation36_spill] sm:$0xff] }
 0x28f   : > { %v1986_v60 = vmul.f32 0.0625, %v1984_v8  ;;  %v4272_v8 = vld [vmem:[%s6908_s18 + $0x38] sm:$0xff]  ;;  %v7149_v59 = vrot.slane %v7148_v36, 6 }
 0x291   : > { %v2094_v48 = vsel %vm2018_vm8, %v1986_v60, %v1985_v24  ;;  %v2724_v24 = vld [vmem:[%s6908_s18 + $0x8] sm:$0xff]  ;;  %v2939_v60 = vpack.c.bf16 %v4272_v8, %v4271_v32  ;;  %v6595_v32 = vsel %vm1217_vm1, 0.0, %v7149_v59  ;;  %v3144_v8 = vld [vmem:[%s6911_s21] sm:$0xff] }
 0x292   : > { %4431 = vmatmul.mubr.msk.f32.vlgmr.msra.gmra.mxu1 %vm1966_vm7, %v2094_v48 }
 0x293   : > { %4440 = vmatprep.mubr.msk.f32.mxu1 %vm5330_vm2, %v7145_v42  ;;  %4439 = vmatpush3.msk.msra.mxu1 %vm1743_vm6, %v2267_v38  ;;  %v4270_v38 = vld [vmem:[%s6908_s18 + $0x28] sm:$0xff] }
 0x294   : > { %4448 = vmatprep.subr.mxu1 %v7145_v42 }
 0x340   : > { %v2088_v43 = vpop.f32.mrf.mxu0 }
 0x342   : > { %v4421_v3 = vpop.f32.mrf.mxu0 }
 0x352   : > { %v2163_v2 = vpop.f32.mrf.mxu1 }
 0x353   : > { %v2164_v31 = vadd.f32 %v2163_v2, %v2088_v43  ;;  %v2938_v43 = vpack.c.bf16 %v4270_v38, %v4269_v30  ;;  %v4261_v2 = vld [vmem:[#allocation22] ss:$0 sm:$0xff]  ;;  %v3145_v38 = vld [vmem:[%s6911_s21 + $0x8] sm:$0xff] }
 0x354   : > { %v4432_v7 = vpop.f32.mrf.mxu1 }
 0x355   : > { %v2174_v22 = vadd.f32 %v4244_v13, %v2164_v31 }
 0x357   : > { %v4245_v20 = vmul.f32 -1.442695, %v2174_v22 }
 0x359   : > { %4793 = vpow2.f32 %v4245_v20  ;;  %v4267_v20 = vld [vmem:[#allocation22 + $0x1] ss:$0 sm:$0xff] }
 0x366   : > { %v4794_v39 = vpop.eup %4793 }
 0x367   : > { %v2178_v14 = vadd.f32 1.0, %v4794_v39 }
 0x369   : > { %4795 = vrcp.f32 %v2178_v14 }
 0x376   : > { %v4796_v41 = vpop.eup %4795 }
 0x377   : > { %v2181_v56 = vmul.f32 %v4796_v41, %v2174_v22 }
 0x379   : > { %4436 = vmatmul.mubr.msk.f32.vlgmr.msra.gmra.mxu0 %vm2190_vm9, %v2181_v56 }
 0x37a   : > { %4444 = vmatpush3.msk.msra.mxu0 %vm1743_vm6, %v2344_v25  ;;  %4445 = vmatprep.mubr.msk.f32.mxu0 %vm5330_vm2, %v7145_v42 }
 0x37b   : > { %4453 = vmatprep.subr.mxu0 %v7145_v42 }
 0x439   : > { %v2263_v40 = vpop.f32.mrf.mxu0 }
 0x43a   : > { %v2264_v11 = vadd.f32 %v4246_v50, %v2263_v40 }
 0x43b   : > { %v4437_v53 = vpop.f32.mrf.mxu0 }
 0x43c   : > { %4441 = vmatmul.mubr.msk.f32.vlgmr.msra.gmra.mxu1 %vm2190_vm9, %v2264_v11  ;;  %4446 = vmatmul.mubr.msk.f32.vlgmr.msra.gmra.mxu0 %vm2190_vm9, %v2264_v11  ;;  %v4255_v44 = vmul.f32 -1.442695, %v2264_v11  ;;  %v5331_v53 = vmov 1966171168  }
 0x43d   : > { %4449 = vmatpush3.msra.mxu1 %v2419_v15  ;;  %4450 = vmatprep.mubr.msk.f32.mxu1 %vm5330_vm2, %v7145_v42 }
 0x43e   : > { %4458 = vmatprep.subr.mxu1 %v7145_v42  ;;  %4455 = vmatprep.mubr.msk.f32.mxu0 %vm5330_vm2, %v7145_v42  ;;  %4797 = vpow2.f32 %v4255_v44  ;;  %v2686_v44 = vunpack.c.l.s4 %v5331_v53  ;;  %v4299_v53 = vld [vmem:[%s6912_s22 + $0x20] sm:$0xff] }
 0x43f   : > { %4454 = vmatpush3.msk.msra.mxu0 %vm1217_vm1, %v2516_v18 }
 0x440   : > { %4463 = vmatprep.subr.mxu0 %v7145_v42 }
 0x44b   : > { %v4798_v19 = vpop.eup %4797 }
 0x44c   : > { %v2504_v45 = vadd.f32 1.0, %v4798_v19  ;;  %v2687_v19 = vunpack.c.0.s8 %v2686_v44 }
 0x44e   : > { %4799 = vrcp.f32 %v2504_v45  ;;  %v7146_v45 = vld [vmem:[#allocation42_spill] sm:$0xff] }
 0x45b   : > { %v4800_v0 = vpop.eup %4799 }
 0x45c   : > { %v2507_v57 = vmul.f32 %v4800_v0, %v2264_v11 }
 0x4fc   : > { %v2340_v1 = vpop.f32.mrf.mxu1  ;;  %v2414_v35 = vpop.f32.mrf.mxu0 }
 0x4fd   : > { %v2418_v61 = vmul.f32 %v2414_v35, %v2340_v1  ;;  %v2690_v1 = vsub.s32 %v2687_v19, %v7146_v45  ;;  %v4300_v45 = vld [vmem:[%s6912_s22 + $0x28] sm:$0xff] }
 0x4fe   : > { %v4442_v6 = vpop.f32.mrf.mxu1  ;;  %v4447_v21 = vpop.f32.mrf.mxu0 }
 0x4ff   : > { %4451 = vmatmul.mubr.msk.f32.vlgmr.msra.gmra.mxu1 %vm2427_vm10, %v2418_v61  ;;  %v7147_v21 = vld [vmem:[#allocation43_spill] sm:$0xff] }
 0x500   : > { %4459 = vmatpush3.msk.msra.mxu1 %vm1743_vm6, %v2515_v17  ;;  %4460 = vmatprep.mubr.msk.f32.mxu1 %vm5330_vm2, %v7145_v42 }
 0x501   : > { %4468 = vmatprep.subr.mxu1 %v7145_v42 }
 0x503   : > { %4461 = vmatmul.mubr.msk.f32.vlgmr.msra.gmra.mxu1 %vm2190_vm9, %v2507_v57 }
 0x504   : > { %4469 = vmatpush3.msk.msra.mxu1 %vm1743_vm6, %v2730_v46  ;;  %4470 = vmatprep.mubr.msk.f32.mxu1 %vm5330_vm2, %v7145_v42 }
 0x505   : > { %4481 = vmatprep.subr.bf16.mxu1 %v2728_v49 }
 0x507   : > { %4471 = vmatmul.mubr.msk.f32.vlgmr.msra.gmra.mxu1 %vm2190_vm9, %v2507_v57 }
 0x508   : > { %4482 = vmatpush3.bf16.msra.mxu1 %v2728_v49 }
 0x5bf   : > { %v2497_v51 = vpop.f32.mrf.mxu1 }
 0x5c0   : > { %v2498_v47 = vadd.f32 %v4253_v63, %v2497_v51 }
 0x5c1   : > { %v4452_v54 = vpop.f32.mrf.mxu1 }
 0x5c2   : > { %v4256_v27 = vmul.f32 -1.442695, %v2498_v47 }
 0x5c3   : > { %v2666_v16 = vpop.f32.mrf.mxu1 }
 0x5c4   : > { %4801 = vpow2.f32 %v4256_v27 }
 0x5c5   : > { %v4462_v55 = vpop.f32.mrf.mxu1 }
 0x5c7   : > { %v2875_v5 = vpop.f32.mrf.mxu1 }
 0x5c9   : > { %v4472_v34 = vpop.f32.mrf.mxu1 }
 0x5d1   : > { %v4802_v58 = vpop.eup %4801 }
 0x5d2   : > { %v2511_v23 = vadd.f32 1.0, %v4802_v58 }
 0x5d4   : > { %4803 = vrcp.f32 %v2511_v23 }
 0x5e1   : > { %v4804_v37 = vpop.eup %4803 }
 0x5e2   : > { %v2514_v4 = vmul.f32 %v4804_v37, %v2498_v47 }
 0x5e4   : > { %4456 = vmatmul.mubr.msk.f32.vlgmr.msra.gmra.mxu0 %vm2517_vm11, %v2514_v4 }
 0x5e5   : > { %4464 = vmatpush3.msk.msra.mxu0 %vm1217_vm1, %v2732_v26  ;;  %4465 = vmatprep.mubr.msk.f32.mxu0 %vm5330_vm2, %v7145_v42  ;;  %v2723_v42 = vld [vmem:[%s6908_s18] sm:$0xff] }
 0x5e6   : > { %v2727_v48 = vpack.c.bf16 %v2724_v24, %v2723_v42  ;;  %4473 = vmatprep.subr.bf16.mxu0 %v2939_v60  ;;  %v7152_v42 = vld [vmem:[#allocation40_spill] sm:$0xff] }
 0x5e7   : > { %v3140_v24 = vpack.c.bf16 %v7152_v42, %v6595_v32 }
 0x5e8   : > { %4466 = vmatmul.mubr.msk.f32.vlgmr.msra.gmra.mxu0 %vm2517_vm11, %v2514_v4  ;;  %4483 = vmatprep.subr.bf16.mxu1 %v2727_v48 }
 0x5e9   : > { %4474 = vmatpush3.bf16.msra.mxu0 %v2939_v60  ;;  %4484 = vmatpush3.bf16.msra.mxu1 %v2727_v48  ;;  %v7153_v60 = vld [vmem:[#allocation41_spill] sm:$0xff] }
 0x5ea   : > { %4475 = vmatprep.subr.bf16.mxu0 %v2938_v43  ;;  %v3270_v19 = vrot.slane %v7153_v60, 1 }
 0x5ed   : > { %4476 = vmatpush3.bf16.msra.mxu0 %v2938_v43  ;;  %v3146_v43 = vpack.c.bf16 %v3145_v38, %v3144_v8  ;;  %v3743_v8 = vrot.slane %v7152_v42, 4 }
 0x5ef   : > { %4495 = vmatprep.subr.bf16.mxu1 %v3146_v43 }
 0x6a4   : > { %v2590_v3 = vpop.f32.mrf.mxu0 }
 0x6a5   : > { %v2667_v13 = vadd.f32 %v2666_v16, %v2590_v3  ;;  %v7154_v3 = vld [vmem:[#allocation37_spill] sm:$0xff] }
 0x6a6   : > { %v4457_v31 = vpop.f32.mrf.mxu0 }
 0x6a7   : > { %v2677_v7 = vadd.f32 %v4261_v2, %v2667_v13  ;;  %v7155_v2 = vrot.slane %v7154_v3, 6  ;;  %v4287_v31 = vld [vmem:[%s6911_s21 + $0x10] sm:$0xff] }
 0x6a8   : > { %v2802_v22 = vpop.f32.mrf.mxu0 }
 0x6a9   : > { %v4262_v39 = vmul.f32 -1.442695, %v2677_v7  ;;  %v2876_v14 = vadd.f32 %v2875_v5, %v2802_v22  ;;  %v6622_v13 = vsel %vm1217_vm1, %v7155_v2, 0.0  ;;  %v4288_v7 = vld [vmem:[%s6911_s21 + $0x18] sm:$0xff]  ;;  %v4291_v22 = vld [vmem:[%s6912_s22 + $0x10] sm:$0xff] }
 0x6aa   : > { %v4467_v41 = vpop.f32.mrf.mxu0 }
 0x6ab   : > { %4805 = vpow2.f32 %v4262_v39  ;;  %v2887_v56 = vadd.f32 %v4267_v20, %v2876_v14  ;;  %v7156_v20 = vld [vmem:[#allocation39_spill] sm:$0xff]  ;;  %v6636_v41 = vpack.c.bf16 %v4288_v7, %v4287_v31 }
 0x6ac   : > { %v7157_v39 = vrot.slane %v7156_v20, 6  ;;  %v4278_v7 = vld [vmem:[#allocation25] ss:$0 sm:$0xff] }
 0x6ad   : > { %v4268_v25 = vmul.f32 -1.442695, %v2887_v56  ;;  %v4292_v56 = vld [vmem:[%s6912_s22 + $0x18] sm:$0xff] }
 0x6ae   : > { %v3119_v14 = vsel %vm1217_vm1, %v7157_v39, 0.0 }
 0x6af   : > { %4807 = vpow2.f32 %v4268_v25  ;;  %v3366_v25 = vpack.c.bf16 %v4292_v56, %v4291_v22 }
 0x6b8   : > { %v4806_v50 = vpop.eup %4805 }
 0x6b9   : > { %v2681_v40 = vadd.f32 1.0, %v4806_v50  ;;  %v3264_v50 = vrot.slane %v6595_v32, 1 }
 0x6bb   : > { %4809 = vrcp.f32 %v2681_v40  ;;  %v3267_v40 = vrot.slane %v6622_v13, 1 }
 0x6bc   : > { %v4808_v11 = vpop.eup %4807 }
 0x6bd   : > { %v2891_v15 = vadd.f32 1.0, %v4808_v11  ;;  %v3272_v11 = vrot.slane %v3119_v14, 1 }
 0x6bf   : > { %4811 = vrcp.f32 %v2891_v15  ;;  %v3265_v15 = vrot.slane %v7152_v42, 1 }
 0x6c8   : > { %v4810_v35 = vpop.eup %4809 }
 0x6c9   : > { %v2691_v61 = vrot.slane %v4810_v35, %v2690_v1  ;;  %v6658_v35 = vsel %vm1323_vm3, %v3265_v15, %v3267_v40 }
 0x6cb   : > { %v2692_v17 = vcombine.high %v2691_v61, %v2691_v61  ;;  %v2699_v0 = vrot.slane %v2691_v61, %v2690_v1  ;;  %v6660_v61 = vpack.c.bf16 %v4300_v45, %v4299_v53 }
 0x6cc   : > { %v4812_v6 = vpop.eup %4811 }
 0x6cd   : > { %v2710_v57 = vrot.slane %v2699_v0, %v7147_v21  ;;  %v2706_v46 = vrot.slane %v2692_v17, %v2690_v1  ;;  %v2901_v18 = vrot.slane %v4812_v6, %v2690_v1  ;;  %v6668_v6 = vsel %vm1323_vm3, %v3270_v19, %v3272_v11 }
 0x6cf   : > { %v2717_v63 = vmul.f32 %v2710_v57, %v6489_v29  ;;  %v2718_v51 = vmul.f32 %v2710_v57, %v6491_v33  ;;  %v2714_v47 = vrot.slane %v2706_v46, %v7147_v21  ;;  %v2902_v54 = vcombine.high %v2901_v18, %v2901_v18 }
 0x6d0   : > { %v2909_v27 = vrot.slane %v2901_v18, %v2690_v1  ;;  %v3426_v57 = vrot.slane %v6595_v32, 2  ;;  %v3429_v46 = vrot.slane %v6622_v13, 2  ;;  %v3434_v18 = vrot.slane %v3119_v14, 2 }
 0x6d1   : > { %v2721_v16 = vpack.c.bf16 %v2718_v51, %v2717_v63  ;;  %v2719_v55 = vmul.f32 %v2714_v47, %v6498_v12  ;;  %v2720_v5 = vmul.f32 %v2714_v47, %v6501_v28  ;;  %v2916_v34 = vrot.slane %v2902_v54, %v2690_v1 }
 0x6d2   : > { %v2920_v58 = vrot.slane %v2909_v27, %v7147_v21  ;;  %v6655_v1 = vsel %vm1323_vm3, %v3264_v50, %v3265_v15  ;;  %v3427_v63 = vrot.slane %v7152_v42, 2  ;;  %v3432_v47 = vrot.slane %v7153_v60, 2 }
 0x6d3   : > { %4485 = vmatprep.mubr.msk.bf16.mxu1 %vm1966_vm7, %v2721_v16  ;;  %v2722_v23 = vpack.c.bf16 %v2720_v5, %v2719_v55  ;;  %v2924_v37 = vrot.slane %v2916_v34, %v7147_v21  ;;  %v3278_v0 = vpack.c.bf16 %v6658_v35, %v6655_v1  ;;  %v4303_v1 = vld [vmem:[%s6911_s21 + $0x30] sm:$0xff]  ;;  %v4304_v35 = vld [vmem:[%s6911_s21 + $0x38] sm:$0xff] }
 0x6d4   : > { %v2927_v29 = vmul.f32 %v2920_v58, %v6473_v9  ;;  %v2928_v33 = vmul.f32 %v2920_v58, %v6470_v52  ;;  %v7150_v9 = vld [vmem:[#allocation38_spill] sm:$0xff]  ;;  %v6679_v54 = vsel %vm1463_vm4, %v3426_v57, %v3427_v63  ;;  %v6682_v27 = vsel %vm1463_vm4, %v3427_v63, %v3429_v46 }
 0x6d5   : > { %4486 = vmatmul.mubr.msk.bf16.vlgmr.msra.gmra.mxu1 %vm1966_vm7, %v2722_v23  ;;  %v2929_v4 = vmul.f32 %v2924_v37, %v6476_v10  ;;  %v2930_v12 = vmul.f32 %v2924_v37, %v6481_v62  ;;  %v7151_v49 = vrot.slane %v7150_v9, 6  ;;  %v3147_v10 = vld [vmem:[%s6912_s22] sm:$0xff]  ;;  %v3148_v62 = vld [vmem:[%s6912_s22 + $0x8] sm:$0xff]  ;;  %v3440_v55 = vpack.c.bf16 %v6682_v27, %v6679_v54 }
 0x6d6   : > { %v2931_v26 = vpack.c.bf16 %v2928_v33, %v2927_v29  ;;  %v3149_v30 = vpack.c.bf16 %v3148_v62, %v3147_v10  ;;  %4497 = vmatprep.mubr.msk.bf16.mxu1 %vm1002_vm0, %v3140_v24  ;;  %4496 = vmatpush3.bf16.msra.mxu1 %v3146_v43  ;;  %v6690_v5 = vsel %vm1463_vm4, %v3432_v47, %v3434_v18  ;;  %v3584_v58 = vrot.slane %v6595_v32, 3  ;;  %v4312_v54 = vld [vmem:[%s6911_s21 + $0x48] sm:$0xff] }
 0x6d7   : > { %v2932_v28 = vpack.c.bf16 %v2930_v12, %v2929_v4  ;;  %v6600_v52 = vsel %vm1217_vm1, 0.0, %v7151_v49  ;;  %4507 = vmatprep.subr.bf16.mxu1 %v3366_v25  ;;  %v3587_v23 = vrot.slane %v6622_v13, 3  ;;  %v3592_v37 = vrot.slane %v3119_v14, 3 }
 0x6d8   : > { %4477 = vmatprep.mubr.msk.bf16.mxu0 %vm1966_vm7, %v2931_v26  ;;  %v3141_v48 = vpack.c.bf16 %v7153_v60, %v6600_v52  ;;  %4489 = vmatprep.subr.bf16.mxu0 %v3149_v30  ;;  %v3269_v44 = vrot.slane %v6600_v52, 1  ;;  %v3431_v51 = vrot.slane %v6600_v52, 2  ;;  %v3585_v29 = vrot.slane %v7152_v42, 3 }
 0x6d9   : > { %4478 = vmatmul.mubr.msk.bf16.vlgmr.msra.gmra.mxu0 %vm1966_vm7, %v2932_v28  ;;  %v3589_v33 = vrot.slane %v6600_v52, 3  ;;  %v3590_v4 = vrot.slane %v7153_v60, 3  ;;  %v3742_v49 = vrot.slane %v6595_v32, 4  ;;  %v3745_v10 = vrot.slane %v6622_v13, 4  ;;  %v4277_v13 = vld [vmem:[#allocation24] ss:$0 sm:$0xff] }
 0x6da   : > { %4490 = vmatpush3.bf16.msra.mxu0 %v3149_v30  ;;  %v6663_v17 = vsel %vm1323_vm3, %v3269_v44, %v3270_v19  ;;  %v6685_v16 = vsel %vm1463_vm4, %v3431_v51, %v3432_v47  ;;  %v6700_v12 = vsel %vm1603_vm5, %v3584_v58, %v3585_v29  ;;  %v6703_v26 = vsel %vm1603_vm5, %v3585_v29, %v3587_v23 }
 0x6db   : > { %4501 = vmatprep.subr.bf16.mxu0 %v6636_v41  ;;  %v3279_v21 = vpack.c.bf16 %v6668_v6, %v6663_v17  ;;  %v3441_v34 = vpack.c.bf16 %v6690_v5, %v6685_v16  ;;  %v6706_v28 = vsel %vm1603_vm5, %v3589_v33, %v3590_v4  ;;  %v3598_v36 = vpack.c.bf16 %v6703_v26, %v6700_v12 }
 0x6dc   : > { %v6711_v59 = vsel %vm1603_vm5, %v3590_v4, %v3592_v37  ;;  %v3750_v62 = vrot.slane %v3119_v14, 4  ;;  %v3747_v24 = vrot.slane %v6600_v52, 4  ;;  %v6721_v30 = vsel %vm1743_vm6, %v3742_v49, %v3743_v8 }
 0x6dd   : > { %4498 = vmatmul.mubr.msk.bf16.vlgmr.msra.gmra.mxu1 %vm1002_vm0, %v3141_v48  ;;  %v3599_v9 = vpack.c.bf16 %v6711_v59, %v6706_v28  ;;  %v3748_v48 = vrot.slane %v7153_v60, 4  ;;  %v6724_v38 = vsel %vm1743_vm6, %v3743_v8, %v3745_v10 }
 0x6de   : > { %4508 = vmatpush3.bf16.msra.mxu1 %v3366_v25  ;;  %v3756_v3 = vpack.c.bf16 %v6724_v38, %v6721_v30 }
 0x6df   : > { %4519 = vmatprep.subr.bf16.mxu1 %v6660_v61  ;;  %v6727_v43 = vsel %vm1743_vm6, %v3747_v24, %v3748_v48  ;;  %v6730_v32 = vsel %vm1743_vm6, %v3748_v48, %v3750_v62 }
 0x6e0   : > { %v3757_v52 = vpack.c.bf16 %v6730_v32, %v6727_v43 }
 0x795   : > { %v4487_v42 = vpop.f32.mrf.mxu1 }
 0x797   : > { %v3035_v60 = vpop.f32.mrf.mxu1 }
 0x799   : > { %v4479_v2 = vpop.f32.mrf.mxu0  ;;  %v4488_v22 = vpop.f32.mrf.mxu1 }
 0x79a   : > { %v3044_v31 = vadd.f32 %v4487_v42, %v4479_v2 }
 0x79b   : > { %v2980_v20 = vpop.f32.mrf.mxu0  ;;  %v3038_v11 = vpop.f32.mrf.mxu1 }
 0x79c   : > { %v3059_v39 = vmul.f32 %v4277_v13, %v3044_v31  ;;  %v3036_v14 = vadd.f32 %v3035_v60, %v2980_v20 }
 0x79d   : > { %v4480_v56 = vpop.f32.mrf.mxu0  ;;  %v4499_v12 = vpop.f32.mrf.mxu1 }
 0x79e   : > { %v3070_v25 = vadd.f32 %v4278_v7, %v3059_v39  ;;  %v3057_v50 = vmul.f32 %v4277_v13, %v3036_v14  ;;  %v3047_v40 = vadd.f32 %v4488_v22, %v4480_v56  ;;  %v4295_v14 = vld [vmem:[%s6911_s21 + $0x20] sm:$0xff]  ;;  %v4296_v56 = vld [vmem:[%s6911_s21 + $0x28] sm:$0xff] }
 0x79f   : > { %v2983_v15 = vpop.f32.mrf.mxu0  ;;  %v3245_v26 = vpop.f32.mrf.mxu1 }
 0x7a0   : > { %v4281_v53 = vmul.f32 -1.442695, %v3070_v25  ;;  %v3068_v44 = vadd.f32 %v4278_v7, %v3057_v50  ;;  %v3060_v19 = vmul.f32 %v4277_v13, %v3047_v40  ;;  %v3039_v45 = vadd.f32 %v3038_v11, %v2983_v15 }
 0x7a2   : > { %4813 = vpow2.f32 %v4281_v53  ;;  %v4279_v57 = vmul.f32 -1.442695, %v3068_v44  ;;  %v3071_v46 = vadd.f32 %v4278_v7, %v3060_v19  ;;  %v3058_v18 = vmul.f32 %v4277_v13, %v3039_v45 }
 0x7a4   : > { %4815 = vpow2.f32 %v4279_v57  ;;  %v4282_v63 = vmul.f32 -1.442695, %v3071_v46  ;;  %v3069_v51 = vadd.f32 %v4278_v7, %v3058_v18 }
 0x7a6   : > { %4817 = vpow2.f32 %v4282_v63  ;;  %v4280_v47 = vmul.f32 -1.442695, %v3069_v51 }
 0x7a8   : > { %4819 = vpow2.f32 %v4280_v47 }
 0x7af   : > { %v4814_v58 = vpop.eup %4813 }
 0x7b0   : > { %v3086_v23 = vadd.f32 1.0, %v4814_v58 }
 0x7b1   : > { %v4816_v37 = vpop.eup %4815 }
 0x7b2   : > { %4821 = vrcp.f32 %v3086_v23  ;;  %v3084_v29 = vadd.f32 1.0, %v4816_v37 }
 0x7b3   : > { %v4818_v33 = vpop.eup %4817 }
 0x7b4   : > { %4823 = vrcp.f32 %v3084_v29  ;;  %v3087_v4 = vadd.f32 1.0, %v4818_v33  ;;  %v4307_v33 = vld [vmem:[%s6912_s22 + $0x30] sm:$0xff] }
 0x7b5   : > { %v4820_v49 = vpop.eup %4819 }
 0x7b6   : > { %4825 = vrcp.f32 %v3087_v4  ;;  %v3085_v10 = vadd.f32 1.0, %v4820_v49  ;;  %v4308_v4 = vld [vmem:[%s6912_s22 + $0x38] sm:$0xff] }
 0x7b8   : > { %4827 = vrcp.f32 %v3085_v10 }
 0x7bf   : > { %v4822_v62 = vpop.eup %4821 }
 0x7c0   : > { %v3098_v8 = vmul.f32 %v4822_v62, %v3070_v25 }
 0x7c1   : > { %v4824_v24 = vpop.eup %4823 }
 0x7c2   : > { %v3127_v48 = vrot.slane %v3098_v8, 6  ;;  %v3096_v42 = vmul.f32 %v4824_v24, %v3068_v44  ;;  %v3461_v44 = vpack.c.bf16 %v4296_v56, %v4295_v14  ;;  %v3619_v56 = vpack.c.bf16 %v4304_v35, %v4303_v1 }
 0x7c3   : > { %v4826_v60 = vpop.eup %4825 }
 0x7c4   : > { %v3124_v2 = vrot.slane %v3096_v42, 6  ;;  %v3099_v13 = vmul.f32 %v4826_v60, %v3071_v46  ;;  %v6737_v7 = vsel %vm1217_vm1, 0.0, %v3127_v48  ;;  %v3682_v42 = vpack.c.bf16 %v4308_v4, %v4307_v33 }
 0x7c5   : > { %v4828_v31 = vpop.eup %4827  ;;  %v3289_v11 = vrot.slane %v6737_v7, 1  ;;  %v3605_v27 = vrot.slane %v6737_v7, 3 }
 0x7c6   : > { %v6740_v22 = vsel %vm1217_vm1, 0.0, %v3124_v2  ;;  %v3128_v20 = vrot.slane %v3099_v13, 6  ;;  %v3097_v39 = vmul.f32 %v4828_v31, %v3069_v51 }
 0x7c7   : > { %v3284_v53 = vrot.slane %v6740_v22, 1  ;;  %v3442_v46 = vrot.slane %v6740_v22, 2 }
 0x7c8   : > { %v6749_v25 = vsel %vm1217_vm1, %v3127_v48, %v3128_v20  ;;  %v6752_v50 = vsel %vm1217_vm1, %v3128_v20, 0.0  ;;  %v3125_v40 = vrot.slane %v3097_v39, 6  ;;  %v3600_v20 = vrot.slane %v6740_v22, 3 }
 0x7c9   : > { %v3292_v15 = vrot.slane %v6752_v50, 1  ;;  %v3290_v57 = vrot.slane %v6749_v25, 1  ;;  %v3143_v58 = vpack.c.bf16 %v6749_v25, %v6737_v7  ;;  %v3450_v60 = vrot.slane %v6752_v50, 2 }
 0x7ca   : > { %v6758_v19 = vsel %vm1217_vm1, %v3124_v2, %v3125_v40  ;;  %v6761_v45 = vsel %vm1217_vm1, %v3125_v40, 0.0  ;;  %v3448_v13 = vrot.slane %v6749_v25, 2  ;;  %v4315_v40 = vld [vmem:[%s6912_s22 + $0x40] sm:$0xff] }
 0x7cb   : > { %v3142_v18 = vpack.c.bf16 %v6758_v19, %v6740_v22  ;;  %v3285_v63 = vrot.slane %v6758_v19, 1  ;;  %v3287_v51 = vrot.slane %v6761_v45, 1  ;;  %v3443_v47 = vrot.slane %v6758_v19, 2 }
 0x7cc   : > { %v3291_v23 = vsel %vm1323_vm3, %v3289_v11, %v3290_v57  ;;  %v3293_v37 = vsel %vm1323_vm3, %v3290_v57, %v3292_v15  ;;  %v3445_v29 = vrot.slane %v6761_v45, 2  ;;  %v3601_v31 = vrot.slane %v6758_v19, 3  ;;  %v4316_v11 = vld [vmem:[%s6912_s22 + $0x48] sm:$0xff] }
 0x7cd   : > { %4491 = vmatprep.mubr.msk.bf16.mxu0 %vm1002_vm0, %v3142_v18  ;;  %v3286_v49 = vsel %vm1323_vm3, %v3284_v53, %v3285_v63  ;;  %v3288_v10 = vsel %vm1323_vm3, %v3285_v63, %v3287_v51  ;;  %v3444_v62 = vsel %vm1463_vm4, %v3442_v46, %v3443_v47  ;;  %v3299_v48 = vpack.c.bf16 %v3293_v37, %v3291_v23 }
 0x7ce   : > { %4492 = vmatmul.mubr.msk.bf16.vlgmr.msra.gmra.mxu0 %vm1002_vm0, %v3143_v58  ;;  %v3298_v8 = vpack.c.bf16 %v3288_v10, %v3286_v49  ;;  %v3446_v24 = vsel %vm1463_vm4, %v3443_v47, %v3445_v29  ;;  %v3451_v14 = vsel %vm1463_vm4, %v3448_v13, %v3450_v60  ;;  %v3602_v15 = vsel %vm1603_vm5, %v3600_v20, %v3601_v31 }
 0x7cf   : > { %4502 = vmatpush3.bf16.msra.mxu0 %v6636_v41  ;;  %4503 = vmatprep.mubr.msk.bf16.mxu0 %vm1002_vm0, %v3278_v0  ;;  %v3456_v2 = vpack.c.bf16 %v3446_v24, %v3444_v62  ;;  %v3603_v41 = vrot.slane %v6761_v45, 3  ;;  %v3447_v0 = vrot.slane %v6737_v7, 2  ;;  %v3840_v57 = vpack.c.bf16 %v4316_v11, %v4315_v40 }
 0x7d0   : > { %4509 = vmatprep.mubr.msk.bf16.mxu1 %vm1002_vm0, %v3298_v8  ;;  %4513 = vmatprep.subr.bf16.mxu0 %v3461_v44  ;;  %v3608_v46 = vrot.slane %v6752_v50, 3  ;;  %v3606_v63 = vrot.slane %v6749_v25, 3  ;;  %v3759_v17 = vrot.slane %v6758_v19, 4  ;;  %v3761_v6 = vrot.slane %v6761_v45, 4 }
 0x7d1   : > { %4510 = vmatmul.mubr.msk.bf16.vlgmr.msra.gmra.mxu1 %vm1002_vm0, %v3299_v48  ;;  %v3449_v39 = vsel %vm1463_vm4, %v3447_v0, %v3448_v13  ;;  %v3764_v37 = vrot.slane %v6749_v25, 4  ;;  %v3763_v29 = vrot.slane %v6737_v7, 4 }
 0x7d2   : > { %4521 = vmatprep.mubr.msk.bf16.mxu1 %vm1002_vm0, %v3456_v2  ;;  %4520 = vmatpush3.bf16.msra.mxu1 %v6660_v61  ;;  %v3604_v61 = vsel %vm1603_vm5, %v3601_v31, %v3603_v41  ;;  %v3457_v53 = vpack.c.bf16 %v3451_v14, %v3449_v39  ;;  %v3609_v19 = vsel %vm1603_vm5, %v3606_v63, %v3608_v46 }
 0x7d3   : > { %4531 = vmatprep.subr.bf16.mxu1 %v3682_v42  ;;  %v3614_v18 = vpack.c.bf16 %v3604_v61, %v3602_v15  ;;  %v3762_v47 = vsel %vm1743_vm6, %v3759_v17, %v3761_v6  ;;  %v3765_v16 = vsel %vm1743_vm6, %v3763_v29, %v3764_v37 }
 0x7d6   : > { %4504 = vmatmul.mubr.msk.bf16.vlgmr.msra.gmra.mxu0 %vm1002_vm0, %v3279_v21  ;;  %v4311_v21 = vld [vmem:[%s6911_s21 + $0x40] sm:$0xff] }
 0x7d7   : > { %4514 = vmatpush3.bf16.msra.mxu0 %v3461_v44  ;;  %4515 = vmatprep.mubr.msk.bf16.mxu0 %vm1002_vm0, %v3440_v55  ;;  %v3758_v55 = vrot.slane %v6740_v22, 4  ;;  %v3607_v44 = vsel %vm1603_vm5, %v3605_v27, %v3606_v63  ;;  %v3777_v45 = vpack.c.bf16 %v4312_v54, %v4311_v21  ;;  %v3766_v22 = vrot.slane %v6752_v50, 4 }
 0x7d8   : > { %4525 = vmatprep.subr.bf16.mxu0 %v3619_v56  ;;  %v3615_v58 = vpack.c.bf16 %v3609_v19, %v3607_v44 }
 0x7d9   : > { %4522 = vmatmul.mubr.msk.bf16.vlgmr.msra.gmra.mxu1 %vm1002_vm0, %v3457_v53  ;;  %v3760_v51 = vsel %vm1743_vm6, %v3758_v55, %v3759_v17  ;;  %v3767_v5 = vsel %vm1743_vm6, %v3764_v37, %v3766_v22 }
 0x7da   : > { %4533 = vmatprep.mubr.msk.bf16.mxu1 %vm1002_vm0, %v3614_v18  ;;  %4532 = vmatpush3.bf16.msra.mxu1 %v3682_v42  ;;  %v3772_v23 = vpack.c.bf16 %v3762_v47, %v3760_v51 }
 0x7db   : > { %4543 = vmatprep.subr.bf16.mxu1 %v3840_v57 }
 0x7de   : > { %4516 = vmatmul.mubr.msk.bf16.vlgmr.msra.gmra.mxu0 %vm1002_vm0, %v3441_v34  ;;  %v3773_v34 = vpack.c.bf16 %v3767_v5, %v3765_v16  ;;  %v4319_v5 = vld [vmem:[%s6913_s23] ss:$0 sm:$0xff] }
 0x7df   : > { %4526 = vmatpush3.bf16.msra.mxu0 %v3619_v56  ;;  %4527 = vmatprep.mubr.msk.bf16.mxu0 %vm1002_vm0, %v3598_v36  ;;  %v4500_v36 = vpop.f32.mrf.mxu1 }
 0x7e0   : > { %4537 = vmatprep.subr.bf16.mxu0 %v3777_v45 }
 0x7e1   : > { %4534 = vmatmul.mubr.msk.bf16.vlgmr.msra.gmra.mxu1 %vm1002_vm0, %v3615_v58  ;;  %v3248_v28 = vpop.f32.mrf.mxu1 }
 0x7e2   : > { %4545 = vmatprep.mubr.msk.bf16.mxu1 %vm1002_vm0, %v3772_v23  ;;  %4544 = vmatpush3.bf16.msra.mxu1 %v3840_v57 }
 0x7e6   : > { %4528 = vmatmul.mubr.msk.bf16.vlgmr.msra.gmra.mxu0 %vm1002_vm0, %v3599_v9 }
 0x7e7   : > { %4538 = vmatpush3.bf16.msra.mxu0 %v3777_v45  ;;  %4539 = vmatprep.mubr.msk.bf16.mxu0 %vm1002_vm0, %v3756_v3 }
 0x7e9   : > { %4546 = vmatmul.mubr.msk.bf16.vlgmr.msra.gmra.mxu1 %vm1002_vm0, %v3773_v34 }
 0x7ee   : > { %4540 = vmatmul.mubr.msk.bf16.vlgmr.msra.gmra.mxu0 %vm1002_vm0, %v3757_v52 }
 0x88e   : > { %v4493_v59 = vpop.f32.mrf.mxu0 }
 0x88f   : > { %v3254_v62 = vadd.f32 %v4499_v12, %v4493_v59  ;;  %v4320_v59 = vld [vmem:[%s7158_s2] ss:$0 sm:$0xff] }
 0x890   : > { %v3190_v9 = vpop.f32.mrf.mxu0 }
 0x891   : > { %v4511_v7 = vpop.f32.mrf.mxu1  ;;  %v3246_v52 = vadd.f32 %v3245_v26, %v3190_v9 }
 0x892   : > { %v4494_v25 = vpop.f32.mrf.mxu0 }
 0x893   : > { %v3407_v50 = vpop.f32.mrf.mxu1  ;;  %v3257_v42 = vadd.f32 %v4500_v36, %v4494_v25 }
 0x894   : > { %v3193_v33 = vpop.f32.mrf.mxu0 }
 0x895   : > { %v4512_v30 = vpop.f32.mrf.mxu1  ;;  %v3249_v31 = vadd.f32 %v3248_v28, %v3193_v33 }
 0x896   : > { %v4505_v38 = vpop.f32.mrf.mxu0 }
 0x897   : > { %v3410_v3 = vpop.f32.mrf.mxu1  ;;  %v3361_v8 = vadd.f32 %v4505_v38, %v3254_v62 }
 0x898   : > { %v3344_v4 = vpop.f32.mrf.mxu0 }
 0x899   : > { %v4523_v49 = vpop.f32.mrf.mxu1  ;;  %v3359_v60 = vadd.f32 %v3344_v4, %v3246_v52  ;;  %v3424_v1 = vadd.f32 %v4511_v7, %v3361_v8 }
 0x89a   : > { %v4506_v10 = vpop.f32.mrf.mxu0 }
 0x89b   : > { %v3565_v43 = vpop.f32.mrf.mxu1  ;;  %v3362_v41 = vadd.f32 %v4506_v10, %v3257_v42  ;;  %v3422_v14 = vadd.f32 %v3407_v50, %v3359_v60 }
 0x89c   : > { %v3347_v32 = vpop.f32.mrf.mxu0 }
 0x89d   : > { %v4524_v24 = vpop.f32.mrf.mxu1  ;;  %v3360_v20 = vadd.f32 %v3347_v32, %v3249_v31  ;;  %v3425_v15 = vadd.f32 %v4512_v30, %v3362_v41 }
 0x89e   : > { %v4517_v48 = vpop.f32.mrf.mxu0 }
 0x89f   : > { %v3568_v2 = vpop.f32.mrf.mxu1  ;;  %v3519_v39 = vadd.f32 %v4517_v48, %v3424_v1  ;;  %v3423_v46 = vadd.f32 %v3410_v3, %v3360_v20 }
 0x8a0   : > { %v3502_v13 = vpop.f32.mrf.mxu0 }
 0x8a1   : > { %v4535_v35 = vpop.f32.mrf.mxu1  ;;  %v3517_v11 = vadd.f32 %v3502_v13, %v3422_v14  ;;  %v3582_v18 = vadd.f32 %v4523_v49, %v3519_v39 }
 0x8a2   : > { %v4518_v0 = vpop.f32.mrf.mxu0 }
 0x8a3   : > { %v3723_v56 = vpop.f32.mrf.mxu1  ;;  %v3520_v57 = vadd.f32 %v4518_v0, %v3425_v15  ;;  %v3580_v54 = vadd.f32 %v3565_v43, %v3517_v11 }
 0x8a4   : > { %v3505_v40 = vpop.f32.mrf.mxu0 }
 0x8a5   : > { %v4536_v61 = vpop.f32.mrf.mxu1  ;;  %v3518_v6 = vadd.f32 %v3505_v40, %v3423_v46  ;;  %v3583_v19 = vadd.f32 %v4524_v24, %v3520_v57 }
 0x8a6   : > { %v4529_v53 = vpop.f32.mrf.mxu0 }
 0x8a7   : > { %v3726_v63 = vpop.f32.mrf.mxu1  ;;  %v3677_v21 = vadd.f32 %v4529_v53, %v3582_v18  ;;  %v3581_v47 = vadd.f32 %v3568_v2, %v3518_v6 }
 0x8a8   : > { %v3660_v17 = vpop.f32.mrf.mxu0 }
 0x8a9   : > { %v4547_v27 = vpop.f32.mrf.mxu1  ;;  %v3675_v44 = vadd.f32 %v3660_v17, %v3580_v54  ;;  %v3740_v58 = vadd.f32 %v4535_v35, %v3677_v21 }
 0x8aa   : > { %v4530_v55 = vpop.f32.mrf.mxu0 }
 0x8ab   : > { %v3678_v51 = vadd.f32 %v4530_v55, %v3583_v19  ;;  %v3881_v22 = vpop.f32.mrf.mxu1  ;;  %v3738_v16 = vadd.f32 %v3723_v56, %v3675_v44 }
 0x8ac   : > { %v3663_v45 = vpop.f32.mrf.mxu0 }
 0x8ad   : > { %v3676_v37 = vadd.f32 %v3663_v45, %v3581_v47  ;;  %v3741_v36 = vadd.f32 %v4536_v61, %v3678_v51  ;;  %v4548_v28 = vpop.f32.mrf.mxu1 }
 0x8ae   : > { %v4541_v23 = vpop.f32.mrf.mxu0 }
 0x8af   : > { %v3835_v29 = vadd.f32 %v4541_v23, %v3740_v58  ;;  %v3739_v33 = vadd.f32 %v3726_v63, %v3676_v37  ;;  %v3884_v10 = vpop.f32.mrf.mxu1 }
 0x8b0   : > { %v3818_v34 = vpop.f32.mrf.mxu0 }
 0x8b1   : > { %v3898_v12 = vadd.f32 %v4547_v27, %v3835_v29  ;;  %v3833_v26 = vadd.f32 %v3818_v34, %v3738_v16 }
 0x8b2   : > { %v4542_v9 = vpop.f32.mrf.mxu0 }
 0x8b3   : > { %v3909_v7 = vmul.f32 %v4319_v5, %v3898_v12  ;;  %v3896_v25 = vadd.f32 %v3881_v22, %v3833_v26  ;;  %v3836_v50 = vadd.f32 %v4542_v9, %v3741_v36 }
 0x8b4   : > { %v3821_v30 = vpop.f32.mrf.mxu0 }
 0x8b5   : > { %v3920_v38 = vadd.f32 %v4320_v59, %v3909_v7  ;;  %v3907_v3 = vmul.f32 %v4319_v5, %v3896_v25  ;;  %v3899_v4 = vadd.f32 %v4548_v28, %v3836_v50  ;;  %v3834_v49 = vadd.f32 %v3821_v30, %v3739_v33 }
 0x8b7   : > { %v4323_v62 = vmul.f32 -1.442695, %v3920_v38  ;;  %v3918_v43 = vadd.f32 %v4320_v59, %v3907_v3  ;;  %v3910_v32 = vmul.f32 %v4319_v5, %v3899_v4  ;;  %v3897_v52 = vadd.f32 %v3884_v10, %v3834_v49 }
 0x8b9   : > { %4829 = vpow2.f32 %v4323_v62  ;;  %v4321_v8 = vmul.f32 -1.442695, %v3918_v43  ;;  %v3921_v24 = vadd.f32 %v4320_v59, %v3910_v32  ;;  %v3908_v48 = vmul.f32 %v4319_v5, %v3897_v52 }
 0x8bb   : > { %4831 = vpow2.f32 %v4321_v8  ;;  %v4324_v42 = vmul.f32 -1.442695, %v3921_v24  ;;  %v3919_v60 = vadd.f32 %v4320_v59, %v3908_v48 }
 0x8bd   : > { %4833 = vpow2.f32 %v4324_v42  ;;  %v4322_v2 = vmul.f32 -1.442695, %v3919_v60 }
 0x8bf   : > { %4835 = vpow2.f32 %v4322_v2 }
 0x8c6   : > { %v4830_v13 = vpop.eup %4829 }
 0x8c7   : > { %v3936_v31 = vadd.f32 1.0, %v4830_v13 }
 0x8c8   : > { %v4832_v41 = vpop.eup %4831 }
 0x8c9   : > { %v3934_v1 = vadd.f32 1.0, %v4832_v41  ;;  %4837 = vrcp.f32 %v3936_v31 }
 0x8ca   : > { %v4834_v35 = vpop.eup %4833 }
 0x8cb   : > { %4839 = vrcp.f32 %v3934_v1  ;;  %v3937_v0 = vadd.f32 1.0, %v4834_v35 }
 0x8cc   : > { %v4836_v20 = vpop.eup %4835 }
 0x8cd   : > { %v3935_v39 = vadd.f32 1.0, %v4836_v20  ;;  %4841 = vrcp.f32 %v3937_v0 }
 0x8cf   : > { %4843 = vrcp.f32 %v3935_v39 }
 0x8d6   : > { %v4838_v14 = vpop.eup %4837 }
 0x8d7   : > { %v3948_v11 = vmul.f32 %v4838_v14, %v3920_v38 }
 0x8d8   : > { %v4840_v56 = vpop.eup %4839 }
 0x8d9   : > { %v3946_v40 = vmul.f32 %v4840_v56, %v3918_v43  ;;  %3952 = vst.msk [vmem:[%s990_s9 + $0x10] sm:$0xff] %vm1002_vm0, %v3948_v11 }
 0x8da   : > { %v4842_v15 = vpop.eup %4841 }
 0x8db   : > { %3950 = vst.msk [vmem:[%s990_s9] sm:$0xff] %vm1002_vm0, %v3946_v40  ;;  %v3949_v57 = vmul.f32 %v4842_v15, %v3921_v24 }
 0x8dc   : > { %v4844_v61 = vpop.eup %4843 }
 0x8dd   : > { %v3947_v53 = vmul.f32 %v4844_v61, %v3919_v60  ;;  %3953 = vst.msk [vmem:[%s990_s9 + $0x18] sm:$0xff] %vm1002_vm0, %v3949_v57 }
 0x8df   : > { %3951 = vst.msk [vmem:[%s990_s9 + $0x8] sm:$0xff] %vm1002_vm0, %v3947_v53 }
 0x8e0 PF: > { %s44_s29 = sadd.s32 1, %s5303_s29  }
 0x8e1   : > { %p41_p6 = scmp.ge.s32.totalorder %s44_s29, 4  }
 0x8e3   :  { %43 = sbr.rel (!%p41_p6) target bundleno = 24 (0x18), region = 237 }
 0x8e8   :  { %3978 = vsyncpa [#allocation3], 1 }
 0x8e9   :  { %3980 = vsyncpa [#allocation3 + $0x1], 1 }
 0x8ea   :  { %3981 = vsyncpa [#allocation5], 1 }
 0x8eb   :  { %3982 = vsyncpa [#allocation8], 1 }
 0x8ec   :  { %3983 = vsyncpa [#allocation11], 1 }
 0x8ed   :  { %3984 = vsyncpa [#allocation14], 1 }
 0x8ee   :  { %3985 = vsyncpa [#allocation17], 1 }
 0x8ef   :  { %3986 = vsyncpa [#allocation20], 1 }
 0x8f0   :  { %3987 = vsyncpa [#allocation23], 1 }
 0x8f1   :  { %3988 = vsyncpa [#allocation26], 1 }

// kernel: _lambda_.6
= control target key start
LH: loop header
LB: loop body
LE: loop exit
PB: predicated region body
PF: predicated region fallthrough
CT: control target
= control target key end

     0   :  { %s4395_s29 = smov 0   ;;  %s5679_s0 = inlined_call_operand.vmem [shape: f32[4,16,16], index: 0, kind: input, shape index: {}]   ;;  %s5680_s1 = inlined_call_operand.vmem [shape: f32[2,16,16], index: 1, kind: input, shape index: {}]   ;;  %s5681_s2 = inlined_call_operand.vmem [shape: f32[2,1,16], index: 2, kind: input, shape index: {}]   ;;  %s5682_s3 = inlined_call_operand.vmem [shape: f32[2,1,16], index: 3, kind: input, shape index: {}]   ;;  %s5683_s4 = inlined_call_operand.vmem [shape: f32[5,2,2,16], index: 4, kind: input, shape index: {}]   ;;  %s5684_s5 = inlined_call_operand.vmem [shape: f32[2,1,16], index: 5, kind: input, shape index: {}]   ;;  %s5685_s6 = inlined_call_operand.vmem [shape: f32[2,1,16], index: 6, kind: input, shape index: {}]   ;;  %s5686_s7 = inlined_call_operand.vmem [shape: f32[2,16,4], index: 7, kind: input, shape index: {}]   ;;  %s5687_s8 = inlined_call_operand.vmem [shape: f32[1,4], index: 8, kind: input, shape index: {}]   ;;  %s5688_s9 = inlined_call_operand.vmem [shape: f32[4,4], index: 9, kind: input, shape index: {}]   ;;  %s5689_s10 = inlined_call_operand.vmem [shape: f32[1,4], index: 10, kind: input, shape index: {}]   ;;  %s5690_s11 = inlined_call_operand.vmem [shape: f32[4,8], index: 11, kind: input, shape index: {}]   ;;  %s5691_s12 = inlined_call_operand.vmem [shape: f32[4,8], index: 12, kind: input, shape index: {}]   ;;  %s5692_s13 = inlined_call_operand.vmem [shape: f32[8,2], index: 13, kind: input, shape index: {}]   ;;  %s5693_s14 = inlined_call_operand.vmem [shape: f32[1,2], index: 14, kind: input, shape index: {}]   ;;  %s5694_s15 = inlined_call_operand.vmem [shape: f32[2,4,16], index: 15, kind: input, shape index: {}]   ;;  %s5695_s16 = inlined_call_operand.vmem [shape: f32[2,2,16], index: 16, kind: input, shape index: {}]   ;;  %s5696_s17 = inlined_call_operand.vmem [shape: f32[2,1,16], index: 17, kind: input, shape index: {}]   ;;  %s5697_s18 = inlined_call_operand.vmem [shape: f32[2,16,16], index: 18, kind: input, shape index: {}]   ;;  %s5698_s19 = inlined_call_operand.vmem [shape: f32[1,16], index: 19, kind: input, shape index: {}]   ;;  %s5699_s20 = inlined_call_operand.vmem [shape: f32[1,16], index: 20, kind: input, shape index: {}]   ;;  %s5700_s21 = inlined_call_operand.vmem [shape: f32[5,16,8], index: 21, kind: input, shape index: {}]   ;;  %s5701_s22 = inlined_call_operand.vmem [shape: f32[5,16,8], index: 22, kind: input, shape index: {}]   ;;  %s5702_s23 = inlined_call_operand.vmem [shape: f32[1,8], index: 23, kind: input, shape index: {}]   ;;  %s5703_s24 = inlined_call_operand.vmem [shape: f32[1,8], index: 24, kind: input, shape index: {}]   ;;  %s5704_s25 = inlined_call_operand.vmem [shape: f32[4,16,8], index: 25, kind: output, shape index: {}]  }
   0x1   :  { %5771 = sst [smem:[#allocation40_spill]] %s5679_s0 }
   0x2   :  { %5772 = sst [smem:[#allocation41_spill]] %s5680_s1 }
   0x3   :  { %5773 = sst [smem:[#allocation42_spill]] %s5681_s2 }
   0x4   :  { %5774 = sst [smem:[#allocation43_spill]] %s5682_s3 }
   0x5   :  { %5775 = sst [smem:[#allocation44_spill]] %s5683_s4 }
   0x6   :  { %5776 = sst [smem:[#allocation45_spill]] %s5684_s5 }
   0x7   :  { %5777 = sst [smem:[#allocation46_spill]] %s5685_s6 }
   0x8   :  { %5778 = sst [smem:[#allocation47_spill]] %s5686_s7 }
   0x9   :  { %5779 = sst [smem:[#allocation48_spill]] %s5687_s8 }
   0xa   :  { %5780 = sst [smem:[#allocation49_spill]] %s5688_s9 }
   0xb LB: > { %s3782_s2 = sadd.s32 4294967295, %s4260_s29   ;;  %p3786_p0 = scmp.ge.s32.totalorder %s4260_s29, 1  ;;  %s4260_s29 = sphi %s4395_s29, %s35_s29  }
   0xc   : > { %p689_p1 = scmp.lt.s32.totalorder %s4260_s29, 3 }
   0xe   : > { %p690_p2 = pnand %p3786_p0, %p689_p1 }
  0x10   : > { %693 = sbr.rel (%p690_p2) target bundleno = 2047 (0x7ff), region = 120 }
  0x15   : > { %s5781_s7 = sld [smem:[#allocation41_spill]]  ;;  %s3787_s27 = sshll.u32 %s3782_s2, 1  ;;  %vm783_vm0 = vcmask 130048   ;;  %vm998_vm1 = vcmask 1041408   ;;  %v5717_v20 = vmov 0.0   ;;  %vm4263_vm2 = vmmov 0  }
  0x16   : > { %p760_p3 = scmp.lt.s32.totalorder %s3787_s27, 3  ;;  %s5782_s2 = sld [smem:[#allocation40_spill]]  ;;  %v1037_v62 = vlaneseq  ;;  %vm1104_vm3 = vcmask 1046528   ;;  %vm1244_vm4 = vcmask 1045504   ;;  %vm1384_vm5 = vcmask 1044480  }
  0x17   : > { %s5789_s26 = sld [smem:[#allocation47_spill]]  ;;  %vm1524_vm6 = vcmask 1043456   ;;  %vm1794_vm7 = vcmask 1041409   ;;  %vm1966_vm8 = vcmask 31744   ;;  %vm2203_vm9 = vcmask 64512  }
  0x18   : > { %s5925_s27 = smov (!%p760_p3, %s3787_s27), 3  ;;  %s5790_s30 = sld [smem:[#allocation42_spill]]  ;;  %vm2293_vm10 = vcmask 15360  }
  0x19   : > { %s5712_s9 = sshll.u32 %s5925_s27, 4  ;;  %s5791_s28 = sld [smem:[#allocation43_spill]] }
  0x1a   : > { %s5794_s3 = sld [smem:[#allocation44_spill]] }
  0x1b   : > { %v780_v0 = vld [vmem:[%s5781_s7] sm:$0xff]  ;;  %v781_v1 = vld [vmem:[%s5781_s7 + $0x8] sm:$0xff]  ;;  %v3801_v2 = vld [vmem:[%s5781_s7 + $0x10] sm:$0xff]  ;;  %s5884_s5 = sld [smem:[#allocation45_spill]] }
  0x1c   : > { %v782_v3 = vpack.c.bf16 %v781_v1, %v780_v0  ;;  %v3802_v4 = vld [vmem:[%s5781_s7 + $0x18] sm:$0xff]  ;;  %s764_s6 = scalar_lea.vmem %s5782_s2, %s5712_s9  ;;  %s5909_s1 = sld [smem:[#allocation49_spill]] }
  0x1d   : > { %v892_v5 = vpack.c.bf16 %v3802_v4, %v3801_v2  ;;  %v4423_v6 = vld [vmem:[%s764_s6] sm:$0xff]  ;;  %v4425_v7 = vld [vmem:[%s764_s6 + $0x8] sm:$0xff]  ;;  %v4427_v8 = vld [vmem:[%s764_s6 + $0x10] sm:$0xff]  ;;  %v4515_v4 = vshrl.u32 %v1037_v62, 7 }
  0x1e   : > { %3989 = vmatprep.subr.bf16.mxu0 %v782_v3  ;;  %5783 = vst [vmem:[#allocation2_spill] sm:$0xff] %v4423_v6  ;;  %5784 = vst [vmem:[#allocation3_spill] sm:$0xff] %v4425_v7  ;;  %v778_v9 = vpack.c.bf16 %v4425_v7, %v4423_v6  ;;  %v5716_v10 = vrot.slane %v4423_v6, 6  ;;  %v5714_v11 = vrot.slane %v4425_v7, 6  ;;  %v4433_v12 = vld [vmem:[%s764_s6 + $0x18] sm:$0xff]  ;;  %v5715_v14 = vrot.slane %v4427_v8, 6 }
  0x1f   : > { %3995 = vmatprep.subr.bf16.mxu1 %v892_v5  ;;  %3990 = vmatpush3.bf16.msra.mxu0 %v782_v3  ;;  %5785 = vst [vmem:[#allocation4_spill] sm:$0xff] %v4427_v8  ;;  %5786 = vst [vmem:[#allocation5_spill] sm:$0xff] %v4433_v12  ;;  %v779_v13 = vpack.c.bf16 %v4433_v12, %v4427_v8  ;;  %v5713_v15 = vrot.slane %v4433_v12, 6  ;;  %v3836_v18 = vld [vmem:[%s5789_s26 + $0x18] sm:$0xff]  ;;  %v1788_v19 = vld [vmem:[%s5789_s26 + $0x8] sm:$0xff]  ;;  %s5885_s6 = sld [smem:[#allocation46_spill]] }
  0x20   : > { %3996 = vmatpush3.bf16.msra.mxu1 %v892_v5  ;;  %3991 = vmatprep.mubr.msk.bf16.mxu0 %vm783_vm0, %v778_v9  ;;  %v4445_v16 = vsel %vm998_vm1, %v5716_v10, %v5714_v11  ;;  %v3835_v21 = vld [vmem:[%s5789_s26 + $0x10] sm:$0xff]  ;;  %v1787_v22 = vld [vmem:[%s5789_s26] sm:$0xff]  ;;  %5792 = vst [vmem:[#allocation8_spill] sm:$0xff] %v4515_v4  ;;  %v4518_v5 = vsub.s32 0, %v4515_v4 }
  0x21   : > { %5787 = vst [vmem:[#allocation6_spill] sm:$0xff] %v4445_v16  ;;  %3997 = vmatprep.mubr.msk.bf16.mxu1 %vm783_vm0, %v778_v9  ;;  %v4455_v17 = vsel %vm998_vm1, %v5715_v14, %v5713_v15  ;;  %4001 = vmatprep.subr.mxu0 %v5717_v20  ;;  %v3795_v23 = vld [vmem:[%s5790_s30] ss:$0 sm:$0xff]  ;;  %v3806_v24 = vld [vmem:[%s5790_s30 + $0x1] ss:$0 sm:$0xff] }
  0x22   : > { %3992 = vmatmul.mubr.msk.bf16.vlgmr.msra.gmra.mxu0 %vm783_vm0, %v779_v13  ;;  %5788 = vst [vmem:[#allocation7_spill] sm:$0xff] %v4455_v17  ;;  %4008 = vmatprep.subr.mxu1 %v5717_v20  ;;  %v3796_v26 = vld [vmem:[%s5791_s28] ss:$0 sm:$0xff]  ;;  %v3808_v28 = vld [vmem:[%s5791_s28 + $0x1] ss:$0 sm:$0xff]  ;;  %5793 = vst [vmem:[#allocation9_spill] sm:$0xff] %v4518_v5 }
  0x23   : > { %3998 = vmatmul.mubr.msk.bf16.vlgmr.msra.gmra.mxu1 %vm783_vm0, %v779_v13  ;;  %4002 = vmatpush3.msra.mxu0 %v3836_v18  ;;  %v1035_v9 = vld [vmem:[%s5794_s3] sm:$0x3]  ;;  %v1063_v13 = vsub.s32 1, %v4515_v4 }
  0x24   : > { %4009 = vmatpush3.msra.mxu1 %v1788_v19  ;;  %4003 = vmatprep.subr.mxu0 %v5717_v20  ;;  %v3813_v19 = vld [vmem:[%s5794_s3 + $0x4] sm:$0x3] }
  0x25   : > { %4010 = vmatprep.subr.mxu1 %v5717_v20  ;;  %4004 = vmatpush3.msra.mxu0 %v3835_v21 }
  0x26   : > { %4011 = vmatpush3.msra.mxu1 %v1787_v22  ;;  %4005 = vmatprep.mubr.msk.f32.mxu0 %vm4263_vm2, %v5717_v20  ;;  %v3815_v22 = vld [vmem:[%s5794_s3 + $0x8] sm:$0x3] }
  0x27   : > { %4012 = vmatprep.mubr.msk.f32.mxu1 %vm4263_vm2, %v5717_v20  ;;  %4015 = vmatprep.subr.mxu0 %v5717_v20 }
  0x28   : > { %4020 = vmatprep.subr.mxu1 %v5717_v20 }
  0xe2   : > { %v3993_v25 = vpop.f32.mrf.mxu0 }
  0xe3   : > { %v3999_v27 = vpop.f32.mrf.mxu1  ;;  %v848_v29 = vmul.f32 %v3993_v25, %v3795_v23  ;;  %v4534_v25 = vrot.slane %v1035_v9, %v4518_v5 }
  0xe4   : > { %v952_v30 = vmul.f32 %v3999_v27, %v3806_v24  ;;  %v824_v31 = vpop.f32.mrf.mxu0 }
  0xe5   : > { %v927_v32 = vpop.f32.mrf.mxu1  ;;  %v4491_v33 = vadd.f32 %v3796_v26, %v848_v29  ;;  %v846_v35 = vmul.f32 %v3795_v23, %v824_v31  ;;  %v4542_v29 = vrot.slane %v3813_v19, %v4518_v5  ;;  %v1036_v31 = vld [vmem:[%s5794_s3 + $0x2] sm:$0x3] }
  0xe6   : > { %v4493_v34 = vadd.f32 %v3808_v28, %v952_v30  ;;  %v950_v36 = vmul.f32 %v3806_v24, %v927_v32  ;;  %v3994_v37 = vpop.f32.mrf.mxu0  ;;  %v4544_v30 = vrot.slane %v3813_v19, %v1063_v13 }
  0xe7   : > { %v4000_v38 = vpop.f32.mrf.mxu1  ;;  %v3799_v39 = vmul.f32 -1.442695, %v4491_v33  ;;  %v4497_v41 = vadd.f32 %v3796_v26, %v846_v35  ;;  %v849_v43 = vmul.f32 %v3994_v37, %v3795_v23  ;;  %v4550_v35 = vrot.slane %v3815_v22, %v4518_v5 }
  0xe8   : > { %v3811_v40 = vmul.f32 -1.442695, %v4493_v34  ;;  %v4499_v42 = vadd.f32 %v3808_v28, %v950_v36  ;;  %v827_v44 = vpop.f32.mrf.mxu0  ;;  %v953_v48 = vmul.f32 %v4000_v38, %v3806_v24  ;;  %v4552_v36 = vrot.slane %v3815_v22, %v1063_v13  ;;  %v3814_v38 = vld [vmem:[%s5794_s3 + $0x6] sm:$0x3] }
  0xe9   : > { %v930_v45 = vpop.f32.mrf.mxu1  ;;  %4138 = vpow2.f32 %v3799_v39  ;;  %v3797_v46 = vmul.f32 -1.442695, %v4497_v41  ;;  %v847_v49 = vmul.f32 %v3795_v23, %v827_v44  ;;  %v4503_v51 = vadd.f32 %v3796_v26, %v849_v43  ;;  %v3817_v23 = vld [vmem:[%s5794_s3 + $0xc] sm:$0x3] }
  0xea   : > { %v3809_v47 = vmul.f32 -1.442695, %v4499_v42  ;;  %4140 = vpow2.f32 %v3811_v40  ;;  %v951_v50 = vmul.f32 %v3806_v24, %v930_v45  ;;  %v4505_v52 = vadd.f32 %v3808_v28, %v953_v48 }
  0xeb   : > { %4142 = vpow2.f32 %v3797_v46  ;;  %v4507_v53 = vadd.f32 %v3796_v26, %v847_v49  ;;  %v3800_v55 = vmul.f32 -1.442695, %v4503_v51  ;;  %v3819_v26 = vld [vmem:[%s5794_s3 + $0x10] sm:$0x3]  ;;  %v4555_v37 = vrot.slane %v3817_v23, %v4518_v5  ;;  %v3816_v46 = vld [vmem:[%s5794_s3 + $0xa] sm:$0x3] }
  0xec   : > { %4144 = vpow2.f32 %v3809_v47  ;;  %v4509_v54 = vadd.f32 %v3808_v28, %v951_v50  ;;  %v3812_v56 = vmul.f32 -1.442695, %v4505_v52  ;;  %v4539_v28 = vrot.slane %v1035_v9, %v1063_v13 }
  0xed   : > { %v3798_v57 = vmul.f32 -1.442695, %v4507_v53  ;;  %4146 = vpow2.f32 %v3800_v55  ;;  %v4560_v43 = vrot.slane %v3817_v23, %v1063_v13  ;;  %v4563_v44 = vrot.slane %v3819_v26, %v4518_v5 }
  0xee   : > { %v3810_v58 = vmul.f32 -1.442695, %v4509_v54  ;;  %4148 = vpow2.f32 %v3812_v56  ;;  %v4565_v45 = vrot.slane %v3819_v26, %v1063_v13  ;;  %v4574_v50 = vrot.slane %v1036_v31, %v4518_v5  ;;  %v3818_v56 = vld [vmem:[%s5794_s3 + $0xe] sm:$0x3] }
  0xef   : > { %4150 = vpow2.f32 %v3798_v57  ;;  %v4576_v55 = vrot.slane %v1036_v31, %v1063_v13 }
  0xf0   : > { %4152 = vpow2.f32 %v3810_v58 }
  0xf6   : > { %v4139_v59 = vpop.eup %4138 }
  0xf7   : > { %v4141_v60 = vpop.eup %4140  ;;  %v875_v61 = vadd.f32 1.0, %v4139_v59 }
  0xf8   : > { %v4143_v63 = vpop.eup %4142  ;;  %v980_v0 = vadd.f32 1.0, %v4141_v60  ;;  %v4585_v60 = vrot.slane %v3814_v38, %v4518_v5 }
  0xf9   : > { %v4145_v1 = vpop.eup %4144  ;;  %4154 = vrcp.f32 %v875_v61  ;;  %v873_v2 = vadd.f32 1.0, %v4143_v63  ;;  %v4587_v61 = vrot.slane %v3814_v38, %v1063_v13 }
  0xfa   : > { %4156 = vrcp.f32 %v980_v0  ;;  %v978_v3 = vadd.f32 1.0, %v4145_v1  ;;  %v4147_v18 = vpop.eup %4146  ;;  %v4594_v0 = vrot.slane %v3816_v46, %v4518_v5  ;;  %v4596_v1 = vrot.slane %v3816_v46, %v1063_v13 }
  0xfb   : > { %4158 = vrcp.f32 %v873_v2  ;;  %v4149_v21 = vpop.eup %4148  ;;  %v876_v32 = vadd.f32 1.0, %v4147_v18  ;;  %v4601_v2 = vrot.slane %v3818_v56, %v1063_v13 }
  0xfc   : > { %4160 = vrcp.f32 %v978_v3  ;;  %v4151_v24 = vpop.eup %4150  ;;  %v981_v39 = vadd.f32 1.0, %v4149_v21 }
  0xfd   : > { %v4153_v27 = vpop.eup %4152  ;;  %v874_v47 = vadd.f32 1.0, %v4151_v24  ;;  %4162 = vrcp.f32 %v876_v32 }
  0xfe   : > { %v979_v57 = vadd.f32 1.0, %v4153_v27  ;;  %4164 = vrcp.f32 %v981_v39 }
  0xff   : > { %4166 = vrcp.f32 %v874_v47 }
 0x100   : > { %4168 = vrcp.f32 %v979_v57 }
 0x106   : > { %v4155_v40 = vpop.eup %4154 }
 0x107   : > { %v4157_v48 = vpop.eup %4156  ;;  %v4571_v49 = vmul.f32 %v4155_v40, %v4491_v33  ;;  %v3820_v33 = vld [vmem:[%s5794_s3 + $0x12] sm:$0x3] }
 0x108   : > { %v4159_v58 = vpop.eup %4158  ;;  %v4582_v59 = vmul.f32 %v4157_v48, %v4493_v34  ;;  %v4599_v34 = vrot.slane %v3818_v56, %v4518_v5  ;;  %v4610_v18 = vrot.slane %v3820_v33, %v4518_v5  ;;  %v4612_v19 = vrot.slane %v3820_v33, %v1063_v13 }
 0x109   : > { %v4161_v62 = vpop.eup %4160  ;;  %v5720_v63 = vrot.slane %v4571_v49, 6  ;;  %v4604_v3 = vmul.f32 %v4159_v58, %v4497_v41 }
 0x10a   : > { %v5719_v41 = vrot.slane %v4582_v59, 6  ;;  %v4622_v23 = vmul.f32 %v4161_v62, %v4499_v42  ;;  %v4163_v12 = vpop.eup %4162 }
 0x10b   : > { %v1012_v9 = vsel %vm998_vm1, 0.0, %v5720_v63  ;;  %v5722_v42 = vrot.slane %v4604_v3, 6 }
 0x10c   : > { %v4615_v21 = vmul.f32 %v4542_v29, %v1012_v9  ;;  %v4618_v22 = vmul.f32 %v4544_v30, %v1012_v9  ;;  %v4625_v24 = vmul.f32 %v4550_v35, %v1012_v9  ;;  %v4628_v26 = vmul.f32 %v4552_v36, %v1012_v9 }
 0x10d   : > { %v4631_v13 = vmul.f32 %v4555_v37, %v1012_v9  ;;  %v4634_v27 = vmul.f32 %v4560_v43, %v1012_v9  ;;  %v1043_v31 = vmul.f32 %v4534_v25, %v1012_v9  ;;  %v1067_v32 = vmul.f32 %v4539_v28, %v1012_v9 }
 0x10e   : > { %5795 = vst [vmem:[#allocation10_spill] sm:$0xff] %v4625_v24  ;;  %5796 = vst [vmem:[#allocation11_spill] sm:$0xff] %v4628_v26  ;;  %v4643_v46 = vmul.f32 %v4563_v44, %v1012_v9  ;;  %v4646_v47 = vmul.f32 %v4565_v45, %v1012_v9  ;;  %v1032_v58 = vsel %vm998_vm1, 0.0, %v5719_v41  ;;  %v1011_v20 = vsel %vm998_vm1, 0.0, %v5722_v42 }
 0x10f   : > { %5797 = vst [vmem:[#allocation12_spill] sm:$0xff] %v4631_v13  ;;  %5798 = vst [vmem:[#allocation13_spill] sm:$0xff] %v4634_v27  ;;  %v1055_v33 = vmul.f32 %v4574_v50, %v1032_v58  ;;  %v1079_v62 = vmul.f32 %v4576_v55, %v1032_v58  ;;  %v4657_v15 = vmul.f32 %v4585_v60, %v1032_v58  ;;  %v5825_v27 = vrot.slane %v4618_v22, 1 }
 0x110   : > { %5799 = vst [vmem:[#allocation14_spill] sm:$0xff] %v4643_v46  ;;  %5800 = vst [vmem:[#allocation15_spill] sm:$0xff] %v4646_v47  ;;  %v4660_v9 = vmul.f32 %v4587_v61, %v1032_v58  ;;  %v4663_v11 = vmul.f32 %v4594_v0, %v1032_v58  ;;  %v4666_v14 = vmul.f32 %v4596_v1, %v1032_v58 }
 0x111   : > { %v4669_v10 = vmul.f32 %v4599_v34, %v1032_v58  ;;  %v4676_v57 = vadd.f32 %v1055_v33, %v1043_v31  ;;  %v4679_v48 = vmul.f32 %v4601_v2, %v1032_v58  ;;  %v4681_v41 = vadd.f32 %v1079_v62, %v1067_v32  ;;  %v4165_v33 = vpop.eup %4164 }
 0x112   : > { %5801 = vst [vmem:[#allocation16_spill] sm:$0xff] %v4663_v11  ;;  %5802 = vst [vmem:[#allocation17_spill] sm:$0xff] %v4666_v14  ;;  %v4689_v40 = vmul.f32 %v4542_v29, %v1011_v20  ;;  %v4692_v31 = vmul.f32 %v4544_v30, %v1011_v20  ;;  %v4695_v32 = vmul.f32 %v4550_v35, %v1011_v20  ;;  %v4167_v56 = vpop.eup %4166 }
 0x113   : > { %5803 = vst [vmem:[#allocation18_spill] sm:$0xff] %v4669_v10  ;;  %5804 = vst [vmem:[#allocation19_spill] sm:$0xff] %v4679_v48  ;;  %v4698_v62 = vmul.f32 %v4552_v36, %v1011_v20  ;;  %v4701_v63 = vmul.f32 %v4555_v37, %v1011_v20  ;;  %v4704_v42 = vmul.f32 %v4560_v43, %v1011_v20  ;;  %v4169_v16 = vpop.eup %4168  ;;  %v5736_v10 = vrot.slane %v4622_v23, 6 }
 0x114   : > { %5805 = vst [vmem:[#allocation20_spill] sm:$0xff] %v4695_v32  ;;  %v1041_v39 = vmul.f32 %v4534_v25, %v1011_v20  ;;  %v4709_v7 = vmul.f32 %v4563_v44, %v1011_v20  ;;  %v4712_v17 = vmul.f32 %v4565_v45, %v1011_v20  ;;  %v1065_v8 = vmul.f32 %v4539_v28, %v1011_v20 }
 0x115   : > { %5806 = vst [vmem:[#allocation21_spill] sm:$0xff] %v4698_v62  ;;  %5807 = vst [vmem:[#allocation22_spill] sm:$0xff] %v4701_v63  ;;  %v888_v13 = vmul.f32 %v4163_v12, %v4503_v51  ;;  %v4726_v6 = vmul.f32 %v4165_v33, %v4505_v52  ;;  %v4731_v4 = vsel %vm998_vm1, 0.0, %v5736_v10  ;;  %v4734_v46 = vmul.f32 %v4167_v56, %v4507_v53 }
 0x116   : > { %5808 = vst [vmem:[#allocation23_spill] sm:$0xff] %v4704_v42  ;;  %5809 = vst [vmem:[#allocation24_spill] sm:$0xff] %v4709_v7  ;;  %v4737_v12 = vmul.f32 %v4169_v16, %v4509_v54  ;;  %v1053_v51 = vmul.f32 %v4574_v50, %v4731_v4  ;;  %v1077_v24 = vmul.f32 %v4576_v55, %v4731_v4  ;;  %v5823_v48 = vrot.slane %v4615_v21, 1 }
 0x117   : > { %5810 = vst [vmem:[#allocation25_spill] sm:$0xff] %v4712_v17  ;;  %5811 = vst [vmem:[#allocation26_spill] sm:$0xff] %v4731_v4  ;;  %v1003_v38 = vrot.slane %v888_v13, 6  ;;  %v4745_v52 = vmul.f32 %v4585_v60, %v4731_v4  ;;  %v4749_v33 = vmul.f32 %v4587_v61, %v4731_v4  ;;  %v4753_v53 = vmul.f32 %v4594_v0, %v4731_v4 }
 0x118   : > { %v4757_v16 = vmul.f32 %v4596_v1, %v4731_v4  ;;  %v4761_v54 = vmul.f32 %v4599_v34, %v4731_v4  ;;  %v4765_v13 = vmul.f32 %v4601_v2, %v4731_v4  ;;  %v4767_v56 = vadd.f32 %v1053_v51, %v1041_v39 }
 0x119   : > { %5812 = vst [vmem:[#allocation27_spill] sm:$0xff] %v4745_v52  ;;  %5813 = vst [vmem:[#allocation28_spill] sm:$0xff] %v4749_v33  ;;  %v4769_v20 = vadd.f32 %v1077_v24, %v1065_v8  ;;  %v4772_v11 = vmul.f32 %v4612_v19, %v1032_v58  ;;  %v4775_v10 = vmul.f32 %v4610_v18, %v1032_v58  ;;  %v5820_v8 = vrot.slane %v4571_v49, 6 }
 0x11a   : > { %5814 = vst [vmem:[#allocation29_spill] sm:$0xff] %v4753_v53  ;;  %5815 = vst [vmem:[#allocation30_spill] sm:$0xff] %v4757_v16  ;;  %v1014_v51 = vsel %vm998_vm1, %v1003_v38, 0.0  ;;  %v1023_v7 = vrot.slane %v4726_v6, 6  ;;  %v5829_v16 = vrot.slane %v4582_v59, 6 }
 0x11b   : > { %5816 = vst [vmem:[#allocation31_spill] sm:$0xff] %v4761_v54  ;;  %5817 = vst [vmem:[#allocation32_spill] sm:$0xff] %v4765_v13  ;;  %v1004_v24 = vsel %vm998_vm1, %v5820_v8, %v1003_v38  ;;  %v1097_v5 = vmul.f32 %v4542_v29, %v1014_v51  ;;  %v1166_v4 = vmul.f32 %v4544_v30, %v1014_v51 }
 0x11c   : > { %5818 = vst [vmem:[#allocation33_spill] sm:$0xff] %v4772_v11  ;;  %5819 = vst [vmem:[#allocation34_spill] sm:$0xff] %v4775_v10  ;;  %v1096_v58 = vmul.f32 %v4542_v29, %v1004_v24  ;;  %v1165_v32 = vmul.f32 %v4544_v30, %v1004_v24  ;;  %v4794_v39 = vmul.f32 %v4550_v35, %v1004_v24 }
 0x11d   : > { %v1237_v49 = vmul.f32 %v4550_v35, %v1014_v51  ;;  %v1113_v38 = vrot.slane %v1097_v5, 1  ;;  %v4798_v10 = vmul.f32 %v4552_v36, %v1004_v24  ;;  %v1306_v54 = vmul.f32 %v4552_v36, %v1014_v51 }
 0x11e   : > { %5821 = vst [vmem:[#allocation35_spill] sm:$0xff] %v4794_v39  ;;  %v1111_v8 = vrot.slane %v1096_v58, 1  ;;  %v1179_v53 = vrot.slane %v1165_v32, 1  ;;  %v1181_v6 = vrot.slane %v1166_v4, 1  ;;  %v1044_v47 = vmul.f32 %v4534_v25, %v1004_v24 }
 0x11f   : > { %5822 = vst [vmem:[#allocation36_spill] sm:$0xff] %v4798_v10  ;;  %v1253_v11 = vrot.slane %v1237_v49, 2  ;;  %v1068_v17 = vmul.f32 %v4539_v28, %v1004_v24  ;;  %v5754_v32 = vrot.slane %v4798_v10, 2  ;;  %v1321_v49 = vrot.slane %v1306_v54, 2 }
 0x120   : > { %v1112_v13 = vsel %vm1104_vm3, %v5823_v48, %v1111_v8  ;;  %v1114_v5 = vsel %vm1104_vm3, %v1111_v8, %v1113_v38  ;;  %v1180_v4 = vsel %vm1104_vm3, %v5825_v27, %v1179_v53  ;;  %v1182_v63 = vsel %vm1104_vm3, %v1179_v53, %v1181_v6 }
 0x121   : > { %v4809_v58 = vadd.f32 %v1112_v13, %v4676_v57  ;;  %v5826_v42 = vrot.slane %v4794_v39, 2  ;;  %v4820_v48 = vmul.f32 %v4555_v37, %v1004_v24  ;;  %v1377_v57 = vmul.f32 %v4555_v37, %v1014_v51 }
 0x122   : > { %v4824_v13 = vmul.f32 %v4560_v43, %v1004_v24  ;;  %v1446_v22 = vmul.f32 %v4560_v43, %v1014_v51  ;;  %v4828_v27 = vmul.f32 %v4563_v44, %v1004_v24  ;;  %v1517_v54 = vmul.f32 %v4563_v44, %v1014_v51 }
 0x123   : > { %5824 = vst [vmem:[#allocation37_spill] sm:$0xff] %v4809_v58  ;;  %v1254_v21 = vsel %vm1244_vm4, %v5826_v42, %v1253_v11  ;;  %5827 = vst [vmem:[#allocation38_spill] sm:$0xff] %v4820_v48  ;;  %v5753_v53 = vrot.slane %v4820_v48, 3  ;;  %v1393_v8 = vrot.slane %v1377_v57, 3  ;;  %v4833_v11 = vmul.f32 %v4565_v45, %v1004_v24 }
 0x124   : > { %5828 = vst [vmem:[#allocation39_spill] sm:$0xff] %v4824_v13  ;;  %v1586_v42 = vmul.f32 %v4565_v45, %v1014_v51  ;;  %v4837_v38 = vadd.f32 %v1180_v4, %v4681_v41  ;;  %v1322_v6 = vsel %vm1244_vm4, %v5754_v32, %v1321_v49  ;;  %v5755_v39 = vrot.slane %v4824_v13, 3 }
 0x125   : > { %v1461_v58 = vrot.slane %v1446_v22, 3  ;;  %v1394_v14 = vsel %vm1384_vm5, %v5753_v53, %v1393_v8  ;;  %v1533_v24 = vrot.slane %v1517_v54, 4  ;;  %v4850_v51 = vsel %vm998_vm1, %v5829_v16, %v1023_v7 }
 0x126   : > { %v1601_v4 = vrot.slane %v1586_v42, 4  ;;  %v1034_v49 = vsel %vm998_vm1, %v1023_v7, 0.0  ;;  %v1056_v22 = vmul.f32 %v4574_v50, %v4850_v51  ;;  %v1080_v54 = vmul.f32 %v4576_v55, %v4850_v51 }
 0x127   : > { %v1462_v8 = vsel %vm1384_vm5, %v5755_v39, %v1461_v58  ;;  %v1131_v59 = vmul.f32 %v4585_v60, %v4850_v51  ;;  %v1132_v16 = vmul.f32 %v4585_v60, %v1034_v49  ;;  %v1199_v42 = vmul.f32 %v4587_v61, %v4850_v51 }
 0x128   : > { %v1060_v53 = vadd.f32 %v1056_v22, %v1044_v47  ;;  %v1200_v7 = vmul.f32 %v4587_v61, %v1034_v49  ;;  %v4869_v32 = vmul.f32 %v4594_v0, %v4850_v51  ;;  %v1084_v41 = vadd.f32 %v1080_v54, %v1068_v17 }
 0x129   : > { %v1145_v58 = vrot.slane %v1131_v59, 1  ;;  %v1147_v39 = vrot.slane %v1132_v16, 1  ;;  %v1272_v57 = vmul.f32 %v4594_v0, %v1034_v49  ;;  %v1213_v13 = vrot.slane %v1199_v42, 1 }
 0x12a   : > { %v1122_v48 = vadd.f32 %v1114_v5, %v1060_v53  ;;  %v1215_v26 = vrot.slane %v1200_v7, 1  ;;  %v5763_v10 = vrot.slane %v4869_v32, 2  ;;  %v5830_v47 = vrot.slane %v4828_v27, 4 }
 0x12b   : > { %v1148_v52 = vsel %vm1104_vm3, %v1145_v58, %v1147_v39  ;;  %v1190_v33 = vadd.f32 %v1182_v63, %v1084_v41  ;;  %v1287_v62 = vrot.slane %v1272_v57, 2  ;;  %v5831_v17 = vrot.slane %v4833_v11, 4 }
 0x12c   : > { %v4876_v22 = vsel %vm1524_vm6, %v5830_v47, %v1533_v24  ;;  %v1156_v59 = vadd.f32 %v1148_v52, %v1122_v48  ;;  %v1216_v5 = vsel %vm1104_vm3, %v1213_v13, %v1215_v26  ;;  %v4887_v53 = vmul.f32 %v4596_v1, %v4850_v51 }
 0x12d   : > { %v4882_v54 = vsel %vm1524_vm6, %v5831_v17, %v1601_v4  ;;  %v1224_v16 = vadd.f32 %v1216_v5, %v1190_v33  ;;  %v1288_v24 = vsel %vm1244_vm4, %v5763_v10, %v1287_v62  ;;  %v1340_v63 = vmul.f32 %v4596_v1, %v1034_v49 }
 0x12e   : > { %v4895_v39 = vmul.f32 %v4599_v34, %v4850_v51  ;;  %v1262_v57 = vadd.f32 %v1254_v21, %v1156_v59  ;;  %v1353_v52 = vrot.slane %v4887_v53, 2  ;;  %v1412_v26 = vmul.f32 %v4599_v34, %v1034_v49  ;;  %v5861_v53 = vld [vmem:[#allocation32_spill] sm:$0xff] }
 0x12f   : > { %v4901_v48 = vmul.f32 %v4601_v2, %v4850_v51  ;;  %v1330_v33 = vadd.f32 %v1322_v6, %v1224_v16  ;;  %v1355_v41 = vrot.slane %v1340_v63, 2  ;;  %v1480_v62 = vmul.f32 %v4601_v2, %v1034_v49 }
 0x130   : > { %v5764_v4 = vrot.slane %v4895_v39, 3  ;;  %v1296_v42 = vadd.f32 %v1288_v24, %v1262_v57  ;;  %v1427_v7 = vrot.slane %v1412_v26, 3  ;;  %v4907_v21 = vmul.f32 %v4610_v18, %v1034_v49 }
 0x131   : > { %v5767_v47 = vrot.slane %v4901_v48, 3  ;;  %v1356_v17 = vsel %vm1244_vm4, %v1353_v52, %v1355_v41  ;;  %v1495_v59 = vrot.slane %v1480_v62, 3  ;;  %v4913_v5 = vmul.f32 %v4612_v19, %v1034_v49 }
 0x132   : > { %v5832_v6 = vrot.slane %v4734_v46, 6  ;;  %v5833_v16 = vrot.slane %v4604_v3, 6  ;;  %v5834_v63 = vrot.slane %v4657_v15, 1  ;;  %v5835_v26 = vrot.slane %v4660_v9, 1 }
 0x133   : > { %v1364_v41 = vadd.f32 %v1356_v17, %v1330_v33  ;;  %v1402_v62 = vadd.f32 %v1394_v14, %v1296_v42  ;;  %v1428_v49 = vsel %vm1384_vm5, %v5764_v4, %v1427_v7  ;;  %v1496_v3 = vsel %vm1384_vm5, %v5767_v47, %v1495_v59 }
 0x134   : > { %v1001_v24 = vsel %vm998_vm1, %v5833_v16, %v5832_v6  ;;  %v4923_v57 = vsel %vm1104_vm3, %v5834_v63, %v1145_v58  ;;  %v1214_v10 = vsel %vm1104_vm3, %v5835_v26, %v1213_v13  ;;  %v5836_v15 = vmov %v5832_v6 }
 0x135   : > { %v1013_v58 = vsel %vm998_vm1, %v5836_v15, 0.0  ;;  %v1470_v16 = vadd.f32 %v1462_v8, %v1364_v41  ;;  %v1042_v13 = vmul.f32 %v4534_v25, %v1001_v24  ;;  %v1093_v14 = vmul.f32 %v4542_v29, %v1001_v24 }
 0x136   : > { %v1094_v33 = vmul.f32 %v4542_v29, %v1013_v58  ;;  %v1162_v42 = vmul.f32 %v4544_v30, %v1001_v24  ;;  %v1163_v7 = vmul.f32 %v4544_v30, %v1013_v58  ;;  %v4945_v17 = vmul.f32 %v4550_v35, %v1001_v24 }
 0x137   : > { %v4947_v59 = vadd.f32 %v1428_v49, %v1402_v62  ;;  %v1106_v46 = vrot.slane %v1093_v14, 1  ;;  %v1234_v8 = vmul.f32 %v4550_v35, %v1013_v58  ;;  %v1302_v63 = vmul.f32 %v4552_v36, %v1001_v24 }
 0x138   : > { %v1066_v25 = vmul.f32 %v4539_v28, %v1001_v24  ;;  %v1108_v26 = vrot.slane %v1094_v33, 1  ;;  %v1174_v41 = vrot.slane %v1162_v42, 1  ;;  %v1176_v15 = vrot.slane %v1163_v7, 1 }
 0x139   : > { %v4952_v29 = vadd.f32 %v1496_v3, %v1470_v16  ;;  %v5837_v6 = vrot.slane %v4689_v40, 1  ;;  %v5766_v4 = vrot.slane %v4945_v17, 2  ;;  %v1303_v62 = vmul.f32 %v4552_v36, %v1013_v58 }
 0x13a   : > { %v1109_v49 = vsel %vm1104_vm3, %v1106_v46, %v1108_v26  ;;  %v5838_v35 = vrot.slane %v4692_v31, 1  ;;  %v1248_v28 = vrot.slane %v1234_v8, 2  ;;  %v1314_v33 = vrot.slane %v1302_v63, 2 }
 0x13b   : > { %v1107_v30 = vsel %vm1104_vm3, %v5837_v6, %v1106_v46  ;;  %v1177_v3 = vsel %vm1104_vm3, %v1174_v41, %v1176_v15  ;;  %v1316_v40 = vrot.slane %v1303_v62, 2  ;;  %v4968_v6 = vmul.f32 %v4555_v37, %v1001_v24 }
 0x13c   : > { %v1175_v14 = vsel %vm1104_vm3, %v5838_v35, %v1174_v41  ;;  %v4964_v42 = vadd.f32 %v1107_v30, %v4767_v56  ;;  %v1374_v16 = vmul.f32 %v4555_v37, %v1013_v58  ;;  %v4972_v36 = vmul.f32 %v4560_v43, %v1001_v24 }
 0x13d   : > { %v1443_v31 = vmul.f32 %v4560_v43, %v1013_v58  ;;  %v4976_v7 = vmul.f32 %v4563_v44, %v1001_v24  ;;  %v4979_v46 = vadd.f32 %v1175_v14, %v4769_v20  ;;  %v5765_v56 = vrot.slane %v4968_v6, 3 }
 0x13e   : > { %v1514_v8 = vmul.f32 %v4563_v44, %v1013_v58  ;;  %v4984_v63 = vmul.f32 %v4565_v45, %v1001_v24  ;;  %v1249_v37 = vsel %vm1244_vm4, %v5766_v4, %v1248_v28  ;;  %v1388_v26 = vrot.slane %v1374_v16, 3 }
 0x13f   : > { %v5768_v43 = vrot.slane %v4972_v36, 3  ;;  %v1456_v41 = vrot.slane %v1443_v31, 3  ;;  %v1317_v15 = vsel %vm1244_vm4, %v1314_v33, %v1316_v40  ;;  %v1526_v20 = vrot.slane %v4976_v7, 4 }
 0x140   : > { %v1583_v30 = vmul.f32 %v4565_v45, %v1013_v58  ;;  %v1020_v62 = vrot.slane %v4737_v12, 6  ;;  %v1389_v44 = vsel %vm1384_vm5, %v5765_v56, %v1388_v26  ;;  %v1528_v35 = vrot.slane %v1514_v8, 4 }
 0x141   : > { %v1457_v24 = vsel %vm1384_vm5, %v5768_v43, %v1456_v41  ;;  %v1594_v14 = vrot.slane %v4984_v63, 4  ;;  %v5839_v40 = vrot.slane %v4622_v23, 6  ;;  %v1223_v12 = vadd.f32 %v1214_v10, %v4837_v38  ;;  %v5840_v10 = vld [vmem:[#allocation21_spill] sm:$0xff] }
 0x142   : > { %v1596_v28 = vrot.slane %v1583_v30, 4  ;;  %v1033_v45 = vsel %vm998_vm1, %v1020_v62, 0.0  ;;  %v5841_v38 = vrot.slane %v5840_v10, 2 }
 0x143   : > { %v5004_v16 = vsel %vm998_vm1, %v5839_v40, %v1020_v62  ;;  %v1129_v26 = vmul.f32 %v4585_v60, %v1033_v45  ;;  %v1197_v41 = vmul.f32 %v4587_v61, %v1033_v45 }
 0x144   : > { %v1054_v58 = vmul.f32 %v4574_v50, %v5004_v16  ;;  %v1078_v31 = vmul.f32 %v4576_v55, %v5004_v16  ;;  %v1128_v8 = vmul.f32 %v4585_v60, %v5004_v16  ;;  %v1196_v23 = vmul.f32 %v4587_v61, %v5004_v16 }
 0x145   : > { %v5020_v30 = vmul.f32 %v4594_v0, %v5004_v16  ;;  %v1315_v50 = vsel %vm1244_vm4, %v5841_v38, %v1314_v33  ;;  %v1142_v56 = vrot.slane %v1129_v26, 1  ;;  %v5028_v60 = vsel %vm1524_vm6, %v1526_v20, %v1528_v35 }
 0x146   : > { %v1058_v62 = vadd.f32 %v1054_v58, %v1042_v13  ;;  %v1082_v55 = vadd.f32 %v1078_v31, %v1066_v25  ;;  %v1140_v40 = vrot.slane %v1128_v8, 1  ;;  %v1208_v9 = vrot.slane %v1196_v23, 1 }
 0x147   : > { %v1210_v4 = vrot.slane %v1197_v41, 1  ;;  %v1269_v61 = vmul.f32 %v4594_v0, %v1033_v45  ;;  %v1597_v47 = vsel %vm1524_vm6, %v1594_v14, %v1596_v28  ;;  %v1280_v13 = vrot.slane %v5020_v30, 2 }
 0x148   : > { %v1120_v10 = vadd.f32 %v1109_v49, %v1058_v62  ;;  %v1188_v43 = vadd.f32 %v1177_v3, %v1082_v55  ;;  %v1143_v25 = vsel %vm1104_vm3, %v1140_v40, %v1142_v56  ;;  %v1336_v35 = vmul.f32 %v4596_v1, %v5004_v16  ;;  %v5842_v49 = vld [vmem:[#allocation28_spill] sm:$0xff] }
 0x149   : > { %v1211_v33 = vsel %vm1104_vm3, %v1208_v9, %v1210_v4  ;;  %v1282_v58 = vrot.slane %v1269_v61, 2  ;;  %v1337_v0 = vmul.f32 %v4596_v1, %v1033_v45  ;;  %v5042_v26 = vmul.f32 %v4599_v34, %v5004_v16 }
 0x14a   : > { %v1154_v31 = vadd.f32 %v1143_v25, %v1120_v10  ;;  %v1222_v8 = vadd.f32 %v1211_v33, %v1188_v43  ;;  %v5843_v3 = vrot.slane %v5842_v49, 1  ;;  %v1348_v23 = vrot.slane %v1336_v35, 2  ;;  %v5846_v49 = vld [vmem:[#allocation36_spill] sm:$0xff] }
 0x14b   : > { %v1409_v56 = vmul.f32 %v4599_v34, %v1033_v45  ;;  %v1476_v4 = vmul.f32 %v4601_v2, %v5004_v16  ;;  %v1350_v62 = vrot.slane %v1337_v0, 2  ;;  %v1420_v43 = vrot.slane %v5042_v26, 3 }
 0x14c   : > { %v1209_v28 = vsel %vm1104_vm3, %v5843_v3, %v1208_v9  ;;  %v1260_v41 = vadd.f32 %v1249_v37, %v1154_v31  ;;  %v1328_v38 = vadd.f32 %v1317_v15, %v1222_v8  ;;  %v1283_v1 = vsel %vm1244_vm4, %v1280_v13, %v1282_v58  ;;  %v5844_v37 = vld [vmem:[#allocation27_spill] sm:$0xff] }
 0x14d   : > { %v1422_v55 = vrot.slane %v1409_v56, 3  ;;  %v1477_v61 = vmul.f32 %v4601_v2, %v1033_v45  ;;  %v1488_v10 = vrot.slane %v1476_v4, 3  ;;  %v1351_v25 = vsel %vm1244_vm4, %v1348_v23, %v1350_v62  ;;  %v5848_v56 = vld [vmem:[#allocation11_spill] sm:$0xff]  ;;  %v5850_v62 = vld [vmem:[#allocation30_spill] sm:$0xff] }
 0x14e   : > { %v1294_v9 = vadd.f32 %v1283_v1, %v1260_v41  ;;  %v1617_v34 = vmul.f32 %v4612_v19, %v1033_v45  ;;  %v1221_v33 = vadd.f32 %v1209_v28, %v4979_v46  ;;  %v5845_v15 = vrot.slane %v5844_v37, 1 }
 0x14f   : > { %v1362_v31 = vadd.f32 %v1351_v25, %v1328_v38  ;;  %v1490_v8 = vrot.slane %v1477_v61, 3  ;;  %v5062_v0 = vmul.f32 %v4610_v18, %v1033_v45  ;;  %v5069_v2 = vsel %vm1384_vm5, %v1420_v43, %v1422_v55  ;;  %v5852_v55 = vld [vmem:[#allocation17_spill] sm:$0xff] }
 0x150   : > { %v1141_v35 = vsel %vm1104_vm3, %v5845_v15, %v1140_v40  ;;  %v5064_v58 = vadd.f32 %v1389_v44, %v1294_v9  ;;  %v5847_v3 = vrot.slane %v5846_v49, 2  ;;  %v5849_v46 = vrot.slane %v5848_v56, 2  ;;  %v5855_v15 = vld [vmem:[#allocation23_spill] sm:$0xff] }
 0x151   : > { %v1327_v4 = vadd.f32 %v1315_v50, %v1221_v33  ;;  %v1468_v40 = vadd.f32 %v1457_v24, %v1362_v31  ;;  %v1630_v41 = vrot.slane %v1617_v34, 4  ;;  %v5851_v45 = vrot.slane %v5850_v62, 2  ;;  %v5857_v33 = vld [vmem:[#allocation39_spill] sm:$0xff] }
 0x152   : > { %v1320_v28 = vsel %vm1244_vm4, %v5849_v46, %v5847_v3  ;;  %v1491_v1 = vsel %vm1384_vm5, %v1488_v10, %v1490_v8  ;;  %v5853_v61 = vrot.slane %v5852_v55, 2  ;;  %v5854_v37 = vrot.slane %v4972_v36, 3  ;;  %v5864_v36 = vld [vmem:[#allocation19_spill] sm:$0xff] }
 0x153   : > { %v1329_v38 = vadd.f32 %v1320_v28, %v1223_v12  ;;  %v1349_v44 = vsel %vm1244_vm4, %v5851_v45, %v1348_v23  ;;  %v5856_v50 = vrot.slane %v5855_v15, 3  ;;  %v1502_v12 = vadd.f32 %v1491_v1, %v1468_v40  ;;  %v5859_v23 = vld [vmem:[#allocation13_spill] sm:$0xff] }
 0x154   : > { %v1354_v9 = vsel %vm1244_vm4, %v5853_v61, %v1353_v52  ;;  %v1361_v25 = vadd.f32 %v1349_v44, %v1327_v4  ;;  %v5858_v31 = vrot.slane %v5857_v33, 3  ;;  %v5860_v49 = vrot.slane %v5859_v23, 3  ;;  %v5866_v40 = vld [vmem:[#allocation25_spill] sm:$0xff]  ;;  %v5869_v44 = vld [vmem:[#allocation15_spill] sm:$0xff]  ;;  %v5875_v23 = vld [vmem:[#allocation20_spill] sm:$0xff] }
 0x155   : > { %v1455_v24 = vsel %vm1384_vm5, %v5856_v50, %v5854_v37  ;;  %v1363_v34 = vadd.f32 %v1354_v9, %v1329_v38  ;;  %v5862_v3 = vrot.slane %v5861_v53, 3  ;;  %v5863_v46 = vrot.slane %v4901_v48, 3  ;;  %v5871_v9 = vld [vmem:[#allocation26_spill] sm:$0xff] }
 0x156   : > { %v1460_v8 = vsel %vm1384_vm5, %v5860_v49, %v5858_v31  ;;  %v1467_v52 = vadd.f32 %v1455_v24, %v1361_v25  ;;  %v5865_v28 = vrot.slane %v5864_v36, 3  ;;  %v5867_v38 = vrot.slane %v5866_v40, 4 }
 0x157   : > { %v1489_v56 = vsel %vm1384_vm5, %v5862_v3, %v1488_v10  ;;  %v5868_v45 = vrot.slane %v4833_v11, 4  ;;  %v5870_v1 = vrot.slane %v5869_v44, 4  ;;  %v1469_v10 = vadd.f32 %v1460_v8, %v1363_v34  ;;  %v5872_v11 = vld [vmem:[#allocation33_spill] sm:$0xff] }
 0x158   : > { %v1494_v4 = vsel %vm1384_vm5, %v5865_v28, %v5863_v46  ;;  %v1595_v62 = vsel %vm1524_vm6, %v5867_v38, %v1594_v14  ;;  %v1608_v61 = vadd.f32 %v1597_v47, %v1502_v12  ;;  %v1610_v48 = vadd.f32 %v4882_v54, %v4952_v29  ;;  %v5873_v47 = vld [vmem:[#allocation37_spill] sm:$0xff] }
 0x159   : > { %v1600_v55 = vsel %vm1524_vm6, %v5870_v1, %v5868_v45  ;;  %v1615_v25 = vmul.f32 %v4612_v19, %v5871_v9  ;;  %v1501_v37 = vadd.f32 %v1489_v56, %v1467_v52  ;;  %v1616_v63 = vmul.f32 %v4612_v19, %v5004_v16  ;;  %v5879_v56 = vld [vmem:[#allocation10_spill] sm:$0xff] }
 0x15a   : > { %v1619_v14 = vmul.f32 %v4612_v19, %v4850_v51  ;;  %v1632_v15 = vrot.slane %v5872_v11, 4  ;;  %v1503_v50 = vadd.f32 %v1494_v4, %v1469_v10  ;;  %v1153_v34 = vadd.f32 %v1141_v35, %v4964_v42  ;;  %v5877_v19 = vld [vmem:[#allocation35_spill] sm:$0xff]  ;;  %v5887_v10 = vld [vmem:[#allocation16_spill] sm:$0xff] }
 0x15b   : > { %v1627_v24 = vrot.slane %v1615_v25, 4  ;;  %v1155_v12 = vadd.f32 %v4923_v57, %v5873_v47  ;;  %v1607_v54 = vadd.f32 %v1595_v62, %v1501_v37  ;;  %v1628_v29 = vrot.slane %v1616_v63, 4  ;;  %v5881_v57 = vld [vmem:[#allocation29_spill] sm:$0xff]  ;;  %v3828_v62 = vld [vmem:[%s5884_s5 + $0x1] ss:$0 sm:$0xff]  ;;  %v5892_v47 = vld [vmem:[#allocation38_spill] sm:$0xff] }
 0x15c   : > { %v1633_v33 = vrot.slane %v1619_v14, 4  ;;  %v5874_v31 = vrot.slane %v4945_v17, 2  ;;  %v5876_v49 = vrot.slane %v5875_v23, 2  ;;  %v1609_v53 = vadd.f32 %v1600_v55, %v1503_v50  ;;  %v5890_v14 = vld [vmem:[#allocation22_spill] sm:$0xff] }
 0x15d   : > { %v5878_v3 = vrot.slane %v5877_v19, 2  ;;  %v5880_v52 = vrot.slane %v5879_v56, 2  ;;  %v5882_v35 = vrot.slane %v5881_v57, 2  ;;  %v1629_v17 = vsel %vm1524_vm6, %v1627_v24, %v1628_v29 }
 0x15e   : > { %v1247_v8 = vsel %vm1244_vm4, %v5876_v49, %v5874_v31  ;;  %v1631_v28 = vsel %vm1524_vm6, %v1628_v29, %v1630_v41  ;;  %v1634_v4 = vsel %vm1524_vm6, %v1632_v15, %v1633_v33  ;;  %v5883_v40 = vrot.slane %v4913_v5, 4  ;;  %v5896_v31 = vld [vmem:[#allocation31_spill] sm:$0xff] }
 0x15f   : > { %v1252_v46 = vsel %vm1244_vm4, %v5880_v52, %v5878_v3  ;;  %v1259_v42 = vadd.f32 %v1247_v8, %v1153_v34  ;;  %v1281_v36 = vsel %vm1244_vm4, %v5882_v35, %v1280_v13  ;;  %v1641_v45 = vadd.f32 %v1629_v17, %v1607_v54  ;;  %v3830_v13 = vld [vmem:[%s5885_s6 + $0x1] ss:$0 sm:$0xff]  ;;  %v5899_v35 = vld [vmem:[#allocation18_spill] sm:$0xff] }
 0x160   : > { %v1636_v38 = vsel %vm1524_vm6, %v1633_v33, %v5883_v40  ;;  %v1642_v30 = vadd.f32 %v1631_v28, %v1608_v61  ;;  %v1643_v44 = vadd.f32 %v1634_v4, %v1609_v53  ;;  %v1261_v55 = vadd.f32 %v1252_v46, %v1155_v12  ;;  %v5894_v54 = vld [vmem:[#allocation12_spill] sm:$0xff] }
 0x161   : > { %v1644_v1 = vadd.f32 %v1636_v38, %v1610_v48  ;;  %v5886_v41 = vrot.slane %v4869_v32, 2  ;;  %v5888_v25 = vrot.slane %v5887_v10, 2  ;;  %v1293_v37 = vadd.f32 %v1281_v36, %v1259_v42  ;;  %v5904_v38 = vld [vmem:[#allocation14_spill] sm:$0xff] }
 0x162   : > { %v5889_v63 = vrot.slane %v4968_v6, 3  ;;  %v5891_v11 = vrot.slane %v5890_v14, 3  ;;  %v1703_v15 = vmul.f32 %v3828_v62, %v1641_v45  ;;  %v1704_v48 = vmul.f32 %v3828_v62, %v1642_v30 }
 0x163   : > { %v1286_v5 = vsel %vm1244_vm4, %v5888_v25, %v5886_v41  ;;  %v1705_v50 = vmul.f32 %v3828_v62, %v1643_v44  ;;  %v1706_v24 = vmul.f32 %v3828_v62, %v1644_v1  ;;  %v5893_v12 = vrot.slane %v5892_v47, 3  ;;  %v5906_v41 = vld [vmem:[#allocation34_spill] sm:$0xff] }
 0x164   : > { %v1387_v61 = vsel %vm1384_vm5, %v5891_v11, %v5889_v63  ;;  %v1295_v34 = vadd.f32 %v1286_v5, %v1261_v55  ;;  %v5895_v32 = vrot.slane %v5894_v54, 3  ;;  %v5897_v6 = vrot.slane %v5896_v31, 3 }
 0x165   : > { %v1399_v33 = vadd.f32 %v1387_v61, %v1293_v37  ;;  %v5172_v49 = vadd.f32 %v3830_v13, %v1703_v15  ;;  %v5174_v8 = vadd.f32 %v3830_v13, %v1704_v48  ;;  %v5176_v53 = vadd.f32 %v3830_v13, %v1705_v50  ;;  %v3822_v61 = vld [vmem:[%s5885_s6] ss:$0 sm:$0xff] }
 0x166   : > { %v1392_v29 = vsel %vm1384_vm5, %v5895_v32, %v5893_v12  ;;  %v1421_v23 = vsel %vm1384_vm5, %v5897_v6, %v1420_v43  ;;  %v5178_v19 = vadd.f32 %v3830_v13, %v1706_v24  ;;  %v1434_v3 = vadd.f32 %v5069_v2, %v5064_v58 }
 0x167   : > { %v1562_v56 = vrot.slane %v5062_v0, 4  ;;  %v1401_v52 = vadd.f32 %v1392_v29, %v1295_v34  ;;  %v1433_v46 = vadd.f32 %v1421_v23, %v1399_v33  ;;  %v3831_v26 = vmul.f32 -1.442695, %v5172_v49  ;;  %v5901_v0 = vld [vmem:[#allocation24_spill] sm:$0xff] }
 0x168   : > { %v3832_v42 = vmul.f32 -1.442695, %v5174_v8  ;;  %v3833_v43 = vmul.f32 -1.442695, %v5176_v53  ;;  %v5898_v57 = vrot.slane %v4895_v39, 3  ;;  %v5900_v36 = vrot.slane %v5899_v35, 3 }
 0x169   : > { %v3834_v28 = vmul.f32 -1.442695, %v5178_v19  ;;  %v5902_v58 = vrot.slane %v5901_v0, 4  ;;  %v5903_v40 = vrot.slane %v4828_v27, 4  ;;  %v5905_v62 = vrot.slane %v5904_v38, 4 }
 0x16a   : > { %v1426_v17 = vsel %vm1384_vm5, %v5900_v36, %v5898_v57  ;;  %4170 = vpow2.f32 %v3831_v26  ;;  %v1547_v30 = vmul.f32 %v4610_v18, %v5871_v9  ;;  %v1548_v44 = vmul.f32 %v4610_v18, %v5004_v16 }
 0x16b   : > { %v1435_v4 = vadd.f32 %v1426_v17, %v1401_v52  ;;  %v1527_v2 = vsel %vm1524_vm6, %v5902_v58, %v1526_v20  ;;  %v1532_v45 = vsel %vm1524_vm6, %v5905_v62, %v5903_v40  ;;  %4172 = vpow2.f32 %v3832_v42 }
 0x16c   : > { %v1539_v39 = vadd.f32 %v1527_v2, %v1433_v46  ;;  %v1540_v7 = vadd.f32 %v5028_v60, %v1434_v3  ;;  %v1542_v20 = vadd.f32 %v4876_v22, %v4947_v59  ;;  %v1551_v27 = vmul.f32 %v4610_v18, %v4850_v51  ;;  %v3821_v51 = vld [vmem:[%s5884_s5] ss:$0 sm:$0xff]  ;;  %s5910_s5 = sld [smem:[#allocation48_spill]] }
 0x16d   : > { %4174 = vpow2.f32 %v3833_v43  ;;  %v1541_v1 = vadd.f32 %v1532_v45, %v1435_v4  ;;  %v1559_v13 = vrot.slane %v1547_v30, 4  ;;  %v1560_v55 = vrot.slane %v1548_v44, 4 }
 0x16e   : > { %4176 = vpow2.f32 %v3834_v28  ;;  %v1564_v10 = vrot.slane %v5906_v41, 4  ;;  %v1565_v9 = vrot.slane %v1551_v27, 4  ;;  %v5907_v5 = vrot.slane %v4907_v21, 4 }
 0x16f   : > { %v1561_v25 = vsel %vm1524_vm6, %v1559_v13, %v1560_v55  ;;  %v1563_v16 = vsel %vm1524_vm6, %v1560_v55, %v1562_v56 }
 0x170   : > { %v1566_v60 = vsel %vm1524_vm6, %v1564_v10, %v1565_v9  ;;  %v1568_v22 = vsel %vm1524_vm6, %v1565_v9, %v5907_v5  ;;  %v1573_v59 = vadd.f32 %v1561_v25, %v1539_v39  ;;  %v1574_v18 = vadd.f32 %v1563_v16, %v1540_v7 }
 0x171   : > { %v1575_v37 = vadd.f32 %v1566_v60, %v1541_v1  ;;  %v1576_v63 = vadd.f32 %v1568_v22, %v1542_v20 }
 0x172   : > { %v1652_v14 = vmul.f32 %v3821_v51, %v1573_v59  ;;  %v1653_v11 = vmul.f32 %v3821_v51, %v1574_v18 }
 0x173   : > { %v1654_v15 = vmul.f32 %v3821_v51, %v1575_v37  ;;  %v1655_v48 = vmul.f32 %v3821_v51, %v1576_v63 }
 0x174   : > { %v1663_v50 = vadd.f32 %v3822_v61, %v1652_v14  ;;  %v1664_v21 = vadd.f32 %v3822_v61, %v1653_v11 }
 0x175   : > { %v5224_v24 = vadd.f32 %v3822_v61, %v1654_v15  ;;  %v5226_v12 = vadd.f32 %v3822_v61, %v1655_v48 }
 0x176   : > { %v3823_v34 = vmul.f32 -1.442695, %v1663_v50  ;;  %v3824_v47 = vmul.f32 -1.442695, %v1664_v21 }
 0x177   : > { %v3825_v54 = vmul.f32 -1.442695, %v5224_v24  ;;  %v4171_v32 = vpop.eup %4170  ;;  %v3826_v56 = vmul.f32 -1.442695, %v5226_v12 }
 0x178   : > { %4178 = vpow2.f32 %v3823_v34  ;;  %v4173_v29 = vpop.eup %4172  ;;  %v1731_v33 = vadd.f32 1.0, %v4171_v32  ;;  %v5908_v32 = vmov 0.0  }
 0x179   : > { %4180 = vpow2.f32 %v3824_v47  ;;  %v1732_v6 = vadd.f32 1.0, %v4173_v29 }
 0x17a   : > { %v4175_v31 = vpop.eup %4174  ;;  %4182 = vpow2.f32 %v3825_v54 }
 0x17b   : > { %v4177_v23 = vpop.eup %4176  ;;  %v1733_v3 = vadd.f32 1.0, %v4175_v31  ;;  %4184 = vrcp.f32 %v1731_v33 }
 0x17c   : > { %v1734_v52 = vadd.f32 1.0, %v4177_v23  ;;  %4186 = vrcp.f32 %v1732_v6 }
 0x17d   : > { %4188 = vrcp.f32 %v1733_v3 }
 0x17e   : > { %4190 = vrcp.f32 %v1734_v52 }
 0x17f   : > { %4192 = vpow2.f32 %v3826_v56 }
 0x185   : > { %v4179_v46 = vpop.eup %4178 }
 0x186   : > { %v4181_v26 = vpop.eup %4180  ;;  %v1679_v42 = vadd.f32 1.0, %v4179_v46 }
 0x187   : > { %v4183_v43 = vpop.eup %4182  ;;  %v1680_v57 = vadd.f32 1.0, %v4181_v26 }
 0x188   : > { %v4185_v35 = vpop.eup %4184  ;;  %v1681_v36 = vadd.f32 1.0, %v4183_v43  ;;  %4194 = vrcp.f32 %v1679_v42  ;;  %v1958_v43 = vld [vmem:[%s5909_s1] sm:$0xf]  ;;  %s5923_s1 = sshll.u32 %s5925_s27, 4 }
 0x189   : > { %v4187_v17 = vpop.eup %4186  ;;  %v5231_v28 = vmul.f32 %v4185_v35, %v5172_v49  ;;  %4196 = vrcp.f32 %v1680_v57  ;;  %v2043_v57 = vld [vmem:[%s5690_s11] sm:$0xf]  ;;  %s771_s4 = scalar_lea.vmem %s5704_s25, %s5923_s1 }
 0x18a   : > { %v4189_v4 = vpop.eup %4188  ;;  %v5234_v0 = vmul.f32 %v4187_v17, %v5174_v8  ;;  %4198 = vrcp.f32 %v1681_v36 }
 0x18b   : > { %v4191_v58 = vpop.eup %4190  ;;  %v5237_v2 = vmul.f32 %v4189_v4, %v5176_v53  ;;  %v1767_v40 = vsel %vm783_vm0, %v5231_v28, 0.0  ;;  %v3839_v4 = vld [vmem:[%s5910_s5] ss:$0 sm:$0xff] }
 0x18c   : > { %v4193_v38 = vpop.eup %4192  ;;  %v5242_v62 = vmul.f32 %v4191_v58, %v5178_v19  ;;  %v1768_v49 = vsel %vm783_vm0, %v5234_v0, 0.0 }
 0x18d   : > { %v1769_v45 = vadd.f32 %v1768_v49, %v1767_v40  ;;  %v1776_v8 = vsel %vm783_vm0, %v5237_v2, 0.0  ;;  %v1682_v39 = vadd.f32 1.0, %v4193_v38 }
 0x18e   : > { %v1777_v30 = vsel %vm783_vm0, %v5242_v62, 0.0 }
 0x18f   : > { %v1770_v53 = vrot.slane %v1769_v45, 4  ;;  %v1778_v44 = vadd.f32 %v1777_v30, %v1776_v8  ;;  %4200 = vrcp.f32 %v1682_v39 }
 0x191   : > { %v1771_v7 = vadd.f32 %v1770_v53, %v1769_v45  ;;  %v1779_v20 = vrot.slane %v1778_v44, 4  ;;  %v2120_v53 = vld [vmem:[%s5691_s12] sm:$0xf] }
 0x193   : > { %v1772_v27 = vrot.slane %v1771_v7, 2  ;;  %v1780_v1 = vadd.f32 %v1779_v20, %v1778_v44  ;;  %v3841_v44 = vld [vmem:[%s5689_s10] ss:$0 sm:$0xff] }
 0x195   : > { %v4195_v19 = vpop.eup %4194  ;;  %v1773_v13 = vadd.f32 %v1772_v27, %v1771_v7  ;;  %v1781_v55 = vrot.slane %v1780_v1, 2  ;;  %v2195_v27 = vld [vmem:[%s5692_s13] sm:$0xff] }
 0x196   : > { %v4197_v41 = vpop.eup %4196  ;;  %v5250_v10 = vmul.f32 %v4195_v19, %v1663_v50 }
 0x197   : > { %v4199_v9 = vpop.eup %4198  ;;  %v1774_v25 = vrot.slane %v1773_v13, 1  ;;  %v1782_v16 = vadd.f32 %v1781_v55, %v1780_v1  ;;  %v5252_v60 = vmul.f32 %v4197_v41, %v1664_v21 }
 0x198   : > { %v1747_v5 = vsel %vm783_vm0, %v5250_v10, 0.0  ;;  %v5257_v18 = vmul.f32 %v4199_v9, %v5224_v24 }
 0x199   : > { %v1775_v22 = vadd.f32 %v1774_v25, %v1773_v13  ;;  %v1783_v59 = vrot.slane %v1782_v16, 1  ;;  %v1748_v51 = vsel %vm783_vm0, %v5252_v60, 0.0 }
 0x19a   : > { %v1749_v37 = vadd.f32 %v1748_v51, %v1747_v5  ;;  %v1756_v50 = vsel %vm783_vm0, %v5257_v18, 0.0 }
 0x19b   : > { %v1784_v63 = vadd.f32 %v1783_v59, %v1782_v16  ;;  %v1785_v14 = vmul.f32 0.0625, %v1775_v22  ;;  %v2291_v16 = vld [vmem:[%s5694_s15] sm:$0xf] }
 0x19c   : > { %v4201_v11 = vpop.eup %4200  ;;  %v1750_v61 = vrot.slane %v1749_v37, 4 }
 0x19d   : > { %v1786_v15 = vmul.f32 0.0625, %v1784_v63  ;;  %v5262_v48 = vmul.f32 %v4201_v11, %v5226_v12  ;;  %v2292_v63 = vld [vmem:[%s5695_s16] sm:$0x3] }
 0x19e   : > { %v1751_v21 = vadd.f32 %v1750_v61, %v1749_v37  ;;  %v3858_v37 = vld [vmem:[%s5694_s15 + $0x4] sm:$0xf] }
 0x19f   : > { %v1795_v24 = vsel %vm1794_vm7, %v1786_v15, %v1785_v14  ;;  %v1757_v34 = vsel %vm783_vm0, %v5262_v48, 0.0  ;;  %v3848_v14 = vld [vmem:[%s5693_s14] ss:$0 sm:$0xff] }
 0x1a0   : > { %4006 = vmatmul.mubr.msk.f32.vlgmr.msra.gmra.mxu0 %vm783_vm0, %v1795_v24  ;;  %v1752_v47 = vrot.slane %v1751_v21, 2  ;;  %v1758_v54 = vadd.f32 %v1757_v34, %v1756_v50 }
 0x1a1   : > { %4017 = vmatprep.mubr.msk.f32.mxu0 %vm4263_vm2, %v5908_v32  ;;  %4016 = vmatpush3.msk.msra.mxu0 %vm1524_vm6, %v1958_v43 }
 0x1a2   : > { %v1753_v29 = vadd.f32 %v1752_v47, %v1751_v21  ;;  %v1759_v33 = vrot.slane %v1758_v54, 4  ;;  %4025 = vmatprep.subr.mxu0 %v5908_v32 }
 0x1a4   : > { %v1754_v12 = vrot.slane %v1753_v29, 1  ;;  %v1760_v31 = vadd.f32 %v1759_v33, %v1758_v54 }
 0x1a6   : > { %v1761_v6 = vrot.slane %v1760_v31, 2  ;;  %v1755_v23 = vadd.f32 %v1754_v12, %v1753_v29 }
 0x1a8   : > { %v1762_v3 = vadd.f32 %v1761_v6, %v1760_v31  ;;  %v1765_v46 = vmul.f32 0.0625, %v1755_v23  ;;  %v3859_v31 = vld [vmem:[%s5695_s16 + $0x2] sm:$0x3]  ;;  %v2500_v23 = vld [vmem:[%s5697_s18 + $0x8] sm:$0xff] }
 0x1a9   : > { %v2499_v6 = vld [vmem:[%s5697_s18] sm:$0xff] }
 0x1aa   : > { %v1763_v56 = vrot.slane %v1762_v3, 1 }
 0x1ac   : > { %v1764_v52 = vadd.f32 %v1763_v56, %v1762_v3  ;;  %v2501_v3 = vpack.c.bf16 %v2500_v23, %v2499_v6  ;;  %v3867_v56 = vld [vmem:[%s5697_s18 + $0x10] sm:$0xff]  ;;  %v5918_v23 = vld [vmem:[#allocation7_spill] sm:$0xff] }
 0x1ae   : > { %v1766_v26 = vmul.f32 0.0625, %v1764_v52 }
 0x1b0   : > { %v1870_v42 = vsel %vm1794_vm7, %v1766_v26, %v1765_v46  ;;  %v3856_v26 = vld [vmem:[%s5696_s17] ss:$0 sm:$0xff] }
 0x1b1   : > { %4013 = vmatmul.mubr.msk.f32.vlgmr.msra.gmra.mxu1 %vm783_vm0, %v1870_v42 }
 0x1b2   : > { %4022 = vmatprep.mubr.msk.f32.mxu1 %vm4263_vm2, %v5908_v32  ;;  %4021 = vmatpush3.msk.msra.mxu1 %vm1524_vm6, %v2043_v57 }
 0x1b3   : > { %4030 = vmatprep.subr.mxu1 %v5908_v32 }
 0x260   : > { %v1864_v35 = vpop.f32.mrf.mxu0 }
 0x262   : > { %v4007_v36 = vpop.f32.mrf.mxu0 }
 0x263   : > { %v3865_v36 = vld [vmem:[%s5696_s17 + $0x1] ss:$0 sm:$0xff] }
 0x271   : > { %v1939_v17 = vpop.f32.mrf.mxu1 }
 0x272   : > { %v1940_v58 = vadd.f32 %v1939_v17, %v1864_v35 }
 0x273   : > { %v4014_v40 = vpop.f32.mrf.mxu1 }
 0x274   : > { %v1950_v38 = vadd.f32 %v3839_v4, %v1940_v58 }
 0x276   : > { %v3840_v49 = vmul.f32 -1.442695, %v1950_v38 }
 0x278   : > { %4202 = vpow2.f32 %v3840_v49 }
 0x285   : > { %v4203_v45 = vpop.eup %4202 }
 0x286   : > { %v1954_v8 = vadd.f32 1.0, %v4203_v45 }
 0x288   : > { %4204 = vrcp.f32 %v1954_v8 }
 0x295   : > { %v4205_v39 = vpop.eup %4204 }
 0x296   : > { %v1957_v30 = vmul.f32 %v4205_v39, %v1950_v38 }
 0x298   : > { %4018 = vmatmul.mubr.msk.f32.vlgmr.msra.gmra.mxu0 %vm1966_vm8, %v1957_v30  ;;  %v4264_v30 = vmov 1966171168  }
 0x299   : > { %4026 = vmatpush3.msk.msra.mxu0 %vm1524_vm6, %v2120_v53  ;;  %4027 = vmatprep.mubr.msk.f32.mxu0 %vm4263_vm2, %v5908_v32  ;;  %v2462_v53 = vunpack.c.l.s4 %v4264_v30  ;;  %v3895_v30 = vld [vmem:[%s5701_s22 + $0x20] sm:$0xff] }
 0x29a   : > { %4035 = vmatprep.subr.mxu0 %v5908_v32 }
 0x358   : > { %v2039_v7 = vpop.f32.mrf.mxu0 }
 0x359   : > { %v2040_v20 = vadd.f32 %v3841_v44, %v2039_v7  ;;  %v2463_v44 = vunpack.c.0.s8 %v2462_v53  ;;  %v5911_v7 = vld [vmem:[#allocation8_spill] sm:$0xff] }
 0x35a   : > { %v4019_v1 = vpop.f32.mrf.mxu0 }
 0x35b   : > { %4023 = vmatmul.mubr.msk.f32.vlgmr.msra.gmra.mxu1 %vm1966_vm8, %v2040_v20  ;;  %4028 = vmatmul.mubr.msk.f32.vlgmr.msra.gmra.mxu0 %vm1966_vm8, %v2040_v20  ;;  %v3850_v19 = vmul.f32 -1.442695, %v2040_v20 }
 0x35c   : > { %4031 = vmatpush3.msra.mxu1 %v2195_v27  ;;  %4032 = vmatprep.mubr.msk.f32.mxu1 %vm4263_vm2, %v5908_v32 }
 0x35d   : > { %4040 = vmatprep.subr.mxu1 %v5908_v32  ;;  %4037 = vmatprep.mubr.msk.f32.mxu0 %vm4263_vm2, %v5908_v32  ;;  %4206 = vpow2.f32 %v3850_v19 }
 0x35e   : > { %4036 = vmatpush3.msk.msra.mxu0 %vm998_vm1, %v2292_v63 }
 0x35f   : > { %4045 = vmatprep.subr.mxu0 %v5908_v32 }
 0x36a   : > { %v4207_v13 = vpop.eup %4206 }
 0x36b   : > { %v2280_v55 = vadd.f32 1.0, %v4207_v13 }
 0x36d   : > { %4208 = vrcp.f32 %v2280_v55 }
 0x37a   : > { %v4209_v5 = vpop.eup %4208 }
 0x37b   : > { %v2283_v51 = vmul.f32 %v4209_v5, %v2040_v20  ;;  %v2466_v20 = vsub.s32 %v2463_v44, %v5911_v7  ;;  %v3040_v44 = vrot.slane %v5918_v23, 1  ;;  %v3896_v7 = vld [vmem:[%s5701_s22 + $0x28] sm:$0xff] }
 0x41b   : > { %v2116_v41 = vpop.f32.mrf.mxu1  ;;  %v2190_v9 = vpop.f32.mrf.mxu0 }
 0x41c   : > { %v2194_v25 = vmul.f32 %v2190_v9, %v2116_v41  ;;  %v5912_v41 = vld [vmem:[#allocation9_spill] sm:$0xff] }
 0x41d   : > { %v4024_v22 = vpop.f32.mrf.mxu1  ;;  %v4029_v59 = vpop.f32.mrf.mxu0 }
 0x41e   : > { %4033 = vmatmul.mubr.msk.f32.vlgmr.msra.gmra.mxu1 %vm2203_vm9, %v2194_v25 }
 0x41f   : > { %4041 = vmatpush3.msk.msra.mxu1 %vm1524_vm6, %v2291_v16  ;;  %4042 = vmatprep.mubr.msk.f32.mxu1 %vm4263_vm2, %v5908_v32 }
 0x420   : > { %4050 = vmatprep.subr.mxu1 %v5908_v32 }
 0x422   : > { %4043 = vmatmul.mubr.msk.f32.vlgmr.msra.gmra.mxu1 %vm1966_vm8, %v2283_v51 }
 0x423   : > { %4051 = vmatpush3.msk.msra.mxu1 %vm1524_vm6, %v3858_v37  ;;  %4052 = vmatprep.mubr.msk.f32.mxu1 %vm4263_vm2, %v5908_v32 }
 0x424   : > { %4061 = vmatprep.subr.bf16.mxu1 %v2501_v3 }
 0x426   : > { %4053 = vmatmul.mubr.msk.f32.vlgmr.msra.gmra.mxu1 %vm1966_vm8, %v2283_v51 }
 0x427   : > { %4062 = vmatpush3.bf16.msra.mxu1 %v2501_v3 }
 0x4de   : > { %v2273_v11 = vpop.f32.mrf.mxu1 }
 0x4df   : > { %v2274_v61 = vadd.f32 %v3848_v14, %v2273_v11 }
 0x4e0   : > { %v4034_v15 = vpop.f32.mrf.mxu1 }
 0x4e1   : > { %v3851_v50 = vmul.f32 -1.442695, %v2274_v61 }
 0x4e2   : > { %v2442_v21 = vpop.f32.mrf.mxu1 }
 0x4e3   : > { %4210 = vpow2.f32 %v3851_v50 }
 0x4e4   : > { %v4044_v24 = vpop.f32.mrf.mxu1 }
 0x4e6   : > { %v2648_v34 = vpop.f32.mrf.mxu1 }
 0x4e8   : > { %v4054_v47 = vpop.f32.mrf.mxu1 }
 0x4e9   : > { %v5913_v47 = vld [vmem:[#allocation2_spill] sm:$0xff] }
 0x4f0   : > { %v4211_v54 = vpop.eup %4210 }
 0x4f1   : > { %v2287_v29 = vadd.f32 1.0, %v4211_v54  ;;  %v5914_v54 = vrot.slane %v5913_v47, 6 }
 0x4f3   : > { %4212 = vrcp.f32 %v2287_v29  ;;  %v5378_v29 = vsel %vm998_vm1, 0.0, %v5914_v54 }
 0x500   : > { %v4213_v33 = vpop.eup %4212 }
 0x501   : > { %v2290_v12 = vmul.f32 %v4213_v33, %v2274_v61 }
 0x503   : > { %4038 = vmatmul.mubr.msk.f32.vlgmr.msra.gmra.mxu0 %vm2293_vm10, %v2290_v12 }
 0x504   : > { %4046 = vmatpush3.msk.msra.mxu0 %vm998_vm1, %v3859_v31  ;;  %4047 = vmatprep.mubr.msk.f32.mxu0 %vm4263_vm2, %v5908_v32  ;;  %v3868_v32 = vld [vmem:[%s5697_s18 + $0x18] sm:$0xff]  ;;  %v5917_v31 = vld [vmem:[#allocation6_spill] sm:$0xff] }
 0x505   : > { %v2709_v52 = vpack.c.bf16 %v3868_v32, %v3867_v56  ;;  %v2910_v6 = vpack.c.bf16 %v5917_v31, %v5378_v29  ;;  %v2915_v32 = vld [vmem:[%s5700_s21 + $0x8] sm:$0xff] }
 0x507   : > { %4048 = vmatmul.mubr.msk.f32.vlgmr.msra.gmra.mxu0 %vm2293_vm10, %v2290_v12  ;;  %4055 = vmatprep.subr.bf16.mxu0 %v2709_v52  ;;  %v2914_v12 = vld [vmem:[%s5700_s21] sm:$0xff] }
 0x508   : > { %4056 = vmatpush3.bf16.msra.mxu0 %v2709_v52  ;;  %v2916_v52 = vpack.c.bf16 %v2915_v32, %v2914_v12  ;;  %v3513_v12 = vrot.slane %v5917_v31, 4 }
 0x50a   : > { %4073 = vmatprep.subr.bf16.mxu1 %v2916_v52 }
 0x5c3   : > { %v2366_v46 = vpop.f32.mrf.mxu0 }
 0x5c4   : > { %v2443_v42 = vadd.f32 %v2442_v21, %v2366_v46  ;;  %v5919_v46 = vld [vmem:[#allocation3_spill] sm:$0xff] }
 0x5c5   : > { %v4039_v43 = vpop.f32.mrf.mxu0 }
 0x5c6   : > { %v2453_v57 = vadd.f32 %v3856_v26, %v2443_v42  ;;  %v5920_v26 = vrot.slane %v5919_v46, 6  ;;  %v3883_v43 = vld [vmem:[%s5700_s21 + $0x10] sm:$0xff] }
 0x5c7   : > { %v2575_v35 = vpop.f32.mrf.mxu0 }
 0x5c8   : > { %v3857_v17 = vmul.f32 -1.442695, %v2453_v57  ;;  %v2649_v4 = vadd.f32 %v2648_v34, %v2575_v35  ;;  %v5405_v42 = vsel %vm998_vm1, %v5920_v26, 0.0  ;;  %v3884_v57 = vld [vmem:[%s5700_s21 + $0x18] sm:$0xff]  ;;  %v3887_v35 = vld [vmem:[%s5701_s22 + $0x10] sm:$0xff] }
 0x5c9   : > { %v4049_v58 = vpop.f32.mrf.mxu0 }
 0x5ca   : > { %4214 = vpow2.f32 %v3857_v17  ;;  %v2660_v40 = vadd.f32 %v3865_v36, %v2649_v4  ;;  %v5921_v36 = vld [vmem:[#allocation5_spill] sm:$0xff]  ;;  %v5419_v58 = vpack.c.bf16 %v3884_v57, %v3883_v43  ;;  %v3874_v57 = vld [vmem:[%s5699_s20] ss:$0 sm:$0xff] }
 0x5cb   : > { %v5922_v17 = vrot.slane %v5921_v36, 6 }
 0x5cc   : > { %v3866_v38 = vmul.f32 -1.442695, %v2660_v40  ;;  %v3888_v40 = vld [vmem:[%s5701_s22 + $0x18] sm:$0xff] }
 0x5cd   : > { %v2889_v4 = vsel %vm998_vm1, %v5922_v17, 0.0 }
 0x5ce   : > { %4216 = vpow2.f32 %v3866_v38  ;;  %v3136_v38 = vpack.c.bf16 %v3888_v40, %v3887_v35 }
 0x5d7   : > { %v4215_v49 = vpop.eup %4214 }
 0x5d8   : > { %v2457_v45 = vadd.f32 1.0, %v4215_v49  ;;  %v3034_v49 = vrot.slane %v5378_v29, 1 }
 0x5da   : > { %4218 = vrcp.f32 %v2457_v45  ;;  %v3037_v45 = vrot.slane %v5405_v42, 1 }
 0x5db   : > { %v4217_v8 = vpop.eup %4216 }
 0x5dc   : > { %v2664_v39 = vadd.f32 1.0, %v4217_v8  ;;  %v3042_v8 = vrot.slane %v2889_v4, 1 }
 0x5de   : > { %4220 = vrcp.f32 %v2664_v39  ;;  %v3035_v39 = vrot.slane %v5917_v31, 1 }
 0x5e7   : > { %v4219_v27 = vpop.eup %4218 }
 0x5e8   : > { %v2467_v1 = vrot.slane %v4219_v27, %v2466_v20  ;;  %v5441_v27 = vsel %vm1104_vm3, %v3035_v39, %v3037_v45 }
 0x5ea   : > { %v2468_v19 = vcombine.high %v2467_v1, %v2467_v1  ;;  %v2475_v13 = vrot.slane %v2467_v1, %v2466_v20  ;;  %v5443_v1 = vpack.c.bf16 %v3896_v7, %v3895_v30 }
 0x5eb   : > { %v4221_v55 = vpop.eup %4220 }
 0x5ec   : > { %v2486_v9 = vrot.slane %v2475_v13, %v5912_v41  ;;  %v2482_v25 = vrot.slane %v2468_v19, %v2466_v20  ;;  %v2674_v16 = vrot.slane %v4221_v55, %v2466_v20  ;;  %v5451_v55 = vsel %vm1104_vm3, %v3040_v44, %v3042_v8 }
 0x5ee   : > { %v2493_v5 = vmul.f32 %v2486_v9, %v5250_v10  ;;  %v2494_v22 = vmul.f32 %v2486_v9, %v5252_v60  ;;  %v2490_v59 = vrot.slane %v2482_v25, %v5912_v41  ;;  %v2675_v51 = vcombine.high %v2674_v16, %v2674_v16 }
 0x5ef   : > { %v2682_v37 = vrot.slane %v2674_v16, %v2466_v20  ;;  %v3196_v9 = vrot.slane %v5378_v29, 2  ;;  %v3199_v25 = vrot.slane %v5405_v42, 2  ;;  %v3204_v16 = vrot.slane %v2889_v4, 2 }
 0x5f0   : > { %v2497_v63 = vpack.c.bf16 %v2494_v22, %v2493_v5  ;;  %v2495_v14 = vmul.f32 %v2490_v59, %v5257_v18  ;;  %v2496_v11 = vmul.f32 %v2490_v59, %v5262_v48  ;;  %v2689_v61 = vrot.slane %v2675_v51, %v2466_v20 }
 0x5f1   : > { %v2693_v15 = vrot.slane %v2682_v37, %v5912_v41  ;;  %v5438_v20 = vsel %vm1104_vm3, %v3034_v49, %v3035_v39  ;;  %v3197_v5 = vrot.slane %v5917_v31, 2  ;;  %v3202_v59 = vrot.slane %v5918_v23, 2 }
 0x5f2   : > { %4063 = vmatprep.mubr.msk.bf16.mxu1 %vm783_vm0, %v2497_v63  ;;  %v2498_v50 = vpack.c.bf16 %v2496_v11, %v2495_v14  ;;  %v2697_v21 = vrot.slane %v2689_v61, %v5912_v41  ;;  %v3048_v13 = vpack.c.bf16 %v5441_v27, %v5438_v20  ;;  %v3899_v20 = vld [vmem:[%s5700_s21 + $0x30] sm:$0xff]  ;;  %v3900_v27 = vld [vmem:[%s5700_s21 + $0x38] sm:$0xff] }
 0x5f3   : > { %v2700_v10 = vmul.f32 %v2693_v15, %v5231_v28  ;;  %v2701_v60 = vmul.f32 %v2693_v15, %v5234_v0  ;;  %v5915_v28 = vld [vmem:[#allocation4_spill] sm:$0xff]  ;;  %v5462_v51 = vsel %vm1244_vm4, %v3196_v9, %v3197_v5  ;;  %v5465_v37 = vsel %vm1244_vm4, %v3197_v5, %v3199_v25 }
 0x5f4   : > { %4064 = vmatmul.mubr.msk.bf16.vlgmr.msra.gmra.mxu1 %vm783_vm0, %v2498_v50  ;;  %v2702_v24 = vmul.f32 %v2697_v21, %v5237_v2  ;;  %v2703_v18 = vmul.f32 %v2697_v21, %v5242_v62  ;;  %v5916_v33 = vrot.slane %v5915_v28, 6  ;;  %v2917_v2 = vld [vmem:[%s5701_s22] sm:$0xff]  ;;  %v2918_v62 = vld [vmem:[%s5701_s22 + $0x8] sm:$0xff]  ;;  %v3210_v14 = vpack.c.bf16 %v5465_v37, %v5462_v51 }
 0x5f5   : > { %v2704_v34 = vpack.c.bf16 %v2701_v60, %v2700_v10  ;;  %v2919_v56 = vpack.c.bf16 %v2918_v62, %v2917_v2  ;;  %4075 = vmatprep.mubr.msk.bf16.mxu1 %vm783_vm0, %v2910_v6  ;;  %4074 = vmatpush3.bf16.msra.mxu1 %v2916_v52  ;;  %v5473_v11 = vsel %vm1244_vm4, %v3202_v59, %v3204_v16  ;;  %v3354_v15 = vrot.slane %v5378_v29, 3  ;;  %v3908_v51 = vld [vmem:[%s5700_s21 + $0x48] sm:$0xff] }
 0x5f6   : > { %v2705_v48 = vpack.c.bf16 %v2703_v18, %v2702_v24  ;;  %v5383_v0 = vsel %vm998_vm1, 0.0, %v5916_v33  ;;  %4085 = vmatprep.subr.bf16.mxu1 %v3136_v38  ;;  %v3357_v50 = vrot.slane %v5405_v42, 3  ;;  %v3362_v21 = vrot.slane %v2889_v4, 3 }
 0x5f7   : > { %4057 = vmatprep.mubr.msk.bf16.mxu0 %vm783_vm0, %v2704_v34  ;;  %v2911_v3 = vpack.c.bf16 %v5918_v23, %v5383_v0  ;;  %4067 = vmatprep.subr.bf16.mxu0 %v2919_v56  ;;  %v3039_v53 = vrot.slane %v5383_v0, 1  ;;  %v3201_v22 = vrot.slane %v5383_v0, 2  ;;  %v3355_v10 = vrot.slane %v5917_v31, 3 }
 0x5f8   : > { %4058 = vmatmul.mubr.msk.bf16.vlgmr.msra.gmra.mxu0 %vm783_vm0, %v2705_v48  ;;  %v3359_v60 = vrot.slane %v5383_v0, 3  ;;  %v3360_v24 = vrot.slane %v5918_v23, 3  ;;  %v3512_v33 = vrot.slane %v5378_v29, 4  ;;  %v3515_v2 = vrot.slane %v5405_v42, 4  ;;  %v3873_v42 = vld [vmem:[%s5698_s19] ss:$0 sm:$0xff] }
 0x5f9   : > { %4068 = vmatpush3.bf16.msra.mxu0 %v2919_v56  ;;  %v5446_v19 = vsel %vm1104_vm3, %v3039_v53, %v3040_v44  ;;  %v5468_v63 = vsel %vm1244_vm4, %v3201_v22, %v3202_v59  ;;  %v5483_v18 = vsel %vm1384_vm5, %v3354_v15, %v3355_v10  ;;  %v5486_v34 = vsel %vm1384_vm5, %v3355_v10, %v3357_v50 }
 0x5fa   : > { %4079 = vmatprep.subr.bf16.mxu0 %v5419_v58  ;;  %v3049_v41 = vpack.c.bf16 %v5451_v55, %v5446_v19  ;;  %v3211_v61 = vpack.c.bf16 %v5473_v11, %v5468_v63  ;;  %v5489_v48 = vsel %vm1384_vm5, %v3359_v60, %v3360_v24  ;;  %v3368_v47 = vpack.c.bf16 %v5486_v34, %v5483_v18 }
 0x5fb   : > { %v5494_v54 = vsel %vm1384_vm5, %v3360_v24, %v3362_v21  ;;  %v3520_v62 = vrot.slane %v2889_v4, 4  ;;  %v3517_v6 = vrot.slane %v5383_v0, 4  ;;  %v5504_v56 = vsel %vm1524_vm6, %v3512_v33, %v3513_v12 }
 0x5fc   : > { %4076 = vmatmul.mubr.msk.bf16.vlgmr.msra.gmra.mxu1 %vm783_vm0, %v2911_v3  ;;  %v3369_v28 = vpack.c.bf16 %v5494_v54, %v5489_v48  ;;  %v3518_v3 = vrot.slane %v5918_v23, 4  ;;  %v5507_v32 = vsel %vm1524_vm6, %v3513_v12, %v3515_v2 }
 0x5fd   : > { %4086 = vmatpush3.bf16.msra.mxu1 %v3136_v38  ;;  %v3526_v46 = vpack.c.bf16 %v5507_v32, %v5504_v56 }
 0x5fe   : > { %4097 = vmatprep.subr.bf16.mxu1 %v5443_v1  ;;  %v5510_v52 = vsel %vm1524_vm6, %v3517_v6, %v3518_v3  ;;  %v5513_v29 = vsel %vm1524_vm6, %v3518_v3, %v3520_v62 }
 0x5ff   : > { %v3527_v0 = vpack.c.bf16 %v5513_v29, %v5510_v52 }
 0x6b4   : > { %v4065_v31 = vpop.f32.mrf.mxu1 }
 0x6b6   : > { %v2805_v23 = vpop.f32.mrf.mxu1 }
 0x6b8   : > { %v4059_v26 = vpop.f32.mrf.mxu0  ;;  %v4066_v35 = vpop.f32.mrf.mxu1 }
 0x6b9   : > { %v2814_v43 = vadd.f32 %v4065_v31, %v4059_v26 }
 0x6ba   : > { %v2750_v36 = vpop.f32.mrf.mxu0  ;;  %v2808_v8 = vpop.f32.mrf.mxu1 }
 0x6bb   : > { %v2829_v17 = vmul.f32 %v3873_v42, %v2814_v43  ;;  %v2806_v4 = vadd.f32 %v2805_v23, %v2750_v36 }
 0x6bc   : > { %v4060_v40 = vpop.f32.mrf.mxu0  ;;  %v4077_v18 = vpop.f32.mrf.mxu1 }
 0x6bd   : > { %v2840_v38 = vadd.f32 %v3874_v57, %v2829_v17  ;;  %v2827_v49 = vmul.f32 %v3873_v42, %v2806_v4  ;;  %v2817_v45 = vadd.f32 %v4066_v35, %v4060_v40  ;;  %v3891_v4 = vld [vmem:[%s5700_s21 + $0x20] sm:$0xff]  ;;  %v3892_v40 = vld [vmem:[%s5700_s21 + $0x28] sm:$0xff] }
 0x6be   : > { %v2753_v39 = vpop.f32.mrf.mxu0  ;;  %v3015_v34 = vpop.f32.mrf.mxu1 }
 0x6bf   : > { %v3877_v30 = vmul.f32 -1.442695, %v2840_v38  ;;  %v2838_v53 = vadd.f32 %v3874_v57, %v2827_v49  ;;  %v2830_v44 = vmul.f32 %v3873_v42, %v2817_v45  ;;  %v2809_v7 = vadd.f32 %v2808_v8, %v2753_v39 }
 0x6c1   : > { %4222 = vpow2.f32 %v3877_v30  ;;  %v3875_v9 = vmul.f32 -1.442695, %v2838_v53  ;;  %v2841_v25 = vadd.f32 %v3874_v57, %v2830_v44  ;;  %v2828_v16 = vmul.f32 %v3873_v42, %v2809_v7 }
 0x6c3   : > { %4224 = vpow2.f32 %v3875_v9  ;;  %v3878_v5 = vmul.f32 -1.442695, %v2841_v25  ;;  %v2839_v22 = vadd.f32 %v3874_v57, %v2828_v16 }
 0x6c5   : > { %4226 = vpow2.f32 %v3878_v5  ;;  %v3876_v59 = vmul.f32 -1.442695, %v2839_v22 }
 0x6c7   : > { %4228 = vpow2.f32 %v3876_v59 }
 0x6ce   : > { %v4223_v15 = vpop.eup %4222 }
 0x6cf   : > { %v2856_v50 = vadd.f32 1.0, %v4223_v15 }
 0x6d0   : > { %v4225_v21 = vpop.eup %4224 }
 0x6d1   : > { %4230 = vrcp.f32 %v2856_v50  ;;  %v2854_v10 = vadd.f32 1.0, %v4225_v21 }
 0x6d2   : > { %v4227_v60 = vpop.eup %4226 }
 0x6d3   : > { %4232 = vrcp.f32 %v2854_v10  ;;  %v2857_v24 = vadd.f32 1.0, %v4227_v60  ;;  %v3903_v60 = vld [vmem:[%s5701_s22 + $0x30] sm:$0xff] }
 0x6d4   : > { %v4229_v33 = vpop.eup %4228 }
 0x6d5   : > { %4234 = vrcp.f32 %v2857_v24  ;;  %v2855_v2 = vadd.f32 1.0, %v4229_v33  ;;  %v3904_v24 = vld [vmem:[%s5701_s22 + $0x38] sm:$0xff] }
 0x6d7   : > { %4236 = vrcp.f32 %v2855_v2 }
 0x6de   : > { %v4231_v62 = vpop.eup %4230 }
 0x6df   : > { %v2868_v12 = vmul.f32 %v4231_v62, %v2840_v38 }
 0x6e0   : > { %v4233_v6 = vpop.eup %4232 }
 0x6e1   : > { %v2897_v3 = vrot.slane %v2868_v12, 6  ;;  %v2866_v31 = vmul.f32 %v4233_v6, %v2838_v53  ;;  %v3231_v53 = vpack.c.bf16 %v3892_v40, %v3891_v4  ;;  %v3389_v40 = vpack.c.bf16 %v3900_v27, %v3899_v20 }
 0x6e2   : > { %v4235_v23 = vpop.eup %4234 }
 0x6e3   : > { %v2894_v26 = vrot.slane %v2866_v31, 6  ;;  %v2869_v42 = vmul.f32 %v4235_v23, %v2841_v25  ;;  %v5526_v57 = vsel %vm998_vm1, 0.0, %v2897_v3  ;;  %v3452_v31 = vpack.c.bf16 %v3904_v24, %v3903_v60 }
 0x6e4   : > { %v4237_v43 = vpop.eup %4236  ;;  %v3059_v8 = vrot.slane %v5526_v57, 1  ;;  %v3375_v37 = vrot.slane %v5526_v57, 3 }
 0x6e5   : > { %v5529_v35 = vsel %vm998_vm1, 0.0, %v2894_v26  ;;  %v2898_v36 = vrot.slane %v2869_v42, 6  ;;  %v2867_v17 = vmul.f32 %v4237_v43, %v2839_v22 }
 0x6e6   : > { %v3054_v30 = vrot.slane %v5529_v35, 1  ;;  %v3212_v25 = vrot.slane %v5529_v35, 2 }
 0x6e7   : > { %v5538_v38 = vsel %vm998_vm1, %v2897_v3, %v2898_v36  ;;  %v5541_v49 = vsel %vm998_vm1, %v2898_v36, 0.0  ;;  %v2895_v45 = vrot.slane %v2867_v17, 6  ;;  %v3370_v36 = vrot.slane %v5529_v35, 3 }
 0x6e8   : > { %v3062_v39 = vrot.slane %v5541_v49, 1  ;;  %v3060_v9 = vrot.slane %v5538_v38, 1  ;;  %v2913_v15 = vpack.c.bf16 %v5538_v38, %v5526_v57  ;;  %v3220_v23 = vrot.slane %v5541_v49, 2 }
 0x6e9   : > { %v5547_v44 = vsel %vm998_vm1, %v2894_v26, %v2895_v45  ;;  %v5550_v7 = vsel %vm998_vm1, %v2895_v45, 0.0  ;;  %v3218_v42 = vrot.slane %v5538_v38, 2  ;;  %v3911_v45 = vld [vmem:[%s5701_s22 + $0x40] sm:$0xff] }
 0x6ea   : > { %v2912_v16 = vpack.c.bf16 %v5547_v44, %v5529_v35  ;;  %v3055_v5 = vrot.slane %v5547_v44, 1  ;;  %v3057_v22 = vrot.slane %v5550_v7, 1  ;;  %v3213_v59 = vrot.slane %v5547_v44, 2 }
 0x6eb   : > { %v3061_v50 = vsel %vm1104_vm3, %v3059_v8, %v3060_v9  ;;  %v3063_v21 = vsel %vm1104_vm3, %v3060_v9, %v3062_v39  ;;  %v3215_v10 = vrot.slane %v5550_v7, 2  ;;  %v3371_v43 = vrot.slane %v5547_v44, 3  ;;  %v3912_v8 = vld [vmem:[%s5701_s22 + $0x48] sm:$0xff] }
 0x6ec   : > { %4069 = vmatprep.mubr.msk.bf16.mxu0 %vm783_vm0, %v2912_v16  ;;  %v3056_v33 = vsel %vm1104_vm3, %v3054_v30, %v3055_v5  ;;  %v3058_v2 = vsel %vm1104_vm3, %v3055_v5, %v3057_v22  ;;  %v3214_v62 = vsel %vm1244_vm4, %v3212_v25, %v3213_v59  ;;  %v3069_v3 = vpack.c.bf16 %v3063_v21, %v3061_v50 }
 0x6ed   : > { %4070 = vmatmul.mubr.msk.bf16.vlgmr.msra.gmra.mxu0 %vm783_vm0, %v2913_v15  ;;  %v3068_v12 = vpack.c.bf16 %v3058_v2, %v3056_v33  ;;  %v3216_v6 = vsel %vm1244_vm4, %v3213_v59, %v3215_v10  ;;  %v3221_v4 = vsel %vm1244_vm4, %v3218_v42, %v3220_v23  ;;  %v3372_v39 = vsel %vm1384_vm5, %v3370_v36, %v3371_v43 }
 0x6ee   : > { %4080 = vmatpush3.bf16.msra.mxu0 %v5419_v58  ;;  %4081 = vmatprep.mubr.msk.bf16.mxu0 %vm783_vm0, %v3048_v13  ;;  %v3226_v26 = vpack.c.bf16 %v3216_v6, %v3214_v62  ;;  %v3373_v58 = vrot.slane %v5550_v7, 3  ;;  %v3217_v13 = vrot.slane %v5526_v57, 2  ;;  %v3610_v9 = vpack.c.bf16 %v3912_v8, %v3911_v45 }
 0x6ef   : > { %4087 = vmatprep.mubr.msk.bf16.mxu1 %vm783_vm0, %v3068_v12  ;;  %4091 = vmatprep.subr.bf16.mxu0 %v3231_v53  ;;  %v3378_v25 = vrot.slane %v5541_v49, 3  ;;  %v3376_v5 = vrot.slane %v5538_v38, 3  ;;  %v3529_v19 = vrot.slane %v5547_v44, 4  ;;  %v3531_v55 = vrot.slane %v5550_v7, 4 }
 0x6f0   : > { %4088 = vmatmul.mubr.msk.bf16.vlgmr.msra.gmra.mxu1 %vm783_vm0, %v3069_v3  ;;  %v3219_v17 = vsel %vm1244_vm4, %v3217_v13, %v3218_v42  ;;  %v3534_v21 = vrot.slane %v5538_v38, 4  ;;  %v3533_v10 = vrot.slane %v5526_v57, 4 }
 0x6f1   : > { %4099 = vmatprep.mubr.msk.bf16.mxu1 %vm783_vm0, %v3226_v26  ;;  %4098 = vmatpush3.bf16.msra.mxu1 %v5443_v1  ;;  %v3374_v1 = vsel %vm1384_vm5, %v3371_v43, %v3373_v58  ;;  %v3227_v30 = vpack.c.bf16 %v3221_v4, %v3219_v17  ;;  %v3379_v44 = vsel %vm1384_vm5, %v3376_v5, %v3378_v25 }
 0x6f2   : > { %4109 = vmatprep.subr.bf16.mxu1 %v3452_v31  ;;  %v3384_v16 = vpack.c.bf16 %v3374_v1, %v3372_v39  ;;  %v3532_v59 = vsel %vm1524_vm6, %v3529_v19, %v3531_v55  ;;  %v3535_v63 = vsel %vm1524_vm6, %v3533_v10, %v3534_v21 }
 0x6f5   : > { %4082 = vmatmul.mubr.msk.bf16.vlgmr.msra.gmra.mxu0 %vm783_vm0, %v3049_v41  ;;  %v3907_v41 = vld [vmem:[%s5700_s21 + $0x40] sm:$0xff] }
 0x6f6   : > { %4092 = vmatpush3.bf16.msra.mxu0 %v3231_v53  ;;  %4093 = vmatprep.mubr.msk.bf16.mxu0 %vm783_vm0, %v3210_v14  ;;  %v3528_v14 = vrot.slane %v5529_v35, 4  ;;  %v3377_v53 = vsel %vm1384_vm5, %v3375_v37, %v3376_v5  ;;  %v3547_v7 = vpack.c.bf16 %v3908_v51, %v3907_v41  ;;  %v3536_v35 = vrot.slane %v5541_v49, 4 }
 0x6f7   : > { %4103 = vmatprep.subr.bf16.mxu0 %v3389_v40  ;;  %v3385_v15 = vpack.c.bf16 %v3379_v44, %v3377_v53 }
 0x6f8   : > { %4100 = vmatmul.mubr.msk.bf16.vlgmr.msra.gmra.mxu1 %vm783_vm0, %v3227_v30  ;;  %v3530_v22 = vsel %vm1524_vm6, %v3528_v14, %v3529_v19  ;;  %v3537_v11 = vsel %vm1524_vm6, %v3534_v21, %v3536_v35 }
 0x6f9   : > { %4111 = vmatprep.mubr.msk.bf16.mxu1 %vm783_vm0, %v3384_v16  ;;  %4110 = vmatpush3.bf16.msra.mxu1 %v3452_v31  ;;  %v3542_v50 = vpack.c.bf16 %v3532_v59, %v3530_v22 }
 0x6fa   : > { %4121 = vmatprep.subr.bf16.mxu1 %v3610_v9 }
 0x6fd   : > { %4094 = vmatmul.mubr.msk.bf16.vlgmr.msra.gmra.mxu0 %vm783_vm0, %v3211_v61  ;;  %v3543_v61 = vpack.c.bf16 %v3537_v11, %v3535_v63  ;;  %v3915_v11 = vld [vmem:[%s5702_s23] ss:$0 sm:$0xff] }
 0x6fe   : > { %4104 = vmatpush3.bf16.msra.mxu0 %v3389_v40  ;;  %4105 = vmatprep.mubr.msk.bf16.mxu0 %vm783_vm0, %v3368_v47  ;;  %v4078_v47 = vpop.f32.mrf.mxu1 }
 0x6ff   : > { %4115 = vmatprep.subr.bf16.mxu0 %v3547_v7 }
 0x700   : > { %4112 = vmatmul.mubr.msk.bf16.vlgmr.msra.gmra.mxu1 %vm783_vm0, %v3385_v15  ;;  %v3018_v48 = vpop.f32.mrf.mxu1 }
 0x701   : > { %4123 = vmatprep.mubr.msk.bf16.mxu1 %vm783_vm0, %v3542_v50  ;;  %4122 = vmatpush3.bf16.msra.mxu1 %v3610_v9 }
 0x705   : > { %4106 = vmatmul.mubr.msk.bf16.vlgmr.msra.gmra.mxu0 %vm783_vm0, %v3369_v28 }
 0x706   : > { %4116 = vmatpush3.bf16.msra.mxu0 %v3547_v7  ;;  %4117 = vmatprep.mubr.msk.bf16.mxu0 %vm783_vm0, %v3526_v46 }
 0x708   : > { %4124 = vmatmul.mubr.msk.bf16.vlgmr.msra.gmra.mxu1 %vm783_vm0, %v3543_v61 }
 0x70d   : > { %4118 = vmatmul.mubr.msk.bf16.vlgmr.msra.gmra.mxu0 %vm783_vm0, %v3527_v0 }
 0x7ad   : > { %v4071_v54 = vpop.f32.mrf.mxu0 }
 0x7ae   : > { %v3024_v62 = vadd.f32 %v4077_v18, %v4071_v54  ;;  %v3916_v54 = vld [vmem:[%s5703_s24] ss:$0 sm:$0xff] }
 0x7af   : > { %v2960_v28 = vpop.f32.mrf.mxu0 }
 0x7b0   : > { %v4089_v57 = vpop.f32.mrf.mxu1  ;;  %v3016_v0 = vadd.f32 %v3015_v34, %v2960_v28 }
 0x7b1   : > { %v4072_v38 = vpop.f32.mrf.mxu0 }
 0x7b2   : > { %v3177_v49 = vpop.f32.mrf.mxu1  ;;  %v3027_v31 = vadd.f32 %v4078_v47, %v4072_v38 }
 0x7b3   : > { %v2963_v60 = vpop.f32.mrf.mxu0 }
 0x7b4   : > { %v4090_v56 = vpop.f32.mrf.mxu1  ;;  %v3019_v43 = vadd.f32 %v3018_v48, %v2963_v60 }
 0x7b5   : > { %v4083_v32 = vpop.f32.mrf.mxu0 }
 0x7b6   : > { %v3180_v46 = vpop.f32.mrf.mxu1  ;;  %v3131_v12 = vadd.f32 %v4083_v32, %v3024_v62 }
 0x7b7   : > { %v3114_v24 = vpop.f32.mrf.mxu0 }
 0x7b8   : > { %v4101_v33 = vpop.f32.mrf.mxu1  ;;  %v3129_v23 = vadd.f32 %v3114_v24, %v3016_v0  ;;  %v3194_v20 = vadd.f32 %v4089_v57, %v3131_v12 }
 0x7b9   : > { %v4084_v2 = vpop.f32.mrf.mxu0 }
 0x7ba   : > { %v3335_v52 = vpop.f32.mrf.mxu1  ;;  %v3132_v58 = vadd.f32 %v4084_v2, %v3027_v31  ;;  %v3192_v4 = vadd.f32 %v3177_v49, %v3129_v23 }
 0x7bb   : > { %v3117_v29 = vpop.f32.mrf.mxu0 }
 0x7bc   : > { %v4102_v6 = vpop.f32.mrf.mxu1  ;;  %v3130_v36 = vadd.f32 %v3117_v29, %v3019_v43  ;;  %v3195_v39 = vadd.f32 %v4090_v56, %v3132_v58 }
 0x7bd   : > { %v4095_v3 = vpop.f32.mrf.mxu0 }
 0x7be   : > { %v3338_v26 = vpop.f32.mrf.mxu1  ;;  %v3289_v17 = vadd.f32 %v4095_v3, %v3194_v20  ;;  %v3193_v25 = vadd.f32 %v3180_v46, %v3130_v36 }
 0x7bf   : > { %v3272_v42 = vpop.f32.mrf.mxu0 }
 0x7c0   : > { %v4113_v27 = vpop.f32.mrf.mxu1  ;;  %v3287_v8 = vadd.f32 %v3272_v42, %v3192_v4  ;;  %v3352_v16 = vadd.f32 %v4101_v33, %v3289_v17 }
 0x7c1   : > { %v4096_v13 = vpop.f32.mrf.mxu0 }
 0x7c2   : > { %v3493_v40 = vpop.f32.mrf.mxu1  ;;  %v3290_v9 = vadd.f32 %v4096_v13, %v3195_v39  ;;  %v3350_v51 = vadd.f32 %v3335_v52, %v3287_v8 }
 0x7c3   : > { %v3275_v45 = vpop.f32.mrf.mxu0 }
 0x7c4   : > { %v4114_v1 = vpop.f32.mrf.mxu1  ;;  %v3288_v55 = vadd.f32 %v3275_v45, %v3193_v25  ;;  %v3353_v44 = vadd.f32 %v4102_v6, %v3290_v9 }
 0x7c5   : > { %v4107_v30 = vpop.f32.mrf.mxu0 }
 0x7c6   : > { %v3496_v5 = vpop.f32.mrf.mxu1  ;;  %v3447_v41 = vadd.f32 %v4107_v30, %v3352_v16  ;;  %v3351_v59 = vadd.f32 %v3338_v26, %v3288_v55 }
 0x7c7   : > { %v3430_v19 = vpop.f32.mrf.mxu0 }
 0x7c8   : > { %v4125_v37 = vpop.f32.mrf.mxu1  ;;  %v3445_v53 = vadd.f32 %v3430_v19, %v3350_v51  ;;  %v3510_v15 = vadd.f32 %v4113_v27, %v3447_v41 }
 0x7c9   : > { %v4108_v14 = vpop.f32.mrf.mxu0 }
 0x7ca   : > { %v3448_v22 = vadd.f32 %v4108_v14, %v3353_v44  ;;  %v3651_v35 = vpop.f32.mrf.mxu1  ;;  %v3508_v63 = vadd.f32 %v3493_v40, %v3445_v53 }
 0x7cb   : > { %v3433_v7 = vpop.f32.mrf.mxu0 }
 0x7cc   : > { %v3446_v21 = vadd.f32 %v3433_v7, %v3351_v59  ;;  %v3511_v47 = vadd.f32 %v4114_v1, %v3448_v22  ;;  %v4126_v48 = vpop.f32.mrf.mxu1 }
 0x7cd   : > { %v4119_v50 = vpop.f32.mrf.mxu0 }
 0x7ce   : > { %v3605_v10 = vadd.f32 %v4119_v50, %v3510_v15  ;;  %v3509_v60 = vadd.f32 %v3496_v5, %v3446_v21  ;;  %v3654_v2 = vpop.f32.mrf.mxu1 }
 0x7cf   : > { %v3588_v61 = vpop.f32.mrf.mxu0 }
 0x7d0   : > { %v3668_v18 = vadd.f32 %v4125_v37, %v3605_v10  ;;  %v3603_v34 = vadd.f32 %v3588_v61, %v3508_v63 }
 0x7d1   : > { %v4120_v28 = vpop.f32.mrf.mxu0 }
 0x7d2   : > { %v3679_v57 = vmul.f32 %v3915_v11, %v3668_v18  ;;  %v3666_v38 = vadd.f32 %v3651_v35, %v3603_v34  ;;  %v3606_v49 = vadd.f32 %v4120_v28, %v3511_v47 }
 0x7d3   : > { %v3591_v56 = vpop.f32.mrf.mxu0 }
 0x7d4   : > { %v3690_v32 = vadd.f32 %v3916_v54, %v3679_v57  ;;  %v3677_v46 = vmul.f32 %v3915_v11, %v3666_v38  ;;  %v3669_v24 = vadd.f32 %v4126_v48, %v3606_v49  ;;  %v3604_v33 = vadd.f32 %v3591_v56, %v3509_v60 }
 0x7d6   : > { %v3919_v62 = vmul.f32 -1.442695, %v3690_v32  ;;  %v3688_v52 = vadd.f32 %v3916_v54, %v3677_v46  ;;  %v3680_v29 = vmul.f32 %v3915_v11, %v3669_v24  ;;  %v3667_v0 = vadd.f32 %v3654_v2, %v3604_v33 }
 0x7d8   : > { %4238 = vpow2.f32 %v3919_v62  ;;  %v3917_v12 = vmul.f32 -1.442695, %v3688_v52  ;;  %v3691_v6 = vadd.f32 %v3916_v54, %v3680_v29  ;;  %v3678_v3 = vmul.f32 %v3915_v11, %v3667_v0 }
 0x7da   : > { %4240 = vpow2.f32 %v3917_v12  ;;  %v3920_v31 = vmul.f32 -1.442695, %v3691_v6  ;;  %v3689_v23 = vadd.f32 %v3916_v54, %v3678_v3 }
 0x7dc   : > { %4242 = vpow2.f32 %v3920_v31  ;;  %v3918_v26 = vmul.f32 -1.442695, %v3689_v23 }
 0x7de   : > { %4244 = vpow2.f32 %v3918_v26 }
 0x7e5   : > { %v4239_v42 = vpop.eup %4238 }
 0x7e6   : > { %v3706_v43 = vadd.f32 1.0, %v4239_v42 }
 0x7e7   : > { %v4241_v58 = vpop.eup %4240 }
 0x7e8   : > { %v3704_v20 = vadd.f32 1.0, %v4241_v58  ;;  %4246 = vrcp.f32 %v3706_v43 }
 0x7e9   : > { %v4243_v27 = vpop.eup %4242 }
 0x7ea   : > { %4248 = vrcp.f32 %v3704_v20  ;;  %v3707_v13 = vadd.f32 1.0, %v4243_v27 }
 0x7eb   : > { %v4245_v36 = vpop.eup %4244 }
 0x7ec   : > { %v3705_v17 = vadd.f32 1.0, %v4245_v36  ;;  %4250 = vrcp.f32 %v3707_v13 }
 0x7ee   : > { %4252 = vrcp.f32 %v3705_v17 }
 0x7f5   : > { %v4247_v4 = vpop.eup %4246 }
 0x7f6   : > { %v3718_v8 = vmul.f32 %v4247_v4, %v3690_v32 }
 0x7f7   : > { %v4249_v40 = vpop.eup %4248 }
 0x7f8   : > { %v3716_v45 = vmul.f32 %v4249_v40, %v3688_v52  ;;  %3722 = vst.msk [vmem:[%s771_s4 + $0x10] sm:$0xff] %vm2203_vm9, %v3718_v8 }
 0x7f9   : > { %v4251_v39 = vpop.eup %4250 }
 0x7fa   : > { %3720 = vst.msk [vmem:[%s771_s4] sm:$0xff] %vm2203_vm9, %v3716_v45  ;;  %v3719_v9 = vmul.f32 %v4251_v39, %v3691_v6 }
 0x7fb   : > { %v4253_v1 = vpop.eup %4252 }
 0x7fc   : > { %v3717_v30 = vmul.f32 %v4253_v1, %v3689_v23  ;;  %3723 = vst.msk [vmem:[%s771_s4 + $0x18] sm:$0xff] %vm2203_vm9, %v3719_v9 }
 0x7fe   : > { %3721 = vst.msk [vmem:[%s771_s4 + $0x8] sm:$0xff] %vm2203_vm9, %v3717_v30 }
 0x7ff PF: > { %s35_s29 = sadd.s32 1, %s4260_s29  }
 0x800   : > { %p32_p4 = scmp.ge.s32.totalorder %s35_s29, 4  }
 0x802   :  { %34 = sbr.rel (!%p32_p4) target bundleno = 11 (0xb), region = 172 }

</bundles_post_ra>
